<compile_context>
chip_gen: v7x
topology: tpu7x:2x2x1
jax: 0.10.0
libtpu: 0.0.40
codegen_flags: <defaults>
</compile_context>

<pallas_src>
import functools

import jax
import jax.numpy as jnp
import numpy as np
from jax.experimental import pallas as pl
from jax.experimental.pallas import tpu as pltpu

_SQRT2 = 1.4142135623730951
_PARALLEL_1D = pltpu.CompilerParams(dimension_semantics=("parallel",))


def _gelu(x):
    # exact (erf) GELU, matching torch.nn.functional.gelu default
    return 0.5 * x * (1.0 + jax.lax.erf(x / _SQRT2))


def _round_up(n, m):
    return ((n + m - 1) // m) * m


def _choose_modes_per_block(m):
    for g in (8, 4, 2, 1):
        if m % g == 0:
            return g
    return 1


# ---------------------------------------------------------------------------
# Pallas kernels
# ---------------------------------------------------------------------------
def _linear_kernel(x_ref, w_ref, b_ref, o_ref, *, act):
    y = jnp.dot(x_ref[...], w_ref[...], preferred_element_type=jnp.float32)
    y = y + b_ref[...]
    if act:
        y = _gelu(y)
    o_ref[...] = y


def _linear_add_kernel(x_ref, w_ref, b_ref, a_ref, o_ref, *, act):
    y = jnp.dot(x_ref[...], w_ref[...], preferred_element_type=jnp.float32)
    y = y + b_ref[...] + a_ref[...]
    if act:
        y = _gelu(y)
    o_ref[...] = y


def _mlp2_kernel(x_ref, w1_ref, b1_ref, w2_ref, b2_ref, o_ref, *, act1, act2):
    # Fused: (x @ w1 + b1) -> gelu -> (@ w2 + b2) [-> gelu]
    h = jnp.dot(x_ref[...], w1_ref[...], preferred_element_type=jnp.float32)
    h = h + b1_ref[...]
    if act1:
        h = _gelu(h)
    y = jnp.dot(h, w2_ref[...], preferred_element_type=jnp.float32)
    y = y + b2_ref[...]
    if act2:
        y = _gelu(y)
    o_ref[...] = y


def _cmul_block_kernel(xr_ref, xi_ref, wr_ref, wd_ref, ws_ref, or_ref, oi_ref):
    # Block of G Fourier modes; Karatsuba complex matmul (3 real matmuls):
    #   k1 = (xr+xi) @ wr ; k2 = xr @ (wi-wr) ; k3 = xi @ (wr+wi)
    #   re = k1 - k3 ; im = k1 + k2
    xr = xr_ref[...]
    xi = xi_ref[...]
    xs = xr + xi
    k1 = jnp.einsum("gbi,gio->gbo", xs, wr_ref[...],
                    preferred_element_type=jnp.float32)
    k2 = jnp.einsum("gbi,gio->gbo", xr, wd_ref[...],
                    preferred_element_type=jnp.float32)
    k3 = jnp.einsum("gbi,gio->gbo", xi, ws_ref[...],
                    preferred_element_type=jnp.float32)
    or_ref[...] = k1 - k3
    oi_ref[...] = k1 + k2


def _nmc_kernel(x1_ref, x2_ref, o_ref):
    # x1: (C, L), x2: (M, L)  ->  o: (C, M), contracting last dims (no .T)
    o_ref[...] = jax.lax.dot_general(
        x1_ref[...], x2_ref[...],
        dimension_numbers=(((1,), (1,)), ((), ())),
        preferred_element_type=jnp.float32)


# ---------------------------------------------------------------------------
# Pallas wrappers
# ---------------------------------------------------------------------------
def pallas_linear(x2d, w, b, add=None, act=False, tile=None):
    """y = x2d @ w + b (+ add) (gelu if act).  x2d: (N, K), w: (K, Cout)."""
    N, K = x2d.shape
    Cout = w.shape[1]
    if tile is None:
        tile = min(512, _round_up(N, 8))
    grid = (pl.cdiv(N, tile),)
    b2 = b.reshape(1, Cout)

    in_specs = [
        pl.BlockSpec((tile, K), lambda i: (i, 0)),
        pl.BlockSpec((K, Cout), lambda i: (0, 0)),
        pl.BlockSpec((1, Cout), lambda i: (0, 0)),
    ]
    args = [x2d, w, b2]
    if add is not None:
        in_specs.append(pl.BlockSpec((tile, Cout), lambda i: (i, 0)))
        args.append(add)
        kernel = functools.partial(_linear_add_kernel, act=act)
    else:
        kernel = functools.partial(_linear_kernel, act=act)

    return pl.pallas_call(
        kernel,
        out_shape=jax.ShapeDtypeStruct((N, Cout), jnp.float32),
        grid=grid,
        in_specs=in_specs,
        out_specs=pl.BlockSpec((tile, Cout), lambda i: (i, 0)),
        compiler_params=_PARALLEL_1D,
    )(*args)


def pallas_mlp2(x2d, w1, b1, w2, b2, act1=True, act2=False, pad_cout=None,
                tile=None):
    """Fused two-layer MLP: gelu(x@w1+b1)@w2+b2 (gelu if act2)."""
    N, K = x2d.shape
    Khid = w1.shape[1]
    Cout = w2.shape[1]
    Cout_p = Cout
    if pad_cout is not None and Cout < pad_cout:
        # lane-dense output store; slice the real columns back in the wrapper
        w2 = jnp.pad(w2, ((0, 0), (0, pad_cout - Cout)))
        b2 = jnp.pad(b2, ((0, pad_cout - Cout),))
        Cout_p = pad_cout
    if tile is None:
        tile = min(512, _round_up(N, 8))
    grid = (pl.cdiv(N, tile),)

    out = pl.pallas_call(
        functools.partial(_mlp2_kernel, act1=act1, act2=act2),
        out_shape=jax.ShapeDtypeStruct((N, Cout_p), jnp.float32),
        grid=grid,
        in_specs=[
            pl.BlockSpec((tile, K), lambda i: (i, 0)),
            pl.BlockSpec((K, Khid), lambda i: (0, 0)),
            pl.BlockSpec((1, Khid), lambda i: (0, 0)),
            pl.BlockSpec((Khid, Cout_p), lambda i: (0, 0)),
            pl.BlockSpec((1, Cout_p), lambda i: (0, 0)),
        ],
        out_specs=pl.BlockSpec((tile, Cout_p), lambda i: (i, 0)),
        compiler_params=_PARALLEL_1D,
    )(x2d, w1, b1.reshape(1, Khid), w2, b2.reshape(1, Cout_p))
    return out[:, :Cout] if Cout_p != Cout else out


def pallas_complex_modemix(xr, xi, wr, wd, ws):
    """xr/xi: (Mb, G, B, Cin); wr/wd/ws: (Mb, G, Cin, Cout) Karatsuba terms."""
    Mb, G, B, Cin = xr.shape
    Cout = wr.shape[3]
    x_spec = pl.BlockSpec((None, G, B, Cin), lambda m: (m, 0, 0, 0))
    w_spec = pl.BlockSpec((None, G, Cin, Cout), lambda m: (m, 0, 0, 0))
    o_spec = pl.BlockSpec((None, G, B, Cout), lambda m: (m, 0, 0, 0))
    out_sds = jax.ShapeDtypeStruct((Mb, G, B, Cout), jnp.float32)
    return pl.pallas_call(
        _cmul_block_kernel,
        out_shape=(out_sds, out_sds),
        grid=(Mb,),
        in_specs=[x_spec, x_spec, w_spec, w_spec, w_spec],
        out_specs=(o_spec, o_spec),
        compiler_params=_PARALLEL_1D,
    )(xr, xi, wr, wd, ws)


def pallas_nmc_einsum(x1, x2):
    """einsum('ncb,nmb->nmc'): x1 (B, C, L), x2 (B, M, L) -> (B, M, C)."""
    B, C, L = x1.shape
    _, M, _ = x2.shape
    out = pl.pallas_call(
        _nmc_kernel,
        out_shape=jax.ShapeDtypeStruct((B, C, M), jnp.float32),
        grid=(B,),
        in_specs=[
            pl.BlockSpec((None, C, L), lambda n: (n, 0, 0)),
            pl.BlockSpec((None, M, L), lambda n: (n, 0, 0)),
        ],
        out_specs=pl.BlockSpec((None, C, M), lambda n: (n, 0, 0)),
        compiler_params=_PARALLEL_1D,
    )(x1, x2)
    return jnp.transpose(out, (0, 2, 1))  # (B, M, C)


# ---------------------------------------------------------------------------
# Spectral conv (FFT in jnp, mode mixing in Pallas)
# ---------------------------------------------------------------------------
def _pack_spectral_weights(w1r, w1i, w2r, w2i, G):
    """(Cin, Cout, m1, m2) x4 -> Karatsuba terms packed (Mb, G, Cin, Cout)."""
    Cin, Cout = w1r.shape[0], w1r.shape[1]

    def to_mio(w):  # (Cin, Cout, m1, m2) -> (m1*m2, Cin, Cout)
        return jnp.transpose(w, (2, 3, 0, 1)).reshape(-1, Cin, Cout)

    wr = jnp.concatenate([to_mio(w1r), to_mio(w2r)], axis=0)
    wi = jnp.concatenate([to_mio(w1i), to_mio(w2i)], axis=0)
    wd = wi - wr
    ws = wr + wi
    M = wr.shape[0]

    def blk(w):
        return w.reshape(M // G, G, Cin, Cout)

    return blk(wr), blk(wd), blk(ws)


def spectral_conv2d(x_nhwc, wr, wd, ws, m1, m2):
    # TODO(synk): rfft2/irfft2 have no clean Pallas equivalent; done with jnp.fft.
    B, H, W, C = x_nhwc.shape
    Mb, G, Cin, Cout = wr.shape

    x_ft = jnp.fft.rfft2(x_nhwc, axes=(1, 2))  # (B, H, W//2+1, C) complex64
    lo = x_ft[:, :m1, :m2, :]
    hi = x_ft[:, H - m1:, :m2, :]
    z = jnp.concatenate([lo, hi], axis=1)                       # (B, 2m1, m2, C)
    z = jnp.transpose(z, (1, 2, 0, 3)).reshape(Mb, G, B, C)     # modes leading
    xr = jnp.real(z).astype(jnp.float32)
    xi = jnp.imag(z).astype(jnp.float32)

    or_, oi_ = pallas_complex_modemix(xr, xi, wr, wd, ws)       # (Mb,G,B,Cout)
    o = jax.lax.complex(or_, oi_).reshape(2 * m1, m2, B, Cout)
    o = jnp.transpose(o, (2, 0, 1, 3))                          # (B, 2m1, m2, Cout)
    lo_o, hi_o = o[:, :m1], o[:, m1:]

    Wr = W // 2 + 1
    if H >= 2 * m1:
        # assemble the spectrum band-wise (pad+concat) instead of zeros+scatter
        top = jnp.pad(lo_o, ((0, 0), (0, 0), (0, Wr - m2), (0, 0)))
        bot = jnp.pad(hi_o, ((0, 0), (0, 0), (0, Wr - m2), (0, 0)))
        mid = jnp.zeros((B, H - 2 * m1, Wr, Cout), jnp.complex64)
        out_ft = jnp.concatenate([top, mid, bot], axis=1)
    else:
        # overlapping bands: fall back to scatter semantics of the reference
        out_ft = jnp.zeros((B, H, Wr, Cout), jnp.complex64)
        out_ft = out_ft.at[:, :m1, :m2, :].set(lo_o)
        out_ft = out_ft.at[:, H - m1:, :m2, :].set(hi_o)
    return jnp.fft.irfft2(out_ft, s=(H, W), axes=(1, 2))


# ---------------------------------------------------------------------------
# IFNO2d forward (Pallas) and a pure-JAX reference
# ---------------------------------------------------------------------------
def ifno2d_forward(params, x, grid, position, *, modes1, modes2, padding=2):
    B, S1, S2, _ = x.shape
    h = jnp.concatenate([x, grid], axis=-1)

    w0, b0 = params["fc0"]
    width = w0.shape[1]
    h = pallas_linear(h.reshape(-1, h.shape[-1]), w0, b0).reshape(B, S1, S2, width)

    h = jnp.pad(h, ((0, 0), (0, padding), (0, padding), (0, 0)))
    Hp, Wp = S1 + padding, S2 + padding

    M = 2 * modes1 * modes2
    G = _choose_modes_per_block(M)

    for l in range(4):
        w1r, w1i, w2r, w2i = params[f"conv{l}"]
        wr, wd, ws = _pack_spectral_weights(w1r, w1i, w2r, w2i, G)
        spec = spectral_conv2d(h, wr, wd, ws, modes1, modes2)
        cw, cb = params[f"w{l}"]
        h = pallas_linear(
            h.reshape(-1, width), cw, cb, add=spec.reshape(-1, width), act=(l < 3)
        ).reshape(B, Hp, Wp, width)

    h = h[:, :S1, :S2, :]

    # fc1 (gelu) + fc2 fused; output padded to 128 lanes inside pallas_mlp2
    w1, b1 = params["fc1"]
    w2, b2 = params["fc2"]
    num_channels = w2.shape[1]
    h = pallas_mlp2(h.reshape(-1, width), w1, b1, w2, b2,
                    act1=True, act2=False, pad_cout=128)       # (N, num_channels)

    x1 = h.reshape(B, S1 * S2, num_channels).transpose(0, 2, 1)  # (B, C, spatial)
    w3, b3 = params["fc3"]
    blength = w3.shape[1]
    x1 = pallas_linear(x1.reshape(B * num_channels, S1 * S2), w3, b3, act=True)
    x1 = x1.reshape(B, num_channels, blength)

    Bp, Mp, ic = position.shape
    w21, b21 = params["fc21"]
    w22, b22 = params["fc22"]
    x2 = pallas_mlp2(position.reshape(Bp * Mp, ic), w21, b21, w22, b22,
                     act1=True, act2=True)
    x2 = x2.reshape(Bp, Mp, blength)

    return pallas_nmc_einsum(x1, x2)  # (B, M, num_channels)


def ifno2d_reference(params, x, grid, position, *, modes1, modes2, padding=2):
    hp = jax.lax.Precision.HIGHEST

    def lin(h, wb, act=False):
        w, b = wb
        y = jnp.einsum("...i,io->...o", h, w, precision=hp) + b
        return _gelu(y) if act else y

    B, S1, S2, _ = x.shape
    h = jnp.concatenate([x, grid], axis=-1)
    h = lin(h, params["fc0"])
    h = jnp.pad(h, ((0, 0), (0, padding), (0, padding), (0, 0)))
    for l in range(4):
        w1r, w1i, w2r, w2i = params[f"conv{l}"]
        w1 = w1r + 1j * w1i
        w2 = w2r + 1j * w2i
        x_ft = jnp.fft.rfft2(h, axes=(1, 2))
        out_ft = jnp.zeros(x_ft.shape[:3] + (w1.shape[1],), jnp.complex64)
        lo = jnp.einsum("bxyi,ioxy->bxyo", x_ft[:, :modes1, :modes2, :], w1, precision=hp)
        hi = jnp.einsum("bxyi,ioxy->bxyo", x_ft[:, -modes1:, :modes2, :], w2, precision=hp)
        out_ft = out_ft.at[:, :modes1, :modes2].set(lo)
        out_ft = out_ft.at[:, -modes1:, :modes2].set(hi)
        spec = jnp.fft.irfft2(out_ft, s=(h.shape[1], h.shape[2]), axes=(1, 2))
        y = spec + lin(h, params[f"w{l}"])
        h = _gelu(y) if l < 3 else y
    h = h[:, :S1, :S2, :]
    h = lin(h, params["fc1"], act=True)
    h = lin(h, params["fc2"])
    C = h.shape[-1]
    x1 = h.reshape(B, S1 * S2, C).transpose(0, 2, 1)
    x1 = lin(x1, params["fc3"], act=True)
    x2 = lin(position, params["fc21"], act=True)
    x2 = lin(x2, params["fc22"], act=True)
    return jnp.einsum("ncb,nmb->nmc", x1, x2, precision=hp)


# ---------------------------------------------------------------------------
# Deterministic parameter init (shapes match IFNO2d.__init__)
# ---------------------------------------------------------------------------
def init_params(key, in_dim, width, m1, m2, num_channels, spatial, blength, input_channel):
    keys = iter(jax.random.split(key, 32))

    def lin(k, fan_in, fan_out):
        kw, kb = jax.random.split(k)
        bound = 1.0 / np.sqrt(fan_in)
        w = jax.random.uniform(kw, (fan_in, fan_out), jnp.float32, -bound, bound)
        b = jax.random.uniform(kb, (fan_out,), jnp.float32, -bound, bound)
        return w, b

    p = {"fc0": lin(next(keys), in_dim, width)}
    scale = 1.0 / (width * width)
    for l in range(4):
        k1, k2, k3, k4 = jax.random.split(next(keys), 4)
        p[f"conv{l}"] = (
            scale * jax.random.uniform(k1, (width, width, m1, m2), jnp.float32),
            scale * jax.random.uniform(k2, (width, width, m1, m2), jnp.float32),
            scale * jax.random.uniform(k3, (width, width, m1, m2), jnp.float32),
            scale * jax.random.uniform(k4, (width, width, m1, m2), jnp.float32),
        )
        p[f"w{l}"] = lin(next(keys), width, width)
    p["fc1"] = lin(next(keys), width, 128)
    p["fc2"] = lin(next(keys), 128, num_channels)
    p["fc3"] = lin(next(keys), spatial, blength)
    p["fc21"] = lin(next(keys), input_channel, blength)
    p["fc22"] = lin(next(keys), blength, blength)
    return p


if __name__ == "__main__":
    B, S1, S2 = 2, 16, 16
    initial_step, num_channels = 10, 1
    width, modes1, modes2 = 32, 4, 4
    spatial = S1 * S2
    blength = 8
    input_channel = 3
    M_pos = 8

    key = jax.random.PRNGKey(0)
    kparam, kx, kg, kp = jax.random.split(key, 4)
    params = init_params(
        kparam,
        in_dim=initial_step * num_channels + 2,
        width=width,
        m1=modes1,
        m2=modes2,
        num_channels=num_channels,
        spatial=spatial,
        blength=blength,
        input_channel=input_channel,
    )

    x = jax.random.normal(kx, (B, S1, S2, initial_step * num_channels), jnp.float32)
    grid = jax.random.normal(kg, (B, S1, S2, 2), jnp.float32)
    position = jax.random.normal(kp, (B, M_pos, input_channel), jnp.float32)

    fwd = jax.jit(functools.partial(ifno2d_forward, modes1=modes1, modes2=modes2))
    out = fwd(params, x, grid, position)
    out = jax.block_until_ready(out)

    ref = ifno2d_reference(params, x, grid, position, modes1=modes1, modes2=modes2)
    np.testing.assert_allclose(np.asarray(out), np.asarray(ref), rtol=1e-2, atol=1e-3)
    assert out.shape == (B, M_pos, num_channels)

    print("KERNEL_OK")
</pallas_src>

<mosaic_0001>
module attributes {stable_mosaic.version = 11 : i64} {
  func.func @_linear_kernel(%arg0: i32, %arg1: memref<512x12xf32, #tpu.memory_space<vmem>>, %arg2: memref<12x32xf32, #tpu.memory_space<vmem>>, %arg3: memref<1x32xf32, #tpu.memory_space<vmem>>, %arg4: memref<512x32xf32, #tpu.memory_space<vmem>>) attributes {dimension_semantics = [#tpu.dimension_semantics<parallel>], iteration_bounds = array<i64: 1>, scalar_prefetch = 0 : i64, scratch_operands = 0 : i64, tpu.core_type = #tpu.core_type<tc>, window_params = [{transform_indices = @transform_0, window_bounds = array<i64: 512, 12>}, {pipeline_mode = #tpu.pipeline_mode<synchronous>, transform_indices = @transform_1, window_bounds = array<i64: 12, 32>}, {pipeline_mode = #tpu.pipeline_mode<synchronous>, transform_indices = @transform_2, window_bounds = array<i64: 1, 32>}, {transform_indices = @transform_3, window_bounds = array<i64: 512, 32>}]} {
    %c0 = arith.constant 0 : index
    %c0_0 = arith.constant 0 : index
    %0 = vector.load %arg1[%c0, %c0_0] : memref<512x12xf32, #tpu.memory_space<vmem>>, vector<512x12xf32>
    %c0_1 = arith.constant 0 : index
    %c0_2 = arith.constant 0 : index
    %1 = vector.load %arg2[%c0_1, %c0_2] : memref<12x32xf32, #tpu.memory_space<vmem>>, vector<12x32xf32>
    %cst = arith.constant dense<0.000000e+00> : vector<512x32xf32>
    %2 = tpu.matmul %0, %1, %cst {dimension_numbers = #tpu.dot_dimension_numbers<[1], [0], [0], [1], [0, 0, 1, 1], [], []>} : vector<512x12xf32>, vector<12x32xf32>, vector<512x32xf32> -> vector<512x32xf32>
    %c0_3 = arith.constant 0 : index
    %c0_4 = arith.constant 0 : index
    %3 = vector.load %arg3[%c0_3, %c0_4] : memref<1x32xf32, #tpu.memory_space<vmem>>, vector<1x32xf32>
    %4 = vector.broadcast %3 : vector<1x32xf32> to vector<512x32xf32>
    %5 = arith.addf %2, %4 : vector<512x32xf32>
    %c0_5 = arith.constant 0 : index
    %c0_6 = arith.constant 0 : index
    %6 = vector.load %arg4[%c0_5, %c0_6] : memref<512x32xf32, #tpu.memory_space<vmem>>, vector<512x32xf32>
    tpu.vector_store %arg4[%c0_5, %c0_6], %5 {strides = array<i32>} : memref<512x32xf32, #tpu.memory_space<vmem>>, vector<512x32xf32>,
    return
  }
  func.func @transform_0(%arg0: i32) -> (i32, i32) {
    %c0_i32 = arith.constant 0 : i32
    %c0_i32_0 = arith.constant 0 : i32
    return %arg0, %c0_i32 : i32, i32
  }
  func.func @transform_1(%arg0: i32) -> (i32, i32) {
    %c0_i32 = arith.constant 0 : i32
    %c0_i32_0 = arith.constant 0 : i32
    %c0_i32_1 = arith.constant 0 : i32
    return %c0_i32, %c0_i32_0 : i32, i32
  }
  func.func @transform_2(%arg0: i32) -> (i32, i32) {
    %c0_i32 = arith.constant 0 : i32
    %c0_i32_0 = arith.constant 0 : i32
    %c0_i32_1 = arith.constant 0 : i32
    return %c0_i32, %c0_i32_0 : i32, i32
  }
  func.func @transform_3(%arg0: i32) -> (i32, i32) {
    %c0_i32 = arith.constant 0 : i32
    %c0_i32_0 = arith.constant 0 : i32
    return %arg0, %c0_i32 : i32, i32
  }
}

module attributes {stable_mosaic.version = 11 : i64} {
  func.func @_cmul_block_kernel(%arg0: i32, %arg1: memref<1x8x2x32xf32, #tpu.memory_space<vmem>>, %arg2: memref<1x8x2x32xf32, #tpu.memory_space<vmem>>, %arg3: memref<1x8x32x32xf32, #tpu.memory_space<vmem>>, %arg4: memref<1x8x32x32xf32, #tpu.memory_space<vmem>>, %arg5: memref<1x8x32x32xf32, #tpu.memory_space<vmem>>, %arg6: memref<1x8x2x32xf32, #tpu.memory_space<vmem>>, %arg7: memref<1x8x2x32xf32, #tpu.memory_space<vmem>>) attributes {dimension_semantics = [#tpu.dimension_semantics<parallel>], iteration_bounds = array<i64: 4>, scalar_prefetch = 0 : i64, scratch_operands = 0 : i64, tpu.core_type = #tpu.core_type<tc>, window_params = [{transform_indices = @transform_0, window_bounds = array<i64: 1, 8, 2, 32>}, {transform_indices = @transform_1, window_bounds = array<i64: 1, 8, 2, 32>}, {transform_indices = @transform_2, window_bounds = array<i64: 1, 8, 32, 32>}, {transform_indices = @transform_3, window_bounds = array<i64: 1, 8, 32, 32>}, {transform_indices = @transform_4, window_bounds = array<i64: 1, 8, 32, 32>}, {transform_indices = @transform_5, window_bounds = array<i64: 1, 8, 2, 32>}, {transform_indices = @transform_6, window_bounds = array<i64: 1, 8, 2, 32>}]} {
    %c0 = arith.constant 0 : index
    %c0_0 = arith.constant 0 : index
    %c0_1 = arith.constant 0 : index
    %c0_2 = arith.constant 0 : index
    %0 = vector.load %arg1[%c0, %c0_0, %c0_1, %c0_2] : memref<1x8x2x32xf32, #tpu.memory_space<vmem>>, vector<1x8x2x32xf32>
    %1 = vector.shape_cast %0 : vector<1x8x2x32xf32> to vector<8x2x32xf32>
    %c0_3 = arith.constant 0 : index
    %c0_4 = arith.constant 0 : index
    %c0_5 = arith.constant 0 : index
    %c0_6 = arith.constant 0 : index
    %2 = vector.load %arg2[%c0_3, %c0_4, %c0_5, %c0_6] : memref<1x8x2x32xf32, #tpu.memory_space<vmem>>, vector<1x8x2x32xf32>
    %3 = vector.shape_cast %2 : vector<1x8x2x32xf32> to vector<8x2x32xf32>
    %4 = arith.addf %1, %3 : vector<8x2x32xf32>
    %c0_7 = arith.constant 0 : index
    %c0_8 = arith.constant 0 : index
    %c0_9 = arith.constant 0 : index
    %c0_10 = arith.constant 0 : index
    %5 = vector.load %arg3[%c0_7, %c0_8, %c0_9, %c0_10] : memref<1x8x32x32xf32, #tpu.memory_space<vmem>>, vector<1x8x32x32xf32>
    %6 = vector.shape_cast %5 : vector<1x8x32x32xf32> to vector<8x32x32xf32>
    "tpu.trace_start"() <{level = 10 : i32, message = "gbi,gio->gbo"}> : () -> ()
    %cst = arith.constant dense<0.000000e+00> : vector<8x2x32xf32>
    %7 = tpu.matmul %4, %6, %cst {dimension_numbers = #tpu.dot_dimension_numbers<[2], [1], [1], [2], [0, 0, 0, 1, 1, 2], [0], [0]>} : vector<8x2x32xf32>, vector<8x32x32xf32>, vector<8x2x32xf32> -> vector<8x2x32xf32>
    "tpu.trace_stop"() : () -> ()
    %c0_11 = arith.constant 0 : index
    %c0_12 = arith.constant 0 : index
    %c0_13 = arith.constant 0 : index
    %c0_14 = arith.constant 0 : index
    %8 = vector.load %arg4[%c0_11, %c0_12, %c0_13, %c0_14] : memref<1x8x32x32xf32, #tpu.memory_space<vmem>>, vector<1x8x32x32xf32>
    %9 = vector.shape_cast %8 : vector<1x8x32x32xf32> to vector<8x32x32xf32>
    "tpu.trace_start"() <{level = 10 : i32, message = "gbi,gio->gbo"}> : () -> ()
    %cst_15 = arith.constant dense<0.000000e+00> : vector<8x2x32xf32>
    %10 = tpu.matmul %1, %9, %cst_15 {dimension_numbers = #tpu.dot_dimension_numbers<[2], [1], [1], [2], [0, 0, 0, 1, 1, 2], [0], [0]>} : vector<8x2x32xf32>, vector<8x32x32xf32>, vector<8x2x32xf32> -> vector<8x2x32xf32>
    "tpu.trace_stop"() : () -> ()
    %c0_16 = arith.constant 0 : index
    %c0_17 = arith.constant 0 : index
    %c0_18 = arith.constant 0 : index
    %c0_19 = arith.constant 0 : index
    %11 = vector.load %arg5[%c0_16, %c0_17, %c0_18, %c0_19] : memref<1x8x32x32xf32, #tpu.memory_space<vmem>>, vector<1x8x32x32xf32>
    %12 = vector.shape_cast %11 : vector<1x8x32x32xf32> to vector<8x32x32xf32>
    "tpu.trace_start"() <{level = 10 : i32, message = "gbi,gio->gbo"}> : () -> ()
    %cst_20 = arith.constant dense<0.000000e+00> : vector<8x2x32xf32>
    %13 = tpu.matmul %3, %12, %cst_20 {dimension_numbers = #tpu.dot_dimension_numbers<[2], [1], [1], [2], [0, 0, 0, 1, 1, 2], [0], [0]>} : vector<8x2x32xf32>, vector<8x32x32xf32>, vector<8x2x32xf32> -> vector<8x2x32xf32>
    "tpu.trace_stop"() : () -> ()
    %14 = arith.subf %7, %13 : vector<8x2x32xf32>
    %c0_21 = arith.constant 0 : index
    %c0_22 = arith.constant 0 : index
    %c0_23 = arith.constant 0 : index
    %c0_24 = arith.constant 0 : index
    %15 = vector.load %arg6[%c0_21, %c0_22, %c0_23, %c0_24] : memref<1x8x2x32xf32, #tpu.memory_space<vmem>>, vector<1x8x2x32xf32>
    %16 = vector.shape_cast %15 : vector<1x8x2x32xf32> to vector<8x2x32xf32>
    %17 = vector.shape_cast %14 : vector<8x2x32xf32> to vector<1x8x2x32xf32>
    tpu.vector_store %arg6[%c0_21, %c0_22, %c0_23, %c0_24], %17 {strides = array<i32>} : memref<1x8x2x32xf32, #tpu.memory_space<vmem>>, vector<1x8x2x32xf32>,
    %18 = arith.addf %7, %10 : vector<8x2x32xf32>
    %c0_25 = arith.constant 0 : index
    %c0_26 = arith.constant 0 : index
    %c0_27 = arith.constant 0 : index
    %c0_28 = arith.constant 0 : index
    %19 = vector.load %arg7[%c0_25, %c0_26, %c0_27, %c0_28] : memref<1x8x2x32xf32, #tpu.memory_space<vmem>>, vector<1x8x2x32xf32>
    %20 = vector.shape_cast %19 : vector<1x8x2x32xf32> to vector<8x2x32xf32>
    %21 = vector.shape_cast %18 : vector<8x2x32xf32> to vector<1x8x2x32xf32>
    tpu.vector_store %arg7[%c0_25, %c0_26, %c0_27, %c0_28], %21 {strides = array<i32>} : memref<1x8x2x32xf32, #tpu.memory_space<vmem>>, vector<1x8x2x32xf32>,
    return
  }
  func.func @transform_0(%arg0: i32) -> (i32, i32, i32, i32) {
    %c0_i32 = arith.constant 0 : i32
    %c0_i32_0 = arith.constant 0 : i32
    %c0_i32_1 = arith.constant 0 : i32
    %c0_i32_2 = arith.constant 0 : i32
    return %arg0, %c0_i32, %c0_i32_0, %c0_i32_1 : i32, i32, i32, i32
  }
  func.func @transform_1(%arg0: i32) -> (i32, i32, i32, i32) {
    %c0_i32 = arith.constant 0 : i32
    %c0_i32_0 = arith.constant 0 : i32
    %c0_i32_1 = arith.constant 0 : i32
    %c0_i32_2 = arith.constant 0 : i32
    return %arg0, %c0_i32, %c0_i32_0, %c0_i32_1 : i32, i32, i32, i32
  }
  func.func @transform_2(%arg0: i32) -> (i32, i32, i32, i32) {
    %c0_i32 = arith.constant 0 : i32
    %c0_i32_0 = arith.constant 0 : i32
    %c0_i32_1 = arith.constant 0 : i32
    %c0_i32_2 = arith.constant 0 : i32
    return %arg0, %c0_i32, %c0_i32_0, %c0_i32_1 : i32, i32, i32, i32
  }
  func.func @transform_3(%arg0: i32) -> (i32, i32, i32, i32) {
    %c0_i32 = arith.constant 0 : i32
    %c0_i32_0 = arith.constant 0 : i32
    %c0_i32_1 = arith.constant 0 : i32
    %c0_i32_2 = arith.constant 0 : i32
    return %arg0, %c0_i32, %c0_i32_0, %c0_i32_1 : i32, i32, i32, i32
  }
  func.func @transform_4(%arg0: i32) -> (i32, i32, i32, i32) {
    %c0_i32 = arith.constant 0 : i32
    %c0_i32_0 = arith.constant 0 : i32
    %c0_i32_1 = arith.constant 0 : i32
    %c0_i32_2 = arith.constant 0 : i32
    return %arg0, %c0_i32, %c0_i32_0, %c0_i32_1 : i32, i32, i32, i32
  }
  func.func @transform_5(%arg0: i32) -> (i32, i32, i32, i32) {
    %c0_i32 = arith.constant 0 : i32
    %c0_i32_0 = arith.constant 0 : i32
    %c0_i32_1 = arith.constant 0 : i32
    %c0_i32_2 = arith.constant 0 : i32
    return %arg0, %c0_i32, %c0_i32_0, %c0_i32_1 : i32, i32, i32, i32
  }
  func.func @transform_6(%arg0: i32) -> (i32, i32, i32, i32) {
    %c0_i32 = arith.constant 0 : i32
    %c0_i32_0 = arith.constant 0 : i32
    %c0_i32_1 = arith.constant 0 : i32
    %c0_i32_2 = arith.constant 0 : i32
    return %arg0, %c0_i32, %c0_i32_0, %c0_i32_1 : i32, i32, i32, i32
  }
}

module attributes {stable_mosaic.version = 11 : i64} {
  func.func @_linear_add_kernel(%arg0: i32, %arg1: memref<512x32xf32, #tpu.memory_space<vmem>>, %arg2: memref<32x32xf32, #tpu.memory_space<vmem>>, %arg3: memref<1x32xf32, #tpu.memory_space<vmem>>, %arg4: memref<512x32xf32, #tpu.memory_space<vmem>>, %arg5: memref<512x32xf32, #tpu.memory_space<vmem>>) attributes {dimension_semantics = [#tpu.dimension_semantics<parallel>], iteration_bounds = array<i64: 2>, scalar_prefetch = 0 : i64, scratch_operands = 0 : i64, tpu.core_type = #tpu.core_type<tc>, window_params = [{transform_indices = @transform_0, window_bounds = array<i64: 512, 32>}, {pipeline_mode = #tpu.pipeline_mode<synchronous>, transform_indices = @transform_1, window_bounds = array<i64: 32, 32>}, {pipeline_mode = #tpu.pipeline_mode<synchronous>, transform_indices = @transform_2, window_bounds = array<i64: 1, 32>}, {transform_indices = @transform_3, window_bounds = array<i64: 512, 32>}, {transform_indices = @transform_4, window_bounds = array<i64: 512, 32>}]} {
    %c0 = arith.constant 0 : index
    %c0_0 = arith.constant 0 : index
    %0 = vector.load %arg1[%c0, %c0_0] : memref<512x32xf32, #tpu.memory_space<vmem>>, vector<512x32xf32>
    %c0_1 = arith.constant 0 : index
    %c0_2 = arith.constant 0 : index
    %1 = vector.load %arg2[%c0_1, %c0_2] : memref<32x32xf32, #tpu.memory_space<vmem>>, vector<32x32xf32>
    %cst = arith.constant dense<0.000000e+00> : vector<512x32xf32>
    %2 = tpu.matmul %0, %1, %cst {dimension_numbers = #tpu.dot_dimension_numbers<[1], [0], [0], [1], [0, 0, 1, 1], [], []>} : vector<512x32xf32>, vector<32x32xf32>, vector<512x32xf32> -> vector<512x32xf32>
    %c0_3 = arith.constant 0 : index
    %c0_4 = arith.constant 0 : index
    %3 = vector.load %arg3[%c0_3, %c0_4] : memref<1x32xf32, #tpu.memory_space<vmem>>, vector<1x32xf32>
    %4 = vector.broadcast %3 : vector<1x32xf32> to vector<512x32xf32>
    %5 = arith.addf %2, %4 : vector<512x32xf32>
    %c0_5 = arith.constant 0 : index
    %c0_6 = arith.constant 0 : index
    %6 = vector.load %arg4[%c0_5, %c0_6] : memref<512x32xf32, #tpu.memory_space<vmem>>, vector<512x32xf32>
    %7 = arith.addf %5, %6 : vector<512x32xf32>
    %cst_7 = arith.constant 5.000000e-01 : f32
    %8 = vector.broadcast %cst_7 : f32 to vector<512x32xf32>
    %9 = arith.mulf %8, %7 : vector<512x32xf32>
    %cst_8 = arith.constant 1.41421354 : f32
    %10 = vector.broadcast %cst_8 : f32 to vector<512x32xf32>
    %11 = arith.divf %7, %10 : vector<512x32xf32>
    %12 = math.erf %11 : vector<512x32xf32>
    %cst_9 = arith.constant 1.000000e+00 : f32
    %13 = vector.broadcast %cst_9 : f32 to vector<512x32xf32>
    %14 = arith.addf %13, %12 : vector<512x32xf32>
    %15 = arith.mulf %9, %14 : vector<512x32xf32>
    %c0_10 = arith.constant 0 : index
    %c0_11 = arith.constant 0 : index
    %16 = vector.load %arg5[%c0_10, %c0_11] : memref<512x32xf32, #tpu.memory_space<vmem>>, vector<512x32xf32>
    tpu.vector_store %arg5[%c0_10, %c0_11], %15 {strides = array<i32>} : memref<512x32xf32, #tpu.memory_space<vmem>>, vector<512x32xf32>,
    return
  }
  func.func @transform_0(%arg0: i32) -> (i32, i32) {
    %c0_i32 = arith.constant 0 : i32
    %c0_i32_0 = arith.constant 0 : i32
    return %arg0, %c0_i32 : i32, i32
  }
  func.func @transform_1(%arg0: i32) -> (i32, i32) {
    %c0_i32 = arith.constant 0 : i32
    %c0_i32_0 = arith.constant 0 : i32
    %c0_i32_1 = arith.constant 0 : i32
    return %c0_i32, %c0_i32_0 : i32, i32
  }
  func.func @transform_2(%arg0: i32) -> (i32, i32) {
    %c0_i32 = arith.constant 0 : i32
    %c0_i32_0 = arith.constant 0 : i32
    %c0_i32_1 = arith.constant 0 : i32
    return %c0_i32, %c0_i32_0 : i32, i32
  }
  func.func @transform_3(%arg0: i32) -> (i32, i32) {
    %c0_i32 = arith.constant 0 : i32
    %c0_i32_0 = arith.constant 0 : i32
    return %arg0, %c0_i32 : i32, i32
  }
  func.func @transform_4(%arg0: i32) -> (i32, i32) {
    %c0_i32 = arith.constant 0 : i32
    %c0_i32_0 = arith.constant 0 : i32
    return %arg0, %c0_i32 : i32, i32
  }
}

module attributes {stable_mosaic.version = 11 : i64} {
  func.func @_linear_add_kernel(%arg0: i32, %arg1: memref<512x32xf32, #tpu.memory_space<vmem>>, %arg2: memref<32x32xf32, #tpu.memory_space<vmem>>, %arg3: memref<1x32xf32, #tpu.memory_space<vmem>>, %arg4: memref<512x32xf32, #tpu.memory_space<vmem>>, %arg5: memref<512x32xf32, #tpu.memory_space<vmem>>) attributes {dimension_semantics = [#tpu.dimension_semantics<parallel>], iteration_bounds = array<i64: 2>, scalar_prefetch = 0 : i64, scratch_operands = 0 : i64, tpu.core_type = #tpu.core_type<tc>, window_params = [{transform_indices = @transform_0, window_bounds = array<i64: 512, 32>}, {pipeline_mode = #tpu.pipeline_mode<synchronous>, transform_indices = @transform_1, window_bounds = array<i64: 32, 32>}, {pipeline_mode = #tpu.pipeline_mode<synchronous>, transform_indices = @transform_2, window_bounds = array<i64: 1, 32>}, {transform_indices = @transform_3, window_bounds = array<i64: 512, 32>}, {transform_indices = @transform_4, window_bounds = array<i64: 512, 32>}]} {
    %c0 = arith.constant 0 : index
    %c0_0 = arith.constant 0 : index
    %0 = vector.load %arg1[%c0, %c0_0] : memref<512x32xf32, #tpu.memory_space<vmem>>, vector<512x32xf32>
    %c0_1 = arith.constant 0 : index
    %c0_2 = arith.constant 0 : index
    %1 = vector.load %arg2[%c0_1, %c0_2] : memref<32x32xf32, #tpu.memory_space<vmem>>, vector<32x32xf32>
    %cst = arith.constant dense<0.000000e+00> : vector<512x32xf32>
    %2 = tpu.matmul %0, %1, %cst {dimension_numbers = #tpu.dot_dimension_numbers<[1], [0], [0], [1], [0, 0, 1, 1], [], []>} : vector<512x32xf32>, vector<32x32xf32>, vector<512x32xf32> -> vector<512x32xf32>
    %c0_3 = arith.constant 0 : index
    %c0_4 = arith.constant 0 : index
    %3 = vector.load %arg3[%c0_3, %c0_4] : memref<1x32xf32, #tpu.memory_space<vmem>>, vector<1x32xf32>
    %4 = vector.broadcast %3 : vector<1x32xf32> to vector<512x32xf32>
    %5 = arith.addf %2, %4 : vector<512x32xf32>
    %c0_5 = arith.constant 0 : index
    %c0_6 = arith.constant 0 : index
    %6 = vector.load %arg4[%c0_5, %c0_6] : memref<512x32xf32, #tpu.memory_space<vmem>>, vector<512x32xf32>
    %7 = arith.addf %5, %6 : vector<512x32xf32>
    %c0_7 = arith.constant 0 : index
    %c0_8 = arith.constant 0 : index
    %8 = vector.load %arg5[%c0_7, %c0_8] : memref<512x32xf32, #tpu.memory_space<vmem>>, vector<512x32xf32>
    tpu.vector_store %arg5[%c0_7, %c0_8], %7 {strides = array<i32>} : memref<512x32xf32, #tpu.memory_space<vmem>>, vector<512x32xf32>,
    return
  }
  func.func @transform_0(%arg0: i32) -> (i32, i32) {
    %c0_i32 = arith.constant 0 : i32
    %c0_i32_0 = arith.constant 0 : i32
    return %arg0, %c0_i32 : i32, i32
  }
  func.func @transform_1(%arg0: i32) -> (i32, i32) {
    %c0_i32 = arith.constant 0 : i32
    %c0_i32_0 = arith.constant 0 : i32
    %c0_i32_1 = arith.constant 0 : i32
    return %c0_i32, %c0_i32_0 : i32, i32
  }
  func.func @transform_2(%arg0: i32) -> (i32, i32) {
    %c0_i32 = arith.constant 0 : i32
    %c0_i32_0 = arith.constant 0 : i32
    %c0_i32_1 = arith.constant 0 : i32
    return %c0_i32, %c0_i32_0 : i32, i32
  }
  func.func @transform_3(%arg0: i32) -> (i32, i32) {
    %c0_i32 = arith.constant 0 : i32
    %c0_i32_0 = arith.constant 0 : i32
    return %arg0, %c0_i32 : i32, i32
  }
  func.func @transform_4(%arg0: i32) -> (i32, i32) {
    %c0_i32 = arith.constant 0 : i32
    %c0_i32_0 = arith.constant 0 : i32
    return %arg0, %c0_i32 : i32, i32
  }
}

module attributes {stable_mosaic.version = 11 : i64} {
  func.func @_mlp2_kernel(%arg0: i32, %arg1: memref<512x32xf32, #tpu.memory_space<vmem>>, %arg2: memref<32x128xf32, #tpu.memory_space<vmem>>, %arg3: memref<1x128xf32, #tpu.memory_space<vmem>>, %arg4: memref<128x128xf32, #tpu.memory_space<vmem>>, %arg5: memref<1x128xf32, #tpu.memory_space<vmem>>, %arg6: memref<512x128xf32, #tpu.memory_space<vmem>>) attributes {dimension_semantics = [#tpu.dimension_semantics<parallel>], iteration_bounds = array<i64: 1>, scalar_prefetch = 0 : i64, scratch_operands = 0 : i64, tpu.core_type = #tpu.core_type<tc>, window_params = [{transform_indices = @transform_0, window_bounds = array<i64: 512, 32>}, {pipeline_mode = #tpu.pipeline_mode<synchronous>, transform_indices = @transform_1, window_bounds = array<i64: 32, 128>}, {pipeline_mode = #tpu.pipeline_mode<synchronous>, transform_indices = @transform_2, window_bounds = array<i64: 1, 128>}, {pipeline_mode = #tpu.pipeline_mode<synchronous>, transform_indices = @transform_3, window_bounds = array<i64: 128, 128>}, {pipeline_mode = #tpu.pipeline_mode<synchronous>, transform_indices = @transform_4, window_bounds = array<i64: 1, 128>}, {transform_indices = @transform_5, window_bounds = array<i64: 512, 128>}]} {
    %c0 = arith.constant 0 : index
    %c0_0 = arith.constant 0 : index
    %0 = vector.load %arg1[%c0, %c0_0] : memref<512x32xf32, #tpu.memory_space<vmem>>, vector<512x32xf32>
    %c0_1 = arith.constant 0 : index
    %c0_2 = arith.constant 0 : index
    %1 = vector.load %arg2[%c0_1, %c0_2] : memref<32x128xf32, #tpu.memory_space<vmem>>, vector<32x128xf32>
    %cst = arith.constant dense<0.000000e+00> : vector<512x128xf32>
    %2 = tpu.matmul %0, %1, %cst {dimension_numbers = #tpu.dot_dimension_numbers<[1], [0], [0], [1], [0, 0, 1, 1], [], []>} : vector<512x32xf32>, vector<32x128xf32>, vector<512x128xf32> -> vector<512x128xf32>
    %c0_3 = arith.constant 0 : index
    %c0_4 = arith.constant 0 : index
    %3 = vector.load %arg3[%c0_3, %c0_4] : memref<1x128xf32, #tpu.memory_space<vmem>>, vector<1x128xf32>
    %4 = vector.broadcast %3 : vector<1x128xf32> to vector<512x128xf32>
    %5 = arith.addf %2, %4 : vector<512x128xf32>
    %cst_5 = arith.constant 5.000000e-01 : f32
    %6 = vector.broadcast %cst_5 : f32 to vector<512x128xf32>
    %7 = arith.mulf %6, %5 : vector<512x128xf32>
    %cst_6 = arith.constant 1.41421354 : f32
    %8 = vector.broadcast %cst_6 : f32 to vector<512x128xf32>
    %9 = arith.divf %5, %8 : vector<512x128xf32>
    %10 = math.erf %9 : vector<512x128xf32>
    %cst_7 = arith.constant 1.000000e+00 : f32
    %11 = vector.broadcast %cst_7 : f32 to vector<512x128xf32>
    %12 = arith.addf %11, %10 : vector<512x128xf32>
    %13 = arith.mulf %7, %12 : vector<512x128xf32>
    %c0_8 = arith.constant 0 : index
    %c0_9 = arith.constant 0 : index
    %14 = vector.load %arg4[%c0_8, %c0_9] : memref<128x128xf32, #tpu.memory_space<vmem>>, vector<128x128xf32>
    %cst_10 = arith.constant dense<0.000000e+00> : vector<512x128xf32>
    %15 = tpu.matmul %13, %14, %cst_10 {dimension_numbers = #tpu.dot_dimension_numbers<[1], [0], [0], [1], [0, 0, 1, 1], [], []>} : vector<512x128xf32>, vector<128x128xf32>, vector<512x128xf32> -> vector<512x128xf32>
    %c0_11 = arith.constant 0 : index
    %c0_12 = arith.constant 0 : index
    %16 = vector.load %arg5[%c0_11, %c0_12] : memref<1x128xf32, #tpu.memory_space<vmem>>, vector<1x128xf32>
    %17 = vector.broadcast %16 : vector<1x128xf32> to vector<512x128xf32>
    %18 = arith.addf %15, %17 : vector<512x128xf32>
    %c0_13 = arith.constant 0 : index
    %c0_14 = arith.constant 0 : index
    %19 = vector.load %arg6[%c0_13, %c0_14] : memref<512x128xf32, #tpu.memory_space<vmem>>, vector<512x128xf32>
    tpu.vector_store %arg6[%c0_13, %c0_14], %18 {strides = array<i32>} : memref<512x128xf32, #tpu.memory_space<vmem>>, vector<512x128xf32>,
    return
  }
  func.func @transform_0(%arg0: i32) -> (i32, i32) {
    %c0_i32 = arith.constant 0 : i32
    %c0_i32_0 = arith.constant 0 : i32
    return %arg0, %c0_i32 : i32, i32
  }
  func.func @transform_1(%arg0: i32) -> (i32, i32) {
    %c0_i32 = arith.constant 0 : i32
    %c0_i32_0 = arith.constant 0 : i32
    %c0_i32_1 = arith.constant 0 : i32
    return %c0_i32, %c0_i32_0 : i32, i32
  }
  func.func @transform_2(%arg0: i32) -> (i32, i32) {
    %c0_i32 = arith.constant 0 : i32
    %c0_i32_0 = arith.constant 0 : i32
    %c0_i32_1 = arith.constant 0 : i32
    return %c0_i32, %c0_i32_0 : i32, i32
  }
  func.func @transform_3(%arg0: i32) -> (i32, i32) {
    %c0_i32 = arith.constant 0 : i32
    %c0_i32_0 = arith.constant 0 : i32
    %c0_i32_1 = arith.constant 0 : i32
    return %c0_i32, %c0_i32_0 : i32, i32
  }
  func.func @transform_4(%arg0: i32) -> (i32, i32) {
    %c0_i32 = arith.constant 0 : i32
    %c0_i32_0 = arith.constant 0 : i32
    %c0_i32_1 = arith.constant 0 : i32
    return %c0_i32, %c0_i32_0 : i32, i32
  }
  func.func @transform_5(%arg0: i32) -> (i32, i32) {
    %c0_i32 = arith.constant 0 : i32
    %c0_i32_0 = arith.constant 0 : i32
    return %arg0, %c0_i32 : i32, i32
  }
}

module attributes {stable_mosaic.version = 11 : i64} {
  func.func @_mlp2_kernel(%arg0: i32, %arg1: memref<16x3xf32, #tpu.memory_space<vmem>>, %arg2: memref<3x8xf32, #tpu.memory_space<vmem>>, %arg3: memref<1x8xf32, #tpu.memory_space<vmem>>, %arg4: memref<8x8xf32, #tpu.memory_space<vmem>>, %arg5: memref<1x8xf32, #tpu.memory_space<vmem>>, %arg6: memref<16x8xf32, #tpu.memory_space<vmem>>) attributes {dimension_semantics = [#tpu.dimension_semantics<parallel>], iteration_bounds = array<i64: 1>, scalar_prefetch = 0 : i64, scratch_operands = 0 : i64, tpu.core_type = #tpu.core_type<tc>, window_params = [{transform_indices = @transform_0, window_bounds = array<i64: 16, 3>}, {pipeline_mode = #tpu.pipeline_mode<synchronous>, transform_indices = @transform_1, window_bounds = array<i64: 3, 8>}, {pipeline_mode = #tpu.pipeline_mode<synchronous>, transform_indices = @transform_2, window_bounds = array<i64: 1, 8>}, {pipeline_mode = #tpu.pipeline_mode<synchronous>, transform_indices = @transform_3, window_bounds = array<i64: 8, 8>}, {pipeline_mode = #tpu.pipeline_mode<synchronous>, transform_indices = @transform_4, window_bounds = array<i64: 1, 8>}, {transform_indices = @transform_5, window_bounds = array<i64: 16, 8>}]} {
    %c0 = arith.constant 0 : index
    %c0_0 = arith.constant 0 : index
    %0 = vector.load %arg1[%c0, %c0_0] : memref<16x3xf32, #tpu.memory_space<vmem>>, vector<16x3xf32>
    %c0_1 = arith.constant 0 : index
    %c0_2 = arith.constant 0 : index
    %1 = vector.load %arg2[%c0_1, %c0_2] : memref<3x8xf32, #tpu.memory_space<vmem>>, vector<3x8xf32>
    %cst = arith.constant dense<0.000000e+00> : vector<16x8xf32>
    %2 = tpu.matmul %0, %1, %cst {dimension_numbers = #tpu.dot_dimension_numbers<[1], [0], [0], [1], [0, 0, 1, 1], [], []>} : vector<16x3xf32>, vector<3x8xf32>, vector<16x8xf32> -> vector<16x8xf32>
    %c0_3 = arith.constant 0 : index
    %c0_4 = arith.constant 0 : index
    %3 = vector.load %arg3[%c0_3, %c0_4] : memref<1x8xf32, #tpu.memory_space<vmem>>, vector<1x8xf32>
    %4 = vector.broadcast %3 : vector<1x8xf32> to vector<16x8xf32>
    %5 = arith.addf %2, %4 : vector<16x8xf32>
    %cst_5 = arith.constant 5.000000e-01 : f32
    %6 = vector.broadcast %cst_5 : f32 to vector<16x8xf32>
    %7 = arith.mulf %6, %5 : vector<16x8xf32>
    %cst_6 = arith.constant 1.41421354 : f32
    %8 = vector.broadcast %cst_6 : f32 to vector<16x8xf32>
    %9 = arith.divf %5, %8 : vector<16x8xf32>
    %10 = math.erf %9 : vector<16x8xf32>
    %cst_7 = arith.constant 1.000000e+00 : f32
    %11 = vector.broadcast %cst_7 : f32 to vector<16x8xf32>
    %12 = arith.addf %11, %10 : vector<16x8xf32>
    %13 = arith.mulf %7, %12 : vector<16x8xf32>
    %c0_8 = arith.constant 0 : index
    %c0_9 = arith.constant 0 : index
    %14 = vector.load %arg4[%c0_8, %c0_9] : memref<8x8xf32, #tpu.memory_space<vmem>>, vector<8x8xf32>
    %cst_10 = arith.constant dense<0.000000e+00> : vector<16x8xf32>
    %15 = tpu.matmul %13, %14, %cst_10 {dimension_numbers = #tpu.dot_dimension_numbers<[1], [0], [0], [1], [0, 0, 1, 1], [], []>} : vector<16x8xf32>, vector<8x8xf32>, vector<16x8xf32> -> vector<16x8xf32>
    %c0_11 = arith.constant 0 : index
    %c0_12 = arith.constant 0 : index
    %16 = vector.load %arg5[%c0_11, %c0_12] : memref<1x8xf32, #tpu.memory_space<vmem>>, vector<1x8xf32>
    %17 = vector.broadcast %16 : vector<1x8xf32> to vector<16x8xf32>
    %18 = arith.addf %15, %17 : vector<16x8xf32>
    %cst_13 = arith.constant 5.000000e-01 : f32
    %19 = vector.broadcast %cst_13 : f32 to vector<16x8xf32>
    %20 = arith.mulf %19, %18 : vector<16x8xf32>
    %cst_14 = arith.constant 1.41421354 : f32
    %21 = vector.broadcast %cst_14 : f32 to vector<16x8xf32>
    %22 = arith.divf %18, %21 : vector<16x8xf32>
    %23 = math.erf %22 : vector<16x8xf32>
    %cst_15 = arith.constant 1.000000e+00 : f32
    %24 = vector.broadcast %cst_15 : f32 to vector<16x8xf32>
    %25 = arith.addf %24, %23 : vector<16x8xf32>
    %26 = arith.mulf %20, %25 : vector<16x8xf32>
    %c0_16 = arith.constant 0 : index
    %c0_17 = arith.constant 0 : index
    %27 = vector.load %arg6[%c0_16, %c0_17] : memref<16x8xf32, #tpu.memory_space<vmem>>, vector<16x8xf32>
    tpu.vector_store %arg6[%c0_16, %c0_17], %26 {strides = array<i32>} : memref<16x8xf32, #tpu.memory_space<vmem>>, vector<16x8xf32>,
    return
  }
  func.func @transform_0(%arg0: i32) -> (i32, i32) {
    %c0_i32 = arith.constant 0 : i32
    %c0_i32_0 = arith.constant 0 : i32
    return %arg0, %c0_i32 : i32, i32
  }
  func.func @transform_1(%arg0: i32) -> (i32, i32) {
    %c0_i32 = arith.constant 0 : i32
    %c0_i32_0 = arith.constant 0 : i32
    %c0_i32_1 = arith.constant 0 : i32
    return %c0_i32, %c0_i32_0 : i32, i32
  }
  func.func @transform_2(%arg0: i32) -> (i32, i32) {
    %c0_i32 = arith.constant 0 : i32
    %c0_i32_0 = arith.constant 0 : i32
    %c0_i32_1 = arith.constant 0 : i32
    return %c0_i32, %c0_i32_0 : i32, i32
  }
  func.func @transform_3(%arg0: i32) -> (i32, i32) {
    %c0_i32 = arith.constant 0 : i32
    %c0_i32_0 = arith.constant 0 : i32
    %c0_i32_1 = arith.constant 0 : i32
    return %c0_i32, %c0_i32_0 : i32, i32
  }
  func.func @transform_4(%arg0: i32) -> (i32, i32) {
    %c0_i32 = arith.constant 0 : i32
    %c0_i32_0 = arith.constant 0 : i32
    %c0_i32_1 = arith.constant 0 : i32
    return %c0_i32, %c0_i32_0 : i32, i32
  }
  func.func @transform_5(%arg0: i32) -> (i32, i32) {
    %c0_i32 = arith.constant 0 : i32
    %c0_i32_0 = arith.constant 0 : i32
    return %arg0, %c0_i32 : i32, i32
  }
}

module attributes {stable_mosaic.version = 11 : i64} {
  func.func @_linear_kernel(%arg0: i32, %arg1: memref<8x256xf32, #tpu.memory_space<vmem>>, %arg2: memref<256x8xf32, #tpu.memory_space<vmem>>, %arg3: memref<1x8xf32, #tpu.memory_space<vmem>>, %arg4: memref<8x8xf32, #tpu.memory_space<vmem>>) attributes {dimension_semantics = [#tpu.dimension_semantics<parallel>], iteration_bounds = array<i64: 1>, scalar_prefetch = 0 : i64, scratch_operands = 0 : i64, tpu.core_type = #tpu.core_type<tc>, window_params = [{transform_indices = @transform_0, window_bounds = array<i64: 8, 256>}, {pipeline_mode = #tpu.pipeline_mode<synchronous>, transform_indices = @transform_1, window_bounds = array<i64: 256, 8>}, {pipeline_mode = #tpu.pipeline_mode<synchronous>, transform_indices = @transform_2, window_bounds = array<i64: 1, 8>}, {transform_indices = @transform_3, window_bounds = array<i64: 8, 8>}]} {
    %c0 = arith.constant 0 : index
    %c0_0 = arith.constant 0 : index
    %0 = vector.load %arg1[%c0, %c0_0] : memref<8x256xf32, #tpu.memory_space<vmem>>, vector<8x256xf32>
    %c0_1 = arith.constant 0 : index
    %c0_2 = arith.constant 0 : index
    %1 = vector.load %arg2[%c0_1, %c0_2] : memref<256x8xf32, #tpu.memory_space<vmem>>, vector<256x8xf32>
    %cst = arith.constant dense<0.000000e+00> : vector<8x8xf32>
    %2 = tpu.matmul %0, %1, %cst {dimension_numbers = #tpu.dot_dimension_numbers<[1], [0], [0], [1], [0, 0, 1, 1], [], []>} : vector<8x256xf32>, vector<256x8xf32>, vector<8x8xf32> -> vector<8x8xf32>
    %c0_3 = arith.constant 0 : index
    %c0_4 = arith.constant 0 : index
    %3 = vector.load %arg3[%c0_3, %c0_4] : memref<1x8xf32, #tpu.memory_space<vmem>>, vector<1x8xf32>
    %4 = vector.broadcast %3 : vector<1x8xf32> to vector<8x8xf32>
    %5 = arith.addf %2, %4 : vector<8x8xf32>
    %cst_5 = arith.constant 5.000000e-01 : f32
    %6 = vector.broadcast %cst_5 : f32 to vector<8x8xf32>
    %7 = arith.mulf %6, %5 : vector<8x8xf32>
    %cst_6 = arith.constant 1.41421354 : f32
    %8 = vector.broadcast %cst_6 : f32 to vector<8x8xf32>
    %9 = arith.divf %5, %8 : vector<8x8xf32>
    %10 = math.erf %9 : vector<8x8xf32>
    %cst_7 = arith.constant 1.000000e+00 : f32
    %11 = vector.broadcast %cst_7 : f32 to vector<8x8xf32>
    %12 = arith.addf %11, %10 : vector<8x8xf32>
    %13 = arith.mulf %7, %12 : vector<8x8xf32>
    %c0_8 = arith.constant 0 : index
    %c0_9 = arith.constant 0 : index
    %14 = vector.load %arg4[%c0_8, %c0_9] : memref<8x8xf32, #tpu.memory_space<vmem>>, vector<8x8xf32>
    tpu.vector_store %arg4[%c0_8, %c0_9], %13 {strides = array<i32>} : memref<8x8xf32, #tpu.memory_space<vmem>>, vector<8x8xf32>,
    return
  }
  func.func @transform_0(%arg0: i32) -> (i32, i32) {
    %c0_i32 = arith.constant 0 : i32
    %c0_i32_0 = arith.constant 0 : i32
    return %arg0, %c0_i32 : i32, i32
  }
  func.func @transform_1(%arg0: i32) -> (i32, i32) {
    %c0_i32 = arith.constant 0 : i32
    %c0_i32_0 = arith.constant 0 : i32
    %c0_i32_1 = arith.constant 0 : i32
    return %c0_i32, %c0_i32_0 : i32, i32
  }
  func.func @transform_2(%arg0: i32) -> (i32, i32) {
    %c0_i32 = arith.constant 0 : i32
    %c0_i32_0 = arith.constant 0 : i32
    %c0_i32_1 = arith.constant 0 : i32
    return %c0_i32, %c0_i32_0 : i32, i32
  }
  func.func @transform_3(%arg0: i32) -> (i32, i32) {
    %c0_i32 = arith.constant 0 : i32
    %c0_i32_0 = arith.constant 0 : i32
    return %arg0, %c0_i32 : i32, i32
  }
}

module attributes {stable_mosaic.version = 11 : i64} {
  func.func @_nmc_kernel(%arg0: i32, %arg1: memref<1x1x8xf32, #tpu.memory_space<vmem>>, %arg2: memref<1x8x8xf32, #tpu.memory_space<vmem>>, %arg3: memref<1x1x8xf32, #tpu.memory_space<vmem>>) attributes {dimension_semantics = [#tpu.dimension_semantics<parallel>], iteration_bounds = array<i64: 2>, scalar_prefetch = 0 : i64, scratch_operands = 0 : i64, tpu.core_type = #tpu.core_type<tc>, window_params = [{transform_indices = @transform_0, window_bounds = array<i64: 1, 1, 8>}, {transform_indices = @transform_1, window_bounds = array<i64: 1, 8, 8>}, {transform_indices = @transform_2, window_bounds = array<i64: 1, 1, 8>}]} {
    %c0 = arith.constant 0 : index
    %c0_0 = arith.constant 0 : index
    %c0_1 = arith.constant 0 : index
    %0 = vector.load %arg1[%c0, %c0_0, %c0_1] : memref<1x1x8xf32, #tpu.memory_space<vmem>>, vector<1x1x8xf32>
    %1 = vector.shape_cast %0 : vector<1x1x8xf32> to vector<1x8xf32>
    %c0_2 = arith.constant 0 : index
    %c0_3 = arith.constant 0 : index
    %c0_4 = arith.constant 0 : index
    %2 = vector.load %arg2[%c0_2, %c0_3, %c0_4] : memref<1x8x8xf32, #tpu.memory_space<vmem>>, vector<1x8x8xf32>
    %3 = vector.shape_cast %2 : vector<1x8x8xf32> to vector<8x8xf32>
    %cst = arith.constant dense<0.000000e+00> : vector<1x8xf32>
    %4 = tpu.matmul %1, %3, %cst {dimension_numbers = #tpu.dot_dimension_numbers<[1], [1], [0], [0], [0, 0, 1, 0], [], []>} : vector<1x8xf32>, vector<8x8xf32>, vector<1x8xf32> -> vector<1x8xf32>
    %c0_5 = arith.constant 0 : index
    %c0_6 = arith.constant 0 : index
    %c0_7 = arith.constant 0 : index
    %5 = vector.load %arg3[%c0_5, %c0_6, %c0_7] : memref<1x1x8xf32, #tpu.memory_space<vmem>>, vector<1x1x8xf32>
    %6 = vector.shape_cast %5 : vector<1x1x8xf32> to vector<1x8xf32>
    %7 = vector.shape_cast %4 : vector<1x8xf32> to vector<1x1x8xf32>
    tpu.vector_store %arg3[%c0_5, %c0_6, %c0_7], %7 {strides = array<i32>} : memref<1x1x8xf32, #tpu.memory_space<vmem>>, vector<1x1x8xf32>,
    return
  }
  func.func @transform_0(%arg0: i32) -> (i32, i32, i32) {
    %c0_i32 = arith.constant 0 : i32
    %c0_i32_0 = arith.constant 0 : i32
    %c0_i32_1 = arith.constant 0 : i32
    return %arg0, %c0_i32, %c0_i32_0 : i32, i32, i32
  }
  func.func @transform_1(%arg0: i32) -> (i32, i32, i32) {
    %c0_i32 = arith.constant 0 : i32
    %c0_i32_0 = arith.constant 0 : i32
    %c0_i32_1 = arith.constant 0 : i32
    return %arg0, %c0_i32, %c0_i32_0 : i32, i32, i32
  }
  func.func @transform_2(%arg0: i32) -> (i32, i32, i32) {
    %c0_i32 = arith.constant 0 : i32
    %c0_i32_0 = arith.constant 0 : i32
    %c0_i32_1 = arith.constant 0 : i32
    return %arg0, %c0_i32, %c0_i32_0 : i32, i32, i32
  }
}

</mosaic_0001>

<bundles_post_ra>
// kernel: ifno2d_forward.13
= control target key start
LH: loop header
LB: loop body
LE: loop exit
PB: predicated region body
PF: predicated region fallthrough
CT: control target
= control target key end

     0   :  { %vm280_vm0 = vcmask 1043456   ;;  %vm87_vm1 = vcmask 97280   ;;  %vm979_vm2 = vmmov 1   ;;  %vm669_vm4 = vcmask 261120   ;;  %s1587_s1 = inlined_call_operand.vmem [shape: f32[12,32], index: 1, kind: input, shape index: {}]   ;;  %s1588_s0 = inlined_call_operand.vmem [shape: f32[512,12], index: 0, kind: input, shape index: {}]   ;;  %s1589_s2 = inlined_call_operand.vmem [shape: f32[1,32], index: 2, kind: input, shape index: {}]   ;;  %s1590_s3 = inlined_call_operand.vmem [shape: f32[512,32], index: 3, kind: output, shape index: {}]  }
   0x1   :  { %v78_v0 = vld [vmem:[%s1587_s1] sm:$0xff]  ;;  %v79_v1 = vld [vmem:[%s1587_s1 + $0x8] sm:$0xf]  ;;  %vm971_vm3 = vmpackc.low %vm280_vm0, %vm979_vm2 }
   0x2   :  { %v970_v2 = vpack.c.bf16 %v79_v1, %v78_v0  ;;  %v14_v3 = vld [vmem:[%s1588_s0] sm:$0xff]  ;;  %v15_v5 = vld [vmem:[%s1588_s0 + $0x8] sm:$0xff]  ;;  %v16_v7 = vld [vmem:[%s1588_s0 + $0x10] sm:$0xff] }
   0x3   :  { %v46_v4 = vld [vmem:[%s1588_s0 + $0x100] sm:$0xff]  ;;  %874 = vmatprep.mubr.msk.f32.mxu0 %vm87_vm1, %v14_v3  ;;  %v47_v6 = vld [vmem:[%s1588_s0 + $0x108] sm:$0xff]  ;;  %v48_v8 = vld [vmem:[%s1588_s0 + $0x110] sm:$0xff] }
   0x4   :  { %922 = vmatprep.mubr.msk.f32.mxu1 %vm87_vm1, %v46_v4  ;;  %972 = vmatprep.subr.msk.bf16.mxu0 %vm971_vm3, %v970_v2  ;;  %v17_v9 = vld [vmem:[%s1588_s0 + $0x18] sm:$0xff]  ;;  %v18_v11 = vld [vmem:[%s1588_s0 + $0x20] sm:$0xff]  ;;  %v19_v13 = vld [vmem:[%s1588_s0 + $0x28] sm:$0xff] }
   0x5   :  { %976 = vmatprep.subr.msk.bf16.mxu1 %vm971_vm3, %v970_v2  ;;  %975 = vmatpush3.bf16.msk.msra.mxu0 %vm971_vm3, %v970_v2  ;;  %v49_v10 = vld [vmem:[%s1588_s0 + $0x118] sm:$0xff]  ;;  %v50_v12 = vld [vmem:[%s1588_s0 + $0x120] sm:$0xff]  ;;  %v51_v14 = vld [vmem:[%s1588_s0 + $0x128] sm:$0xff] }
   0x6   :  { %977 = vmatpush3.bf16.msk.msra.mxu1 %vm971_vm3, %v970_v2  ;;  %v20_v15 = vld [vmem:[%s1588_s0 + $0x30] sm:$0xff]  ;;  %v21_v17 = vld [vmem:[%s1588_s0 + $0x38] sm:$0xff]  ;;  %v22_v19 = vld [vmem:[%s1588_s0 + $0x40] sm:$0xff] }
   0x7   :  { %v52_v16 = vld [vmem:[%s1588_s0 + $0x130] sm:$0xff]  ;;  %v53_v18 = vld [vmem:[%s1588_s0 + $0x138] sm:$0xff]  ;;  %v54_v20 = vld [vmem:[%s1588_s0 + $0x140] sm:$0xff] }
   0x8   :  { %875 = vmatmul.mubr.msk.f32.vlgmr.msra.gmra.mrb[0].mxu0 %vm87_vm1, %v15_v5  ;;  %v23_v21 = vld [vmem:[%s1588_s0 + $0x48] sm:$0xff]  ;;  %v24_v23 = vld [vmem:[%s1588_s0 + $0x50] sm:$0xff]  ;;  %v25_v25 = vld [vmem:[%s1588_s0 + $0x58] sm:$0xff] }
   0x9   :  { %923 = vmatmul.mubr.msk.f32.vlgmr.msra.gmra.mrb[0].mxu1 %vm87_vm1, %v47_v6  ;;  %877 = vmatprep.mubr.msk.f32.mxu0 %vm87_vm1, %v16_v7  ;;  %v55_v22 = vld [vmem:[%s1588_s0 + $0x148] sm:$0xff]  ;;  %v56_v24 = vld [vmem:[%s1588_s0 + $0x150] sm:$0xff]  ;;  %v57_v26 = vld [vmem:[%s1588_s0 + $0x158] sm:$0xff] }
   0xa   :  { %925 = vmatprep.mubr.msk.f32.mxu1 %vm87_vm1, %v48_v8  ;;  %v26_v27 = vld [vmem:[%s1588_s0 + $0x60] sm:$0xff]  ;;  %v27_v29 = vld [vmem:[%s1588_s0 + $0x68] sm:$0xff]  ;;  %v28_v31 = vld [vmem:[%s1588_s0 + $0x70] sm:$0xff] }
   0xb   :  { %v58_v28 = vld [vmem:[%s1588_s0 + $0x160] sm:$0xff]  ;;  %v59_v30 = vld [vmem:[%s1588_s0 + $0x168] sm:$0xff]  ;;  %v60_v32 = vld [vmem:[%s1588_s0 + $0x170] sm:$0xff] }
   0xc   :  { %878 = vmatmul.mubr.msk.f32.gmra.mrb[2].mxu0 %vm87_vm1, %v17_v9  ;;  %v29_v33 = vld [vmem:[%s1588_s0 + $0x78] sm:$0xff]  ;;  %v30_v35 = vld [vmem:[%s1588_s0 + $0x80] sm:$0xff]  ;;  %v31_v37 = vld [vmem:[%s1588_s0 + $0x88] sm:$0xff] }
   0xd   :  { %926 = vmatmul.mubr.msk.f32.gmra.mrb[2].mxu1 %vm87_vm1, %v49_v10  ;;  %880 = vmatprep.mubr.msk.f32.mxu0 %vm87_vm1, %v18_v11  ;;  %v61_v34 = vld [vmem:[%s1588_s0 + $0x178] sm:$0xff]  ;;  %v62_v36 = vld [vmem:[%s1588_s0 + $0x180] sm:$0xff]  ;;  %v63_v38 = vld [vmem:[%s1588_s0 + $0x188] sm:$0xff] }
   0xe   :  { %928 = vmatprep.mubr.msk.f32.mxu1 %vm87_vm1, %v50_v12  ;;  %v32_v39 = vld [vmem:[%s1588_s0 + $0x90] sm:$0xff]  ;;  %v33_v41 = vld [vmem:[%s1588_s0 + $0x98] sm:$0xff]  ;;  %v34_v43 = vld [vmem:[%s1588_s0 + $0xa0] sm:$0xff] }
   0xf   :  { %v64_v40 = vld [vmem:[%s1588_s0 + $0x190] sm:$0xff]  ;;  %v65_v42 = vld [vmem:[%s1588_s0 + $0x198] sm:$0xff]  ;;  %v66_v44 = vld [vmem:[%s1588_s0 + $0x1a0] sm:$0xff] }
  0x10   :  { %881 = vmatmul.mubr.msk.f32.gmra.mrb[4].mxu0 %vm87_vm1, %v19_v13  ;;  %v35_v45 = vld [vmem:[%s1588_s0 + $0xa8] sm:$0xff]  ;;  %v36_v47 = vld [vmem:[%s1588_s0 + $0xb0] sm:$0xff]  ;;  %v37_v49 = vld [vmem:[%s1588_s0 + $0xb8] sm:$0xff] }
  0x11   :  { %929 = vmatmul.mubr.msk.f32.gmra.mrb[4].mxu1 %vm87_vm1, %v51_v14  ;;  %883 = vmatprep.mubr.msk.f32.mxu0 %vm87_vm1, %v20_v15  ;;  %v67_v46 = vld [vmem:[%s1588_s0 + $0x1a8] sm:$0xff]  ;;  %v68_v48 = vld [vmem:[%s1588_s0 + $0x1b0] sm:$0xff]  ;;  %v69_v50 = vld [vmem:[%s1588_s0 + $0x1b8] sm:$0xff] }
  0x12   :  { %931 = vmatprep.mubr.msk.f32.mxu1 %vm87_vm1, %v52_v16  ;;  %v38_v51 = vld [vmem:[%s1588_s0 + $0xc0] sm:$0xff]  ;;  %v39_v53 = vld [vmem:[%s1588_s0 + $0xc8] sm:$0xff]  ;;  %v40_v55 = vld [vmem:[%s1588_s0 + $0xd0] sm:$0xff] }
  0x13   :  { %v70_v52 = vld [vmem:[%s1588_s0 + $0x1c0] sm:$0xff]  ;;  %v71_v54 = vld [vmem:[%s1588_s0 + $0x1c8] sm:$0xff]  ;;  %v72_v56 = vld [vmem:[%s1588_s0 + $0x1d0] sm:$0xff] }
  0x14   :  { %884 = vmatmul.mubr.msk.f32.gmra.mrb[6].mxu0 %vm87_vm1, %v21_v17  ;;  %v41_v57 = vld [vmem:[%s1588_s0 + $0xd8] sm:$0xff]  ;;  %v42_v59 = vld [vmem:[%s1588_s0 + $0xe0] sm:$0xff]  ;;  %v43_v61 = vld [vmem:[%s1588_s0 + $0xe8] sm:$0xff] }
  0x15   :  { %932 = vmatmul.mubr.msk.f32.gmra.mrb[6].mxu1 %vm87_vm1, %v53_v18  ;;  %886 = vmatprep.mubr.msk.f32.mxu0 %vm87_vm1, %v22_v19  ;;  %v73_v58 = vld [vmem:[%s1588_s0 + $0x1d8] sm:$0xff]  ;;  %v74_v60 = vld [vmem:[%s1588_s0 + $0x1e0] sm:$0xff]  ;;  %v75_v62 = vld [vmem:[%s1588_s0 + $0x1e8] sm:$0xff] }
  0x16   :  { %934 = vmatprep.mubr.msk.f32.mxu1 %vm87_vm1, %v54_v20  ;;  %v44_v63 = vld [vmem:[%s1588_s0 + $0xf0] sm:$0xff]  ;;  %v45_v1 = vld [vmem:[%s1588_s0 + $0xf8] sm:$0xff]  ;;  %v1265_v3 = vld [vmem:[%s1589_s2] ss:$0 sm:$0xff] }
  0x17   :  { %v76_v0 = vld [vmem:[%s1588_s0 + $0x1f0] sm:$0xff]  ;;  %v77_v2 = vld [vmem:[%s1588_s0 + $0x1f8] sm:$0xff] }
  0x18   :  { %887 = vmatmul.mubr.msk.f32.gmra.mrb[8].mxu0 %vm87_vm1, %v23_v21 }
  0x19   :  { %935 = vmatmul.mubr.msk.f32.gmra.mrb[8].mxu1 %vm87_vm1, %v55_v22  ;;  %889 = vmatprep.mubr.msk.f32.mxu0 %vm87_vm1, %v24_v23 }
  0x1a   :  { %937 = vmatprep.mubr.msk.f32.mxu1 %vm87_vm1, %v56_v24 }
  0x1c   :  { %890 = vmatmul.mubr.msk.f32.gmra.mrb[10].mxu0 %vm87_vm1, %v25_v25 }
  0x1d   :  { %938 = vmatmul.mubr.msk.f32.gmra.mrb[10].mxu1 %vm87_vm1, %v57_v26  ;;  %892 = vmatprep.mubr.msk.f32.mxu0 %vm87_vm1, %v26_v27 }
  0x1e   :  { %940 = vmatprep.mubr.msk.f32.mxu1 %vm87_vm1, %v58_v28 }
  0x20   :  { %893 = vmatmul.mubr.msk.f32.gmra.mrb[12].mxu0 %vm87_vm1, %v27_v29 }
  0x21   :  { %941 = vmatmul.mubr.msk.f32.gmra.mrb[12].mxu1 %vm87_vm1, %v59_v30  ;;  %895 = vmatprep.mubr.msk.f32.mxu0 %vm87_vm1, %v28_v31 }
  0x22   :  { %943 = vmatprep.mubr.msk.f32.mxu1 %vm87_vm1, %v60_v32 }
  0x24   :  { %896 = vmatmul.mubr.msk.f32.gmra.mrb[14].mxu0 %vm87_vm1, %v29_v33 }
  0x25   :  { %944 = vmatmul.mubr.msk.f32.gmra.mrb[14].mxu1 %vm87_vm1, %v61_v34  ;;  %898 = vmatprep.mubr.msk.f32.mxu0 %vm87_vm1, %v30_v35 }
  0x26   :  { %946 = vmatprep.mubr.msk.f32.mxu1 %vm87_vm1, %v62_v36 }
  0x28   :  { %899 = vmatmul.mubr.msk.f32.gmra.mrb[16].mxu0 %vm87_vm1, %v31_v37 }
  0x29   :  { %947 = vmatmul.mubr.msk.f32.gmra.mrb[16].mxu1 %vm87_vm1, %v63_v38  ;;  %901 = vmatprep.mubr.msk.f32.mxu0 %vm87_vm1, %v32_v39 }
  0x2a   :  { %949 = vmatprep.mubr.msk.f32.mxu1 %vm87_vm1, %v64_v40 }
  0x2c   :  { %902 = vmatmul.mubr.msk.f32.gmra.mrb[18].mxu0 %vm87_vm1, %v33_v41 }
  0x2d   :  { %950 = vmatmul.mubr.msk.f32.gmra.mrb[18].mxu1 %vm87_vm1, %v65_v42  ;;  %904 = vmatprep.mubr.msk.f32.mxu0 %vm87_vm1, %v34_v43 }
  0x2e   :  { %952 = vmatprep.mubr.msk.f32.mxu1 %vm87_vm1, %v66_v44 }
  0x30   :  { %905 = vmatmul.mubr.msk.f32.gmra.mrb[20].mxu0 %vm87_vm1, %v35_v45 }
  0x31   :  { %953 = vmatmul.mubr.msk.f32.gmra.mrb[20].mxu1 %vm87_vm1, %v67_v46  ;;  %907 = vmatprep.mubr.msk.f32.mxu0 %vm87_vm1, %v36_v47 }
  0x32   :  { %955 = vmatprep.mubr.msk.f32.mxu1 %vm87_vm1, %v68_v48 }
  0x34   :  { %908 = vmatmul.mubr.msk.f32.gmra.mrb[22].mxu0 %vm87_vm1, %v37_v49 }
  0x35   :  { %956 = vmatmul.mubr.msk.f32.gmra.mrb[22].mxu1 %vm87_vm1, %v69_v50  ;;  %910 = vmatprep.mubr.msk.f32.mxu0 %vm87_vm1, %v38_v51 }
  0x36   :  { %958 = vmatprep.mubr.msk.f32.mxu1 %vm87_vm1, %v70_v52 }
  0x38   :  { %911 = vmatmul.mubr.msk.f32.gmra.mrb[24].mxu0 %vm87_vm1, %v39_v53 }
  0x39   :  { %959 = vmatmul.mubr.msk.f32.gmra.mrb[24].mxu1 %vm87_vm1, %v71_v54  ;;  %913 = vmatprep.mubr.msk.f32.mxu0 %vm87_vm1, %v40_v55 }
  0x3a   :  { %961 = vmatprep.mubr.msk.f32.mxu1 %vm87_vm1, %v72_v56 }
  0x3c   :  { %914 = vmatmul.mubr.msk.f32.gmra.mrb[26].mxu0 %vm87_vm1, %v41_v57 }
  0x3d   :  { %962 = vmatmul.mubr.msk.f32.gmra.mrb[26].mxu1 %vm87_vm1, %v73_v58  ;;  %916 = vmatprep.mubr.msk.f32.mxu0 %vm87_vm1, %v42_v59 }
  0x3e   :  { %964 = vmatprep.mubr.msk.f32.mxu1 %vm87_vm1, %v74_v60 }
  0x40   :  { %917 = vmatmul.mubr.msk.f32.gmra.mrb[28].mxu0 %vm87_vm1, %v43_v61 }
  0x41   :  { %965 = vmatmul.mubr.msk.f32.gmra.mrb[28].mxu1 %vm87_vm1, %v75_v62  ;;  %919 = vmatprep.mubr.msk.f32.mxu0 %vm87_vm1, %v44_v63 }
  0x42   :  { %967 = vmatprep.mubr.msk.f32.mxu1 %vm87_vm1, %v76_v0 }
  0x44   :  { %920 = vmatmul.mubr.msk.f32.gmra.mrb[30].mxu0 %vm87_vm1, %v45_v1 }
  0x45   :  { %968 = vmatmul.mubr.msk.f32.gmra.mrb[30].mxu1 %vm87_vm1, %v77_v2 }
  0xdb   :  { %v876_v4 = vpop.f32.mrb[0].mxu0 }
  0xdc   :  { %v924_v5 = vpop.f32.mrb[0].mxu1  ;;  %v356_v6 = vadd.f32 %v876_v4, %v1265_v3  ;;  %v350_v8 = vpop.f32.mrb[1].mxu0 }
  0xdd   :  { %v516_v7 = vadd.f32 %v924_v5, %v1265_v3  ;;  %v510_v9 = vpop.f32.mrb[1].mxu1  ;;  %v351_v10 = vadd.f32 %v1265_v3, %v350_v8 }
  0xde   :  { %v511_v11 = vadd.f32 %v1265_v3, %v510_v9  ;;  %671 = vst.msk [vmem:[%s1590_s3 + $0x8] sm:$0xff] %vm669_vm4, %v356_v6 }
  0xdf   :  { %703 = vst.msk [vmem:[%s1590_s3 + $0x108] sm:$0xff] %vm669_vm4, %v516_v7  ;;  %670 = vst.msk [vmem:[%s1590_s3] sm:$0xff] %vm669_vm4, %v351_v10  ;;  %v879_v12 = vpop.f32.mrb[2].mxu0 }
  0xe0   :  { %702 = vst.msk [vmem:[%s1590_s3 + $0x100] sm:$0xff] %vm669_vm4, %v511_v11  ;;  %v927_v13 = vpop.f32.mrb[2].mxu1  ;;  %v366_v14 = vadd.f32 %v879_v12, %v1265_v3  ;;  %v360_v16 = vpop.f32.mrb[3].mxu0 }
  0xe1   :  { %v526_v15 = vadd.f32 %v927_v13, %v1265_v3  ;;  %v520_v17 = vpop.f32.mrb[3].mxu1  ;;  %v361_v18 = vadd.f32 %v1265_v3, %v360_v16 }
  0xe2   :  { %v521_v19 = vadd.f32 %v1265_v3, %v520_v17  ;;  %673 = vst.msk [vmem:[%s1590_s3 + $0x18] sm:$0xff] %vm669_vm4, %v366_v14 }
  0xe3   :  { %705 = vst.msk [vmem:[%s1590_s3 + $0x118] sm:$0xff] %vm669_vm4, %v526_v15  ;;  %672 = vst.msk [vmem:[%s1590_s3 + $0x10] sm:$0xff] %vm669_vm4, %v361_v18  ;;  %v882_v20 = vpop.f32.mrb[4].mxu0 }
  0xe4   :  { %704 = vst.msk [vmem:[%s1590_s3 + $0x110] sm:$0xff] %vm669_vm4, %v521_v19  ;;  %v930_v21 = vpop.f32.mrb[4].mxu1  ;;  %v376_v22 = vadd.f32 %v882_v20, %v1265_v3  ;;  %v370_v24 = vpop.f32.mrb[5].mxu0 }
  0xe5   :  { %v536_v23 = vadd.f32 %v930_v21, %v1265_v3  ;;  %v530_v25 = vpop.f32.mrb[5].mxu1  ;;  %v371_v26 = vadd.f32 %v1265_v3, %v370_v24 }
  0xe6   :  { %v531_v27 = vadd.f32 %v1265_v3, %v530_v25  ;;  %675 = vst.msk [vmem:[%s1590_s3 + $0x28] sm:$0xff] %vm669_vm4, %v376_v22 }
  0xe7   :  { %707 = vst.msk [vmem:[%s1590_s3 + $0x128] sm:$0xff] %vm669_vm4, %v536_v23  ;;  %674 = vst.msk [vmem:[%s1590_s3 + $0x20] sm:$0xff] %vm669_vm4, %v371_v26  ;;  %v885_v28 = vpop.f32.mrb[6].mxu0 }
  0xe8   :  { %706 = vst.msk [vmem:[%s1590_s3 + $0x120] sm:$0xff] %vm669_vm4, %v531_v27  ;;  %v933_v29 = vpop.f32.mrb[6].mxu1  ;;  %v386_v30 = vadd.f32 %v885_v28, %v1265_v3  ;;  %v380_v32 = vpop.f32.mrb[7].mxu0 }
  0xe9   :  { %v546_v31 = vadd.f32 %v933_v29, %v1265_v3  ;;  %v540_v33 = vpop.f32.mrb[7].mxu1  ;;  %v381_v34 = vadd.f32 %v1265_v3, %v380_v32 }
  0xea   :  { %v541_v35 = vadd.f32 %v1265_v3, %v540_v33  ;;  %677 = vst.msk [vmem:[%s1590_s3 + $0x38] sm:$0xff] %vm669_vm4, %v386_v30 }
  0xeb   :  { %709 = vst.msk [vmem:[%s1590_s3 + $0x138] sm:$0xff] %vm669_vm4, %v546_v31  ;;  %676 = vst.msk [vmem:[%s1590_s3 + $0x30] sm:$0xff] %vm669_vm4, %v381_v34  ;;  %v888_v36 = vpop.f32.mrb[8].mxu0 }
  0xec   :  { %708 = vst.msk [vmem:[%s1590_s3 + $0x130] sm:$0xff] %vm669_vm4, %v541_v35  ;;  %v936_v37 = vpop.f32.mrb[8].mxu1  ;;  %v396_v38 = vadd.f32 %v888_v36, %v1265_v3  ;;  %v390_v40 = vpop.f32.mrb[9].mxu0 }
  0xed   :  { %v556_v39 = vadd.f32 %v936_v37, %v1265_v3  ;;  %v550_v41 = vpop.f32.mrb[9].mxu1  ;;  %v391_v42 = vadd.f32 %v1265_v3, %v390_v40 }
  0xee   :  { %v551_v43 = vadd.f32 %v1265_v3, %v550_v41  ;;  %679 = vst.msk [vmem:[%s1590_s3 + $0x48] sm:$0xff] %vm669_vm4, %v396_v38 }
  0xef   :  { %711 = vst.msk [vmem:[%s1590_s3 + $0x148] sm:$0xff] %vm669_vm4, %v556_v39  ;;  %678 = vst.msk [vmem:[%s1590_s3 + $0x40] sm:$0xff] %vm669_vm4, %v391_v42  ;;  %v891_v44 = vpop.f32.mrb[10].mxu0 }
  0xf0   :  { %710 = vst.msk [vmem:[%s1590_s3 + $0x140] sm:$0xff] %vm669_vm4, %v551_v43  ;;  %v939_v45 = vpop.f32.mrb[10].mxu1  ;;  %v406_v46 = vadd.f32 %v891_v44, %v1265_v3  ;;  %v400_v48 = vpop.f32.mrb[11].mxu0 }
  0xf1   :  { %v566_v47 = vadd.f32 %v939_v45, %v1265_v3  ;;  %v560_v49 = vpop.f32.mrb[11].mxu1  ;;  %v401_v50 = vadd.f32 %v1265_v3, %v400_v48 }
  0xf2   :  { %v561_v51 = vadd.f32 %v1265_v3, %v560_v49  ;;  %681 = vst.msk [vmem:[%s1590_s3 + $0x58] sm:$0xff] %vm669_vm4, %v406_v46 }
  0xf3   :  { %713 = vst.msk [vmem:[%s1590_s3 + $0x158] sm:$0xff] %vm669_vm4, %v566_v47  ;;  %680 = vst.msk [vmem:[%s1590_s3 + $0x50] sm:$0xff] %vm669_vm4, %v401_v50  ;;  %v894_v52 = vpop.f32.mrb[12].mxu0 }
  0xf4   :  { %712 = vst.msk [vmem:[%s1590_s3 + $0x150] sm:$0xff] %vm669_vm4, %v561_v51  ;;  %v942_v53 = vpop.f32.mrb[12].mxu1  ;;  %v416_v54 = vadd.f32 %v894_v52, %v1265_v3  ;;  %v410_v56 = vpop.f32.mrb[13].mxu0 }
  0xf5   :  { %v576_v55 = vadd.f32 %v942_v53, %v1265_v3  ;;  %v570_v57 = vpop.f32.mrb[13].mxu1  ;;  %v411_v58 = vadd.f32 %v1265_v3, %v410_v56 }
  0xf6   :  { %v571_v59 = vadd.f32 %v1265_v3, %v570_v57  ;;  %683 = vst.msk [vmem:[%s1590_s3 + $0x68] sm:$0xff] %vm669_vm4, %v416_v54 }
  0xf7   :  { %715 = vst.msk [vmem:[%s1590_s3 + $0x168] sm:$0xff] %vm669_vm4, %v576_v55  ;;  %682 = vst.msk [vmem:[%s1590_s3 + $0x60] sm:$0xff] %vm669_vm4, %v411_v58  ;;  %v897_v60 = vpop.f32.mrb[14].mxu0 }
  0xf8   :  { %714 = vst.msk [vmem:[%s1590_s3 + $0x160] sm:$0xff] %vm669_vm4, %v571_v59  ;;  %v945_v61 = vpop.f32.mrb[14].mxu1  ;;  %v426_v62 = vadd.f32 %v897_v60, %v1265_v3  ;;  %v420_v0 = vpop.f32.mrb[15].mxu0 }
  0xf9   :  { %v586_v63 = vadd.f32 %v945_v61, %v1265_v3  ;;  %v580_v1 = vpop.f32.mrb[15].mxu1  ;;  %v421_v2 = vadd.f32 %v1265_v3, %v420_v0 }
  0xfa   :  { %v581_v4 = vadd.f32 %v1265_v3, %v580_v1  ;;  %685 = vst.msk [vmem:[%s1590_s3 + $0x78] sm:$0xff] %vm669_vm4, %v426_v62 }
  0xfb   :  { %717 = vst.msk [vmem:[%s1590_s3 + $0x178] sm:$0xff] %vm669_vm4, %v586_v63  ;;  %684 = vst.msk [vmem:[%s1590_s3 + $0x70] sm:$0xff] %vm669_vm4, %v421_v2  ;;  %v900_v5 = vpop.f32.mrb[16].mxu0 }
  0xfc   :  { %716 = vst.msk [vmem:[%s1590_s3 + $0x170] sm:$0xff] %vm669_vm4, %v581_v4  ;;  %v948_v6 = vpop.f32.mrb[16].mxu1  ;;  %v436_v7 = vadd.f32 %v900_v5, %v1265_v3  ;;  %v430_v9 = vpop.f32.mrb[17].mxu0 }
  0xfd   :  { %v596_v8 = vadd.f32 %v948_v6, %v1265_v3  ;;  %v590_v10 = vpop.f32.mrb[17].mxu1  ;;  %v431_v11 = vadd.f32 %v1265_v3, %v430_v9 }
  0xfe   :  { %v591_v12 = vadd.f32 %v1265_v3, %v590_v10  ;;  %687 = vst.msk [vmem:[%s1590_s3 + $0x88] sm:$0xff] %vm669_vm4, %v436_v7 }
  0xff   :  { %719 = vst.msk [vmem:[%s1590_s3 + $0x188] sm:$0xff] %vm669_vm4, %v596_v8  ;;  %686 = vst.msk [vmem:[%s1590_s3 + $0x80] sm:$0xff] %vm669_vm4, %v431_v11  ;;  %v903_v13 = vpop.f32.mrb[18].mxu0 }
 0x100   :  { %718 = vst.msk [vmem:[%s1590_s3 + $0x180] sm:$0xff] %vm669_vm4, %v591_v12  ;;  %v951_v14 = vpop.f32.mrb[18].mxu1  ;;  %v446_v15 = vadd.f32 %v903_v13, %v1265_v3  ;;  %v440_v17 = vpop.f32.mrb[19].mxu0 }
 0x101   :  { %v606_v16 = vadd.f32 %v951_v14, %v1265_v3  ;;  %v600_v18 = vpop.f32.mrb[19].mxu1  ;;  %v441_v19 = vadd.f32 %v1265_v3, %v440_v17 }
 0x102   :  { %v601_v20 = vadd.f32 %v1265_v3, %v600_v18  ;;  %689 = vst.msk [vmem:[%s1590_s3 + $0x98] sm:$0xff] %vm669_vm4, %v446_v15 }
 0x103   :  { %721 = vst.msk [vmem:[%s1590_s3 + $0x198] sm:$0xff] %vm669_vm4, %v606_v16  ;;  %688 = vst.msk [vmem:[%s1590_s3 + $0x90] sm:$0xff] %vm669_vm4, %v441_v19  ;;  %v906_v21 = vpop.f32.mrb[20].mxu0 }
 0x104   :  { %720 = vst.msk [vmem:[%s1590_s3 + $0x190] sm:$0xff] %vm669_vm4, %v601_v20  ;;  %v954_v22 = vpop.f32.mrb[20].mxu1  ;;  %v456_v23 = vadd.f32 %v906_v21, %v1265_v3  ;;  %v450_v25 = vpop.f32.mrb[21].mxu0 }
 0x105   :  { %v616_v24 = vadd.f32 %v954_v22, %v1265_v3  ;;  %v610_v26 = vpop.f32.mrb[21].mxu1  ;;  %v451_v27 = vadd.f32 %v1265_v3, %v450_v25 }
 0x106   :  { %v611_v28 = vadd.f32 %v1265_v3, %v610_v26  ;;  %691 = vst.msk [vmem:[%s1590_s3 + $0xa8] sm:$0xff] %vm669_vm4, %v456_v23 }
 0x107   :  { %723 = vst.msk [vmem:[%s1590_s3 + $0x1a8] sm:$0xff] %vm669_vm4, %v616_v24  ;;  %690 = vst.msk [vmem:[%s1590_s3 + $0xa0] sm:$0xff] %vm669_vm4, %v451_v27  ;;  %v909_v29 = vpop.f32.mrb[22].mxu0 }
 0x108   :  { %722 = vst.msk [vmem:[%s1590_s3 + $0x1a0] sm:$0xff] %vm669_vm4, %v611_v28  ;;  %v957_v30 = vpop.f32.mrb[22].mxu1  ;;  %v466_v31 = vadd.f32 %v909_v29, %v1265_v3  ;;  %v460_v33 = vpop.f32.mrb[23].mxu0 }
 0x109   :  { %v626_v32 = vadd.f32 %v957_v30, %v1265_v3  ;;  %v620_v34 = vpop.f32.mrb[23].mxu1  ;;  %v461_v35 = vadd.f32 %v1265_v3, %v460_v33 }
 0x10a   :  { %v621_v36 = vadd.f32 %v1265_v3, %v620_v34  ;;  %693 = vst.msk [vmem:[%s1590_s3 + $0xb8] sm:$0xff] %vm669_vm4, %v466_v31 }
 0x10b   :  { %725 = vst.msk [vmem:[%s1590_s3 + $0x1b8] sm:$0xff] %vm669_vm4, %v626_v32  ;;  %692 = vst.msk [vmem:[%s1590_s3 + $0xb0] sm:$0xff] %vm669_vm4, %v461_v35  ;;  %v912_v37 = vpop.f32.mrb[24].mxu0 }
 0x10c   :  { %724 = vst.msk [vmem:[%s1590_s3 + $0x1b0] sm:$0xff] %vm669_vm4, %v621_v36  ;;  %v960_v38 = vpop.f32.mrb[24].mxu1  ;;  %v476_v39 = vadd.f32 %v912_v37, %v1265_v3  ;;  %v470_v41 = vpop.f32.mrb[25].mxu0 }
 0x10d   :  { %v636_v40 = vadd.f32 %v960_v38, %v1265_v3  ;;  %v630_v42 = vpop.f32.mrb[25].mxu1  ;;  %v471_v43 = vadd.f32 %v1265_v3, %v470_v41 }
 0x10e   :  { %v631_v44 = vadd.f32 %v1265_v3, %v630_v42  ;;  %695 = vst.msk [vmem:[%s1590_s3 + $0xc8] sm:$0xff] %vm669_vm4, %v476_v39 }
 0x10f   :  { %727 = vst.msk [vmem:[%s1590_s3 + $0x1c8] sm:$0xff] %vm669_vm4, %v636_v40  ;;  %694 = vst.msk [vmem:[%s1590_s3 + $0xc0] sm:$0xff] %vm669_vm4, %v471_v43  ;;  %v915_v45 = vpop.f32.mrb[26].mxu0 }
 0x110   :  { %726 = vst.msk [vmem:[%s1590_s3 + $0x1c0] sm:$0xff] %vm669_vm4, %v631_v44  ;;  %v963_v46 = vpop.f32.mrb[26].mxu1  ;;  %v486_v47 = vadd.f32 %v915_v45, %v1265_v3  ;;  %v480_v49 = vpop.f32.mrb[27].mxu0 }
 0x111   :  { %v646_v48 = vadd.f32 %v963_v46, %v1265_v3  ;;  %v640_v50 = vpop.f32.mrb[27].mxu1  ;;  %v481_v51 = vadd.f32 %v1265_v3, %v480_v49 }
 0x112   :  { %v641_v52 = vadd.f32 %v1265_v3, %v640_v50  ;;  %697 = vst.msk [vmem:[%s1590_s3 + $0xd8] sm:$0xff] %vm669_vm4, %v486_v47 }
 0x113   :  { %729 = vst.msk [vmem:[%s1590_s3 + $0x1d8] sm:$0xff] %vm669_vm4, %v646_v48  ;;  %696 = vst.msk [vmem:[%s1590_s3 + $0xd0] sm:$0xff] %vm669_vm4, %v481_v51  ;;  %v918_v53 = vpop.f32.mrb[28].mxu0 }
 0x114   :  { %728 = vst.msk [vmem:[%s1590_s3 + $0x1d0] sm:$0xff] %vm669_vm4, %v641_v52  ;;  %v966_v54 = vpop.f32.mrb[28].mxu1  ;;  %v496_v55 = vadd.f32 %v918_v53, %v1265_v3  ;;  %v490_v57 = vpop.f32.mrb[29].mxu0 }
 0x115   :  { %v656_v56 = vadd.f32 %v966_v54, %v1265_v3  ;;  %v650_v58 = vpop.f32.mrb[29].mxu1  ;;  %v491_v59 = vadd.f32 %v1265_v3, %v490_v57 }
 0x116   :  { %v651_v60 = vadd.f32 %v1265_v3, %v650_v58  ;;  %699 = vst.msk [vmem:[%s1590_s3 + $0xe8] sm:$0xff] %vm669_vm4, %v496_v55 }
 0x117   :  { %731 = vst.msk [vmem:[%s1590_s3 + $0x1e8] sm:$0xff] %vm669_vm4, %v656_v56  ;;  %698 = vst.msk [vmem:[%s1590_s3 + $0xe0] sm:$0xff] %vm669_vm4, %v491_v59  ;;  %v921_v61 = vpop.f32.mrb[30].mxu0 }
 0x118   :  { %730 = vst.msk [vmem:[%s1590_s3 + $0x1e0] sm:$0xff] %vm669_vm4, %v651_v60  ;;  %v969_v62 = vpop.f32.mrb[30].mxu1  ;;  %v506_v63 = vadd.f32 %v921_v61, %v1265_v3  ;;  %v500_v1 = vpop.f32.mrb[31].mxu0 }
 0x119   :  { %v666_v0 = vadd.f32 %v969_v62, %v1265_v3  ;;  %v660_v2 = vpop.f32.mrb[31].mxu1  ;;  %v501_v4 = vadd.f32 %v1265_v3, %v500_v1 }
 0x11a   :  { %v661_v5 = vadd.f32 %v1265_v3, %v660_v2  ;;  %701 = vst.msk [vmem:[%s1590_s3 + $0xf8] sm:$0xff] %vm669_vm4, %v506_v63 }
 0x11b   :  { %733 = vst.msk [vmem:[%s1590_s3 + $0x1f8] sm:$0xff] %vm669_vm4, %v666_v0  ;;  %700 = vst.msk [vmem:[%s1590_s3 + $0xf0] sm:$0xff] %vm669_vm4, %v501_v4 }
 0x11c   :  { %732 = vst.msk [vmem:[%s1590_s3 + $0x1f0] sm:$0xff] %vm669_vm4, %v661_v5 }

// kernel: ifno2d_forward.14
= control target key start
LH: loop header
LB: loop body
LE: loop exit
PB: predicated region body
PF: predicated region fallthrough
CT: control target
= control target key end

     0   :  { %s3024_s21 = smov 0   ;;  %s3425_s0 = inlined_call_operand.vmem [shape: f32[4,8,2,32], index: 0, kind: input, shape index: {}]   ;;  %s3426_s1 = inlined_call_operand.vmem [shape: f32[4,8,2,32], index: 1, kind: input, shape index: {}]   ;;  %s3427_s2 = inlined_call_operand.vmem [shape: f32[4,8,32,32], index: 2, kind: input, shape index: {}]   ;;  %s3428_s3 = inlined_call_operand.vmem [shape: f32[4,8,32,32], index: 3, kind: input, shape index: {}]   ;;  %s3429_s4 = inlined_call_operand.vmem [shape: f32[4,8,32,32], index: 4, kind: input, shape index: {}]   ;;  %s3430_s5 = inlined_call_operand.vmem [shape: f32[4,8,2,32], index: 5, kind: output, shape index: {0}]   ;;  %s3431_s6 = inlined_call_operand.vmem [shape: f32[4,8,2,32], index: 6, kind: output, shape index: {1}]  }
   0x1 LB: > { %s2387_s22 = sadd.s32 4294967295, %s2984_s21   ;;  %p2391_p0 = scmp.ge.s32.totalorder %s2984_s21, 1  ;;  %s2984_s21 = sphi %s3024_s21, %s17_s21  }
   0x2   : > { %p255_p1 = scmp.lt.s32.totalorder %s2984_s21, 5 }
   0x4   : > { %p256_p2 = pnand %p2391_p0, %p255_p1 }
   0x5   : > { %p310_p3 = scmp.lt.s32.totalorder (!%p256_p2), %s2387_s22, 3  ;;  %v2986_v0 = vmov (!%p256_p2), 0.0|0.0   ;;  %vm2987_vm0 = vmmov (!%p256_p2), 0   ;;  %v2988_v1 = vmov (!%p256_p2), 0.0   ;;  %vm401_vm1 = vcmask (!%p256_p2), 261120  }
   0x6   : > { %259 = sbr.rel (%p256_p2) target bundleno = 330 (0x14a), region = 40  ;;  %2823 = vmatprep.subr.bf16.mxu0 (!%p256_p2), %v2986_v0  ;;  %2829 = vmatprep.subr.bf16.mxu1 (!%p256_p2), %v2986_v0  ;;  %vm2226_vm2 = vcmask (!%p256_p2), 254976  }
   0x7   : > { %2567 = vmatprep.mubr.msk.f32.mxu0 (!%p256_p2), %vm2987_vm0, %v2988_v1  ;;  %2578 = vmatprep.mubr.msk.f32.mxu1 (!%p256_p2), %vm2987_vm0, %v2988_v1 }
   0xd   : > { %s3433_s22 = smov (!%p310_p3, %s2387_s22), 3 }
   0xe   : > { %s3038_s23 = sshll.u32 %s3433_s22, 8  ;;  %s3040_s24 = sshll.u32 %s3433_s22, 4 }
   0xf   : > { %s3046_s27 = scalar_lea.vmem %s3427_s2, %s3038_s23  ;;  %s3055_s30 = scalar_lea.vmem %s3425_s0, %s3040_s24 }
  0x10   : > { %v369_v2 = vld [vmem:[%s3046_s27] sm:$0xff]  ;;  %v370_v3 = vld [vmem:[%s3046_s27 + $0x8] sm:$0xff]  ;;  %v371_v7 = vld [vmem:[%s3046_s27 + $0x10] sm:$0xff]  ;;  %s3064_s9 = scalar_lea.vmem %s3426_s1, %s3040_s24  ;;  %s3165_s12 = scalar_lea.vmem %s3428_s3, %s3038_s23 }
  0x11   : > { %v373_v4 = vld [vmem:[%s3046_s27 + $0x20] sm:$0xff]  ;;  %v2824_v5 = vpack.c.bf16 %v370_v3, %v369_v2  ;;  %v374_v6 = vld [vmem:[%s3046_s27 + $0x28] sm:$0xff]  ;;  %v372_v8 = vld [vmem:[%s3046_s27 + $0x18] sm:$0xff]  ;;  %s3263_s15 = scalar_lea.vmem %s3429_s4, %s3038_s23  ;;  %s3374_s18 = scalar_lea.vmem %s3431_s6, %s3040_s24 }
  0x12   : > { %v2830_v9 = vpack.c.bf16 %v374_v6, %v373_v4  ;;  %v375_v10 = vld [vmem:[%s3046_s27 + $0x30] sm:$0xff]  ;;  %v376_v11 = vld [vmem:[%s3046_s27 + $0x38] sm:$0xff]  ;;  %v2827_v12 = vpack.c.bf16 %v372_v8, %v371_v7  ;;  %v3069_v13 = vld [vmem:[%s3055_s30] sm:$0x3]  ;;  %s3400_s22 = scalar_lea.vmem %s3430_s5, %s3040_s24 }
  0x13   : > { %2825 = vmatpush3.bf16.msra.mxu0 %v2824_v5  ;;  %v3072_v14 = vld [vmem:[%s3064_s9] sm:$0x3]  ;;  %v3075_v15 = vld [vmem:[%s3055_s30 + $0x2] sm:$0x3]  ;;  %v2833_v16 = vpack.c.bf16 %v376_v11, %v375_v10  ;;  %v378_v19 = vld [vmem:[%s3046_s27 + $0x48] sm:$0xff] }
  0x14   : > { %2831 = vmatpush3.bf16.msra.mxu1 %v2830_v9  ;;  %2826 = vmatprep.subr.bf16.mxu0 %v2986_v0  ;;  %v3079_v17 = vld [vmem:[%s3064_s9 + $0x2] sm:$0x3]  ;;  %v382_v21 = vld [vmem:[%s3046_s27 + $0x68] sm:$0xff]  ;;  %v361_v22 = vadd.f32 %v3072_v14, %v3069_v13  ;;  %v379_v26 = vld [vmem:[%s3046_s27 + $0x50] sm:$0xff] }
  0x15   : > { %v377_v18 = vld [vmem:[%s3046_s27 + $0x40] sm:$0xff]  ;;  %2832 = vmatprep.subr.bf16.mxu1 %v2986_v0  ;;  %v362_v23 = vadd.f32 %v3079_v17, %v3075_v15  ;;  %v380_v27 = vld [vmem:[%s3046_s27 + $0x58] sm:$0xff]  ;;  %v383_v28 = vld [vmem:[%s3046_s27 + $0x70] sm:$0xff] }
  0x16   : > { %v381_v20 = vld [vmem:[%s3046_s27 + $0x60] sm:$0xff]  ;;  %v2836_v24 = vpack.c.bf16 %v378_v19, %v377_v18  ;;  %v384_v29 = vld [vmem:[%s3046_s27 + $0x78] sm:$0xff]  ;;  %v2839_v30 = vpack.c.bf16 %v380_v27, %v379_v26  ;;  %v386_v37 = vld [vmem:[%s3046_s27 + $0x88] sm:$0xff] }
  0x17   : > { %2828 = vmatpush3.bf16.msra.mxu0 %v2827_v12  ;;  %v2842_v25 = vpack.c.bf16 %v382_v21, %v381_v20  ;;  %v3099_v31 = vld [vmem:[%s3055_s30 + $0x4] sm:$0x3]  ;;  %v3105_v33 = vld [vmem:[%s3055_s30 + $0x6] sm:$0x3]  ;;  %v2845_v34 = vpack.c.bf16 %v384_v29, %v383_v28  ;;  %v390_v39 = vld [vmem:[%s3046_s27 + $0xa8] sm:$0xff] }
  0x18   : > { %2834 = vmatpush3.bf16.msra.mxu1 %v2833_v16  ;;  %2835 = vmatprep.subr.bf16.mxu0 %v2986_v0  ;;  %v3102_v32 = vld [vmem:[%s3064_s9 + $0x4] sm:$0x3]  ;;  %v3109_v35 = vld [vmem:[%s3064_s9 + $0x6] sm:$0x3]  ;;  %v387_v44 = vld [vmem:[%s3046_s27 + $0x90] sm:$0xff] }
  0x19   : > { %2841 = vmatprep.subr.bf16.mxu1 %v2986_v0  ;;  %v385_v36 = vld [vmem:[%s3046_s27 + $0x80] sm:$0xff]  ;;  %v363_v40 = vadd.f32 %v3102_v32, %v3099_v31  ;;  %v364_v41 = vadd.f32 %v3109_v35, %v3105_v33  ;;  %v388_v45 = vld [vmem:[%s3046_s27 + $0x98] sm:$0xff]  ;;  %v391_v46 = vld [vmem:[%s3046_s27 + $0xb0] sm:$0xff] }
  0x1a   : > { %2568 = vmatmul.mubr.msk.f32.vlgmr.msra.gmra.mrb[0].mxu0 %vm401_vm1, %v361_v22  ;;  %v389_v38 = vld [vmem:[%s3046_s27 + $0xa0] sm:$0xff]  ;;  %v2848_v42 = vpack.c.bf16 %v386_v37, %v385_v36  ;;  %v392_v47 = vld [vmem:[%s3046_s27 + $0xb8] sm:$0xff]  ;;  %v2851_v48 = vpack.c.bf16 %v388_v45, %v387_v44  ;;  %v3133_v49 = vld [vmem:[%s3055_s30 + $0x8] sm:$0x3] }
  0x1b   : > { %2579 = vmatmul.mubr.msk.f32.vlgmr.msra.gmra.mrb[0].mxu1 %vm401_vm1, %v362_v23  ;;  %2837 = vmatpush3.bf16.msra.mxu0 %v2836_v24  ;;  %v2854_v43 = vpack.c.bf16 %v390_v39, %v389_v38  ;;  %v3136_v50 = vld [vmem:[%s3064_s9 + $0x8] sm:$0x3]  ;;  %v3139_v51 = vld [vmem:[%s3055_s30 + $0xa] sm:$0x3]  ;;  %v2857_v52 = vpack.c.bf16 %v392_v47, %v391_v46  ;;  %v393_v54 = vld [vmem:[%s3046_s27 + $0xc0] sm:$0xff] }
  0x1c   : > { %2843 = vmatpush3.bf16.msra.mxu1 %v2842_v25  ;;  %2838 = vmatprep.subr.bf16.mxu0 %v2986_v0  ;;  %v3143_v53 = vld [vmem:[%s3064_s9 + $0xa] sm:$0x3]  ;;  %v397_v56 = vld [vmem:[%s3046_s27 + $0xe0] sm:$0xff]  ;;  %v365_v58 = vadd.f32 %v3136_v50, %v3133_v49  ;;  %v395_v62 = vld [vmem:[%s3046_s27 + $0xd0] sm:$0xff] }
  0x1d   : > { %2844 = vmatprep.subr.bf16.mxu1 %v2986_v0  ;;  %2589 = vmatprep.mubr.msk.f32.mxu0 %vm2987_vm0, %v2988_v1  ;;  %v394_v55 = vld [vmem:[%s3046_s27 + $0xc8] sm:$0xff]  ;;  %v366_v59 = vadd.f32 %v3143_v53, %v3139_v51  ;;  %v396_v63 = vld [vmem:[%s3046_s27 + $0xd8] sm:$0xff]  ;;  %v399_v2 = vld [vmem:[%s3046_s27 + $0xf0] sm:$0xff] }
  0x1e   : > { %2600 = vmatprep.mubr.msk.f32.mxu1 %vm2987_vm0, %v2988_v1  ;;  %v398_v57 = vld [vmem:[%s3046_s27 + $0xe8] sm:$0xff]  ;;  %v2860_v60 = vpack.c.bf16 %v394_v55, %v393_v54  ;;  %v400_v3 = vld [vmem:[%s3046_s27 + $0xf8] sm:$0xff]  ;;  %v2863_v4 = vpack.c.bf16 %v396_v63, %v395_v62  ;;  %v986_v10 = vld [vmem:[%s3165_s12] sm:$0xff] }
  0x1f   : > { %2840 = vmatpush3.bf16.msra.mxu0 %v2839_v30  ;;  %v2866_v61 = vpack.c.bf16 %v398_v57, %v397_v56  ;;  %v3173_v5 = vld [vmem:[%s3055_s30 + $0xc] sm:$0x3]  ;;  %v3179_v7 = vld [vmem:[%s3055_s30 + $0xe] sm:$0x3]  ;;  %v2869_v8 = vpack.c.bf16 %v400_v3, %v399_v2  ;;  %v990_v12 = vld [vmem:[%s3165_s12 + $0x20] sm:$0xff] }
  0x20   : > { %2846 = vmatpush3.bf16.msra.mxu1 %v2845_v34  ;;  %2847 = vmatprep.subr.bf16.mxu0 %v2986_v0  ;;  %v3176_v6 = vld [vmem:[%s3064_s9 + $0xc] sm:$0x3]  ;;  %v3183_v9 = vld [vmem:[%s3064_s9 + $0xe] sm:$0x3]  ;;  %v988_v22 = vld [vmem:[%s3165_s12 + $0x10] sm:$0xff] }
  0x21   : > { %2853 = vmatprep.subr.bf16.mxu1 %v2986_v0  ;;  %v987_v11 = vld [vmem:[%s3165_s12 + $0x8] sm:$0xff]  ;;  %v367_v18 = vadd.f32 %v3176_v6, %v3173_v5  ;;  %v368_v19 = vadd.f32 %v3183_v9, %v3179_v7  ;;  %v989_v23 = vld [vmem:[%s3165_s12 + $0x18] sm:$0xff]  ;;  %v992_v24 = vld [vmem:[%s3165_s12 + $0x30] sm:$0xff] }
  0x22   : > { %2590 = vmatmul.mubr.msk.f32.vlgmr.msra.gmra.mrb[2].mxu0 %vm401_vm1, %v363_v40  ;;  %v991_v16 = vld [vmem:[%s3165_s12 + $0x28] sm:$0xff]  ;;  %v2872_v20 = vpack.c.bf16 %v987_v11, %v986_v10  ;;  %v993_v25 = vld [vmem:[%s3165_s12 + $0x38] sm:$0xff]  ;;  %v2875_v26 = vpack.c.bf16 %v989_v23, %v988_v22  ;;  %v994_v28 = vld [vmem:[%s3165_s12 + $0x40] sm:$0xff] }
  0x23   : > { %2601 = vmatmul.mubr.msk.f32.vlgmr.msra.gmra.mrb[2].mxu1 %vm401_vm1, %v364_v41  ;;  %2849 = vmatpush3.bf16.msra.mxu0 %v2848_v42  ;;  %v2878_v21 = vpack.c.bf16 %v991_v16, %v990_v12  ;;  %v2881_v27 = vpack.c.bf16 %v993_v25, %v992_v24  ;;  %v995_v29 = vld [vmem:[%s3165_s12 + $0x48] sm:$0xff]  ;;  %v998_v30 = vld [vmem:[%s3165_s12 + $0x60] sm:$0xff]  ;;  %v996_v38 = vld [vmem:[%s3165_s12 + $0x50] sm:$0xff] }
  0x24   : > { %2855 = vmatpush3.bf16.msra.mxu1 %v2854_v43  ;;  %2850 = vmatprep.subr.bf16.mxu0 %v2986_v0  ;;  %v999_v34 = vld [vmem:[%s3165_s12 + $0x68] sm:$0xff]  ;;  %v2884_v36 = vpack.c.bf16 %v995_v29, %v994_v28  ;;  %v997_v39 = vld [vmem:[%s3165_s12 + $0x58] sm:$0xff]  ;;  %v1000_v40 = vld [vmem:[%s3165_s12 + $0x70] sm:$0xff] }
  0x25   : > { %2856 = vmatprep.subr.bf16.mxu1 %v2986_v0  ;;  %2611 = vmatprep.mubr.msk.f32.mxu0 %vm2987_vm0, %v2988_v1  ;;  %v2890_v37 = vpack.c.bf16 %v999_v34, %v998_v30  ;;  %v1001_v41 = vld [vmem:[%s3165_s12 + $0x78] sm:$0xff]  ;;  %v2887_v42 = vpack.c.bf16 %v997_v39, %v996_v38  ;;  %v1002_v44 = vld [vmem:[%s3165_s12 + $0x80] sm:$0xff]  ;;  %v1003_v45 = vld [vmem:[%s3165_s12 + $0x88] sm:$0xff] }
  0x26   : > { %2622 = vmatprep.mubr.msk.f32.mxu1 %vm2987_vm0, %v2988_v1  ;;  %v2893_v43 = vpack.c.bf16 %v1001_v41, %v1000_v40  ;;  %v1007_v46 = vld [vmem:[%s3165_s12 + $0xa8] sm:$0xff]  ;;  %v1008_v54 = vld [vmem:[%s3165_s12 + $0xb0] sm:$0xff]  ;;  %v1009_v55 = vld [vmem:[%s3165_s12 + $0xb8] sm:$0xff] }
  0x27   : > { %2852 = vmatpush3.bf16.msra.mxu0 %v2851_v48  ;;  %v1004_v48 = vld [vmem:[%s3165_s12 + $0x90] sm:$0xff]  ;;  %v2905_v57 = vpack.c.bf16 %v1009_v55, %v1008_v54  ;;  %v1013_v63 = vld [vmem:[%s3165_s12 + $0xd8] sm:$0xff]  ;;  %v1602_v10 = vld [vmem:[%s3263_s15] sm:$0xff] }
  0x28   : > { %2858 = vmatpush3.bf16.msra.mxu1 %v2857_v52  ;;  %2859 = vmatprep.subr.bf16.mxu0 %v2986_v0  ;;  %v1005_v52 = vld [vmem:[%s3165_s12 + $0x98] sm:$0xff]  ;;  %v1012_v62 = vld [vmem:[%s3165_s12 + $0xd0] sm:$0xff]  ;;  %v1603_v11 = vld [vmem:[%s3263_s15 + $0x8] sm:$0xff] }
  0x29   : > { %2865 = vmatprep.subr.bf16.mxu1 %v2986_v0  ;;  %v2899_v56 = vpack.c.bf16 %v1005_v52, %v1004_v48  ;;  %v1016_v2 = vld [vmem:[%s3165_s12 + $0xf0] sm:$0xff]  ;;  %v1017_v3 = vld [vmem:[%s3165_s12 + $0xf8] sm:$0xff]  ;;  %v1607_v12 = vld [vmem:[%s3263_s15 + $0x28] sm:$0xff] }
  0x2a   : > { %2612 = vmatmul.mubr.msk.f32.vlgmr.msra.gmra.mrb[4].mxu0 %vm401_vm1, %v365_v58  ;;  %v1010_v58 = vld [vmem:[%s3165_s12 + $0xc0] sm:$0xff]  ;;  %v1611_v25 = vld [vmem:[%s3263_s15 + $0x48] sm:$0xff]  ;;  %v1612_v28 = vld [vmem:[%s3263_s15 + $0x50] sm:$0xff] }
  0x2b   : > { %2623 = vmatmul.mubr.msk.f32.vlgmr.msra.gmra.mrb[4].mxu1 %vm401_vm1, %v366_v59  ;;  %2861 = vmatpush3.bf16.msra.mxu0 %v2860_v60  ;;  %v1011_v59 = vld [vmem:[%s3165_s12 + $0xc8] sm:$0xff]  ;;  %v1610_v24 = vld [vmem:[%s3263_s15 + $0x40] sm:$0xff]  ;;  %v1613_v29 = vld [vmem:[%s3263_s15 + $0x58] sm:$0xff] }
  0x2c   : > { %2867 = vmatpush3.bf16.msra.mxu1 %v2866_v61  ;;  %2862 = vmatprep.subr.bf16.mxu0 %v2986_v0  ;;  %v2908_v60 = vpack.c.bf16 %v1011_v59, %v1010_v58  ;;  %v1616_v30 = vld [vmem:[%s3263_s15 + $0x70] sm:$0xff]  ;;  %v1617_v34 = vld [vmem:[%s3263_s15 + $0x78] sm:$0xff]  ;;  %v1618_v38 = vld [vmem:[%s3263_s15 + $0x80] sm:$0xff] }
  0x2d   : > { %2868 = vmatprep.subr.bf16.mxu1 %v2986_v0  ;;  %2633 = vmatprep.mubr.msk.f32.mxu0 %vm2987_vm0, %v2988_v1  ;;  %v1619_v39 = vld [vmem:[%s3263_s15 + $0x88] sm:$0xff]  ;;  %v1628_v54 = vld [vmem:[%s3263_s15 + $0xd0] sm:$0xff]  ;;  %v1629_v55 = vld [vmem:[%s3263_s15 + $0xd8] sm:$0xff] }
  0x2e   : > { %2644 = vmatprep.mubr.msk.f32.mxu1 %vm2987_vm0, %v2988_v1  ;;  %v1623_v40 = vld [vmem:[%s3263_s15 + $0xa8] sm:$0xff]  ;;  %v2959_v58 = vpack.c.bf16 %v1629_v55, %v1628_v54 }
  0x2f   : > { %2864 = vmatpush3.bf16.msra.mxu0 %v2863_v4  ;;  %v2911_v4 = vpack.c.bf16 %v1013_v63, %v1012_v62  ;;  %v1631_v48 = vld [vmem:[%s3263_s15 + $0xe8] sm:$0xff] }
  0x30   : > { %2870 = vmatpush3.bf16.msra.mxu1 %v2869_v8  ;;  %2871 = vmatprep.subr.bf16.mxu0 %v2986_v0  ;;  %v2917_v8 = vpack.c.bf16 %v1017_v3, %v1016_v2 }
  0x31   : > { %2877 = vmatprep.subr.bf16.mxu1 %v2986_v0 }
  0x32   : > { %2634 = vmatmul.mubr.msk.f32.vlgmr.msra.gmra.mrb[6].mxu0 %vm401_vm1, %v367_v18  ;;  %v1604_v18 = vld [vmem:[%s3263_s15 + $0x10] sm:$0xff] }
  0x33   : > { %2645 = vmatmul.mubr.msk.f32.vlgmr.msra.gmra.mrb[6].mxu1 %vm401_vm1, %v368_v19  ;;  %2873 = vmatpush3.bf16.msra.mxu0 %v2872_v20  ;;  %v1605_v19 = vld [vmem:[%s3263_s15 + $0x18] sm:$0xff]  ;;  %v1608_v20 = vld [vmem:[%s3263_s15 + $0x30] sm:$0xff] }
  0x34   : > { %2879 = vmatpush3.bf16.msra.mxu1 %v2878_v21  ;;  %2874 = vmatprep.subr.bf16.mxu0 %v2986_v0  ;;  %v1609_v21 = vld [vmem:[%s3263_s15 + $0x38] sm:$0xff]  ;;  %v2923_v22 = vpack.c.bf16 %v1605_v19, %v1604_v18 }
  0x35   : > { %2880 = vmatprep.subr.bf16.mxu1 %v2986_v0  ;;  %2655 = vmatprep.mubr.msk.f32.mxu0 %vm2987_vm0, %v2988_v1  ;;  %v2929_v23 = vpack.c.bf16 %v1609_v21, %v1608_v20 }
  0x36   : > { %2666 = vmatprep.mubr.msk.f32.mxu1 %vm2987_vm0, %v2988_v1 }
  0x37   : > { %2876 = vmatpush3.bf16.msra.mxu0 %v2875_v26  ;;  %v1615_v26 = vld [vmem:[%s3263_s15 + $0x68] sm:$0xff] }
  0x38   : > { %2882 = vmatpush3.bf16.msra.mxu1 %v2881_v27  ;;  %2883 = vmatprep.subr.bf16.mxu0 %v2986_v0 }
  0x39   : > { %2889 = vmatprep.subr.bf16.mxu1 %v2986_v0 }
  0x3a   : > { %2656 = vmatmul.mubr.msk.f32.vlgmr.msra.gmra.mrb[8].mxu0 %vm401_vm1, %v3069_v13  ;;  %v1006_v13 = vld [vmem:[%s3165_s12 + $0xa0] sm:$0xff] }
  0x3b   : > { %2667 = vmatmul.mubr.msk.f32.vlgmr.msra.gmra.mrb[8].mxu1 %vm401_vm1, %v3075_v15  ;;  %2885 = vmatpush3.bf16.msra.mxu0 %v2884_v36  ;;  %v2896_v15 = vpack.c.bf16 %v1003_v45, %v1002_v44  ;;  %v2902_v47 = vpack.c.bf16 %v1007_v46, %v1006_v13  ;;  %v2935_v36 = vpack.c.bf16 %v1613_v29, %v1612_v28  ;;  %v1624_v44 = vld [vmem:[%s3263_s15 + $0xb0] sm:$0xff]  ;;  %v1625_v45 = vld [vmem:[%s3263_s15 + $0xb8] sm:$0xff] }
  0x3c   : > { %2891 = vmatpush3.bf16.msra.mxu1 %v2890_v37  ;;  %2886 = vmatprep.subr.bf16.mxu0 %v2986_v0  ;;  %v2941_v37 = vpack.c.bf16 %v1617_v34, %v1616_v30  ;;  %v2953_v46 = vpack.c.bf16 %v1625_v45, %v1624_v44 }
  0x3d   : > { %2892 = vmatprep.subr.bf16.mxu1 %v2986_v0  ;;  %2677 = vmatprep.mubr.msk.f32.mxu0 %vm2987_vm0, %v2988_v1 }
  0x3e   : > { %2688 = vmatprep.mubr.msk.f32.mxu1 %vm2987_vm0, %v2988_v1 }
  0x3f   : > { %2888 = vmatpush3.bf16.msra.mxu0 %v2887_v42  ;;  %v1620_v42 = vld [vmem:[%s3263_s15 + $0x90] sm:$0xff] }
  0x40   : > { %2894 = vmatpush3.bf16.msra.mxu1 %v2893_v43  ;;  %2895 = vmatprep.subr.bf16.mxu0 %v2986_v0  ;;  %v1621_v43 = vld [vmem:[%s3263_s15 + $0x98] sm:$0xff] }
  0x41   : > { %2901 = vmatprep.subr.bf16.mxu1 %v2986_v0  ;;  %v2947_v13 = vpack.c.bf16 %v1621_v43, %v1620_v42 }
  0x42   : > { %2678 = vmatmul.mubr.msk.f32.vlgmr.msra.gmra.mrb[10].mxu0 %vm401_vm1, %v3099_v31  ;;  %v1014_v31 = vld [vmem:[%s3165_s12 + $0xe0] sm:$0xff] }
  0x43   : > { %2689 = vmatmul.mubr.msk.f32.vlgmr.msra.gmra.mrb[10].mxu1 %vm401_vm1, %v3105_v33  ;;  %2897 = vmatpush3.bf16.msra.mxu0 %v2896_v15  ;;  %v1015_v33 = vld [vmem:[%s3165_s12 + $0xe8] sm:$0xff]  ;;  %v1626_v15 = vld [vmem:[%s3263_s15 + $0xc0] sm:$0xff] }
  0x44   : > { %2903 = vmatpush3.bf16.msra.mxu1 %v2902_v47  ;;  %2898 = vmatprep.subr.bf16.mxu0 %v2986_v0  ;;  %v2914_v61 = vpack.c.bf16 %v1015_v33, %v1014_v31  ;;  %v1627_v47 = vld [vmem:[%s3263_s15 + $0xc8] sm:$0xff] }
  0x45   : > { %2904 = vmatprep.subr.bf16.mxu1 %v2986_v0  ;;  %2699 = vmatprep.mubr.msk.f32.mxu0 %vm2987_vm0, %v2988_v1 }
  0x46   : > { %2710 = vmatprep.mubr.msk.f32.mxu1 %vm2987_vm0, %v2988_v1 }
  0x47   : > { %2900 = vmatpush3.bf16.msra.mxu0 %v2899_v56  ;;  %v1632_v56 = vld [vmem:[%s3263_s15 + $0xf0] sm:$0xff] }
  0x48   : > { %2906 = vmatpush3.bf16.msra.mxu1 %v2905_v57  ;;  %2907 = vmatprep.subr.bf16.mxu0 %v2986_v0  ;;  %v1633_v57 = vld [vmem:[%s3263_s15 + $0xf8] sm:$0xff] }
  0x49   : > { %2913 = vmatprep.subr.bf16.mxu1 %v2986_v0  ;;  %v2965_v59 = vpack.c.bf16 %v1633_v57, %v1632_v56 }
  0x4a   : > { %2700 = vmatmul.mubr.msk.f32.vlgmr.msra.gmra.mrb[12].mxu0 %vm401_vm1, %v3133_v49  ;;  %v1606_v49 = vld [vmem:[%s3263_s15 + $0x20] sm:$0xff] }
  0x4b   : > { %2711 = vmatmul.mubr.msk.f32.vlgmr.msra.gmra.mrb[12].mxu1 %vm401_vm1, %v3139_v51  ;;  %2909 = vmatpush3.bf16.msra.mxu0 %v2908_v60  ;;  %v2920_v51 = vpack.c.bf16 %v1603_v11, %v1602_v10  ;;  %v2926_v16 = vpack.c.bf16 %v1607_v12, %v1606_v49 }
  0x4c   : > { %2915 = vmatpush3.bf16.msra.mxu1 %v2914_v61  ;;  %2910 = vmatprep.subr.bf16.mxu0 %v2986_v0 }
  0x4d   : > { %2916 = vmatprep.subr.bf16.mxu1 %v2986_v0  ;;  %2721 = vmatprep.mubr.msk.f32.mxu0 %vm2987_vm0, %v2988_v1 }
  0x4e   : > { %2732 = vmatprep.mubr.msk.f32.mxu1 %vm2987_vm0, %v2988_v1 }
  0x4f   : > { %2912 = vmatpush3.bf16.msra.mxu0 %v2911_v4 }
  0x50   : > { %2918 = vmatpush3.bf16.msra.mxu1 %v2917_v8  ;;  %2919 = vmatprep.subr.bf16.mxu0 %v2986_v0 }
  0x51   : > { %2925 = vmatprep.subr.bf16.mxu1 %v2986_v0 }
  0x52   : > { %2722 = vmatmul.mubr.msk.f32.vlgmr.msra.gmra.mrb[14].mxu0 %vm401_vm1, %v3173_v5  ;;  %v1614_v5 = vld [vmem:[%s3263_s15 + $0x60] sm:$0xff] }
  0x53   : > { %2733 = vmatmul.mubr.msk.f32.vlgmr.msra.gmra.mrb[14].mxu1 %vm401_vm1, %v3179_v7  ;;  %2921 = vmatpush3.bf16.msra.mxu0 %v2920_v51  ;;  %v2932_v7 = vpack.c.bf16 %v1611_v25, %v1610_v24  ;;  %v2938_v27 = vpack.c.bf16 %v1615_v26, %v1614_v5 }
  0x54   : > { %2927 = vmatpush3.bf16.msra.mxu1 %v2926_v16  ;;  %2922 = vmatprep.subr.bf16.mxu0 %v2986_v0 }
  0x55   : > { %2928 = vmatprep.subr.bf16.mxu1 %v2986_v0  ;;  %2743 = vmatprep.mubr.msk.f32.mxu0 %vm2987_vm0, %v2988_v1 }
  0x56   : > { %2754 = vmatprep.mubr.msk.f32.mxu1 %vm2987_vm0, %v2988_v1 }
  0x57   : > { %2924 = vmatpush3.bf16.msra.mxu0 %v2923_v22 }
  0x58   : > { %2930 = vmatpush3.bf16.msra.mxu1 %v2929_v23  ;;  %2931 = vmatprep.subr.bf16.mxu0 %v2986_v0 }
  0x59   : > { %2937 = vmatprep.subr.bf16.mxu1 %v2986_v0 }
  0x5a   : > { %2744 = vmatmul.mubr.msk.f32.vlgmr.msra.gmra.mrb[16].mxu0 %vm401_vm1, %v3072_v14  ;;  %v1622_v14 = vld [vmem:[%s3263_s15 + $0xa0] sm:$0xff] }
  0x5b   : > { %2755 = vmatmul.mubr.msk.f32.vlgmr.msra.gmra.mrb[16].mxu1 %vm401_vm1, %v3079_v17  ;;  %2933 = vmatpush3.bf16.msra.mxu0 %v2932_v7  ;;  %v2944_v17 = vpack.c.bf16 %v1619_v39, %v1618_v38  ;;  %v2950_v41 = vpack.c.bf16 %v1623_v40, %v1622_v14 }
  0x5c   : > { %2939 = vmatpush3.bf16.msra.mxu1 %v2938_v27  ;;  %2934 = vmatprep.subr.bf16.mxu0 %v2986_v0 }
  0x5d   : > { %2940 = vmatprep.subr.bf16.mxu1 %v2986_v0  ;;  %2765 = vmatprep.mubr.msk.f32.mxu0 %vm2987_vm0, %v2988_v1 }
  0x5e   : > { %2776 = vmatprep.mubr.msk.f32.mxu1 %vm2987_vm0, %v2988_v1 }
  0x5f   : > { %2936 = vmatpush3.bf16.msra.mxu0 %v2935_v36 }
  0x60   : > { %2942 = vmatpush3.bf16.msra.mxu1 %v2941_v37  ;;  %2943 = vmatprep.subr.bf16.mxu0 %v2986_v0 }
  0x61   : > { %2949 = vmatprep.subr.bf16.mxu1 %v2986_v0 }
  0x62   : > { %2766 = vmatmul.mubr.msk.f32.vlgmr.msra.gmra.mrb[18].mxu0 %vm401_vm1, %v3102_v32  ;;  %v1630_v32 = vld [vmem:[%s3263_s15 + $0xe0] sm:$0xff] }
  0x63   : > { %2777 = vmatmul.mubr.msk.f32.vlgmr.msra.gmra.mrb[18].mxu1 %vm401_vm1, %v3109_v35  ;;  %2945 = vmatpush3.bf16.msra.mxu0 %v2944_v17  ;;  %v2956_v35 = vpack.c.bf16 %v1627_v47, %v1626_v15  ;;  %v2962_v52 = vpack.c.bf16 %v1631_v48, %v1630_v32 }
  0x64   : > { %2951 = vmatpush3.bf16.msra.mxu1 %v2950_v41  ;;  %2946 = vmatprep.subr.bf16.mxu0 %v2986_v0 }
  0x65   : > { %2952 = vmatprep.subr.bf16.mxu1 %v2986_v0  ;;  %2787 = vmatprep.mubr.msk.f32.mxu0 %vm2987_vm0, %v2988_v1 }
  0x66   : > { %2798 = vmatprep.mubr.msk.f32.mxu1 %vm2987_vm0, %v2988_v1 }
  0x67   : > { %2948 = vmatpush3.bf16.msra.mxu0 %v2947_v13 }
  0x68   : > { %2954 = vmatpush3.bf16.msra.mxu1 %v2953_v46  ;;  %2955 = vmatprep.subr.bf16.mxu0 %v2986_v0 }
  0x69   : > { %2961 = vmatprep.subr.bf16.mxu1 %v2986_v0 }
  0x6a   : > { %2788 = vmatmul.mubr.msk.f32.vlgmr.msra.gmra.mrb[20].mxu0 %vm401_vm1, %v3136_v50 }
  0x6b   : > { %2799 = vmatmul.mubr.msk.f32.vlgmr.msra.gmra.mrb[20].mxu1 %vm401_vm1, %v3143_v53  ;;  %2957 = vmatpush3.bf16.msra.mxu0 %v2956_v35 }
  0x6c   : > { %2963 = vmatpush3.bf16.msra.mxu1 %v2962_v52  ;;  %2958 = vmatprep.subr.bf16.mxu0 %v2986_v0 }
  0x6d   : > { %2964 = vmatprep.subr.bf16.mxu1 %v2986_v0  ;;  %2809 = vmatprep.mubr.msk.f32.mxu0 %vm2987_vm0, %v2988_v1 }
  0x6e   : > { %2820 = vmatprep.mubr.msk.f32.mxu1 %vm2987_vm0, %v2988_v1 }
  0x6f   : > { %2960 = vmatpush3.bf16.msra.mxu0 %v2959_v58 }
  0x70   : > { %2966 = vmatpush3.bf16.msra.mxu1 %v2965_v59 }
  0x72   : > { %2810 = vmatmul.mubr.msk.f32.vlgmr.msra.gmra.mrb[22].mxu0 %vm401_vm1, %v3176_v6 }
  0x73   : > { %2821 = vmatmul.mubr.msk.f32.vlgmr.msra.gmra.mrb[22].mxu1 %vm401_vm1, %v3183_v9 }
  0xed   : > { %v471_v50 = vpop.f32.mrb[0].mxu0 }
  0xee   : > { %v544_v53 = vpop.f32.mrb[0].mxu1  ;;  %v2569_v31 = vpop.f32.mrb[1].mxu0 }
  0xef   : > { %v2580_v33 = vpop.f32.mrb[1].mxu1 }
  0xf5   : > { %v617_v0 = vpop.f32.mrb[2].mxu0 }
  0xf6   : > { %v690_v60 = vpop.f32.mrb[2].mxu1  ;;  %v2591_v61 = vpop.f32.mrb[3].mxu0 }
  0xf7   : > { %v2602_v62 = vpop.f32.mrb[3].mxu1 }
  0xfd   : > { %v3362_v63 = vpop.f32.mrb[4].mxu0 }
  0xfe   : > { %v3364_v1 = vpop.f32.mrb[4].mxu1  ;;  %v2613_v2 = vpop.f32.mrb[5].mxu0 }
  0xff   : > { %v2624_v3 = vpop.f32.mrb[5].mxu1 }
 0x105   : > { %v3366_v4 = vpop.f32.mrb[6].mxu0 }
 0x106   : > { %v3368_v6 = vpop.f32.mrb[6].mxu1  ;;  %v2635_v9 = vpop.f32.mrb[7].mxu0 }
 0x107   : > { %v2646_v8 = vpop.f32.mrb[7].mxu1 }
 0x10d   : > { %v1087_v10 = vpop.f32.mrb[8].mxu0 }
 0x10e   : > { %v2235_v11 = vadd.f32 %v1087_v10, %v471_v50  ;;  %v1160_v49 = vpop.f32.mrb[8].mxu1  ;;  %v2657_v12 = vpop.f32.mrb[9].mxu0 }
 0x10f   : > { %v2236_v51 = vadd.f32 %v1160_v49, %v544_v53  ;;  %v2668_v16 = vpop.f32.mrb[9].mxu1 }
 0x110   : > { %2243 = vst.msk [vmem:[%s3374_s18] sm:$0x3] %vm2226_vm2, %v2235_v11 }
 0x111   : > { %2244 = vst.msk [vmem:[%s3374_s18 + $0x2] sm:$0x3] %vm2226_vm2, %v2236_v51 }
 0x115   : > { %v1233_v18 = vpop.f32.mrb[10].mxu0 }
 0x116   : > { %v2237_v19 = vadd.f32 %v1233_v18, %v617_v0  ;;  %v1306_v20 = vpop.f32.mrb[10].mxu1  ;;  %v2679_v21 = vpop.f32.mrb[11].mxu0 }
 0x117   : > { %v2238_v22 = vadd.f32 %v1306_v20, %v690_v60  ;;  %v2690_v23 = vpop.f32.mrb[11].mxu1 }
 0x118   : > { %2245 = vst.msk [vmem:[%s3374_s18 + $0x4] sm:$0x3] %vm2226_vm2, %v2237_v19 }
 0x119   : > { %2246 = vst.msk [vmem:[%s3374_s18 + $0x6] sm:$0x3] %vm2226_vm2, %v2238_v22 }
 0x11d   : > { %v1379_v24 = vpop.f32.mrb[12].mxu0 }
 0x11e   : > { %v2239_v25 = vadd.f32 %v1379_v24, %v3362_v63  ;;  %v1452_v5 = vpop.f32.mrb[12].mxu1  ;;  %v2701_v26 = vpop.f32.mrb[13].mxu0 }
 0x11f   : > { %v2240_v7 = vadd.f32 %v1452_v5, %v3364_v1  ;;  %v2712_v27 = vpop.f32.mrb[13].mxu1 }
 0x120   : > { %2247 = vst.msk [vmem:[%s3374_s18 + $0x8] sm:$0x3] %vm2226_vm2, %v2239_v25 }
 0x121   : > { %2248 = vst.msk [vmem:[%s3374_s18 + $0xa] sm:$0x3] %vm2226_vm2, %v2240_v7 }
 0x125   : > { %v1525_v28 = vpop.f32.mrb[14].mxu0 }
 0x126   : > { %v2241_v29 = vadd.f32 %v1525_v28, %v3366_v4  ;;  %v1598_v30 = vpop.f32.mrb[14].mxu1  ;;  %v2723_v34 = vpop.f32.mrb[15].mxu0 }
 0x127   : > { %v2242_v36 = vadd.f32 %v1598_v30, %v3368_v6  ;;  %v2734_v37 = vpop.f32.mrb[15].mxu1 }
 0x128   : > { %2249 = vst.msk [vmem:[%s3374_s18 + $0xc] sm:$0x3] %vm2226_vm2, %v2241_v29 }
 0x129   : > { %2250 = vst.msk [vmem:[%s3374_s18 + $0xe] sm:$0x3] %vm2226_vm2, %v2242_v36 }
 0x12d   : > { %v1703_v38 = vpop.f32.mrb[16].mxu0 }
 0x12e   : > { %v2218_v39 = vsub.f32 %v471_v50, %v1703_v38  ;;  %v1776_v14 = vpop.f32.mrb[16].mxu1  ;;  %v2745_v40 = vpop.f32.mrb[17].mxu0 }
 0x12f   : > { %v2219_v17 = vsub.f32 %v544_v53, %v1776_v14  ;;  %v2756_v41 = vpop.f32.mrb[17].mxu1 }
 0x130   : > { %2227 = vst.msk [vmem:[%s3400_s22] sm:$0x3] %vm2226_vm2, %v2218_v39 }
 0x131   : > { %2228 = vst.msk [vmem:[%s3400_s22 + $0x2] sm:$0x3] %vm2226_vm2, %v2219_v17 }
 0x135   : > { %v1849_v42 = vpop.f32.mrb[18].mxu0 }
 0x136   : > { %v2220_v43 = vsub.f32 %v617_v0, %v1849_v42  ;;  %v1922_v44 = vpop.f32.mrb[18].mxu1  ;;  %v2767_v45 = vpop.f32.mrb[19].mxu0 }
 0x137   : > { %v2221_v13 = vsub.f32 %v690_v60, %v1922_v44  ;;  %v2778_v46 = vpop.f32.mrb[19].mxu1 }
 0x138   : > { %2229 = vst.msk [vmem:[%s3400_s22 + $0x4] sm:$0x3] %vm2226_vm2, %v2220_v43 }
 0x139   : > { %2230 = vst.msk [vmem:[%s3400_s22 + $0x6] sm:$0x3] %vm2226_vm2, %v2221_v13 }
 0x13d   : > { %v1995_v15 = vpop.f32.mrb[20].mxu0 }
 0x13e   : > { %v2222_v47 = vsub.f32 %v3362_v63, %v1995_v15  ;;  %v2068_v32 = vpop.f32.mrb[20].mxu1  ;;  %v2789_v48 = vpop.f32.mrb[21].mxu0 }
 0x13f   : > { %v2223_v35 = vsub.f32 %v3364_v1, %v2068_v32  ;;  %v2800_v52 = vpop.f32.mrb[21].mxu1 }
 0x140   : > { %2231 = vst.msk [vmem:[%s3400_s22 + $0x8] sm:$0x3] %vm2226_vm2, %v2222_v47 }
 0x141   : > { %2232 = vst.msk [vmem:[%s3400_s22 + $0xa] sm:$0x3] %vm2226_vm2, %v2223_v35 }
 0x145   : > { %v2141_v54 = vpop.f32.mrb[22].mxu0 }
 0x146   : > { %v2224_v55 = vsub.f32 %v3366_v4, %v2141_v54  ;;  %v2214_v56 = vpop.f32.mrb[22].mxu1  ;;  %v2811_v57 = vpop.f32.mrb[23].mxu0 }
 0x147   : > { %v2225_v58 = vsub.f32 %v3368_v6, %v2214_v56  ;;  %v2822_v59 = vpop.f32.mrb[23].mxu1 }
 0x148   : > { %2233 = vst.msk [vmem:[%s3400_s22 + $0xc] sm:$0x3] %vm2226_vm2, %v2224_v55 }
 0x149   : > { %2234 = vst.msk [vmem:[%s3400_s22 + $0xe] sm:$0x3] %vm2226_vm2, %v2225_v58 }
 0x14a PF: > { %s17_s21 = sadd.s32 1, %s2984_s21  }
 0x14b   : > { %p14_p4 = scmp.ge.s32.totalorder %s17_s21, 6  }
 0x14d   :  { %16 = sbr.rel (!%p14_p4) target bundleno = 1 (0x1), region = 94 }

// kernel: reverse.8
= control target key start
LH: loop header
LB: loop body
LE: loop exit
PB: predicated region body
PF: predicated region fallthrough
CT: control target
= control target key end

     0   :  { %s584_s0 = inlined_call_operand.vmem [shape: f32[2,32,18,8], index: 0, kind: input, shape index: {}]   ;;  %s585_s1 = inlined_call_operand.vmem [shape: f32[2,32,18,8], index: 1, kind: output, shape index: {}]  }
   0x1   :  { %v192_v0 = vld [vmem:[%s584_s0 + $0xa8] sm:$0xff]  ;;  %v195_v2 = vld [vmem:[%s584_s0 + $0x90] sm:$0xff]  ;;  %v199_v4 = vld [vmem:[%s584_s0 + $0x78] sm:$0xff] }
   0x2   :  { %v193_v1 = vld [vmem:[%s584_s0 + $0x168] sm:$0xff]  ;;  %4 = vst [vmem:[%s585_s1] sm:$0xff] %v192_v0  ;;  %196 = vst [vmem:[%s585_s1 + $0x18] sm:$0xff] %v195_v2  ;;  %v197_v3 = vld [vmem:[%s584_s0 + $0x150] sm:$0xff] }
   0x3   :  { %194 = vst [vmem:[%s585_s1 + $0xc0] sm:$0xff] %v193_v1  ;;  %v201_v5 = vld [vmem:[%s584_s0 + $0x138] sm:$0xff]  ;;  %198 = vst [vmem:[%s585_s1 + $0xd8] sm:$0xff] %v197_v3  ;;  %v203_v6 = vld [vmem:[%s584_s0 + $0x60] sm:$0xff] }
   0x4   :  { %200 = vst [vmem:[%s585_s1 + $0x30] sm:$0xff] %v199_v4  ;;  %202 = vst [vmem:[%s585_s1 + $0xf0] sm:$0xff] %v201_v5  ;;  %v205_v7 = vld [vmem:[%s584_s0 + $0x120] sm:$0xff]  ;;  %v207_v8 = vld [vmem:[%s584_s0 + $0x48] sm:$0xff] }
   0x5   :  { %204 = vst [vmem:[%s585_s1 + $0x48] sm:$0xff] %v203_v6  ;;  %206 = vst [vmem:[%s585_s1 + $0x108] sm:$0xff] %v205_v7  ;;  %v209_v9 = vld [vmem:[%s584_s0 + $0x108] sm:$0xff]  ;;  %v211_v10 = vld [vmem:[%s584_s0 + $0x30] sm:$0xff] }
   0x6   :  { %208 = vst [vmem:[%s585_s1 + $0x60] sm:$0xff] %v207_v8  ;;  %v213_v11 = vld [vmem:[%s584_s0 + $0xf0] sm:$0xff]  ;;  %210 = vst [vmem:[%s585_s1 + $0x120] sm:$0xff] %v209_v9  ;;  %v215_v12 = vld [vmem:[%s584_s0 + $0x18] sm:$0xff] }
   0x7   :  { %212 = vst [vmem:[%s585_s1 + $0x78] sm:$0xff] %v211_v10  ;;  %214 = vst [vmem:[%s585_s1 + $0x138] sm:$0xff] %v213_v11  ;;  %v217_v13 = vld [vmem:[%s584_s0 + $0xd8] sm:$0xff]  ;;  %v57_v14 = vld [vmem:[%s584_s0] sm:$0xff] }
   0x8   :  { %216 = vst [vmem:[%s585_s1 + $0x90] sm:$0xff] %v215_v12  ;;  %218 = vst [vmem:[%s585_s1 + $0x150] sm:$0xff] %v217_v13  ;;  %v220_v15 = vld [vmem:[%s584_s0 + $0xc0] sm:$0xff]  ;;  %v222_v16 = vld [vmem:[%s584_s0 + $0xb0] sm:$0xff] }
   0x9   :  { %219 = vst [vmem:[%s585_s1 + $0xa8] sm:$0xff] %v57_v14  ;;  %v224_v17 = vld [vmem:[%s584_s0 + $0x170] sm:$0xff]  ;;  %221 = vst [vmem:[%s585_s1 + $0x168] sm:$0xff] %v220_v15  ;;  %v226_v18 = vld [vmem:[%s584_s0 + $0x98] sm:$0xff] }
   0xa   :  { %223 = vst [vmem:[%s585_s1 + $0x8] sm:$0xff] %v222_v16  ;;  %225 = vst [vmem:[%s585_s1 + $0xc8] sm:$0xff] %v224_v17  ;;  %v228_v19 = vld [vmem:[%s584_s0 + $0x158] sm:$0xff]  ;;  %v230_v20 = vld [vmem:[%s584_s0 + $0x80] sm:$0xff] }
   0xb   :  { %227 = vst [vmem:[%s585_s1 + $0x20] sm:$0xff] %v226_v18  ;;  %229 = vst [vmem:[%s585_s1 + $0xe0] sm:$0xff] %v228_v19  ;;  %v232_v21 = vld [vmem:[%s584_s0 + $0x140] sm:$0xff]  ;;  %v234_v22 = vld [vmem:[%s584_s0 + $0x68] sm:$0xff] }
   0xc   :  { %231 = vst [vmem:[%s585_s1 + $0x38] sm:$0xff] %v230_v20  ;;  %v236_v23 = vld [vmem:[%s584_s0 + $0x128] sm:$0xff]  ;;  %233 = vst [vmem:[%s585_s1 + $0xf8] sm:$0xff] %v232_v21  ;;  %v238_v24 = vld [vmem:[%s584_s0 + $0x50] sm:$0xff] }
   0xd   :  { %235 = vst [vmem:[%s585_s1 + $0x50] sm:$0xff] %v234_v22  ;;  %237 = vst [vmem:[%s585_s1 + $0x110] sm:$0xff] %v236_v23  ;;  %v240_v25 = vld [vmem:[%s584_s0 + $0x110] sm:$0xff]  ;;  %v242_v26 = vld [vmem:[%s584_s0 + $0x38] sm:$0xff] }
   0xe   :  { %239 = vst [vmem:[%s585_s1 + $0x68] sm:$0xff] %v238_v24  ;;  %241 = vst [vmem:[%s585_s1 + $0x128] sm:$0xff] %v240_v25  ;;  %v244_v27 = vld [vmem:[%s584_s0 + $0xf8] sm:$0xff]  ;;  %v246_v28 = vld [vmem:[%s584_s0 + $0x20] sm:$0xff] }
   0xf   :  { %243 = vst [vmem:[%s585_s1 + $0x80] sm:$0xff] %v242_v26  ;;  %v248_v29 = vld [vmem:[%s584_s0 + $0xe0] sm:$0xff]  ;;  %245 = vst [vmem:[%s585_s1 + $0x140] sm:$0xff] %v244_v27  ;;  %v250_v30 = vld [vmem:[%s584_s0 + $0x8] sm:$0xff] }
  0x10   :  { %247 = vst [vmem:[%s585_s1 + $0x98] sm:$0xff] %v246_v28  ;;  %249 = vst [vmem:[%s585_s1 + $0x158] sm:$0xff] %v248_v29  ;;  %v252_v31 = vld [vmem:[%s584_s0 + $0xc8] sm:$0xff]  ;;  %v254_v32 = vld [vmem:[%s584_s0 + $0xb8] sm:$0xff] }
  0x11   :  { %251 = vst [vmem:[%s585_s1 + $0xb0] sm:$0xff] %v250_v30  ;;  %253 = vst [vmem:[%s585_s1 + $0x170] sm:$0xff] %v252_v31  ;;  %v256_v33 = vld [vmem:[%s584_s0 + $0x178] sm:$0xff]  ;;  %v258_v34 = vld [vmem:[%s584_s0 + $0xa0] sm:$0xff] }
  0x12   :  { %255 = vst [vmem:[%s585_s1 + $0x10] sm:$0xff] %v254_v32  ;;  %v260_v35 = vld [vmem:[%s584_s0 + $0x160] sm:$0xff]  ;;  %257 = vst [vmem:[%s585_s1 + $0xd0] sm:$0xff] %v256_v33  ;;  %v262_v36 = vld [vmem:[%s584_s0 + $0x88] sm:$0xff] }
  0x13   :  { %259 = vst [vmem:[%s585_s1 + $0x28] sm:$0xff] %v258_v34  ;;  %261 = vst [vmem:[%s585_s1 + $0xe8] sm:$0xff] %v260_v35  ;;  %v264_v37 = vld [vmem:[%s584_s0 + $0x148] sm:$0xff]  ;;  %v266_v38 = vld [vmem:[%s584_s0 + $0x70] sm:$0xff] }
  0x14   :  { %263 = vst [vmem:[%s585_s1 + $0x40] sm:$0xff] %v262_v36  ;;  %265 = vst [vmem:[%s585_s1 + $0x100] sm:$0xff] %v264_v37  ;;  %v268_v39 = vld [vmem:[%s584_s0 + $0x130] sm:$0xff]  ;;  %v270_v40 = vld [vmem:[%s584_s0 + $0x58] sm:$0xff] }
  0x15   :  { %267 = vst [vmem:[%s585_s1 + $0x58] sm:$0xff] %v266_v38  ;;  %v272_v41 = vld [vmem:[%s584_s0 + $0x118] sm:$0xff]  ;;  %269 = vst [vmem:[%s585_s1 + $0x118] sm:$0xff] %v268_v39  ;;  %v274_v42 = vld [vmem:[%s584_s0 + $0x40] sm:$0xff] }
  0x16   :  { %271 = vst [vmem:[%s585_s1 + $0x70] sm:$0xff] %v270_v40  ;;  %273 = vst [vmem:[%s585_s1 + $0x130] sm:$0xff] %v272_v41  ;;  %v276_v43 = vld [vmem:[%s584_s0 + $0x100] sm:$0xff]  ;;  %v278_v44 = vld [vmem:[%s584_s0 + $0x28] sm:$0xff] }
  0x17   :  { %275 = vst [vmem:[%s585_s1 + $0x88] sm:$0xff] %v274_v42  ;;  %277 = vst [vmem:[%s585_s1 + $0x148] sm:$0xff] %v276_v43  ;;  %v280_v45 = vld [vmem:[%s584_s0 + $0xe8] sm:$0xff]  ;;  %v282_v46 = vld [vmem:[%s584_s0 + $0x10] sm:$0xff] }
  0x18   :  { %279 = vst [vmem:[%s585_s1 + $0xa0] sm:$0xff] %v278_v44  ;;  %v284_v47 = vld [vmem:[%s584_s0 + $0xd0] sm:$0xff]  ;;  %281 = vst [vmem:[%s585_s1 + $0x160] sm:$0xff] %v280_v45 }
  0x19   :  { %283 = vst [vmem:[%s585_s1 + $0xb8] sm:$0xff] %v282_v46  ;;  %285 = vst [vmem:[%s585_s1 + $0x178] sm:$0xff] %v284_v47 }

// kernel: ifno2d_forward.15
= control target key start
LH: loop header
LB: loop body
LE: loop exit
PB: predicated region body
PF: predicated region fallthrough
CT: control target
= control target key end

     0   :  { %s2514_s15 = smov 0   ;;  %s2516_s16 = smov 0   ;;  %s3530_s0 = inlined_call_operand.vmem [shape: f32[648,32], index: 0, kind: input, shape index: {}]   ;;  %s3531_s1 = inlined_call_operand.vmem [shape: f32[32,32], index: 1, kind: input, shape index: {}]   ;;  %s3532_s2 = inlined_call_operand.vmem [shape: f32[1,32], index: 2, kind: input, shape index: {}]   ;;  %s3533_s3 = inlined_call_operand.vmem [shape: f32[648,32], index: 3, kind: input, shape index: {}]   ;;  %s3534_s4 = inlined_call_operand.vmem [shape: f32[648,32], index: 4, kind: output, shape index: {}]  }
   0x1   :  { %s2518_s17 = smov 0  }
   0x2 LB: > { %s2527_s18 = sadd.s32 4294967295, %s2455_s17   ;;  %s2529_s19 = sadd.s32 1, %s2455_s17   ;;  %s2455_s17 = sphi %s2518_s17, %s3543_s17   ;;  %s2451_s16 = sphi %s2516_s16, %s3542_s16   ;;  %s2447_s15 = sphi %s2514_s15, %s3541_s15  }
   0x3   : > { %s112_s20 = ssub.s32 %s2455_s17, %s2529_s19  ;;  %s115_s21 = sadd.s32 1, %s2451_s16 }
   0x4   : > { %p113_p0 = scmp.eq.s32.totalorder %s112_s20, 0  ;;  %p125_p1 = scmp.ne.s32.totalorder %s2451_s16, %s2447_s15 }
   0x5   : > { %p126_p2 = scmp.eq.s32.totalorder %s2527_s18, 1  ;;  %p1909_p3 = scmp.ge.s32.totalorder %s2455_s17, 1 }
   0x6   : > { %s2537_s22 = scalar_select %p113_p0, %s2451_s16, %s115_s21  }
   0x7   : > { %p2539_p4 = por %p126_p2, %p125_p1  ;;  %p190_p5 = scmp.lt.s32.totalorder %s2455_s17, 3 }
   0x9   : > { %p191_p6 = pnand %p1909_p3, %p190_p5 }
   0xa   : > { %v325_v0 = vld [vmem:[%s3531_s1] sm:$0xff] (!%p191_p6)  ;;  %v326_v1 = vld [vmem:[%s3531_s1 + $0x8] sm:$0xff] (!%p191_p6)  ;;  %v327_v2 = vld [vmem:[%s3531_s1 + $0x10] sm:$0xff] (!%p191_p6)  ;;  %s2553_s30 = sshll.u32 (!%p191_p6), %s2527_s18, 6  ;;  %vm336_vm0 = vcmask (!%p191_p6), 261120   ;;  %s225_s21 = sand.u32 (!%p191_p6), 1, %s2447_s15  }
   0xb   : > { %194 = sbr.rel (%p191_p6) target bundleno = 434 (0x1b2), region = 36  ;;  %v2172_v3 = vpack.c.bf16 (!%p191_p6), %v326_v1, %v325_v0  ;;  %v328_v4 = vld [vmem:[%s3531_s1 + $0x18] sm:$0xff] (!%p191_p6)  ;;  %p233_p7 = scmp.lt.s32.totalorder (!%p191_p6), %s2553_s30, 80 }
   0xc   : > { %v2176_v5 = vpack.c.bf16 (!%p191_p6), %v328_v4, %v327_v2  ;;  %s2746_s15 = sshll.u32 (!%p191_p6), %s225_s21, 9 }
   0xd   : > { %2173 = vmatprep.subr.bf16.mxu0 (!%p191_p6), %v2172_v3  ;;  %2180 = vmatprep.subr.bf16.mxu1 (!%p191_p6), %v2172_v3  ;;  %s2775_s24 = scalar_lea.vmem (!%p191_p6), [#allocation2], %s2746_s15  }
   0xe   : > { %2175 = vmatpush3.bf16.msra.mxu0 (!%p191_p6), %v2172_v3  ;;  %2182 = vmatpush3.bf16.msra.mxu1 (!%p191_p6), %v2172_v3 }
   0xf   : > { %2177 = vmatprep.subr.bf16.mxu0 (!%p191_p6), %v2176_v5  ;;  %2181 = vmatprep.subr.bf16.mxu1 (!%p191_p6), %v2176_v5 }
  0x12   : > { %s2560_s7 = scalar_select %p233_p7, %s2553_s30, 80  ;;  %2179 = vmatpush3.bf16.msra.mxu0 %v2176_v5  ;;  %2183 = vmatpush3.bf16.msra.mxu1 %v2176_v5 }
  0x13   : > { %s1435_s27 = ssub.s32 (%p2539_p4), 81, %s2553_s30  ;;  %s1997_s28 = sshll.u32 (%p2539_p4), %s2527_s18, 9 }
  0x14   : > { %s1912_s8 = sshll.u32 %s2560_s7, 3  ;;  %p1436_p8 = scmp.lt.s32.totalorder (%p2539_p4), %s1435_s27, 64 }
  0x15   : > { %s2568_s11 = scalar_lea.vmem %s3530_s0, %s1912_s8  ;;  %s2703_s14 = scalar_lea.vmem %s3533_s3, %s1912_s8 }
  0x16   : > { %v261_v6 = vld [vmem:[%s2568_s11] sm:$0xff]  ;;  %v262_v8 = vld [vmem:[%s2568_s11 + $0x8] sm:$0xff]  ;;  %v263_v10 = vld [vmem:[%s2568_s11 + $0x10] sm:$0xff]  ;;  %s3331_s6 = scalar_lea.vmem (%p2539_p4), %s3534_s4, %s1997_s28  }
  0x17   : > { %v293_v7 = vld [vmem:[%s2568_s11 + $0x100] sm:$0xff]  ;;  %v294_v9 = vld [vmem:[%s2568_s11 + $0x108] sm:$0xff]  ;;  %2076 = vmatprep.mubr.msk.f32.mxu0 %vm336_vm0, %v261_v6  ;;  %v295_v11 = vld [vmem:[%s2568_s11 + $0x110] sm:$0xff] }
  0x18   : > { %2124 = vmatprep.mubr.msk.f32.mxu1 %vm336_vm0, %v293_v7  ;;  %2077 = vmatmul.mubr.msk.f32.vlgmr.msra.gmra.mrb[0].mxu0 %vm336_vm0, %v262_v8  ;;  %v264_v12 = vld [vmem:[%s2568_s11 + $0x18] sm:$0xff]  ;;  %v265_v14 = vld [vmem:[%s2568_s11 + $0x20] sm:$0xff]  ;;  %v266_v16 = vld [vmem:[%s2568_s11 + $0x28] sm:$0xff] }
  0x19   : > { %2125 = vmatmul.mubr.msk.f32.vlgmr.msra.gmra.mrb[0].mxu1 %vm336_vm0, %v294_v9  ;;  %2079 = vmatprep.mubr.msk.f32.mxu0 %vm336_vm0, %v263_v10  ;;  %v296_v13 = vld [vmem:[%s2568_s11 + $0x118] sm:$0xff]  ;;  %v297_v15 = vld [vmem:[%s2568_s11 + $0x120] sm:$0xff]  ;;  %v298_v17 = vld [vmem:[%s2568_s11 + $0x128] sm:$0xff] }
  0x1a   : > { %2127 = vmatprep.mubr.msk.f32.mxu1 %vm336_vm0, %v295_v11  ;;  %v267_v18 = vld [vmem:[%s2568_s11 + $0x30] sm:$0xff]  ;;  %v268_v20 = vld [vmem:[%s2568_s11 + $0x38] sm:$0xff]  ;;  %v269_v22 = vld [vmem:[%s2568_s11 + $0x40] sm:$0xff] }
  0x1b   : > { %v299_v19 = vld [vmem:[%s2568_s11 + $0x130] sm:$0xff]  ;;  %v300_v21 = vld [vmem:[%s2568_s11 + $0x138] sm:$0xff]  ;;  %v301_v23 = vld [vmem:[%s2568_s11 + $0x140] sm:$0xff] }
  0x1c   : > { %2080 = vmatmul.mubr.msk.f32.gmra.mrb[2].mxu0 %vm336_vm0, %v264_v12  ;;  %v270_v24 = vld [vmem:[%s2568_s11 + $0x48] sm:$0xff]  ;;  %v271_v26 = vld [vmem:[%s2568_s11 + $0x50] sm:$0xff]  ;;  %v272_v28 = vld [vmem:[%s2568_s11 + $0x58] sm:$0xff] }
  0x1d   : > { %2128 = vmatmul.mubr.msk.f32.gmra.mrb[2].mxu1 %vm336_vm0, %v296_v13  ;;  %2082 = vmatprep.mubr.msk.f32.mxu0 %vm336_vm0, %v265_v14  ;;  %v302_v25 = vld [vmem:[%s2568_s11 + $0x148] sm:$0xff]  ;;  %v303_v27 = vld [vmem:[%s2568_s11 + $0x150] sm:$0xff]  ;;  %v304_v29 = vld [vmem:[%s2568_s11 + $0x158] sm:$0xff] }
  0x1e   : > { %2130 = vmatprep.mubr.msk.f32.mxu1 %vm336_vm0, %v297_v15  ;;  %v273_v30 = vld [vmem:[%s2568_s11 + $0x60] sm:$0xff]  ;;  %v274_v32 = vld [vmem:[%s2568_s11 + $0x68] sm:$0xff]  ;;  %v275_v34 = vld [vmem:[%s2568_s11 + $0x70] sm:$0xff] }
  0x1f   : > { %v305_v31 = vld [vmem:[%s2568_s11 + $0x160] sm:$0xff]  ;;  %v306_v33 = vld [vmem:[%s2568_s11 + $0x168] sm:$0xff]  ;;  %v307_v35 = vld [vmem:[%s2568_s11 + $0x170] sm:$0xff] }
  0x20   : > { %2083 = vmatmul.mubr.msk.f32.gmra.mrb[4].mxu0 %vm336_vm0, %v266_v16  ;;  %v276_v36 = vld [vmem:[%s2568_s11 + $0x78] sm:$0xff]  ;;  %v277_v38 = vld [vmem:[%s2568_s11 + $0x80] sm:$0xff]  ;;  %v278_v40 = vld [vmem:[%s2568_s11 + $0x88] sm:$0xff] }
  0x21   : > { %2131 = vmatmul.mubr.msk.f32.gmra.mrb[4].mxu1 %vm336_vm0, %v298_v17  ;;  %2085 = vmatprep.mubr.msk.f32.mxu0 %vm336_vm0, %v267_v18  ;;  %v308_v37 = vld [vmem:[%s2568_s11 + $0x178] sm:$0xff]  ;;  %v309_v39 = vld [vmem:[%s2568_s11 + $0x180] sm:$0xff]  ;;  %v310_v41 = vld [vmem:[%s2568_s11 + $0x188] sm:$0xff] }
  0x22   : > { %2133 = vmatprep.mubr.msk.f32.mxu1 %vm336_vm0, %v299_v19  ;;  %v279_v42 = vld [vmem:[%s2568_s11 + $0x90] sm:$0xff]  ;;  %v280_v44 = vld [vmem:[%s2568_s11 + $0x98] sm:$0xff]  ;;  %v281_v46 = vld [vmem:[%s2568_s11 + $0xa0] sm:$0xff] }
  0x23   : > { %v311_v43 = vld [vmem:[%s2568_s11 + $0x190] sm:$0xff]  ;;  %v312_v45 = vld [vmem:[%s2568_s11 + $0x198] sm:$0xff]  ;;  %v313_v47 = vld [vmem:[%s2568_s11 + $0x1a0] sm:$0xff] }
  0x24   : > { %2086 = vmatmul.mubr.msk.f32.gmra.mrb[6].mxu0 %vm336_vm0, %v268_v20  ;;  %v282_v48 = vld [vmem:[%s2568_s11 + $0xa8] sm:$0xff]  ;;  %v283_v50 = vld [vmem:[%s2568_s11 + $0xb0] sm:$0xff]  ;;  %v284_v52 = vld [vmem:[%s2568_s11 + $0xb8] sm:$0xff] }
  0x25   : > { %2134 = vmatmul.mubr.msk.f32.gmra.mrb[6].mxu1 %vm336_vm0, %v300_v21  ;;  %2088 = vmatprep.mubr.msk.f32.mxu0 %vm336_vm0, %v269_v22  ;;  %v314_v49 = vld [vmem:[%s2568_s11 + $0x1a8] sm:$0xff]  ;;  %v315_v51 = vld [vmem:[%s2568_s11 + $0x1b0] sm:$0xff]  ;;  %v316_v53 = vld [vmem:[%s2568_s11 + $0x1b8] sm:$0xff] }
  0x26   : > { %2136 = vmatprep.mubr.msk.f32.mxu1 %vm336_vm0, %v301_v23  ;;  %v285_v54 = vld [vmem:[%s2568_s11 + $0xc0] sm:$0xff]  ;;  %v286_v56 = vld [vmem:[%s2568_s11 + $0xc8] sm:$0xff]  ;;  %v287_v58 = vld [vmem:[%s2568_s11 + $0xd0] sm:$0xff] }
  0x27   : > { %v317_v55 = vld [vmem:[%s2568_s11 + $0x1c0] sm:$0xff]  ;;  %v318_v57 = vld [vmem:[%s2568_s11 + $0x1c8] sm:$0xff]  ;;  %v319_v59 = vld [vmem:[%s2568_s11 + $0x1d0] sm:$0xff] }
  0x28   : > { %2089 = vmatmul.mubr.msk.f32.gmra.mrb[8].mxu0 %vm336_vm0, %v270_v24  ;;  %v288_v60 = vld [vmem:[%s2568_s11 + $0xd8] sm:$0xff]  ;;  %v289_v62 = vld [vmem:[%s2568_s11 + $0xe0] sm:$0xff]  ;;  %v290_v0 = vld [vmem:[%s2568_s11 + $0xe8] sm:$0xff] }
  0x29   : > { %2137 = vmatmul.mubr.msk.f32.gmra.mrb[8].mxu1 %vm336_vm0, %v302_v25  ;;  %2091 = vmatprep.mubr.msk.f32.mxu0 %vm336_vm0, %v271_v26  ;;  %v320_v61 = vld [vmem:[%s2568_s11 + $0x1d8] sm:$0xff]  ;;  %v321_v63 = vld [vmem:[%s2568_s11 + $0x1e0] sm:$0xff]  ;;  %v322_v1 = vld [vmem:[%s2568_s11 + $0x1e8] sm:$0xff] }
  0x2a   : > { %2139 = vmatprep.mubr.msk.f32.mxu1 %vm336_vm0, %v303_v27  ;;  %v291_v2 = vld [vmem:[%s2568_s11 + $0xf0] sm:$0xff]  ;;  %v292_v4 = vld [vmem:[%s2568_s11 + $0xf8] sm:$0xff]  ;;  %v2708_v6 = vld [vmem:[%s3532_s2] ss:$0 sm:$0xff] }
  0x2b   : > { %v323_v3 = vld [vmem:[%s2568_s11 + $0x1f0] sm:$0xff]  ;;  %v324_v5 = vld [vmem:[%s2568_s11 + $0x1f8] sm:$0xff]  ;;  %v915_v8 = vld [vmem:[%s2703_s14 + $0x8] sm:$0xff] }
  0x2c   : > { %2092 = vmatmul.mubr.msk.f32.gmra.mrb[10].mxu0 %vm336_vm0, %v272_v28  ;;  %v947_v10 = vld [vmem:[%s2703_s14 + $0x108] sm:$0xff]  ;;  %v914_v14 = vld [vmem:[%s2703_s14] sm:$0xff] }
  0x2d   : > { %2140 = vmatmul.mubr.msk.f32.gmra.mrb[10].mxu1 %vm336_vm0, %v304_v29  ;;  %2094 = vmatprep.mubr.msk.f32.mxu0 %vm336_vm0, %v273_v30  ;;  %v946_v16 = vld [vmem:[%s2703_s14 + $0x100] sm:$0xff]  ;;  %v917_v29 = vld [vmem:[%s2703_s14 + $0x18] sm:$0xff] }
  0x2e   : > { %2142 = vmatprep.mubr.msk.f32.mxu1 %vm336_vm0, %v305_v31  ;;  %v949_v30 = vld [vmem:[%s2703_s14 + $0x118] sm:$0xff] }
  0x30   : > { %2095 = vmatmul.mubr.msk.f32.gmra.mrb[12].mxu0 %vm336_vm0, %v274_v32 }
  0x31   : > { %2143 = vmatmul.mubr.msk.f32.gmra.mrb[12].mxu1 %vm336_vm0, %v306_v33  ;;  %2097 = vmatprep.mubr.msk.f32.mxu0 %vm336_vm0, %v275_v34  ;;  %v916_v34 = vld [vmem:[%s2703_s14 + $0x10] sm:$0xff] }
  0x32   : > { %2145 = vmatprep.mubr.msk.f32.mxu1 %vm336_vm0, %v307_v35 }
  0x34   : > { %2098 = vmatmul.mubr.msk.f32.gmra.mrb[14].mxu0 %vm336_vm0, %v276_v36  ;;  %v948_v36 = vld [vmem:[%s2703_s14 + $0x110] sm:$0xff] }
  0x35   : > { %2146 = vmatmul.mubr.msk.f32.gmra.mrb[14].mxu1 %vm336_vm0, %v308_v37  ;;  %2100 = vmatprep.mubr.msk.f32.mxu0 %vm336_vm0, %v277_v38 }
  0x36   : > { %2148 = vmatprep.mubr.msk.f32.mxu1 %vm336_vm0, %v309_v39 }
  0x38   : > { %2101 = vmatmul.mubr.msk.f32.gmra.mrb[16].mxu0 %vm336_vm0, %v278_v40 }
  0x39   : > { %2149 = vmatmul.mubr.msk.f32.gmra.mrb[16].mxu1 %vm336_vm0, %v310_v41  ;;  %2103 = vmatprep.mubr.msk.f32.mxu0 %vm336_vm0, %v279_v42 }
  0x3a   : > { %2151 = vmatprep.mubr.msk.f32.mxu1 %vm336_vm0, %v311_v43 }
  0x3c   : > { %2104 = vmatmul.mubr.msk.f32.gmra.mrb[18].mxu0 %vm336_vm0, %v280_v44 }
  0x3d   : > { %2152 = vmatmul.mubr.msk.f32.gmra.mrb[18].mxu1 %vm336_vm0, %v312_v45  ;;  %2106 = vmatprep.mubr.msk.f32.mxu0 %vm336_vm0, %v281_v46 }
  0x3e   : > { %2154 = vmatprep.mubr.msk.f32.mxu1 %vm336_vm0, %v313_v47 }
  0x40   : > { %2107 = vmatmul.mubr.msk.f32.gmra.mrb[20].mxu0 %vm336_vm0, %v282_v48  ;;  %v919_v48 = vld [vmem:[%s2703_s14 + $0x28] sm:$0xff] }
  0x41   : > { %2155 = vmatmul.mubr.msk.f32.gmra.mrb[20].mxu1 %vm336_vm0, %v314_v49  ;;  %2109 = vmatprep.mubr.msk.f32.mxu0 %vm336_vm0, %v283_v50  ;;  %v951_v50 = vld [vmem:[%s2703_s14 + $0x128] sm:$0xff] }
  0x42   : > { %2157 = vmatprep.mubr.msk.f32.mxu1 %vm336_vm0, %v315_v51 }
  0x44   : > { %2110 = vmatmul.mubr.msk.f32.gmra.mrb[22].mxu0 %vm336_vm0, %v284_v52 }
  0x45   : > { %2158 = vmatmul.mubr.msk.f32.gmra.mrb[22].mxu1 %vm336_vm0, %v316_v53  ;;  %2112 = vmatprep.mubr.msk.f32.mxu0 %vm336_vm0, %v285_v54 }
  0x46   : > { %2160 = vmatprep.mubr.msk.f32.mxu1 %vm336_vm0, %v317_v55 }
  0x48   : > { %2113 = vmatmul.mubr.msk.f32.gmra.mrb[24].mxu0 %vm336_vm0, %v286_v56 }
  0x49   : > { %2161 = vmatmul.mubr.msk.f32.gmra.mrb[24].mxu1 %vm336_vm0, %v318_v57  ;;  %2115 = vmatprep.mubr.msk.f32.mxu0 %vm336_vm0, %v287_v58 }
  0x4a   : > { %2163 = vmatprep.mubr.msk.f32.mxu1 %vm336_vm0, %v319_v59 }
  0x4c   : > { %2116 = vmatmul.mubr.msk.f32.gmra.mrb[26].mxu0 %vm336_vm0, %v288_v60  ;;  %v918_v60 = vld [vmem:[%s2703_s14 + $0x20] sm:$0xff] }
  0x4d   : > { %2164 = vmatmul.mubr.msk.f32.gmra.mrb[26].mxu1 %vm336_vm0, %v320_v61  ;;  %2118 = vmatprep.mubr.msk.f32.mxu0 %vm336_vm0, %v289_v62  ;;  %v950_v61 = vld [vmem:[%s2703_s14 + $0x120] sm:$0xff] }
  0x4e   : > { %2166 = vmatprep.mubr.msk.f32.mxu1 %vm336_vm0, %v321_v63 }
  0x50   : > { %2119 = vmatmul.mubr.msk.f32.gmra.mrb[28].mxu0 %vm336_vm0, %v290_v0 }
  0x51   : > { %2167 = vmatmul.mubr.msk.f32.gmra.mrb[28].mxu1 %vm336_vm0, %v322_v1  ;;  %2121 = vmatprep.mubr.msk.f32.mxu0 %vm336_vm0, %v291_v2  ;;  %v921_v2 = vld [vmem:[%s2703_s14 + $0x38] sm:$0xff] }
  0x52   : > { %2169 = vmatprep.mubr.msk.f32.mxu1 %vm336_vm0, %v323_v3 }
  0x54   : > { %2122 = vmatmul.mubr.msk.f32.gmra.mrb[30].mxu0 %vm336_vm0, %v292_v4  ;;  %v953_v4 = vld [vmem:[%s2703_s14 + $0x138] sm:$0xff] }
  0x55   : > { %2170 = vmatmul.mubr.msk.f32.gmra.mrb[30].mxu1 %vm336_vm0, %v324_v5 }
  0xeb   : > { %v2078_v7 = vpop.f32.mrb[0].mxu0 }
  0xec   : > { %v2126_v9 = vpop.f32.mrb[0].mxu1  ;;  %v601_v11 = vadd.f32 %v2078_v7, %v2708_v6  ;;  %v595_v13 = vpop.f32.mrb[1].mxu0 }
  0xed   : > { %v761_v12 = vadd.f32 %v2126_v9, %v2708_v6  ;;  %v755_v15 = vpop.f32.mrb[1].mxu1  ;;  %v596_v17 = vadd.f32 %v2708_v6, %v595_v13 }
  0xee   : > { %v756_v18 = vadd.f32 %v2708_v6, %v755_v15  ;;  %v979_v19 = vadd.f32 %v915_v8, %v601_v11 }
  0xef   : > { %v1011_v20 = vadd.f32 %v947_v10, %v761_v12  ;;  %v978_v21 = vadd.f32 %v914_v14, %v596_v17  ;;  %v2081_v23 = vpop.f32.mrb[2].mxu0 }
  0xf0   : > { %v1010_v22 = vadd.f32 %v946_v16, %v756_v18  ;;  %v2129_v24 = vpop.f32.mrb[2].mxu1  ;;  %v1108_v25 = vmul.f32 0.70710677, %v979_v19  ;;  %v611_v31 = vadd.f32 %v2081_v23, %v2708_v6  ;;  %v605_v33 = vpop.f32.mrb[3].mxu0  ;;  %v1043_v53 = vmul.f32 0.5, %v979_v19 }
  0xf1   : > { %v1140_v26 = vmul.f32 0.70710677, %v1011_v20  ;;  %v1107_v27 = vmul.f32 0.70710677, %v978_v21  ;;  %v771_v32 = vadd.f32 %v2129_v24, %v2708_v6  ;;  %v765_v35 = vpop.f32.mrb[3].mxu1  ;;  %v606_v37 = vadd.f32 %v2708_v6, %v605_v33 }
  0xf2   : > { %v1139_v28 = vmul.f32 0.70710677, %v1010_v22  ;;  %2272 = verf.f32 %v1108_v25  ;;  %v766_v38 = vadd.f32 %v2708_v6, %v765_v35  ;;  %v981_v41 = vadd.f32 %v917_v29, %v611_v31  ;;  %v920_v31 = vld [vmem:[%s2703_s14 + $0x30] sm:$0xff] }
  0xf3   : > { %2274 = verf.f32 %v1140_v26  ;;  %v2084_v39 = vpop.f32.mrb[4].mxu0  ;;  %v1013_v42 = vadd.f32 %v949_v30, %v771_v32  ;;  %v980_v46 = vadd.f32 %v916_v34, %v606_v37  ;;  %v1075_v54 = vmul.f32 0.5, %v1011_v20 }
  0xf4   : > { %v2132_v40 = vpop.f32.mrb[4].mxu1  ;;  %2276 = verf.f32 %v1107_v27  ;;  %v621_v43 = vadd.f32 %v2084_v39, %v2708_v6  ;;  %v615_v44 = vpop.f32.mrb[5].mxu0  ;;  %v2727_v47 = vadd.f32 %v948_v36, %v766_v38  ;;  %v1110_v51 = vmul.f32 0.70710677, %v981_v41 }
  0xf5   : > { %v775_v45 = vpop.f32.mrb[5].mxu1  ;;  %2278 = verf.f32 %v1139_v28  ;;  %v781_v49 = vadd.f32 %v2132_v40, %v2708_v6  ;;  %v1142_v52 = vmul.f32 0.70710677, %v1013_v42  ;;  %v1109_v55 = vmul.f32 0.70710677, %v980_v46 }
  0xf6   : > { %v1141_v56 = vmul.f32 0.70710677, %v2727_v47  ;;  %2280 = verf.f32 %v1110_v51  ;;  %v2734_v57 = vadd.f32 %v919_v48, %v621_v43  ;;  %v616_v59 = vadd.f32 %v2708_v6, %v615_v44  ;;  %v955_v48 = vld [vmem:[%s2703_s14 + $0x148] sm:$0xff] }
  0xf7   : > { %v2736_v58 = vadd.f32 %v951_v50, %v781_v49  ;;  %v2087_v62 = vpop.f32.mrb[6].mxu0  ;;  %2282 = verf.f32 %v1142_v52  ;;  %v776_v0 = vadd.f32 %v2708_v6, %v775_v45  ;;  %v1042_v8 = vmul.f32 0.5, %v978_v21 }
  0xf8   : > { %v2135_v63 = vpop.f32.mrb[6].mxu1  ;;  %v631_v1 = vadd.f32 %v2087_v62, %v2708_v6  ;;  %v625_v5 = vpop.f32.mrb[7].mxu0  ;;  %v1074_v9 = vmul.f32 0.5, %v1010_v22  ;;  %2284 = verf.f32 %v1109_v55  ;;  %v1112_v10 = vmul.f32 0.70710677, %v2734_v57 }
  0xf9   : > { %v791_v3 = vadd.f32 %v2135_v63, %v2708_v6  ;;  %v785_v7 = vpop.f32.mrb[7].mxu1  ;;  %2286 = verf.f32 %v1141_v56  ;;  %v1144_v11 = vmul.f32 0.70710677, %v2736_v58  ;;  %v2750_v12 = vadd.f32 %v918_v60, %v616_v59 }
  0xfa   : > { %v2752_v13 = vadd.f32 %v950_v61, %v776_v0  ;;  %v1045_v17 = vmul.f32 0.5, %v981_v41  ;;  %2288 = verf.f32 %v1112_v10  ;;  %v2754_v18 = vadd.f32 %v921_v2, %v631_v1 }
  0xfb   : > { %v2090_v14 = vpop.f32.mrb[8].mxu0  ;;  %v2756_v19 = vadd.f32 %v953_v4, %v791_v3  ;;  %2290 = verf.f32 %v1144_v11  ;;  %v1111_v24 = vmul.f32 0.70710677, %v2750_v12  ;;  %v626_v25 = vadd.f32 %v2708_v6, %v625_v5 }
  0xfc   : > { %v2138_v15 = vpop.f32.mrb[8].mxu1  ;;  %v2273_v16 = vpop.eup %2272  ;;  %v1077_v28 = vmul.f32 0.5, %v1013_v42  ;;  %v1044_v29 = vmul.f32 0.5, %v980_v46  ;;  %v1143_v30 = vmul.f32 0.70710677, %v2752_v13  ;;  %v1076_v40 = vmul.f32 0.5, %v2727_v47 }
  0xfd   : > { %v635_v20 = vpop.f32.mrb[9].mxu0  ;;  %v2758_v21 = vpop.f32.mrb[9].mxu1  ;;  %v1236_v23 = vadd.f32 1.0, %v2273_v16  ;;  %2292 = verf.f32 %v1111_v24  ;;  %v1114_v35 = vmul.f32 0.70710677, %v2754_v18  ;;  %v2780_v45 = vadd.f32 %v920_v31, %v626_v25  ;;  %v952_v46 = vld [vmem:[%s2703_s14 + $0x130] sm:$0xff] }
  0xfe   : > { %v2275_v22 = vpop.eup %2274  ;;  %2294 = verf.f32 %v1143_v30  ;;  %v1146_v44 = vmul.f32 0.70710677, %v2756_v19  ;;  %v923_v47 = vld [vmem:[%s2703_s14 + $0x48] sm:$0xff]  ;;  %v786_v51 = vadd.f32 %v2708_v6, %v785_v7  ;;  %v641_v52 = vadd.f32 %v2090_v14, %v2708_v6  ;;  %v922_v16 = vld [vmem:[%s2703_s14 + $0x40] sm:$0xff] }
  0xff   : > { %v2277_v26 = vpop.eup %2276  ;;  %v1268_v27 = vadd.f32 1.0, %v2275_v22  ;;  %v1300_v33 = vmul.f32 %v1236_v23, %v1043_v53  ;;  %v2765_v36 = vpop.f32.mrb[10].mxu0  ;;  %2296 = verf.f32 %v1114_v35  ;;  %v801_v53 = vadd.f32 %v2138_v15, %v2708_v6  ;;  %v925_v35 = vld [vmem:[%s2703_s14 + $0x58] sm:$0xff] }
 0x100   : > { %v2279_v32 = vpop.eup %2278  ;;  %v1235_v34 = vadd.f32 1.0, %v2277_v26  ;;  %v2767_v37 = vpop.f32.mrb[10].mxu1  ;;  %v1047_v56 = vmul.f32 0.5, %v2734_v57  ;;  %2298 = verf.f32 %v1146_v44  ;;  %v1113_v59 = vmul.f32 0.70710677, %v2780_v45 }
 0x101   : > { %v1332_v38 = vmul.f32 %v1268_v27, %v1075_v54  ;;  %v1267_v39 = vadd.f32 1.0, %v2279_v32  ;;  %v2770_v41 = vpop.f32.mrb[11].mxu0  ;;  %v2772_v42 = vpop.f32.mrb[11].mxu1  ;;  %1364 = vst.msk [vmem:[%s2775_s24 + $0x8] sm:$0xff] %vm336_vm0, %v1300_v33  ;;  %v2800_v0 = vadd.f32 %v952_v46, %v786_v51  ;;  %v2802_v1 = vadd.f32 %v923_v47, %v641_v52 }
 0x102   : > { %v1299_v43 = vmul.f32 %v1235_v34, %v1042_v8  ;;  %v2281_v49 = vpop.eup %2280  ;;  %v2804_v2 = vadd.f32 %v955_v48, %v801_v53  ;;  %2300 = verf.f32 %v1113_v59  ;;  %v636_v8 = vadd.f32 %v2708_v6, %v635_v20  ;;  %v954_v34 = vld [vmem:[%s2703_s14 + $0x140] sm:$0xff]  ;;  %v957_v53 = vld [vmem:[%s2703_s14 + $0x158] sm:$0xff] }
 0x103   : > { %1396 = vst.msk [vmem:[%s2775_s24 + $0x108] sm:$0xff] %vm336_vm0, %v1332_v38  ;;  %v1331_v50 = vmul.f32 %v1267_v39, %v1074_v9  ;;  %v2283_v54 = vpop.eup %2282  ;;  %v1238_v55 = vadd.f32 1.0, %v2281_v49  ;;  %v2794_v60 = vpop.f32.mrb[12].mxu0  ;;  %v1079_v14 = vmul.f32 0.5, %v2736_v58  ;;  %v1145_v15 = vmul.f32 0.70710677, %v2800_v0 }
 0x104   : > { %1363 = vst.msk [vmem:[%s2775_s24] sm:$0xff] %vm336_vm0, %v1299_v43  ;;  %v2796_v61 = vpop.f32.mrb[12].mxu1  ;;  %v2285_v62 = vpop.eup %2284  ;;  %v1270_v63 = vadd.f32 1.0, %v2283_v54  ;;  %v1116_v25 = vmul.f32 0.70710677, %v2802_v1  ;;  %v2832_v33 = vadd.f32 %v922_v16, %v636_v8  ;;  %v651_v43 = vadd.f32 %v2765_v36, %v2708_v6  ;;  %v924_v54 = vld [vmem:[%s2703_s14 + $0x50] sm:$0xff] }
 0x105   : > { %1395 = vst.msk [vmem:[%s2775_s24 + $0x100] sm:$0xff] %vm336_vm0, %v1331_v50  ;;  %v2806_v57 = vpop.f32.mrb[13].mxu0  ;;  %v2808_v3 = vpop.f32.mrb[13].mxu1  ;;  %v1302_v5 = vmul.f32 %v1238_v55, %v1045_v17  ;;  %v1237_v7 = vadd.f32 1.0, %v2285_v62  ;;  %v1046_v17 = vmul.f32 0.5, %v2750_v12  ;;  %2302 = verf.f32 %v1145_v15 }
 0x106   : > { %v2287_v4 = vpop.eup %2286  ;;  %v1334_v10 = vmul.f32 %v1270_v63, %v1077_v28  ;;  %v1078_v28 = vmul.f32 0.5, %v2752_v13  ;;  %2304 = verf.f32 %v1116_v25  ;;  %v1148_v32 = vmul.f32 0.70710677, %v2804_v2 }
 0x107   : > { %v2289_v9 = vpop.eup %2288  ;;  %v1269_v11 = vadd.f32 1.0, %v2287_v4  ;;  %1366 = vst.msk [vmem:[%s2775_s24 + $0x18] sm:$0xff] %vm336_vm0, %v1302_v5  ;;  %v1301_v23 = vmul.f32 %v1237_v7, %v1044_v29  ;;  %v2818_v20 = vpop.f32.mrb[14].mxu0  ;;  %v1049_v47 = vmul.f32 0.5, %v2754_v18  ;;  %v1115_v48 = vmul.f32 0.70710677, %v2832_v33 }
 0x108   : > { %v2291_v22 = vpop.eup %2290  ;;  %v1240_v24 = vadd.f32 1.0, %v2289_v9  ;;  %v2820_v26 = vpop.f32.mrb[14].mxu1  ;;  %1398 = vst.msk [vmem:[%s2775_s24 + $0x118] sm:$0xff] %vm336_vm0, %v1334_v10  ;;  %2306 = verf.f32 %v1148_v32  ;;  %v2854_v36 = vadd.f32 %v925_v35, %v651_v43  ;;  %v811_v62 = vadd.f32 %v2767_v37, %v2708_v6  ;;  %v927_v32 = vld [vmem:[%s2703_s14 + $0x68] sm:$0xff] }
 0x109   : > { %v1333_v58 = vmul.f32 %v1269_v11, %v1076_v40  ;;  %v1272_v27 = vadd.f32 1.0, %v2291_v22  ;;  %v2825_v29 = vpop.f32.mrb[15].mxu0  ;;  %v2827_v30 = vpop.f32.mrb[15].mxu1  ;;  %1365 = vst.msk [vmem:[%s2775_s24 + $0x10] sm:$0xff] %vm336_vm0, %v1301_v23  ;;  %v796_v40 = vadd.f32 %v2708_v6, %v2758_v21  ;;  %2308 = verf.f32 %v1115_v48 }
 0x10a   : > { %v2293_v12 = vpop.eup %2292  ;;  %v1304_v31 = vmul.f32 %v1240_v24, %v1047_v56  ;;  %v646_v63 = vadd.f32 %v2708_v6, %v2770_v41  ;;  %v1081_v5 = vmul.f32 0.5, %v2756_v19  ;;  %v1048_v10 = vmul.f32 0.5, %v2780_v45  ;;  %v956_v41 = vld [vmem:[%s2703_s14 + $0x150] sm:$0xff] }
 0x10b   : > { %v2295_v38 = vpop.eup %2294  ;;  %1397 = vst.msk [vmem:[%s2775_s24 + $0x110] sm:$0xff] %vm336_vm0, %v1333_v58  ;;  %v1336_v13 = vmul.f32 %v1272_v27, %v1079_v14  ;;  %v1239_v39 = vadd.f32 1.0, %v2293_v12  ;;  %v2846_v49 = vpop.f32.mrb[16].mxu0  ;;  %v2852_v52 = vadd.f32 %v954_v34, %v796_v40  ;;  %v1118_v11 = vmul.f32 0.70710677, %v2854_v36  ;;  %v959_v34 = vld [vmem:[%s2703_s14 + $0x168] sm:$0xff] }
 0x10c   : > { %v2297_v44 = vpop.eup %2296  ;;  %1368 = vst.msk [vmem:[%s2775_s24 + $0x28] sm:$0xff] %vm336_vm0, %v1304_v31  ;;  %v1271_v46 = vadd.f32 1.0, %v2295_v38  ;;  %v2848_v50 = vpop.f32.mrb[16].mxu1  ;;  %v2874_v37 = vadd.f32 %v957_v53, %v811_v62  ;;  %v2876_v14 = vadd.f32 %v924_v54, %v646_v63  ;;  %v806_v45 = vadd.f32 %v2708_v6, %v2772_v42 }
 0x10d   : > { %1400 = vst.msk [vmem:[%s2775_s24 + $0x128] sm:$0xff] %vm336_vm0, %v1336_v13  ;;  %v1303_v21 = vmul.f32 %v1239_v39, %v1046_v17  ;;  %v1242_v51 = vadd.f32 1.0, %v2297_v44  ;;  %v2858_v18 = vpop.f32.mrb[17].mxu0  ;;  %v2860_v55 = vpop.f32.mrb[17].mxu1  ;;  %v1147_v8 = vmul.f32 0.70710677, %v2852_v52  ;;  %v661_v42 = vadd.f32 %v2794_v60, %v2708_v6 }
 0x10e   : > { %v2299_v56 = vpop.eup %2298  ;;  %v1335_v59 = vmul.f32 %v1271_v46, %v1078_v28  ;;  %v1080_v17 = vmul.f32 0.5, %v2800_v0  ;;  %v1051_v25 = vmul.f32 0.5, %v2802_v1  ;;  %v1150_v58 = vmul.f32 0.70710677, %v2874_v37  ;;  %v926_v0 = vld [vmem:[%s2703_s14 + $0x60] sm:$0xff] }
 0x10f   : > { %1367 = vst.msk [vmem:[%s2775_s24 + $0x20] sm:$0xff] %vm336_vm0, %v1303_v21  ;;  %v1306_v4 = vmul.f32 %v1242_v51, %v1049_v47  ;;  %v1274_v7 = vadd.f32 1.0, %v2299_v56  ;;  %v2301_v9 = vpop.eup %2300  ;;  %v2879_v15 = vpop.f32.mrb[18].mxu0  ;;  %2310 = verf.f32 %v1147_v8  ;;  %v1117_v12 = vmul.f32 0.70710677, %v2876_v14  ;;  %v958_v56 = vld [vmem:[%s2703_s14 + $0x160] sm:$0xff] }
 0x110   : > { %1399 = vst.msk [vmem:[%s2775_s24 + $0x120] sm:$0xff] %vm336_vm0, %v1335_v59  ;;  %v2881_v16 = vpop.f32.mrb[18].mxu1  ;;  %v1241_v22 = vadd.f32 1.0, %v2301_v9  ;;  %v2887_v23 = vpop.f32.mrb[19].mxu0  ;;  %2312 = verf.f32 %v1118_v11  ;;  %v2897_v31 = vadd.f32 %v956_v41, %v806_v45  ;;  %v821_v38 = vadd.f32 %v2796_v61, %v2708_v6  ;;  %v929_v41 = vld [vmem:[%s2703_s14 + $0x78] sm:$0xff]  ;;  %v928_v45 = vld [vmem:[%s2703_s14 + $0x70] sm:$0xff] }
 0x111   : > { %1370 = vst.msk [vmem:[%s2775_s24 + $0x38] sm:$0xff] %vm336_vm0, %v1306_v4  ;;  %v1338_v19 = vmul.f32 %v1274_v7, %v1081_v5  ;;  %v2889_v24 = vpop.f32.mrb[19].mxu1  ;;  %v2303_v27 = vpop.eup %2302  ;;  %2314 = verf.f32 %v1150_v58  ;;  %v656_v13 = vadd.f32 %v2708_v6, %v2806_v57  ;;  %v1083_v43 = vmul.f32 0.5, %v2804_v2 }
 0x112   : > { %v1305_v28 = vmul.f32 %v1241_v22, %v1048_v10  ;;  %v2305_v35 = vpop.eup %2304  ;;  %v1273_v1 = vadd.f32 1.0, %v2303_v27  ;;  %2316 = verf.f32 %v1117_v12  ;;  %v1149_v44 = vmul.f32 0.70710677, %v2897_v31  ;;  %v961_v22 = vld [vmem:[%s2703_s14 + $0x178] sm:$0xff] }
 0x113   : > { %1402 = vst.msk [vmem:[%s2775_s24 + $0x138] sm:$0xff] %vm336_vm0, %v1338_v19  ;;  %v2908_v39 = vpop.f32.mrb[20].mxu0  ;;  %v1244_v60 = vadd.f32 1.0, %v2305_v35  ;;  %v2307_v57 = vpop.eup %2306  ;;  %v2920_v48 = vadd.f32 %v927_v32, %v661_v42  ;;  %v2922_v21 = vadd.f32 %v959_v34, %v821_v38  ;;  %v2924_v51 = vadd.f32 %v926_v0, %v656_v13 }
 0x114   : > { %v2910_v40 = vpop.f32.mrb[20].mxu1  ;;  %1369 = vst.msk [vmem:[%s2775_s24 + $0x30] sm:$0xff] %vm336_vm0, %v1305_v28  ;;  %v2916_v46 = vpop.f32.mrb[21].mxu0  ;;  %v1337_v47 = vmul.f32 %v1273_v1, %v1080_v17  ;;  %v1276_v54 = vadd.f32 1.0, %v2307_v57  ;;  %2318 = verf.f32 %v1149_v44  ;;  %v816_v2 = vadd.f32 %v2708_v6, %v2808_v3  ;;  %v960_v28 = vld [vmem:[%s2703_s14 + $0x170] sm:$0xff] }
 0x115   : > { %v2918_v61 = vpop.f32.mrb[21].mxu1  ;;  %v1308_v53 = vmul.f32 %v1244_v60, %v1051_v25  ;;  %v2309_v59 = vpop.eup %2308  ;;  %v1050_v62 = vmul.f32 0.5, %v2832_v33  ;;  %v1120_v63 = vmul.f32 0.70710677, %v2920_v48  ;;  %v1152_v4 = vmul.f32 0.70710677, %v2922_v21 }
 0x116   : > { %1401 = vst.msk [vmem:[%s2775_s24 + $0x130] sm:$0xff] %vm336_vm0, %v1337_v47  ;;  %v1340_v5 = vmul.f32 %v1276_v54, %v1083_v43  ;;  %v1243_v7 = vadd.f32 1.0, %v2309_v59  ;;  %v1082_v3 = vmul.f32 0.5, %v2852_v52  ;;  %v1119_v8 = vmul.f32 0.70710677, %v2924_v51 }
 0x117   : > { %1372 = vst.msk [vmem:[%s2775_s24 + $0x48] sm:$0xff] %vm336_vm0, %v1308_v53  ;;  %v2938_v9 = vpop.f32.mrb[22].mxu0  ;;  %2320 = verf.f32 %v1120_v63  ;;  %v2942_v33 = vadd.f32 %v958_v56, %v816_v2  ;;  %v671_v11 = vadd.f32 %v2818_v20, %v2708_v6  ;;  %v831_v19 = vadd.f32 %v2820_v26, %v2708_v6  ;;  %v931_v56 = vld [vmem:[%s2703_s14 + $0x88] sm:$0xff] }
 0x118   : > { %v2940_v10 = vpop.f32.mrb[22].mxu1  ;;  %v2951_v52 = vpop.f32.mrb[23].mxu0  ;;  %1404 = vst.msk [vmem:[%s2775_s24 + $0x148] sm:$0xff] %vm336_vm0, %v1340_v5  ;;  %v1307_v58 = vmul.f32 %v1243_v7, %v1050_v62  ;;  %2322 = verf.f32 %v1152_v4  ;;  %v666_v27 = vadd.f32 %v2708_v6, %v2825_v29  ;;  %v826_v20 = vadd.f32 %v2708_v6, %v2827_v30 }
 0x119   : > { %v2953_v17 = vpop.f32.mrb[23].mxu1  ;;  %v2311_v25 = vpop.eup %2310  ;;  %v1053_v42 = vmul.f32 0.5, %v2854_v36  ;;  %2324 = verf.f32 %v1119_v8  ;;  %v1151_v32 = vmul.f32 0.70710677, %v2942_v33  ;;  %v2970_v29 = vadd.f32 %v929_v41, %v671_v11 }
 0x11a   : > { %v2313_v26 = vpop.eup %2312  ;;  %v1275_v12 = vadd.f32 1.0, %v2311_v25  ;;  %1371 = vst.msk [vmem:[%s2775_s24 + $0x40] sm:$0xff] %vm336_vm0, %v1307_v58  ;;  %v2972_v30 = vadd.f32 %v961_v22, %v831_v19  ;;  %v2974_v1 = vadd.f32 %v928_v45, %v666_v27  ;;  %v1085_v43 = vmul.f32 0.5, %v2874_v37  ;;  %v963_v19 = vld [vmem:[%s2703_s14 + $0x188] sm:$0xff]  ;;  %v930_v58 = vld [vmem:[%s2703_s14 + $0x80] sm:$0xff] }
 0x11b   : > { %v2964_v34 = vpop.f32.mrb[24].mxu0  ;;  %v1246_v35 = vadd.f32 1.0, %v2313_v26  ;;  %v2315_v13 = vpop.eup %2314  ;;  %2326 = verf.f32 %v1151_v32  ;;  %v2981_v44 = vadd.f32 %v960_v28, %v826_v20  ;;  %v1122_v54 = vmul.f32 0.70710677, %v2970_v29  ;;  %v962_v27 = vld [vmem:[%s2703_s14 + $0x180] sm:$0xff]  ;;  %v933_v20 = vld [vmem:[%s2703_s14 + $0x98] sm:$0xff] }
 0x11c   : > { %v2966_v0 = vpop.f32.mrb[24].mxu1  ;;  %v2976_v38 = vpop.f32.mrb[25].mxu0  ;;  %v1339_v60 = vmul.f32 %v1275_v12, %v1082_v3  ;;  %v1278_v53 = vadd.f32 1.0, %v2315_v13  ;;  %v681_v2 = vadd.f32 %v2846_v49, %v2708_v6  ;;  %v1052_v59 = vmul.f32 0.5, %v2876_v14 }
 0x11d   : > { %v2978_v36 = vpop.f32.mrb[25].mxu1  ;;  %v2317_v57 = vpop.eup %2316  ;;  %v1310_v47 = vmul.f32 %v1246_v35, %v1053_v42  ;;  %v1084_v37 = vmul.f32 0.5, %v2897_v31  ;;  %v1154_v63 = vmul.f32 0.70710677, %v2972_v30  ;;  %v1055_v49 = vmul.f32 0.5, %v2920_v48 }
 0x11e   : > { %1403 = vst.msk [vmem:[%s2775_s24 + $0x140] sm:$0xff] %vm336_vm0, %v1339_v60  ;;  %v1245_v62 = vadd.f32 1.0, %v2317_v57  ;;  %v2319_v5 = vpop.eup %2318  ;;  %v1342_v7 = vmul.f32 %v1278_v53, %v1085_v43  ;;  %2328 = verf.f32 %v1122_v54  ;;  %v1121_v14 = vmul.f32 0.70710677, %v2974_v1 }
 0x11f   : > { %v2992_v4 = vpop.f32.mrb[26].mxu0  ;;  %1374 = vst.msk [vmem:[%s2775_s24 + $0x58] sm:$0xff] %vm336_vm0, %v1310_v47  ;;  %v1277_v11 = vadd.f32 1.0, %v2319_v5  ;;  %2330 = verf.f32 %v1154_v63  ;;  %v1153_v41 = vmul.f32 0.70710677, %v2981_v44  ;;  %v3008_v48 = vadd.f32 %v931_v56, %v681_v2 }
 0x120   : > { %v2998_v3 = vpop.f32.mrb[26].mxu1  ;;  %v3000_v31 = vpop.f32.mrb[27].mxu0  ;;  %v1309_v8 = vmul.f32 %v1245_v62, %v1052_v59  ;;  %1406 = vst.msk [vmem:[%s2775_s24 + $0x158] sm:$0xff] %vm336_vm0, %v1342_v7  ;;  %2332 = verf.f32 %v1121_v14  ;;  %v841_v45 = vadd.f32 %v2848_v50, %v2708_v6  ;;  %v676_v25 = vadd.f32 %v2708_v6, %v2858_v18  ;;  %v965_v62 = vld [vmem:[%s2703_s14 + $0x198] sm:$0xff] }
 0x121   : > { %v3004_v22 = vpop.f32.mrb[27].mxu1  ;;  %v2321_v28 = vpop.eup %2320  ;;  %v1341_v26 = vmul.f32 %v1277_v11, %v1084_v37  ;;  %2334 = verf.f32 %v1153_v41  ;;  %v836_v12 = vadd.f32 %v2708_v6, %v2860_v55  ;;  %v691_v42 = vadd.f32 %v2879_v15, %v2708_v6 }
 0x122   : > { %1373 = vst.msk [vmem:[%s2775_s24 + $0x50] sm:$0xff] %vm336_vm0, %v1309_v8  ;;  %v2323_v18 = vpop.eup %2322  ;;  %v1248_v35 = vadd.f32 1.0, %v2321_v28  ;;  %v1087_v13 = vmul.f32 0.5, %v2922_v21  ;;  %v1124_v60 = vmul.f32 0.70710677, %v3008_v48  ;;  %v3029_v43 = vadd.f32 %v963_v19, %v841_v45 }
 0x123   : > { %v3023_v32 = vpop.f32.mrb[28].mxu0  ;;  %v2325_v55 = vpop.eup %2324  ;;  %1405 = vst.msk [vmem:[%s2775_s24 + $0x150] sm:$0xff] %vm336_vm0, %v1341_v26  ;;  %v1280_v15 = vadd.f32 1.0, %v2323_v18  ;;  %v3037_v53 = vadd.f32 %v930_v58, %v676_v25  ;;  %v3039_v54 = vadd.f32 %v962_v27, %v836_v12  ;;  %v3041_v2 = vadd.f32 %v933_v20, %v691_v42  ;;  %v932_v27 = vld [vmem:[%s2703_s14 + $0x90] sm:$0xff] }
 0x124   : > { %v3025_v50 = vpop.f32.mrb[28].mxu1  ;;  %v3031_v57 = vpop.f32.mrb[29].mxu0  ;;  %v1312_v21 = vmul.f32 %v1248_v35, %v1055_v49  ;;  %v1054_v56 = vmul.f32 0.5, %v2924_v51  ;;  %v1247_v59 = vadd.f32 1.0, %v2325_v55  ;;  %2336 = verf.f32 %v1124_v60  ;;  %v964_v20 = vld [vmem:[%s2703_s14 + $0x190] sm:$0xff] }
 0x125   : > { %v3033_v47 = vpop.f32.mrb[29].mxu1  ;;  %v2327_v37 = vpop.eup %2326  ;;  %v1344_v63 = vmul.f32 %v1280_v15, %v1087_v13  ;;  %v1086_v5 = vmul.f32 0.5, %v2942_v33  ;;  %v1156_v7 = vmul.f32 0.70710677, %v3029_v43  ;;  %v1123_v14 = vmul.f32 0.70710677, %v3037_v53 }
 0x126   : > { %1376 = vst.msk [vmem:[%s2775_s24 + $0x68] sm:$0xff] %vm336_vm0, %v1312_v21  ;;  %v1311_v51 = vmul.f32 %v1247_v59, %v1054_v56  ;;  %v1279_v49 = vadd.f32 1.0, %v2327_v37  ;;  %v1057_v11 = vmul.f32 0.5, %v2970_v29  ;;  %v1155_v41 = vmul.f32 0.70710677, %v3039_v54 }
 0x127   : > { %v3048_v8 = vpop.f32.mrb[30].mxu0  ;;  %1408 = vst.msk [vmem:[%s2775_s24 + $0x168] sm:$0xff] %vm336_vm0, %v1344_v63  ;;  %v1089_v45 = vmul.f32 0.5, %v2972_v30  ;;  %2338 = verf.f32 %v1156_v7  ;;  %v1126_v25 = vmul.f32 0.70710677, %v3041_v2  ;;  %v851_v58 = vadd.f32 %v2881_v16, %v2708_v6 }
 0x128   : > { %v3054_v19 = vpop.f32.mrb[30].mxu1  ;;  %v3056_v33 = vpop.f32.mrb[31].mxu0  ;;  %1375 = vst.msk [vmem:[%s2775_s24 + $0x60] sm:$0xff] %vm336_vm0, %v1311_v51  ;;  %v1343_v26 = vmul.f32 %v1279_v49, %v1086_v5  ;;  %2340 = verf.f32 %v1123_v14  ;;  %v686_v12 = vadd.f32 %v2708_v6, %v2887_v23  ;;  %v846_v30 = vadd.f32 %v2708_v6, %v2889_v24  ;;  %v967_v51 = vld [vmem:[%s2703_s14 + $0x1a8] sm:$0xff] }
 0x129   : > { %v3066_v29 = vpop.f32.mrb[31].mxu1  ;;  %v2329_v28 = vpop.eup %2328  ;;  %2342 = verf.f32 %v1155_v41  ;;  %v3074_v16 = vadd.f32 %v965_v62, %v851_v58  ;;  %v701_v35 = vadd.f32 %v2908_v39, %v2708_v6  ;;  %v1056_v21 = vmul.f32 0.5, %v2974_v1  ;;  %v935_v39 = vld [vmem:[%s2703_s14 + $0xa8] sm:$0xff] }
 0x12a   : > { %v2331_v42 = vpop.eup %2330  ;;  %v1250_v18 = vadd.f32 1.0, %v2329_v28  ;;  %1407 = vst.msk [vmem:[%s2775_s24 + $0x160] sm:$0xff] %vm336_vm0, %v1343_v26  ;;  %2344 = verf.f32 %v1126_v25  ;;  %v3080_v55 = vadd.f32 %v932_v27, %v686_v12  ;;  %v3082_v23 = vadd.f32 %v964_v20, %v846_v30  ;;  %v966_v25 = vld [vmem:[%s2703_s14 + $0x1a0] sm:$0xff] }
 0x12b   : > { %v2333_v13 = vpop.eup %2332  ;;  %v1282_v60 = vadd.f32 1.0, %v2331_v42  ;;  %v1158_v59 = vmul.f32 0.70710677, %v3074_v16  ;;  %v1088_v37 = vmul.f32 0.5, %v2981_v44  ;;  %v1059_v14 = vmul.f32 0.5, %v3008_v48 }
 0x12c   : > { %v2335_v24 = vpop.eup %2334  ;;  %v1314_v15 = vmul.f32 %v1250_v18, %v1057_v11  ;;  %v1249_v56 = vadd.f32 1.0, %v2333_v13  ;;  %v1125_v5 = vmul.f32 0.70710677, %v3080_v55  ;;  %v1157_v1 = vmul.f32 0.70710677, %v3082_v23 }
 0x12d   : > { %v1346_v62 = vmul.f32 %v1282_v60, %v1089_v45  ;;  %v1281_v63 = vadd.f32 1.0, %v2335_v24  ;;  %2346 = verf.f32 %v1158_v59  ;;  %v3096_v44 = vadd.f32 %v935_v39, %v701_v35  ;;  %v934_v45 = vld [vmem:[%s2703_s14 + $0xa0] sm:$0xff] }
 0x12e   : > { %1378 = vst.msk [vmem:[%s2775_s24 + $0x78] sm:$0xff] %vm336_vm0, %v1314_v15  ;;  %v1313_v7 = vmul.f32 %v1249_v56, %v1056_v21  ;;  %v2337_v49 = vpop.eup %2336  ;;  %2348 = verf.f32 %v1125_v5  ;;  %v861_v41 = vadd.f32 %v2910_v40, %v2708_v6  ;;  %v696_v58 = vadd.f32 %v2708_v6, %v2916_v46  ;;  %v969_v56 = vld [vmem:[%s2703_s14 + $0x1b8] sm:$0xff] }
 0x12f   : > { %1410 = vst.msk [vmem:[%s2775_s24 + $0x178] sm:$0xff] %vm336_vm0, %v1346_v62  ;;  %v1345_v11 = vmul.f32 %v1281_v63, %v1088_v37  ;;  %v1252_v48 = vadd.f32 1.0, %v2337_v49  ;;  %2350 = verf.f32 %v1157_v1  ;;  %v856_v27 = vadd.f32 %v2708_v6, %v2918_v61  ;;  %v968_v1 = vld [vmem:[%s2703_s14 + $0x1b0] sm:$0xff] }
 0x130   : > { %1377 = vst.msk [vmem:[%s2775_s24 + $0x70] sm:$0xff] %vm336_vm0, %v1313_v7  ;;  %v1091_v20 = vmul.f32 0.5, %v3029_v43  ;;  %v1058_v40 = vmul.f32 0.5, %v3037_v53  ;;  %v1128_v28 = vmul.f32 0.70710677, %v3096_v44  ;;  %v3113_v26 = vadd.f32 %v967_v51, %v861_v41  ;;  %v937_v53 = vld [vmem:[%s2703_s14 + $0xb8] sm:$0xff] }
 0x131   : > { %1409 = vst.msk [vmem:[%s2775_s24 + $0x170] sm:$0xff] %vm336_vm0, %v1345_v11  ;;  %v2339_v12 = vpop.eup %2338  ;;  %v1316_v30 = vmul.f32 %v1252_v48, %v1059_v14  ;;  %v3115_v42 = vadd.f32 %v934_v45, %v696_v58  ;;  %v3117_v46 = vadd.f32 %v966_v25, %v856_v27  ;;  %v711_v61 = vadd.f32 %v2938_v9, %v2708_v6 }
 0x132   : > { %v2341_v18 = vpop.eup %2340  ;;  %v1284_v35 = vadd.f32 1.0, %v2339_v12  ;;  %2352 = verf.f32 %v1128_v28  ;;  %v1160_v43 = vmul.f32 0.70710677, %v3113_v26  ;;  %v871_v13 = vadd.f32 %v2940_v10, %v2708_v6  ;;  %v939_v28 = vld [vmem:[%s2703_s14 + $0xc8] sm:$0xff] }
 0x133   : > { %v2343_v60 = vpop.eup %2342  ;;  %1380 = vst.msk [vmem:[%s2775_s24 + $0x88] sm:$0xff] %vm336_vm0, %v1316_v30  ;;  %v1251_v24 = vadd.f32 1.0, %v2341_v18  ;;  %v1090_v15 = vmul.f32 0.5, %v3039_v54  ;;  %v1061_v21 = vmul.f32 0.5, %v3041_v2  ;;  %v1127_v9 = vmul.f32 0.70710677, %v3115_v42 }
 0x134   : > { %v2345_v59 = vpop.eup %2344  ;;  %v1348_v39 = vmul.f32 %v1284_v35, %v1091_v20  ;;  %v1283_v62 = vadd.f32 1.0, %v2343_v60  ;;  %2354 = verf.f32 %v1160_v43  ;;  %v1159_v10 = vmul.f32 0.70710677, %v3117_v46  ;;  %v936_v54 = vld [vmem:[%s2703_s14 + $0xb0] sm:$0xff] }
 0x135   : > { %v1315_v37 = vmul.f32 %v1251_v24, %v1058_v40  ;;  %v1254_v63 = vadd.f32 1.0, %v2345_v59  ;;  %2356 = verf.f32 %v1127_v9  ;;  %v3132_v5 = vadd.f32 %v937_v53, %v711_v61  ;;  %v971_v53 = vld [vmem:[%s2703_s14 + $0x1c8] sm:$0xff] }
 0x136   : > { %1412 = vst.msk [vmem:[%s2775_s24 + $0x188] sm:$0xff] %vm336_vm0, %v1348_v39  ;;  %v1347_v2 = vmul.f32 %v1283_v62, %v1090_v15  ;;  %2358 = verf.f32 %v1159_v10  ;;  %v3137_v7 = vadd.f32 %v969_v56, %v871_v13  ;;  %v706_v14 = vadd.f32 %v2708_v6, %v2951_v52  ;;  %v938_v15 = vld [vmem:[%s2703_s14 + $0xc0] sm:$0xff] }
 0x137   : > { %v2347_v51 = vpop.eup %2346  ;;  %1379 = vst.msk [vmem:[%s2775_s24 + $0x80] sm:$0xff] %vm336_vm0, %v1315_v37  ;;  %v1318_v49 = vmul.f32 %v1254_v63, %v1061_v21  ;;  %v1093_v11 = vmul.f32 0.5, %v3074_v16  ;;  %v1130_v41 = vmul.f32 0.70710677, %v3132_v5  ;;  %v866_v45 = vadd.f32 %v2708_v6, %v2953_v17  ;;  %v3182_v56 = vld [vmem:[%s3532_s2] ss:$0 sm:$0xff] }
 0x138   : > { %v2349_v25 = vpop.eup %2348  ;;  %1411 = vst.msk [vmem:[%s2775_s24 + $0x180] sm:$0xff] %vm336_vm0, %v1347_v2  ;;  %v1286_v48 = vadd.f32 1.0, %v2347_v51  ;;  %v1060_v58 = vmul.f32 0.5, %v3080_v55  ;;  %v1162_v52 = vmul.f32 0.70710677, %v3137_v7  ;;  %v3152_v27 = vadd.f32 %v936_v54, %v706_v14 }
 0x139   : > { %v2351_v20 = vpop.eup %2350  ;;  %1382 = vst.msk [vmem:[%s2775_s24 + $0x98] sm:$0xff] %vm336_vm0, %v1318_v49  ;;  %v1253_v16 = vadd.f32 1.0, %v2349_v25  ;;  %2360 = verf.f32 %v1130_v41  ;;  %v3156_v40 = vadd.f32 %v968_v1, %v866_v45  ;;  %v721_v17 = vadd.f32 %v2964_v34, %v2708_v6  ;;  %v941_v1 = vld [vmem:[%s2703_s14 + $0xd8] sm:$0xff] }
 0x13a   : > { %v1350_v12 = vmul.f32 %v1286_v48, %v1093_v11  ;;  %v1092_v55 = vmul.f32 0.5, %v3082_v23  ;;  %v1285_v30 = vadd.f32 1.0, %v2351_v20  ;;  %2362 = verf.f32 %v1162_v52  ;;  %v973_v25 = vld [vmem:[%s2703_s14 + $0x1d8] sm:$0xff]  ;;  %v940_v20 = vld [vmem:[%s2703_s14 + $0xd0] sm:$0xff] }
 0x13b   : > { %v1317_v61 = vmul.f32 %v1253_v16, %v1060_v58  ;;  %v1063_v18 = vmul.f32 0.5, %v3096_v44  ;;  %v1129_v35 = vmul.f32 0.70710677, %v3152_v27  ;;  %v1161_v43 = vmul.f32 0.70710677, %v3156_v40  ;;  %v970_v44 = vld [vmem:[%s2703_s14 + $0x1c0] sm:$0xff] }
 0x13c   : > { %v2353_v13 = vpop.eup %2352  ;;  %1414 = vst.msk [vmem:[%s2775_s24 + $0x198] sm:$0xff] %vm336_vm0, %v1350_v12  ;;  %v1349_v34 = vmul.f32 %v1285_v30, %v1092_v55  ;;  %v3168_v60 = vadd.f32 %v939_v28, %v721_v17  ;;  %v881_v23 = vadd.f32 %v2966_v0, %v2708_v6  ;;  %v716_v24 = vadd.f32 %v2708_v6, %v2976_v38  ;;  %v972_v16 = vld [vmem:[%s2703_s14 + $0x1d0] sm:$0xff] }
 0x13d   : > { %1381 = vst.msk [vmem:[%s2775_s24 + $0x90] sm:$0xff] %vm336_vm0, %v1317_v61  ;;  %v1256_v21 = vadd.f32 1.0, %v2353_v13  ;;  %v1095_v9 = vmul.f32 0.5, %v3113_v26  ;;  %2364 = verf.f32 %v1129_v35  ;;  %v876_v59 = vadd.f32 %v3182_v56, %v2978_v36 }
 0x13e   : > { %v2355_v0 = vpop.eup %2354  ;;  %1413 = vst.msk [vmem:[%s2775_s24 + $0x190] sm:$0xff] %vm336_vm0, %v1349_v34  ;;  %2366 = verf.f32 %v1161_v43  ;;  %v1132_v6 = vmul.f32 0.70710677, %v3168_v60  ;;  %v3189_v38 = vadd.f32 %v971_v53, %v881_v23  ;;  %v731_v26 = vadd.f32 %v3182_v56, %v2992_v4 }
 0x13f   : > { %v2357_v39 = vpop.eup %2356  ;;  %v1320_v62 = vmul.f32 %v1256_v21, %v1063_v18  ;;  %v1288_v10 = vadd.f32 1.0, %v2355_v0  ;;  %v3193_v37 = vadd.f32 %v938_v15, %v716_v24  ;;  %v3195_v63 = vadd.f32 %v970_v44, %v876_v59  ;;  %v975_v59 = vld [vmem:[%s2703_s14 + $0x1e8] sm:$0xff]  ;;  %v942_v0 = vld [vmem:[%s2703_s14 + $0xe0] sm:$0xff] }
 0x140   : > { %v2359_v36 = vpop.eup %2358  ;;  %v1062_v54 = vmul.f32 0.5, %v3115_v42  ;;  %v1255_v2 = vadd.f32 1.0, %v2357_v39  ;;  %2368 = verf.f32 %v1132_v6  ;;  %v1164_v14 = vmul.f32 0.70710677, %v3189_v38 }
 0x141   : > { %1384 = vst.msk [vmem:[%s2775_s24 + $0xa8] sm:$0xff] %vm336_vm0, %v1320_v62  ;;  %v1352_v4 = vmul.f32 %v1288_v10, %v1095_v9  ;;  %v1094_v51 = vmul.f32 0.5, %v3117_v46  ;;  %v1287_v49 = vadd.f32 1.0, %v2359_v36  ;;  %v1131_v11 = vmul.f32 0.70710677, %v3193_v37 }
 0x142   : > { %v1319_v41 = vmul.f32 %v1255_v2, %v1062_v54  ;;  %v1065_v42 = vmul.f32 0.5, %v3132_v5  ;;  %2370 = verf.f32 %v1164_v14  ;;  %v1163_v45 = vmul.f32 0.70710677, %v3195_v63 }
 0x143   : > { %v2361_v48 = vpop.eup %2360  ;;  %1416 = vst.msk [vmem:[%s2775_s24 + $0x1a8] sm:$0xff] %vm336_vm0, %v1352_v4  ;;  %v1351_v58 = vmul.f32 %v1287_v49, %v1094_v51  ;;  %2372 = verf.f32 %v1131_v11  ;;  %v3209_v52 = vadd.f32 %v941_v1, %v731_v26  ;;  %v891_v46 = vadd.f32 %v3182_v56, %v2998_v3  ;;  %v974_v4 = vld [vmem:[%s2703_s14 + $0x1e0] sm:$0xff]  ;;  %v945_v49 = vld [vmem:[%s2703_s14 + $0xf8] sm:$0xff] }
 0x144   : > { %v2363_v17 = vpop.eup %2362  ;;  %1383 = vst.msk [vmem:[%s2775_s24 + $0xa0] sm:$0xff] %vm336_vm0, %v1319_v41  ;;  %v1258_v5 = vadd.f32 1.0, %v2361_v48  ;;  %2374 = verf.f32 %v1163_v45  ;;  %v726_v28 = vadd.f32 %v3182_v56, %v3000_v31  ;;  %v886_v12 = vadd.f32 %v3182_v56, %v3004_v22  ;;  %v943_v22 = vld [vmem:[%s2703_s14 + $0xe8] sm:$0xff] }
 0x145   : > { %1415 = vst.msk [vmem:[%s2775_s24 + $0x1a0] sm:$0xff] %vm336_vm0, %v1351_v58  ;;  %v1097_v55 = vmul.f32 0.5, %v3137_v7  ;;  %v1290_v3 = vadd.f32 1.0, %v2363_v17  ;;  %v1134_v30 = vmul.f32 0.70710677, %v3209_v52  ;;  %v3225_v61 = vadd.f32 %v973_v25, %v891_v46  ;;  %v977_v25 = vld [vmem:[%s2703_s14 + $0x1f8] sm:$0xff] }
 0x146   : > { %v1322_v18 = vmul.f32 %v1258_v5, %v1065_v42  ;;  %v3227_v35 = vadd.f32 %v940_v20, %v726_v28  ;;  %v3229_v43 = vadd.f32 %v972_v16, %v886_v12  ;;  %v741_v31 = vadd.f32 %v3182_v56, %v3023_v32  ;;  %v944_v16 = vld [vmem:[%s2703_s14 + $0xf0] sm:$0xff] }
 0x147   : > { %v2365_v53 = vpop.eup %2364  ;;  %v1354_v13 = vmul.f32 %v1290_v3, %v1097_v55  ;;  %v1064_v7 = vmul.f32 0.5, %v3152_v27  ;;  %2376 = verf.f32 %v1134_v30  ;;  %v1166_v34 = vmul.f32 0.70710677, %v3225_v61 }
 0x148   : > { %v2367_v23 = vpop.eup %2366  ;;  %1386 = vst.msk [vmem:[%s2775_s24 + $0xb8] sm:$0xff] %vm336_vm0, %v1322_v18  ;;  %v1257_v24 = vadd.f32 1.0, %v2365_v53  ;;  %v1096_v15 = vmul.f32 0.5, %v3156_v40  ;;  %v1067_v44 = vmul.f32 0.5, %v3168_v60  ;;  %v1133_v32 = vmul.f32 0.70710677, %v3227_v35 }
 0x149   : > { %1418 = vst.msk [vmem:[%s2775_s24 + $0x1b8] sm:$0xff] %vm336_vm0, %v1354_v13  ;;  %v1289_v21 = vadd.f32 1.0, %v2367_v23  ;;  %2378 = verf.f32 %v1166_v34  ;;  %v1165_v27 = vmul.f32 0.70710677, %v3229_v43  ;;  %v3244_v9 = vadd.f32 %v943_v22, %v741_v31 }
 0x14a   : > { %v2369_v6 = vpop.eup %2368  ;;  %v1321_v26 = vmul.f32 %v1257_v24, %v1064_v7  ;;  %2380 = verf.f32 %v1133_v32  ;;  %v901_v40 = vadd.f32 %v3182_v56, %v3025_v50  ;;  %v736_v60 = vadd.f32 %v3182_v56, %v3031_v57  ;;  %v976_v7 = vld [vmem:[%s2703_s14 + $0x1f0] sm:$0xff] }
 0x14b   : > { %v1353_v39 = vmul.f32 %v1289_v21, %v1096_v15  ;;  %v1260_v62 = vadd.f32 1.0, %v2369_v6  ;;  %v1099_v10 = vmul.f32 0.5, %v3189_v38  ;;  %2382 = verf.f32 %v1165_v27 }
 0x14c   : > { %v2371_v36 = vpop.eup %2370  ;;  %1385 = vst.msk [vmem:[%s2775_s24 + $0xb0] sm:$0xff] %vm336_vm0, %v1321_v26  ;;  %v1136_v54 = vmul.f32 0.70710677, %v3244_v9  ;;  %v3256_v2 = vadd.f32 %v975_v59, %v901_v40  ;;  %v3258_v14 = vadd.f32 %v942_v0, %v736_v60  ;;  %v896_v50 = vadd.f32 %v3182_v56, %v3033_v47 }
 0x14d   : > { %v2373_v57 = vpop.eup %2372  ;;  %1417 = vst.msk [vmem:[%s2775_s24 + $0x1b0] sm:$0xff] %vm336_vm0, %v1353_v39  ;;  %v1324_v1 = vmul.f32 %v1260_v62, %v1067_v44  ;;  %v1292_v38 = vadd.f32 1.0, %v2371_v36  ;;  %v751_v51 = vadd.f32 %v3182_v56, %v3048_v8  ;;  %v911_v11 = vadd.f32 %v3182_v56, %v3054_v19 }
 0x14e   : > { %v2375_v41 = vpop.eup %2374  ;;  %v1066_v42 = vmul.f32 0.5, %v3193_v37  ;;  %v1259_v45 = vadd.f32 1.0, %v2373_v57  ;;  %2384 = verf.f32 %v1136_v54  ;;  %v1168_v47 = vmul.f32 0.70710677, %v3256_v2 }
 0x14f   : > { %1388 = vst.msk [vmem:[%s2775_s24 + $0xc8] sm:$0xff] %vm336_vm0, %v1324_v1  ;;  %v1356_v48 = vmul.f32 %v1292_v38, %v1099_v10  ;;  %v1098_v8 = vmul.f32 0.5, %v3195_v63  ;;  %v1291_v58 = vadd.f32 1.0, %v2375_v41  ;;  %v1135_v46 = vmul.f32 0.70710677, %v3258_v14 }
 0x150   : > { %v1323_v19 = vmul.f32 %v1259_v45, %v1066_v42  ;;  %2386 = verf.f32 %v1168_v47  ;;  %v1038_v20 = vadd.f32 %v974_v4, %v896_v50  ;;  %v3277_v37 = vadd.f32 %v945_v49, %v751_v51 }
 0x151   : > { %v2377_v17 = vpop.eup %2376  ;;  %1420 = vst.msk [vmem:[%s2775_s24 + $0x1c8] sm:$0xff] %vm336_vm0, %v1356_v48  ;;  %v1355_v5 = vmul.f32 %v1291_v58, %v1098_v8  ;;  %2388 = verf.f32 %v1135_v46  ;;  %v1041_v28 = vadd.f32 %v977_v25, %v911_v11  ;;  %v746_v63 = vadd.f32 %v3182_v56, %v3056_v33 }
 0x152   : > { %1387 = vst.msk [vmem:[%s2775_s24 + $0xc0] sm:$0xff] %vm336_vm0, %v1323_v19  ;;  %v1069_v12 = vmul.f32 0.5, %v3209_v52  ;;  %v1262_v55 = vadd.f32 1.0, %v2377_v17  ;;  %v1101_v3 = vmul.f32 0.5, %v3225_v61  ;;  %v1167_v30 = vmul.f32 0.70710677, %v1038_v20 }
 0x153   : > { %v2379_v18 = vpop.eup %2378  ;;  %1419 = vst.msk [vmem:[%s2775_s24 + $0x1c0] sm:$0xff] %vm336_vm0, %v1355_v5  ;;  %v1068_v31 = vmul.f32 0.5, %v3227_v35  ;;  %v1138_v22 = vmul.f32 0.70710677, %v3277_v37  ;;  %v1170_v53 = vmul.f32 0.70710677, %v1041_v28  ;;  %v1008_v13 = vadd.f32 %v944_v16, %v746_v63 }
 0x154   : > { %v2381_v33 = vpop.eup %2380  ;;  %v1326_v34 = vmul.f32 %v1262_v55, %v1069_v12  ;;  %v1294_v23 = vadd.f32 1.0, %v2379_v18  ;;  %2390 = verf.f32 %v1167_v30  ;;  %v906_v52 = vadd.f32 %v3182_v56, %v3066_v29 }
 0x155   : > { %v2383_v61 = vpop.eup %2382  ;;  %v1261_v24 = vadd.f32 1.0, %v2381_v33  ;;  %v1100_v15 = vmul.f32 0.5, %v3229_v43  ;;  %2392 = verf.f32 %v1138_v22  ;;  %v1137_v35 = vmul.f32 0.70710677, %v1008_v13 }
 0x156   : > { %1390 = vst.msk [vmem:[%s2775_s24 + $0xd8] sm:$0xff] %vm336_vm0, %v1326_v34  ;;  %v1358_v44 = vmul.f32 %v1294_v23, %v1101_v3  ;;  %v1293_v32 = vadd.f32 1.0, %v2383_v61  ;;  %2394 = verf.f32 %v1170_v53  ;;  %v1040_v21 = vadd.f32 %v976_v7, %v906_v52 }
 0x157   : > { %v1325_v27 = vmul.f32 %v1261_v24, %v1068_v31  ;;  %2396 = verf.f32 %v1137_v35  ;;  %v1071_v43 = vmul.f32 0.5, %v3244_v9  ;;  %v1103_v60 = vmul.f32 0.5, %v3256_v2 }
 0x158   : > { %v2385_v59 = vpop.eup %2384  ;;  %1422 = vst.msk [vmem:[%s2775_s24 + $0x1d8] sm:$0xff] %vm336_vm0, %v1358_v44  ;;  %v1357_v29 = vmul.f32 %v1293_v32, %v1100_v15  ;;  %v1169_v56 = vmul.f32 0.70710677, %v1040_v21  ;;  %v1070_v62 = vmul.f32 0.5, %v3258_v14  ;;  %v1102_v57 = vmul.f32 0.5, %v1038_v20 }
 0x159   : > { %1389 = vst.msk [vmem:[%s2775_s24 + $0xd0] sm:$0xff] %vm336_vm0, %v1325_v27  ;;  %v1264_v0 = vadd.f32 1.0, %v2385_v59  ;;  %v1073_v2 = vmul.f32 0.5, %v3277_v37  ;;  %v1105_v49 = vmul.f32 0.5, %v1041_v28  ;;  %v1072_v42 = vmul.f32 0.5, %v1008_v13 }
 0x15a   : > { %v2387_v6 = vpop.eup %2386  ;;  %1421 = vst.msk [vmem:[%s2775_s24 + $0x1d0] sm:$0xff] %vm336_vm0, %v1357_v29  ;;  %2398 = verf.f32 %v1169_v56  ;;  %v1104_v8 = vmul.f32 0.5, %v1040_v21 }
 0x15b   : > { %v2389_v26 = vpop.eup %2388  ;;  %v1328_v40 = vmul.f32 %v1264_v0, %v1071_v43  ;;  %v1296_v39 = vadd.f32 1.0, %v2387_v6 }
 0x15c   : > { %v1263_v10 = vadd.f32 1.0, %v2389_v26 }
 0x15d   : > { %1392 = vst.msk [vmem:[%s2775_s24 + $0xe8] sm:$0xff] %vm336_vm0, %v1328_v40  ;;  %v1360_v36 = vmul.f32 %v1296_v39, %v1103_v60 }
 0x15e   : > { %v2391_v54 = vpop.eup %2390  ;;  %v1327_v9 = vmul.f32 %v1263_v10, %v1070_v62 }
 0x15f   : > { %v2393_v50 = vpop.eup %2392  ;;  %1424 = vst.msk [vmem:[%s2775_s24 + $0x1e8] sm:$0xff] %vm336_vm0, %v1360_v36  ;;  %v1295_v1 = vadd.f32 1.0, %v2391_v54 }
 0x160   : > { %v2395_v38 = vpop.eup %2394  ;;  %1391 = vst.msk [vmem:[%s2775_s24 + $0xe0] sm:$0xff] %vm336_vm0, %v1327_v9  ;;  %v1266_v14 = vadd.f32 1.0, %v2393_v50 }
 0x161   : > { %v2397_v4 = vpop.eup %2396  ;;  %v1359_v51 = vmul.f32 %v1295_v1, %v1102_v57  ;;  %v1298_v11 = vadd.f32 1.0, %v2395_v38 }
 0x162   : > { %v1330_v41 = vmul.f32 %v1266_v14, %v1073_v2  ;;  %v1265_v45 = vadd.f32 1.0, %v2397_v4 }
 0x163   : > { %1423 = vst.msk [vmem:[%s2775_s24 + $0x1e0] sm:$0xff] %vm336_vm0, %v1359_v51  ;;  %v1362_v47 = vmul.f32 %v1298_v11, %v1105_v49  ;;  %1433 = sbr.rel (!%p2539_p4) target bundleno = 434 (0x1b2), region = 40 }
 0x164   : > { %v2399_v25 = vpop.eup %2398  ;;  %1394 = vst.msk [vmem:[%s2775_s24 + $0xf8] sm:$0xff] %vm336_vm0, %v1330_v41  ;;  %v1329_v48 = vmul.f32 %v1265_v45, %v1072_v42 }
 0x165   : > { %1426 = vst.msk [vmem:[%s2775_s24 + $0x1f8] sm:$0xff] %vm336_vm0, %v1362_v47  ;;  %v1297_v58 = vadd.f32 1.0, %v2399_v25 }
 0x166   : > { %1393 = vst.msk [vmem:[%s2775_s24 + $0xf0] sm:$0xff] %vm336_vm0, %v1329_v48 }
 0x167   : > { %v1361_v46 = vmul.f32 %v1297_v58, %v1104_v8 }
 0x169   : > { %1425 = vst.msk [vmem:[%s2775_s24 + $0x1f0] sm:$0xff] %vm336_vm0, %v1361_v46 }
 0x16a   : > { %s3545_s27 = smov (!%p1436_p8, %s1435_s27), 64 }
 0x16b   : > { %s1982_s7 = sshll.u32 %s3545_s27, 7 }
 0x16c   : > { %p1985_p9 = scmp.eq.s32.totalorder %s1982_s7, 0 }
 0x16d   : > { %s3337_s8 = sshrl.u32 (!%p1985_p9), %s3545_s27, 6 }
 0x16e   : > { %1444 = sbr.rel (%p1985_p9) target bundleno = 434 (0x1b2), region = 44  ;;  %p1986_p10 = scmp.le.s32.totalorder (!%p1985_p9), %s3337_s8, 0 }
 0x175   : > { %1856 = sbr.rel (%p1986_p10) target bundleno = 413 (0x19d), region = 123  ;;  %s3536_s18 = smov (!%p1986_p10), %s3331_s6 }
 0x176   : > { %s3537_s23 = smov (!%p1986_p10), %s2775_s24  ;;  %s3346_s30 = smov (!%p1986_p10), 0  }
 0x177   : > { %s3348_s9 = smov (!%p1986_p10), 0  }
 0x17c LB: >> { %v1632_v19 = vld [vmem:[%s2463_s23] sm:$0xff]  ;;  %v1634_v20 = vld [vmem:[%s2463_s23 + $0x8] sm:$0xff]  ;;  %v1636_v37 = vld [vmem:[%s2463_s23 + $0x10] sm:$0xff]  ;;  %s1760_s10 = sadd.s32 1, %s2467_s30  ;;  %s1626_s9 = sadd.s32 1, %s2471_s9   ;;  %s2471_s9 = sphi %s3348_s9, %s1626_s9   ;;  %s2467_s30 = sphi %s3346_s30, %s3540_s30   ;;  %s2463_s23 = sphi %s3537_s23, %s3539_s23   ;;  %s2459_s18 = sphi %s3536_s18, %s3538_s18  }
 0x17d   : >> { %1633 = vst [vmem:[%s2459_s18] sm:$0xff] %v1632_v19  ;;  %1635 = vst [vmem:[%s2459_s18 + $0x8] sm:$0xff] %v1634_v20  ;;  %v1638_v16 = vld [vmem:[%s2463_s23 + $0x18] sm:$0xff]  ;;  %v1640_v17 = vld [vmem:[%s2463_s23 + $0x20] sm:$0xff]  ;;  %p1761_p11 = scmp.ge.s32.totalorder %s1760_s10, %s3337_s8  ;;  %p1625_p12 = scmp.ge.s32.totalorder %s1626_s9, %s3337_s8 }
 0x17e   : >> { %1637 = vst [vmem:[%s2459_s18 + $0x10] sm:$0xff] %v1636_v37  ;;  %v1642_v5 = vld [vmem:[%s2463_s23 + $0x28] sm:$0xff]  ;;  %1639 = vst [vmem:[%s2459_s18 + $0x18] sm:$0xff] %v1638_v16  ;;  %v1644_v28 = vld [vmem:[%s2463_s23 + $0x30] sm:$0xff] }
 0x17f   : >> { %1641 = vst [vmem:[%s2459_s18 + $0x20] sm:$0xff] %v1640_v17  ;;  %1643 = vst [vmem:[%s2459_s18 + $0x28] sm:$0xff] %v1642_v5  ;;  %v1646_v63 = vld [vmem:[%s2463_s23 + $0x38] sm:$0xff]  ;;  %v1648_v12 = vld [vmem:[%s2463_s23 + $0x40] sm:$0xff]  ;;  %s3547_s10 = smov (%p1761_p11, %s1760_s10), 0 }
 0x180   : >> { %1645 = vst [vmem:[%s2459_s18 + $0x30] sm:$0xff] %v1644_v28  ;;  %1647 = vst [vmem:[%s2459_s18 + $0x38] sm:$0xff] %v1646_v63  ;;  %v1650_v55 = vld [vmem:[%s2463_s23 + $0x48] sm:$0xff]  ;;  %v1652_v3 = vld [vmem:[%s2463_s23 + $0x50] sm:$0xff]  ;;  %s1987_s11 = sshll.u32 %s3547_s10, 9  ;;  %s3540_s30 = smov %s3547_s10 }
 0x181   : >> { %1649 = vst [vmem:[%s2459_s18 + $0x40] sm:$0xff] %v1648_v12  ;;  %v1654_v30 = vld [vmem:[%s2463_s23 + $0x58] sm:$0xff]  ;;  %1651 = vst [vmem:[%s2459_s18 + $0x48] sm:$0xff] %v1650_v55  ;;  %v1656_v18 = vld [vmem:[%s2463_s23 + $0x60] sm:$0xff]  ;;  %s3404_s12 = scalar_lea.vmem %s2775_s24, %s1987_s11 [#allocation2]   ;;  %s3407_s13 = scalar_lea.vmem %s3331_s6, %s1987_s11  }
 0x182   : >> { %1653 = vst [vmem:[%s2459_s18 + $0x50] sm:$0xff] %v1652_v3  ;;  %1655 = vst [vmem:[%s2459_s18 + $0x58] sm:$0xff] %v1654_v30  ;;  %v1658_v31 = vld [vmem:[%s2463_s23 + $0x68] sm:$0xff]  ;;  %v1660_v22 = vld [vmem:[%s2463_s23 + $0x70] sm:$0xff] }
 0x183   : >> { %1657 = vst [vmem:[%s2459_s18 + $0x60] sm:$0xff] %v1656_v18  ;;  %1659 = vst [vmem:[%s2459_s18 + $0x68] sm:$0xff] %v1658_v31  ;;  %v1662_v53 = vld [vmem:[%s2463_s23 + $0x78] sm:$0xff]  ;;  %v1664_v13 = vld [vmem:[%s2463_s23 + $0x80] sm:$0xff] }
 0x184   : >> { %1661 = vst [vmem:[%s2459_s18 + $0x70] sm:$0xff] %v1660_v22  ;;  %v1666_v7 = vld [vmem:[%s2463_s23 + $0x88] sm:$0xff]  ;;  %1663 = vst [vmem:[%s2459_s18 + $0x78] sm:$0xff] %v1662_v53  ;;  %v1668_v33 = vld [vmem:[%s2463_s23 + $0x90] sm:$0xff] }
 0x185   : >> { %1665 = vst [vmem:[%s2459_s18 + $0x80] sm:$0xff] %v1664_v13  ;;  %1667 = vst [vmem:[%s2459_s18 + $0x88] sm:$0xff] %v1666_v7  ;;  %v1670_v34 = vld [vmem:[%s2463_s23 + $0x98] sm:$0xff]  ;;  %v1672_v23 = vld [vmem:[%s2463_s23 + $0xa0] sm:$0xff] }
 0x186   : >> { %1669 = vst [vmem:[%s2459_s18 + $0x90] sm:$0xff] %v1668_v33  ;;  %1671 = vst [vmem:[%s2459_s18 + $0x98] sm:$0xff] %v1670_v34  ;;  %v1674_v52 = vld [vmem:[%s2463_s23 + $0xa8] sm:$0xff]  ;;  %v1676_v61 = vld [vmem:[%s2463_s23 + $0xb0] sm:$0xff] }
 0x187   : >> { %1673 = vst [vmem:[%s2459_s18 + $0xa0] sm:$0xff] %v1672_v23  ;;  %v1678_v24 = vld [vmem:[%s2463_s23 + $0xb8] sm:$0xff]  ;;  %1675 = vst [vmem:[%s2459_s18 + $0xa8] sm:$0xff] %v1674_v52  ;;  %v1680_v15 = vld [vmem:[%s2463_s23 + $0xc0] sm:$0xff] }
 0x188   : >> { %1677 = vst [vmem:[%s2459_s18 + $0xb0] sm:$0xff] %v1676_v61  ;;  %1679 = vst [vmem:[%s2459_s18 + $0xb8] sm:$0xff] %v1678_v24  ;;  %v1682_v35 = vld [vmem:[%s2463_s23 + $0xc8] sm:$0xff]  ;;  %v1684_v44 = vld [vmem:[%s2463_s23 + $0xd0] sm:$0xff] }
 0x189   : >> { %1681 = vst [vmem:[%s2459_s18 + $0xc0] sm:$0xff] %v1680_v15  ;;  %1683 = vst [vmem:[%s2459_s18 + $0xc8] sm:$0xff] %v1682_v35  ;;  %v1686_v32 = vld [vmem:[%s2463_s23 + $0xd8] sm:$0xff]  ;;  %v1688_v21 = vld [vmem:[%s2463_s23 + $0xe0] sm:$0xff] }
 0x18a   : >> { %1685 = vst [vmem:[%s2459_s18 + $0xd0] sm:$0xff] %v1684_v44  ;;  %v1690_v27 = vld [vmem:[%s2463_s23 + $0xe8] sm:$0xff]  ;;  %1687 = vst [vmem:[%s2459_s18 + $0xd8] sm:$0xff] %v1686_v32  ;;  %v1692_v59 = vld [vmem:[%s2463_s23 + $0xf0] sm:$0xff] }
 0x18b   : >> { %1689 = vst [vmem:[%s2459_s18 + $0xe0] sm:$0xff] %v1688_v21  ;;  %1691 = vst [vmem:[%s2459_s18 + $0xe8] sm:$0xff] %v1690_v27  ;;  %v1694_v29 = vld [vmem:[%s2463_s23 + $0xf8] sm:$0xff]  ;;  %v1696_v56 = vld [vmem:[%s2463_s23 + $0x100] sm:$0xff] }
 0x18c   : >> { %1693 = vst [vmem:[%s2459_s18 + $0xf0] sm:$0xff] %v1692_v59  ;;  %1695 = vst [vmem:[%s2459_s18 + $0xf8] sm:$0xff] %v1694_v29  ;;  %v1698_v43 = vld [vmem:[%s2463_s23 + $0x108] sm:$0xff]  ;;  %v1700_v0 = vld [vmem:[%s2463_s23 + $0x110] sm:$0xff] }
 0x18d   : >> { %1697 = vst [vmem:[%s2459_s18 + $0x100] sm:$0xff] %v1696_v56  ;;  %v1702_v6 = vld [vmem:[%s2463_s23 + $0x118] sm:$0xff]  ;;  %1699 = vst [vmem:[%s2459_s18 + $0x108] sm:$0xff] %v1698_v43  ;;  %v1704_v26 = vld [vmem:[%s2463_s23 + $0x120] sm:$0xff] }
 0x18e   : >> { %1701 = vst [vmem:[%s2459_s18 + $0x110] sm:$0xff] %v1700_v0  ;;  %1703 = vst [vmem:[%s2459_s18 + $0x118] sm:$0xff] %v1702_v6  ;;  %v1706_v40 = vld [vmem:[%s2463_s23 + $0x128] sm:$0xff]  ;;  %v1708_v60 = vld [vmem:[%s2463_s23 + $0x130] sm:$0xff] }
 0x18f   : >> { %1705 = vst [vmem:[%s2459_s18 + $0x120] sm:$0xff] %v1704_v26  ;;  %1707 = vst [vmem:[%s2459_s18 + $0x128] sm:$0xff] %v1706_v40  ;;  %v1710_v39 = vld [vmem:[%s2463_s23 + $0x138] sm:$0xff]  ;;  %v1712_v62 = vld [vmem:[%s2463_s23 + $0x140] sm:$0xff] }
 0x190   : >> { %1709 = vst [vmem:[%s2459_s18 + $0x130] sm:$0xff] %v1708_v60  ;;  %v1714_v10 = vld [vmem:[%s2463_s23 + $0x148] sm:$0xff]  ;;  %1711 = vst [vmem:[%s2459_s18 + $0x138] sm:$0xff] %v1710_v39  ;;  %v1716_v36 = vld [vmem:[%s2463_s23 + $0x150] sm:$0xff] }
 0x191   : >> { %1713 = vst [vmem:[%s2459_s18 + $0x140] sm:$0xff] %v1712_v62  ;;  %1715 = vst [vmem:[%s2459_s18 + $0x148] sm:$0xff] %v1714_v10  ;;  %v1718_v54 = vld [vmem:[%s2463_s23 + $0x158] sm:$0xff]  ;;  %v1720_v9 = vld [vmem:[%s2463_s23 + $0x160] sm:$0xff] }
 0x192   : >> { %1717 = vst [vmem:[%s2459_s18 + $0x150] sm:$0xff] %v1716_v36  ;;  %1719 = vst [vmem:[%s2459_s18 + $0x158] sm:$0xff] %v1718_v54  ;;  %v1722_v50 = vld [vmem:[%s2463_s23 + $0x168] sm:$0xff]  ;;  %v1724_v57 = vld [vmem:[%s2463_s23 + $0x170] sm:$0xff] }
 0x193   : >> { %1721 = vst [vmem:[%s2459_s18 + $0x160] sm:$0xff] %v1720_v9  ;;  %v1726_v1 = vld [vmem:[%s2463_s23 + $0x178] sm:$0xff]  ;;  %1723 = vst [vmem:[%s2459_s18 + $0x168] sm:$0xff] %v1722_v50  ;;  %v1728_v38 = vld [vmem:[%s2463_s23 + $0x180] sm:$0xff] }
 0x194   : >> { %1725 = vst [vmem:[%s2459_s18 + $0x170] sm:$0xff] %v1724_v57  ;;  %1727 = vst [vmem:[%s2459_s18 + $0x178] sm:$0xff] %v1726_v1  ;;  %v1730_v2 = vld [vmem:[%s2463_s23 + $0x188] sm:$0xff]  ;;  %v1732_v14 = vld [vmem:[%s2463_s23 + $0x190] sm:$0xff] }
 0x195   : >> { %1729 = vst [vmem:[%s2459_s18 + $0x180] sm:$0xff] %v1728_v38  ;;  %1731 = vst [vmem:[%s2459_s18 + $0x188] sm:$0xff] %v1730_v2  ;;  %v1734_v4 = vld [vmem:[%s2463_s23 + $0x198] sm:$0xff]  ;;  %v1736_v51 = vld [vmem:[%s2463_s23 + $0x1a0] sm:$0xff] }
 0x196   : >> { %1733 = vst [vmem:[%s2459_s18 + $0x190] sm:$0xff] %v1732_v14  ;;  %v1738_v49 = vld [vmem:[%s2463_s23 + $0x1a8] sm:$0xff]  ;;  %1735 = vst [vmem:[%s2459_s18 + $0x198] sm:$0xff] %v1734_v4  ;;  %v1740_v11 = vld [vmem:[%s2463_s23 + $0x1b0] sm:$0xff]  ;;  %1628 = sbr.rel (!%p1625_p12) target bundleno = 380 (0x17c), region = 129 }
 0x197   : >> { %1737 = vst [vmem:[%s2459_s18 + $0x1a0] sm:$0xff] %v1736_v51  ;;  %1739 = vst [vmem:[%s2459_s18 + $0x1a8] sm:$0xff] %v1738_v49  ;;  %v1742_v41 = vld [vmem:[%s2463_s23 + $0x1b8] sm:$0xff]  ;;  %v1744_v42 = vld [vmem:[%s2463_s23 + $0x1c0] sm:$0xff] }
 0x198   : >> { %1741 = vst [vmem:[%s2459_s18 + $0x1b0] sm:$0xff] %v1740_v11  ;;  %1743 = vst [vmem:[%s2459_s18 + $0x1b8] sm:$0xff] %v1742_v41  ;;  %v1746_v45 = vld [vmem:[%s2463_s23 + $0x1c8] sm:$0xff]  ;;  %v1748_v47 = vld [vmem:[%s2463_s23 + $0x1d0] sm:$0xff] }
 0x199   : >> { %1745 = vst [vmem:[%s2459_s18 + $0x1c0] sm:$0xff] %v1744_v42  ;;  %v1750_v25 = vld [vmem:[%s2463_s23 + $0x1d8] sm:$0xff]  ;;  %1747 = vst [vmem:[%s2459_s18 + $0x1c8] sm:$0xff] %v1746_v45  ;;  %v1752_v48 = vld [vmem:[%s2463_s23 + $0x1e0] sm:$0xff] }
 0x19a   : >> { %1749 = vst [vmem:[%s2459_s18 + $0x1d0] sm:$0xff] %v1748_v47  ;;  %1751 = vst [vmem:[%s2459_s18 + $0x1d8] sm:$0xff] %v1750_v25  ;;  %v1754_v8 = vld [vmem:[%s2463_s23 + $0x1e8] sm:$0xff]  ;;  %v1756_v58 = vld [vmem:[%s2463_s23 + $0x1f0] sm:$0xff] }
 0x19b   : >> { %1753 = vst [vmem:[%s2459_s18 + $0x1e0] sm:$0xff] %v1752_v48  ;;  %1755 = vst [vmem:[%s2459_s18 + $0x1e8] sm:$0xff] %v1754_v8  ;;  %v1758_v46 = vld [vmem:[%s2463_s23 + $0x1f8] sm:$0xff]  ;;  %s3539_s23 = smov %s3404_s12 }
 0x19c   : >> { %1757 = vst [vmem:[%s2459_s18 + $0x1f0] sm:$0xff] %v1756_v58  ;;  %1759 = vst [vmem:[%s2459_s18 + $0x1f8] sm:$0xff] %v1758_v46  ;;  %s3538_s18 = smov %s3407_s13 }
 0x19d PF: > { %s3512_s14 = sand.u32 63, %s3545_s27   ;;  %s1998_s17 = sshll.u32 %s3337_s8, 9 }
 0x19e   : > { %s1771_s20 = scalar_lea.vmem %s2775_s24, %s1998_s17 [#allocation2]   ;;  %s1773_s21 = scalar_lea.vmem %s3331_s6, %s1998_s17  }
 0x19f   : > { %p1992_p13 = scmp.le.s32.totalorder %s3512_s14, 0 }
 0x1a0   : > { %s2473_s15 = smov (!%p1992_p13), %s1773_s21   ;;  %s2477_s25 = smov (!%p1992_p13), %s1771_s20  }
 0x1a1   : > { %1870 = sbr.rel (%p1992_p13) target bundleno = 434 (0x1b2), region = 134  ;;  %s2481_s26 = smov (!%p1992_p13), 0  }
 0x1a2   : > { %s2485_s28 = smov (!%p1992_p13), 0  }
 0x1a8 LB: >> { %v1783_v19 = vld [vmem:[%s2479_s25] sm:$0xff]  ;;  %s1785_s27 = sadd.s32 1, %s2483_s26  ;;  %s1777_s28 = sadd.s32 1, %s2487_s28   ;;  %s2487_s28 = sphi %s2485_s28, %s1777_s28   ;;  %s2483_s26 = sphi %s2481_s26, %s2482_s26   ;;  %s2479_s25 = sphi %s2477_s25, %s1790_s25   ;;  %s2475_s15 = sphi %s2473_s15, %s1791_s15  }
 0x1a9   : >> { %1784 = vst [vmem:[%s2475_s15] sm:$0xff] %v1783_v19  ;;  %p1786_p0 = scmp.ge.s32.totalorder %s1785_s27, %s3512_s14  ;;  %p1776_p1 = scmp.ge.s32.totalorder %s1777_s28, %s3512_s14 }
 0x1ab   : >> { %s3549_s27 = smov (%p1786_p0, %s1785_s27), 0  ;;  %1779 = sbr.rel (!%p1776_p1) target bundleno = 424 (0x1a8), region = 140 }
 0x1ac   : >> { %s1993_s24 = sshll.u32 %s3549_s27, 3  ;;  %s2482_s26 = smov %s3549_s27  }
 0x1ad   : >> { %s1790_s25 = scalar_lea.vmem %s1771_s20, %s1993_s24 [#allocation2]   ;;  %s1791_s15 = scalar_lea.vmem %s1773_s21, %s1993_s24  }
 0x1b2 PF: > { %p11_p2 = scmp.ge.s32.totalorder %s2529_s19, 4   ;;  %s3541_s15 = smov %s2451_s16 }
 0x1b3   : > { %s3542_s16 = smov %s2537_s22  ;;  %s3543_s17 = smov %s2529_s19 }
 0x1b4   :  { %13 = sbr.rel (!%p11_p2) target bundleno = 2 (0x2), region = 151 }

// kernel: ifno2d_forward.21
= control target key start
LH: loop header
LB: loop body
LE: loop exit
PB: predicated region body
PF: predicated region fallthrough
CT: control target
= control target key end

     0   :  { %s2064_s15 = smov 0   ;;  %s2066_s16 = smov 0   ;;  %s2725_s0 = inlined_call_operand.vmem [shape: f32[648,32], index: 0, kind: input, shape index: {}]   ;;  %s2726_s1 = inlined_call_operand.vmem [shape: f32[32,32], index: 1, kind: input, shape index: {}]   ;;  %s2727_s2 = inlined_call_operand.vmem [shape: f32[1,32], index: 2, kind: input, shape index: {}]   ;;  %s2728_s3 = inlined_call_operand.vmem [shape: f32[648,32], index: 3, kind: input, shape index: {}]   ;;  %s2729_s4 = inlined_call_operand.vmem [shape: f32[648,32], index: 4, kind: output, shape index: {}]  }
   0x1   :  { %s2068_s17 = smov 0  }
   0x2 LB: > { %s2077_s18 = sadd.s32 4294967295, %s2005_s17   ;;  %s2079_s19 = sadd.s32 1, %s2005_s17   ;;  %s2005_s17 = sphi %s2068_s17, %s2738_s17   ;;  %s2001_s16 = sphi %s2066_s16, %s2737_s16   ;;  %s1997_s15 = sphi %s2064_s15, %s2736_s15  }
   0x3   : > { %s112_s20 = ssub.s32 %s2005_s17, %s2079_s19  ;;  %s115_s21 = sadd.s32 1, %s2001_s16 }
   0x4   : > { %p113_p0 = scmp.eq.s32.totalorder %s112_s20, 0  ;;  %p125_p1 = scmp.ne.s32.totalorder %s2001_s16, %s1997_s15 }
   0x5   : > { %p126_p2 = scmp.eq.s32.totalorder %s2077_s18, 1  ;;  %p1588_p3 = scmp.ge.s32.totalorder %s2005_s17, 1 }
   0x6   : > { %s2087_s22 = scalar_select %p113_p0, %s2001_s16, %s115_s21  }
   0x7   : > { %p2089_p4 = por %p126_p2, %p125_p1  ;;  %p190_p5 = scmp.lt.s32.totalorder %s2005_s17, 3 }
   0x9   : > { %p191_p6 = pnand %p1588_p3, %p190_p5 }
   0xa   : > { %v325_v0 = vld [vmem:[%s2726_s1] sm:$0xff] (!%p191_p6)  ;;  %v326_v1 = vld [vmem:[%s2726_s1 + $0x8] sm:$0xff] (!%p191_p6)  ;;  %v327_v2 = vld [vmem:[%s2726_s1 + $0x10] sm:$0xff] (!%p191_p6)  ;;  %s2103_s30 = sshll.u32 (!%p191_p6), %s2077_s18, 6  ;;  %vm336_vm0 = vcmask (!%p191_p6), 261120   ;;  %s225_s12 = sand.u32 (!%p191_p6), 1, %s1997_s15  }
   0xb   : > { %194 = sbr.rel (%p191_p6) target bundleno = 375 (0x177), region = 36  ;;  %v1851_v3 = vpack.c.bf16 (!%p191_p6), %v326_v1, %v325_v0  ;;  %v328_v4 = vld [vmem:[%s2726_s1 + $0x18] sm:$0xff] (!%p191_p6)  ;;  %p233_p7 = scmp.lt.s32.totalorder (!%p191_p6), %s2103_s30, 80 }
   0xc   : > { %v1855_v5 = vpack.c.bf16 (!%p191_p6), %v328_v4, %v327_v2  ;;  %s1589_s24 = sshll.u32 (!%p191_p6), %s225_s12, 9 }
   0xd   : > { %1852 = vmatprep.subr.bf16.mxu0 (!%p191_p6), %v1851_v3  ;;  %1859 = vmatprep.subr.bf16.mxu1 (!%p191_p6), %v1851_v3  ;;  %s2271_s15 = scalar_lea.vmem (!%p191_p6), [#allocation2], %s1589_s24  }
   0xe   : > { %1854 = vmatpush3.bf16.msra.mxu0 (!%p191_p6), %v1851_v3  ;;  %1861 = vmatpush3.bf16.msra.mxu1 (!%p191_p6), %v1851_v3 }
   0xf   : > { %1856 = vmatprep.subr.bf16.mxu0 (!%p191_p6), %v1855_v5  ;;  %1860 = vmatprep.subr.bf16.mxu1 (!%p191_p6), %v1855_v5 }
  0x12   : > { %s2110_s7 = scalar_select %p233_p7, %s2103_s30, 80  ;;  %1858 = vmatpush3.bf16.msra.mxu0 %v1855_v5  ;;  %1862 = vmatpush3.bf16.msra.mxu1 %v1855_v5 }
  0x13   : > { %s1114_s25 = ssub.s32 (%p2089_p4), 81, %s2103_s30  ;;  %s1676_s26 = sshll.u32 (%p2089_p4), %s2077_s18, 9 }
  0x14   : > { %s1591_s8 = sshll.u32 %s2110_s7, 3  ;;  %p1115_p8 = scmp.lt.s32.totalorder (%p2089_p4), %s1114_s25, 64 }
  0x15   : > { %s2118_s11 = scalar_lea.vmem %s2725_s0, %s1591_s8  ;;  %s2254_s17 = scalar_lea.vmem %s2728_s3, %s1591_s8 }
  0x16   : > { %v261_v6 = vld [vmem:[%s2118_s11] sm:$0xff]  ;;  %v262_v8 = vld [vmem:[%s2118_s11 + $0x8] sm:$0xff]  ;;  %v263_v10 = vld [vmem:[%s2118_s11 + $0x10] sm:$0xff]  ;;  %s2526_s29 = scalar_lea.vmem (%p2089_p4), %s2729_s4, %s1676_s26  }
  0x17   : > { %v293_v7 = vld [vmem:[%s2118_s11 + $0x100] sm:$0xff]  ;;  %v294_v9 = vld [vmem:[%s2118_s11 + $0x108] sm:$0xff]  ;;  %1755 = vmatprep.mubr.msk.f32.mxu0 %vm336_vm0, %v261_v6  ;;  %v295_v11 = vld [vmem:[%s2118_s11 + $0x110] sm:$0xff] }
  0x18   : > { %1803 = vmatprep.mubr.msk.f32.mxu1 %vm336_vm0, %v293_v7  ;;  %1756 = vmatmul.mubr.msk.f32.vlgmr.msra.gmra.mrb[0].mxu0 %vm336_vm0, %v262_v8  ;;  %v264_v12 = vld [vmem:[%s2118_s11 + $0x18] sm:$0xff]  ;;  %v265_v14 = vld [vmem:[%s2118_s11 + $0x20] sm:$0xff]  ;;  %v266_v16 = vld [vmem:[%s2118_s11 + $0x28] sm:$0xff] }
  0x19   : > { %1804 = vmatmul.mubr.msk.f32.vlgmr.msra.gmra.mrb[0].mxu1 %vm336_vm0, %v294_v9  ;;  %1758 = vmatprep.mubr.msk.f32.mxu0 %vm336_vm0, %v263_v10  ;;  %v296_v13 = vld [vmem:[%s2118_s11 + $0x118] sm:$0xff]  ;;  %v297_v15 = vld [vmem:[%s2118_s11 + $0x120] sm:$0xff]  ;;  %v298_v17 = vld [vmem:[%s2118_s11 + $0x128] sm:$0xff] }
  0x1a   : > { %1806 = vmatprep.mubr.msk.f32.mxu1 %vm336_vm0, %v295_v11  ;;  %v267_v18 = vld [vmem:[%s2118_s11 + $0x30] sm:$0xff]  ;;  %v268_v20 = vld [vmem:[%s2118_s11 + $0x38] sm:$0xff]  ;;  %v269_v22 = vld [vmem:[%s2118_s11 + $0x40] sm:$0xff] }
  0x1b   : > { %v299_v19 = vld [vmem:[%s2118_s11 + $0x130] sm:$0xff]  ;;  %v300_v21 = vld [vmem:[%s2118_s11 + $0x138] sm:$0xff]  ;;  %v301_v23 = vld [vmem:[%s2118_s11 + $0x140] sm:$0xff] }
  0x1c   : > { %1759 = vmatmul.mubr.msk.f32.gmra.mrb[2].mxu0 %vm336_vm0, %v264_v12  ;;  %v270_v24 = vld [vmem:[%s2118_s11 + $0x48] sm:$0xff]  ;;  %v271_v26 = vld [vmem:[%s2118_s11 + $0x50] sm:$0xff]  ;;  %v272_v28 = vld [vmem:[%s2118_s11 + $0x58] sm:$0xff] }
  0x1d   : > { %1807 = vmatmul.mubr.msk.f32.gmra.mrb[2].mxu1 %vm336_vm0, %v296_v13  ;;  %1761 = vmatprep.mubr.msk.f32.mxu0 %vm336_vm0, %v265_v14  ;;  %v302_v25 = vld [vmem:[%s2118_s11 + $0x148] sm:$0xff]  ;;  %v303_v27 = vld [vmem:[%s2118_s11 + $0x150] sm:$0xff]  ;;  %v304_v29 = vld [vmem:[%s2118_s11 + $0x158] sm:$0xff] }
  0x1e   : > { %1809 = vmatprep.mubr.msk.f32.mxu1 %vm336_vm0, %v297_v15  ;;  %v273_v30 = vld [vmem:[%s2118_s11 + $0x60] sm:$0xff]  ;;  %v274_v32 = vld [vmem:[%s2118_s11 + $0x68] sm:$0xff]  ;;  %v275_v34 = vld [vmem:[%s2118_s11 + $0x70] sm:$0xff] }
  0x1f   : > { %v305_v31 = vld [vmem:[%s2118_s11 + $0x160] sm:$0xff]  ;;  %v306_v33 = vld [vmem:[%s2118_s11 + $0x168] sm:$0xff]  ;;  %v307_v35 = vld [vmem:[%s2118_s11 + $0x170] sm:$0xff] }
  0x20   : > { %1762 = vmatmul.mubr.msk.f32.gmra.mrb[4].mxu0 %vm336_vm0, %v266_v16  ;;  %v276_v36 = vld [vmem:[%s2118_s11 + $0x78] sm:$0xff]  ;;  %v277_v38 = vld [vmem:[%s2118_s11 + $0x80] sm:$0xff]  ;;  %v278_v40 = vld [vmem:[%s2118_s11 + $0x88] sm:$0xff] }
  0x21   : > { %1810 = vmatmul.mubr.msk.f32.gmra.mrb[4].mxu1 %vm336_vm0, %v298_v17  ;;  %1764 = vmatprep.mubr.msk.f32.mxu0 %vm336_vm0, %v267_v18  ;;  %v308_v37 = vld [vmem:[%s2118_s11 + $0x178] sm:$0xff]  ;;  %v309_v39 = vld [vmem:[%s2118_s11 + $0x180] sm:$0xff]  ;;  %v310_v41 = vld [vmem:[%s2118_s11 + $0x188] sm:$0xff] }
  0x22   : > { %1812 = vmatprep.mubr.msk.f32.mxu1 %vm336_vm0, %v299_v19  ;;  %v279_v42 = vld [vmem:[%s2118_s11 + $0x90] sm:$0xff]  ;;  %v280_v44 = vld [vmem:[%s2118_s11 + $0x98] sm:$0xff]  ;;  %v281_v46 = vld [vmem:[%s2118_s11 + $0xa0] sm:$0xff] }
  0x23   : > { %v311_v43 = vld [vmem:[%s2118_s11 + $0x190] sm:$0xff]  ;;  %v312_v45 = vld [vmem:[%s2118_s11 + $0x198] sm:$0xff]  ;;  %v313_v47 = vld [vmem:[%s2118_s11 + $0x1a0] sm:$0xff] }
  0x24   : > { %1765 = vmatmul.mubr.msk.f32.gmra.mrb[6].mxu0 %vm336_vm0, %v268_v20  ;;  %v282_v48 = vld [vmem:[%s2118_s11 + $0xa8] sm:$0xff]  ;;  %v283_v50 = vld [vmem:[%s2118_s11 + $0xb0] sm:$0xff]  ;;  %v284_v52 = vld [vmem:[%s2118_s11 + $0xb8] sm:$0xff] }
  0x25   : > { %1813 = vmatmul.mubr.msk.f32.gmra.mrb[6].mxu1 %vm336_vm0, %v300_v21  ;;  %1767 = vmatprep.mubr.msk.f32.mxu0 %vm336_vm0, %v269_v22  ;;  %v314_v49 = vld [vmem:[%s2118_s11 + $0x1a8] sm:$0xff]  ;;  %v315_v51 = vld [vmem:[%s2118_s11 + $0x1b0] sm:$0xff]  ;;  %v316_v53 = vld [vmem:[%s2118_s11 + $0x1b8] sm:$0xff] }
  0x26   : > { %1815 = vmatprep.mubr.msk.f32.mxu1 %vm336_vm0, %v301_v23  ;;  %v285_v54 = vld [vmem:[%s2118_s11 + $0xc0] sm:$0xff]  ;;  %v286_v56 = vld [vmem:[%s2118_s11 + $0xc8] sm:$0xff]  ;;  %v287_v58 = vld [vmem:[%s2118_s11 + $0xd0] sm:$0xff] }
  0x27   : > { %v317_v55 = vld [vmem:[%s2118_s11 + $0x1c0] sm:$0xff]  ;;  %v318_v57 = vld [vmem:[%s2118_s11 + $0x1c8] sm:$0xff]  ;;  %v319_v59 = vld [vmem:[%s2118_s11 + $0x1d0] sm:$0xff] }
  0x28   : > { %1768 = vmatmul.mubr.msk.f32.gmra.mrb[8].mxu0 %vm336_vm0, %v270_v24  ;;  %v288_v60 = vld [vmem:[%s2118_s11 + $0xd8] sm:$0xff]  ;;  %v289_v62 = vld [vmem:[%s2118_s11 + $0xe0] sm:$0xff]  ;;  %v290_v0 = vld [vmem:[%s2118_s11 + $0xe8] sm:$0xff] }
  0x29   : > { %1816 = vmatmul.mubr.msk.f32.gmra.mrb[8].mxu1 %vm336_vm0, %v302_v25  ;;  %1770 = vmatprep.mubr.msk.f32.mxu0 %vm336_vm0, %v271_v26  ;;  %v320_v61 = vld [vmem:[%s2118_s11 + $0x1d8] sm:$0xff]  ;;  %v321_v63 = vld [vmem:[%s2118_s11 + $0x1e0] sm:$0xff]  ;;  %v322_v1 = vld [vmem:[%s2118_s11 + $0x1e8] sm:$0xff] }
  0x2a   : > { %1818 = vmatprep.mubr.msk.f32.mxu1 %vm336_vm0, %v303_v27  ;;  %v291_v2 = vld [vmem:[%s2118_s11 + $0xf0] sm:$0xff]  ;;  %v292_v4 = vld [vmem:[%s2118_s11 + $0xf8] sm:$0xff]  ;;  %v2259_v6 = vld [vmem:[%s2727_s2] ss:$0 sm:$0xff] }
  0x2b   : > { %v323_v3 = vld [vmem:[%s2118_s11 + $0x1f0] sm:$0xff]  ;;  %v324_v5 = vld [vmem:[%s2118_s11 + $0x1f8] sm:$0xff]  ;;  %v915_v8 = vld [vmem:[%s2254_s17 + $0x8] sm:$0xff] }
  0x2c   : > { %1771 = vmatmul.mubr.msk.f32.gmra.mrb[10].mxu0 %vm336_vm0, %v272_v28  ;;  %v947_v10 = vld [vmem:[%s2254_s17 + $0x108] sm:$0xff]  ;;  %v914_v14 = vld [vmem:[%s2254_s17] sm:$0xff]  ;;  %v917_v24 = vld [vmem:[%s2254_s17 + $0x18] sm:$0xff] }
  0x2d   : > { %1819 = vmatmul.mubr.msk.f32.gmra.mrb[10].mxu1 %vm336_vm0, %v304_v29  ;;  %1773 = vmatprep.mubr.msk.f32.mxu0 %vm336_vm0, %v273_v30  ;;  %v946_v16 = vld [vmem:[%s2254_s17 + $0x100] sm:$0xff]  ;;  %v949_v26 = vld [vmem:[%s2254_s17 + $0x118] sm:$0xff]  ;;  %v916_v30 = vld [vmem:[%s2254_s17 + $0x10] sm:$0xff] }
  0x2e   : > { %1821 = vmatprep.mubr.msk.f32.mxu1 %vm336_vm0, %v305_v31 }
  0x30   : > { %1774 = vmatmul.mubr.msk.f32.gmra.mrb[12].mxu0 %vm336_vm0, %v274_v32  ;;  %v948_v32 = vld [vmem:[%s2254_s17 + $0x110] sm:$0xff] }
  0x31   : > { %1822 = vmatmul.mubr.msk.f32.gmra.mrb[12].mxu1 %vm336_vm0, %v306_v33  ;;  %1776 = vmatprep.mubr.msk.f32.mxu0 %vm336_vm0, %v275_v34 }
  0x32   : > { %1824 = vmatprep.mubr.msk.f32.mxu1 %vm336_vm0, %v307_v35 }
  0x34   : > { %1777 = vmatmul.mubr.msk.f32.gmra.mrb[14].mxu0 %vm336_vm0, %v276_v36 }
  0x35   : > { %1825 = vmatmul.mubr.msk.f32.gmra.mrb[14].mxu1 %vm336_vm0, %v308_v37  ;;  %1779 = vmatprep.mubr.msk.f32.mxu0 %vm336_vm0, %v277_v38 }
  0x36   : > { %1827 = vmatprep.mubr.msk.f32.mxu1 %vm336_vm0, %v309_v39 }
  0x38   : > { %1780 = vmatmul.mubr.msk.f32.gmra.mrb[16].mxu0 %vm336_vm0, %v278_v40  ;;  %v919_v40 = vld [vmem:[%s2254_s17 + $0x28] sm:$0xff] }
  0x39   : > { %1828 = vmatmul.mubr.msk.f32.gmra.mrb[16].mxu1 %vm336_vm0, %v310_v41  ;;  %1782 = vmatprep.mubr.msk.f32.mxu0 %vm336_vm0, %v279_v42  ;;  %v951_v42 = vld [vmem:[%s2254_s17 + $0x128] sm:$0xff] }
  0x3a   : > { %1830 = vmatprep.mubr.msk.f32.mxu1 %vm336_vm0, %v311_v43 }
  0x3c   : > { %1783 = vmatmul.mubr.msk.f32.gmra.mrb[18].mxu0 %vm336_vm0, %v280_v44 }
  0x3d   : > { %1831 = vmatmul.mubr.msk.f32.gmra.mrb[18].mxu1 %vm336_vm0, %v312_v45  ;;  %1785 = vmatprep.mubr.msk.f32.mxu0 %vm336_vm0, %v281_v46  ;;  %v918_v46 = vld [vmem:[%s2254_s17 + $0x20] sm:$0xff] }
  0x3e   : > { %1833 = vmatprep.mubr.msk.f32.mxu1 %vm336_vm0, %v313_v47 }
  0x40   : > { %1786 = vmatmul.mubr.msk.f32.gmra.mrb[20].mxu0 %vm336_vm0, %v282_v48  ;;  %v950_v48 = vld [vmem:[%s2254_s17 + $0x120] sm:$0xff] }
  0x41   : > { %1834 = vmatmul.mubr.msk.f32.gmra.mrb[20].mxu1 %vm336_vm0, %v314_v49  ;;  %1788 = vmatprep.mubr.msk.f32.mxu0 %vm336_vm0, %v283_v50 }
  0x42   : > { %1836 = vmatprep.mubr.msk.f32.mxu1 %vm336_vm0, %v315_v51 }
  0x44   : > { %1789 = vmatmul.mubr.msk.f32.gmra.mrb[22].mxu0 %vm336_vm0, %v284_v52 }
  0x45   : > { %1837 = vmatmul.mubr.msk.f32.gmra.mrb[22].mxu1 %vm336_vm0, %v316_v53  ;;  %1791 = vmatprep.mubr.msk.f32.mxu0 %vm336_vm0, %v285_v54 }
  0x46   : > { %1839 = vmatprep.mubr.msk.f32.mxu1 %vm336_vm0, %v317_v55 }
  0x48   : > { %1792 = vmatmul.mubr.msk.f32.gmra.mrb[24].mxu0 %vm336_vm0, %v286_v56  ;;  %v921_v56 = vld [vmem:[%s2254_s17 + $0x38] sm:$0xff] }
  0x49   : > { %1840 = vmatmul.mubr.msk.f32.gmra.mrb[24].mxu1 %vm336_vm0, %v318_v57  ;;  %1794 = vmatprep.mubr.msk.f32.mxu0 %vm336_vm0, %v287_v58  ;;  %v953_v58 = vld [vmem:[%s2254_s17 + $0x138] sm:$0xff] }
  0x4a   : > { %1842 = vmatprep.mubr.msk.f32.mxu1 %vm336_vm0, %v319_v59 }
  0x4c   : > { %1795 = vmatmul.mubr.msk.f32.gmra.mrb[26].mxu0 %vm336_vm0, %v288_v60 }
  0x4d   : > { %1843 = vmatmul.mubr.msk.f32.gmra.mrb[26].mxu1 %vm336_vm0, %v320_v61  ;;  %1797 = vmatprep.mubr.msk.f32.mxu0 %vm336_vm0, %v289_v62  ;;  %v920_v62 = vld [vmem:[%s2254_s17 + $0x30] sm:$0xff] }
  0x4e   : > { %1845 = vmatprep.mubr.msk.f32.mxu1 %vm336_vm0, %v321_v63 }
  0x50   : > { %1798 = vmatmul.mubr.msk.f32.gmra.mrb[28].mxu0 %vm336_vm0, %v290_v0  ;;  %v952_v0 = vld [vmem:[%s2254_s17 + $0x130] sm:$0xff] }
  0x51   : > { %1846 = vmatmul.mubr.msk.f32.gmra.mrb[28].mxu1 %vm336_vm0, %v322_v1  ;;  %1800 = vmatprep.mubr.msk.f32.mxu0 %vm336_vm0, %v291_v2 }
  0x52   : > { %1848 = vmatprep.mubr.msk.f32.mxu1 %vm336_vm0, %v323_v3 }
  0x54   : > { %1801 = vmatmul.mubr.msk.f32.gmra.mrb[30].mxu0 %vm336_vm0, %v292_v4 }
  0x55   : > { %1849 = vmatmul.mubr.msk.f32.gmra.mrb[30].mxu1 %vm336_vm0, %v324_v5 }
  0xeb   : > { %v1757_v7 = vpop.f32.mrb[0].mxu0 }
  0xec   : > { %v1805_v9 = vpop.f32.mrb[0].mxu1  ;;  %v601_v11 = vadd.f32 %v1757_v7, %v2259_v6  ;;  %v595_v13 = vpop.f32.mrb[1].mxu0 }
  0xed   : > { %v761_v12 = vadd.f32 %v1805_v9, %v2259_v6  ;;  %v755_v15 = vpop.f32.mrb[1].mxu1  ;;  %v596_v17 = vadd.f32 %v2259_v6, %v595_v13  ;;  %v923_v9 = vld [vmem:[%s2254_s17 + $0x48] sm:$0xff] }
  0xee   : > { %v756_v18 = vadd.f32 %v2259_v6, %v755_v15  ;;  %v979_v19 = vadd.f32 %v915_v8, %v601_v11  ;;  %v955_v11 = vld [vmem:[%s2254_s17 + $0x148] sm:$0xff]  ;;  %v922_v15 = vld [vmem:[%s2254_s17 + $0x40] sm:$0xff] }
  0xef   : > { %v1011_v20 = vadd.f32 %v947_v10, %v761_v12  ;;  %v978_v21 = vadd.f32 %v914_v14, %v596_v17  ;;  %v1760_v23 = vpop.f32.mrb[2].mxu0  ;;  %v954_v17 = vld [vmem:[%s2254_s17 + $0x140] sm:$0xff] }
  0xf0   : > { %v1010_v22 = vadd.f32 %v946_v16, %v756_v18  ;;  %v1808_v25 = vpop.f32.mrb[2].mxu1  ;;  %1043 = vst.msk [vmem:[%s2271_s15 + $0x8] sm:$0xff] %vm336_vm0, %v979_v19  ;;  %v611_v27 = vadd.f32 %v1760_v23, %v2259_v6  ;;  %v605_v29 = vpop.f32.mrb[3].mxu0 }
  0xf1   : > { %1075 = vst.msk [vmem:[%s2271_s15 + $0x108] sm:$0xff] %vm336_vm0, %v1011_v20  ;;  %v771_v28 = vadd.f32 %v1808_v25, %v2259_v6  ;;  %v765_v31 = vpop.f32.mrb[3].mxu1  ;;  %1042 = vst.msk [vmem:[%s2271_s15] sm:$0xff] %vm336_vm0, %v978_v21  ;;  %v606_v33 = vadd.f32 %v2259_v6, %v605_v29  ;;  %v925_v25 = vld [vmem:[%s2254_s17 + $0x58] sm:$0xff] }
  0xf2   : > { %1074 = vst.msk [vmem:[%s2271_s15 + $0x100] sm:$0xff] %vm336_vm0, %v1010_v22  ;;  %v766_v34 = vadd.f32 %v2259_v6, %v765_v31  ;;  %v981_v35 = vadd.f32 %v917_v24, %v611_v27  ;;  %v957_v27 = vld [vmem:[%s2254_s17 + $0x158] sm:$0xff]  ;;  %v924_v31 = vld [vmem:[%s2254_s17 + $0x50] sm:$0xff] }
  0xf3   : > { %v1013_v36 = vadd.f32 %v949_v26, %v771_v28  ;;  %v980_v37 = vadd.f32 %v916_v30, %v606_v33  ;;  %v1763_v39 = vpop.f32.mrb[4].mxu0  ;;  %v956_v33 = vld [vmem:[%s2254_s17 + $0x150] sm:$0xff] }
  0xf4   : > { %v1012_v38 = vadd.f32 %v948_v32, %v766_v34  ;;  %v1811_v41 = vpop.f32.mrb[4].mxu1  ;;  %1045 = vst.msk [vmem:[%s2271_s15 + $0x18] sm:$0xff] %vm336_vm0, %v981_v35  ;;  %v621_v43 = vadd.f32 %v1763_v39, %v2259_v6  ;;  %v615_v45 = vpop.f32.mrb[5].mxu0 }
  0xf5   : > { %1077 = vst.msk [vmem:[%s2271_s15 + $0x118] sm:$0xff] %vm336_vm0, %v1013_v36  ;;  %v781_v44 = vadd.f32 %v1811_v41, %v2259_v6  ;;  %v775_v47 = vpop.f32.mrb[5].mxu1  ;;  %1044 = vst.msk [vmem:[%s2271_s15 + $0x10] sm:$0xff] %vm336_vm0, %v980_v37  ;;  %v616_v49 = vadd.f32 %v2259_v6, %v615_v45  ;;  %v927_v41 = vld [vmem:[%s2254_s17 + $0x68] sm:$0xff] }
  0xf6   : > { %1076 = vst.msk [vmem:[%s2271_s15 + $0x110] sm:$0xff] %vm336_vm0, %v1012_v38  ;;  %v776_v50 = vadd.f32 %v2259_v6, %v775_v47  ;;  %v983_v51 = vadd.f32 %v919_v40, %v621_v43  ;;  %v959_v43 = vld [vmem:[%s2254_s17 + $0x168] sm:$0xff]  ;;  %v926_v47 = vld [vmem:[%s2254_s17 + $0x60] sm:$0xff] }
  0xf7   : > { %v1015_v52 = vadd.f32 %v951_v42, %v781_v44  ;;  %v982_v53 = vadd.f32 %v918_v46, %v616_v49  ;;  %v1766_v55 = vpop.f32.mrb[6].mxu0  ;;  %v958_v49 = vld [vmem:[%s2254_s17 + $0x160] sm:$0xff] }
  0xf8   : > { %v1014_v54 = vadd.f32 %v950_v48, %v776_v50  ;;  %v1814_v57 = vpop.f32.mrb[6].mxu1  ;;  %1047 = vst.msk [vmem:[%s2271_s15 + $0x28] sm:$0xff] %vm336_vm0, %v983_v51  ;;  %v631_v59 = vadd.f32 %v1766_v55, %v2259_v6  ;;  %v625_v61 = vpop.f32.mrb[7].mxu0 }
  0xf9   : > { %1079 = vst.msk [vmem:[%s2271_s15 + $0x128] sm:$0xff] %vm336_vm0, %v1015_v52  ;;  %v791_v60 = vadd.f32 %v1814_v57, %v2259_v6  ;;  %v785_v63 = vpop.f32.mrb[7].mxu1  ;;  %1046 = vst.msk [vmem:[%s2271_s15 + $0x20] sm:$0xff] %vm336_vm0, %v982_v53  ;;  %v626_v1 = vadd.f32 %v2259_v6, %v625_v61  ;;  %v929_v57 = vld [vmem:[%s2254_s17 + $0x78] sm:$0xff] }
  0xfa   : > { %1078 = vst.msk [vmem:[%s2271_s15 + $0x120] sm:$0xff] %vm336_vm0, %v1014_v54  ;;  %v786_v2 = vadd.f32 %v2259_v6, %v785_v63  ;;  %v985_v3 = vadd.f32 %v921_v56, %v631_v59  ;;  %v961_v59 = vld [vmem:[%s2254_s17 + $0x178] sm:$0xff]  ;;  %v928_v63 = vld [vmem:[%s2254_s17 + $0x70] sm:$0xff] }
  0xfb   : > { %v1017_v4 = vadd.f32 %v953_v58, %v791_v60  ;;  %v984_v5 = vadd.f32 %v920_v62, %v626_v1  ;;  %v1769_v8 = vpop.f32.mrb[8].mxu0  ;;  %v960_v1 = vld [vmem:[%s2254_s17 + $0x170] sm:$0xff] }
  0xfc   : > { %v1016_v7 = vadd.f32 %v952_v0, %v786_v2  ;;  %v1817_v10 = vpop.f32.mrb[8].mxu1  ;;  %1049 = vst.msk [vmem:[%s2271_s15 + $0x38] sm:$0xff] %vm336_vm0, %v985_v3  ;;  %v641_v12 = vadd.f32 %v1769_v8, %v2259_v6  ;;  %v635_v14 = vpop.f32.mrb[9].mxu0 }
  0xfd   : > { %1081 = vst.msk [vmem:[%s2271_s15 + $0x138] sm:$0xff] %vm336_vm0, %v1017_v4  ;;  %v801_v13 = vadd.f32 %v1817_v10, %v2259_v6  ;;  %v795_v16 = vpop.f32.mrb[9].mxu1  ;;  %1048 = vst.msk [vmem:[%s2271_s15 + $0x30] sm:$0xff] %vm336_vm0, %v984_v5  ;;  %v636_v18 = vadd.f32 %v2259_v6, %v635_v14  ;;  %v931_v10 = vld [vmem:[%s2254_s17 + $0x88] sm:$0xff] }
  0xfe   : > { %1080 = vst.msk [vmem:[%s2271_s15 + $0x130] sm:$0xff] %vm336_vm0, %v1016_v7  ;;  %v796_v19 = vadd.f32 %v2259_v6, %v795_v16  ;;  %v987_v20 = vadd.f32 %v923_v9, %v641_v12  ;;  %v963_v12 = vld [vmem:[%s2254_s17 + $0x188] sm:$0xff]  ;;  %v930_v16 = vld [vmem:[%s2254_s17 + $0x80] sm:$0xff] }
  0xff   : > { %v1019_v21 = vadd.f32 %v955_v11, %v801_v13  ;;  %v986_v22 = vadd.f32 %v922_v15, %v636_v18  ;;  %v1772_v24 = vpop.f32.mrb[10].mxu0  ;;  %v962_v18 = vld [vmem:[%s2254_s17 + $0x180] sm:$0xff] }
 0x100   : > { %v1018_v23 = vadd.f32 %v954_v17, %v796_v19  ;;  %v1820_v26 = vpop.f32.mrb[10].mxu1  ;;  %1051 = vst.msk [vmem:[%s2271_s15 + $0x48] sm:$0xff] %vm336_vm0, %v987_v20  ;;  %v651_v28 = vadd.f32 %v1772_v24, %v2259_v6  ;;  %v645_v30 = vpop.f32.mrb[11].mxu0 }
 0x101   : > { %1083 = vst.msk [vmem:[%s2271_s15 + $0x148] sm:$0xff] %vm336_vm0, %v1019_v21  ;;  %v811_v29 = vadd.f32 %v1820_v26, %v2259_v6  ;;  %v805_v32 = vpop.f32.mrb[11].mxu1  ;;  %1050 = vst.msk [vmem:[%s2271_s15 + $0x40] sm:$0xff] %vm336_vm0, %v986_v22  ;;  %v646_v34 = vadd.f32 %v2259_v6, %v645_v30  ;;  %v933_v26 = vld [vmem:[%s2254_s17 + $0x98] sm:$0xff] }
 0x102   : > { %1082 = vst.msk [vmem:[%s2271_s15 + $0x140] sm:$0xff] %vm336_vm0, %v1018_v23  ;;  %v806_v35 = vadd.f32 %v2259_v6, %v805_v32  ;;  %v989_v36 = vadd.f32 %v925_v25, %v651_v28  ;;  %v965_v28 = vld [vmem:[%s2254_s17 + $0x198] sm:$0xff]  ;;  %v932_v32 = vld [vmem:[%s2254_s17 + $0x90] sm:$0xff] }
 0x103   : > { %v1021_v37 = vadd.f32 %v957_v27, %v811_v29  ;;  %v988_v38 = vadd.f32 %v924_v31, %v646_v34  ;;  %v1775_v40 = vpop.f32.mrb[12].mxu0  ;;  %v964_v34 = vld [vmem:[%s2254_s17 + $0x190] sm:$0xff] }
 0x104   : > { %v1020_v39 = vadd.f32 %v956_v33, %v806_v35  ;;  %v1823_v42 = vpop.f32.mrb[12].mxu1  ;;  %1053 = vst.msk [vmem:[%s2271_s15 + $0x58] sm:$0xff] %vm336_vm0, %v989_v36  ;;  %v661_v44 = vadd.f32 %v1775_v40, %v2259_v6  ;;  %v655_v46 = vpop.f32.mrb[13].mxu0 }
 0x105   : > { %1085 = vst.msk [vmem:[%s2271_s15 + $0x158] sm:$0xff] %vm336_vm0, %v1021_v37  ;;  %v821_v45 = vadd.f32 %v1823_v42, %v2259_v6  ;;  %v815_v48 = vpop.f32.mrb[13].mxu1  ;;  %1052 = vst.msk [vmem:[%s2271_s15 + $0x50] sm:$0xff] %vm336_vm0, %v988_v38  ;;  %v656_v50 = vadd.f32 %v2259_v6, %v655_v46  ;;  %v935_v42 = vld [vmem:[%s2254_s17 + $0xa8] sm:$0xff] }
 0x106   : > { %1084 = vst.msk [vmem:[%s2271_s15 + $0x150] sm:$0xff] %vm336_vm0, %v1020_v39  ;;  %v816_v51 = vadd.f32 %v2259_v6, %v815_v48  ;;  %v991_v52 = vadd.f32 %v927_v41, %v661_v44  ;;  %v967_v44 = vld [vmem:[%s2254_s17 + $0x1a8] sm:$0xff]  ;;  %v934_v48 = vld [vmem:[%s2254_s17 + $0xa0] sm:$0xff] }
 0x107   : > { %v1023_v53 = vadd.f32 %v959_v43, %v821_v45  ;;  %v990_v54 = vadd.f32 %v926_v47, %v656_v50  ;;  %v1778_v56 = vpop.f32.mrb[14].mxu0  ;;  %v966_v50 = vld [vmem:[%s2254_s17 + $0x1a0] sm:$0xff] }
 0x108   : > { %v1022_v55 = vadd.f32 %v958_v49, %v816_v51  ;;  %v1826_v58 = vpop.f32.mrb[14].mxu1  ;;  %1055 = vst.msk [vmem:[%s2271_s15 + $0x68] sm:$0xff] %vm336_vm0, %v991_v52  ;;  %v671_v60 = vadd.f32 %v1778_v56, %v2259_v6  ;;  %v665_v62 = vpop.f32.mrb[15].mxu0 }
 0x109   : > { %1087 = vst.msk [vmem:[%s2271_s15 + $0x168] sm:$0xff] %vm336_vm0, %v1023_v53  ;;  %v831_v61 = vadd.f32 %v1826_v58, %v2259_v6  ;;  %v825_v0 = vpop.f32.mrb[15].mxu1  ;;  %1054 = vst.msk [vmem:[%s2271_s15 + $0x60] sm:$0xff] %vm336_vm0, %v990_v54  ;;  %v666_v2 = vadd.f32 %v2259_v6, %v665_v62  ;;  %v937_v58 = vld [vmem:[%s2254_s17 + $0xb8] sm:$0xff] }
 0x10a   : > { %1086 = vst.msk [vmem:[%s2271_s15 + $0x160] sm:$0xff] %vm336_vm0, %v1022_v55  ;;  %v826_v3 = vadd.f32 %v2259_v6, %v825_v0  ;;  %v993_v4 = vadd.f32 %v929_v57, %v671_v60  ;;  %v969_v60 = vld [vmem:[%s2254_s17 + $0x1b8] sm:$0xff]  ;;  %v936_v0 = vld [vmem:[%s2254_s17 + $0xb0] sm:$0xff] }
 0x10b   : > { %v1025_v5 = vadd.f32 %v961_v59, %v831_v61  ;;  %v992_v7 = vadd.f32 %v928_v63, %v666_v2  ;;  %v1781_v9 = vpop.f32.mrb[16].mxu0  ;;  %v968_v2 = vld [vmem:[%s2254_s17 + $0x1b0] sm:$0xff] }
 0x10c   : > { %v1024_v8 = vadd.f32 %v960_v1, %v826_v3  ;;  %v1829_v11 = vpop.f32.mrb[16].mxu1  ;;  %1057 = vst.msk [vmem:[%s2271_s15 + $0x78] sm:$0xff] %vm336_vm0, %v993_v4  ;;  %v681_v13 = vadd.f32 %v1781_v9, %v2259_v6  ;;  %v675_v15 = vpop.f32.mrb[17].mxu0 }
 0x10d   : > { %1089 = vst.msk [vmem:[%s2271_s15 + $0x178] sm:$0xff] %vm336_vm0, %v1025_v5  ;;  %v841_v14 = vadd.f32 %v1829_v11, %v2259_v6  ;;  %v835_v17 = vpop.f32.mrb[17].mxu1  ;;  %1056 = vst.msk [vmem:[%s2271_s15 + $0x70] sm:$0xff] %vm336_vm0, %v992_v7  ;;  %v676_v19 = vadd.f32 %v2259_v6, %v675_v15  ;;  %v939_v11 = vld [vmem:[%s2254_s17 + $0xc8] sm:$0xff] }
 0x10e   : > { %1088 = vst.msk [vmem:[%s2271_s15 + $0x170] sm:$0xff] %vm336_vm0, %v1024_v8  ;;  %v836_v20 = vadd.f32 %v2259_v6, %v835_v17  ;;  %v995_v21 = vadd.f32 %v931_v10, %v681_v13  ;;  %v971_v13 = vld [vmem:[%s2254_s17 + $0x1c8] sm:$0xff]  ;;  %v938_v17 = vld [vmem:[%s2254_s17 + $0xc0] sm:$0xff] }
 0x10f   : > { %v1027_v22 = vadd.f32 %v963_v12, %v841_v14  ;;  %v994_v23 = vadd.f32 %v930_v16, %v676_v19  ;;  %v1784_v25 = vpop.f32.mrb[18].mxu0  ;;  %v970_v19 = vld [vmem:[%s2254_s17 + $0x1c0] sm:$0xff] }
 0x110   : > { %v1026_v24 = vadd.f32 %v962_v18, %v836_v20  ;;  %v1832_v27 = vpop.f32.mrb[18].mxu1  ;;  %1059 = vst.msk [vmem:[%s2271_s15 + $0x88] sm:$0xff] %vm336_vm0, %v995_v21  ;;  %v691_v29 = vadd.f32 %v1784_v25, %v2259_v6  ;;  %v685_v31 = vpop.f32.mrb[19].mxu0 }
 0x111   : > { %1091 = vst.msk [vmem:[%s2271_s15 + $0x188] sm:$0xff] %vm336_vm0, %v1027_v22  ;;  %v851_v30 = vadd.f32 %v1832_v27, %v2259_v6  ;;  %v845_v33 = vpop.f32.mrb[19].mxu1  ;;  %1058 = vst.msk [vmem:[%s2271_s15 + $0x80] sm:$0xff] %vm336_vm0, %v994_v23  ;;  %v686_v35 = vadd.f32 %v2259_v6, %v685_v31  ;;  %v941_v27 = vld [vmem:[%s2254_s17 + $0xd8] sm:$0xff] }
 0x112   : > { %1090 = vst.msk [vmem:[%s2271_s15 + $0x180] sm:$0xff] %vm336_vm0, %v1026_v24  ;;  %v846_v36 = vadd.f32 %v2259_v6, %v845_v33  ;;  %v997_v37 = vadd.f32 %v933_v26, %v691_v29  ;;  %v973_v29 = vld [vmem:[%s2254_s17 + $0x1d8] sm:$0xff]  ;;  %v940_v33 = vld [vmem:[%s2254_s17 + $0xd0] sm:$0xff] }
 0x113   : > { %v1029_v38 = vadd.f32 %v965_v28, %v851_v30  ;;  %v996_v39 = vadd.f32 %v932_v32, %v686_v35  ;;  %v1787_v41 = vpop.f32.mrb[20].mxu0  ;;  %v972_v35 = vld [vmem:[%s2254_s17 + $0x1d0] sm:$0xff] }
 0x114   : > { %v1028_v40 = vadd.f32 %v964_v34, %v846_v36  ;;  %v1835_v43 = vpop.f32.mrb[20].mxu1  ;;  %1061 = vst.msk [vmem:[%s2271_s15 + $0x98] sm:$0xff] %vm336_vm0, %v997_v37  ;;  %v701_v45 = vadd.f32 %v1787_v41, %v2259_v6  ;;  %v695_v47 = vpop.f32.mrb[21].mxu0 }
 0x115   : > { %1093 = vst.msk [vmem:[%s2271_s15 + $0x198] sm:$0xff] %vm336_vm0, %v1029_v38  ;;  %v861_v46 = vadd.f32 %v1835_v43, %v2259_v6  ;;  %v855_v49 = vpop.f32.mrb[21].mxu1  ;;  %1060 = vst.msk [vmem:[%s2271_s15 + $0x90] sm:$0xff] %vm336_vm0, %v996_v39  ;;  %v696_v51 = vadd.f32 %v2259_v6, %v695_v47  ;;  %v943_v43 = vld [vmem:[%s2254_s17 + $0xe8] sm:$0xff] }
 0x116   : > { %1092 = vst.msk [vmem:[%s2271_s15 + $0x190] sm:$0xff] %vm336_vm0, %v1028_v40  ;;  %v856_v52 = vadd.f32 %v2259_v6, %v855_v49  ;;  %v999_v53 = vadd.f32 %v935_v42, %v701_v45  ;;  %v975_v45 = vld [vmem:[%s2254_s17 + $0x1e8] sm:$0xff]  ;;  %v942_v49 = vld [vmem:[%s2254_s17 + $0xe0] sm:$0xff] }
 0x117   : > { %v1031_v54 = vadd.f32 %v967_v44, %v861_v46  ;;  %v998_v55 = vadd.f32 %v934_v48, %v696_v51  ;;  %v1790_v57 = vpop.f32.mrb[22].mxu0  ;;  %v974_v51 = vld [vmem:[%s2254_s17 + $0x1e0] sm:$0xff] }
 0x118   : > { %v1030_v56 = vadd.f32 %v966_v50, %v856_v52  ;;  %v1838_v59 = vpop.f32.mrb[22].mxu1  ;;  %1063 = vst.msk [vmem:[%s2271_s15 + $0xa8] sm:$0xff] %vm336_vm0, %v999_v53  ;;  %v711_v61 = vadd.f32 %v1790_v57, %v2259_v6  ;;  %v705_v63 = vpop.f32.mrb[23].mxu0 }
 0x119   : > { %1095 = vst.msk [vmem:[%s2271_s15 + $0x1a8] sm:$0xff] %vm336_vm0, %v1031_v54  ;;  %v871_v62 = vadd.f32 %v1838_v59, %v2259_v6  ;;  %v865_v1 = vpop.f32.mrb[23].mxu1  ;;  %1062 = vst.msk [vmem:[%s2271_s15 + $0xa0] sm:$0xff] %vm336_vm0, %v998_v55  ;;  %v706_v3 = vadd.f32 %v2259_v6, %v705_v63  ;;  %v945_v59 = vld [vmem:[%s2254_s17 + $0xf8] sm:$0xff] }
 0x11a   : > { %1094 = vst.msk [vmem:[%s2271_s15 + $0x1a0] sm:$0xff] %vm336_vm0, %v1030_v56  ;;  %v866_v4 = vadd.f32 %v2259_v6, %v865_v1  ;;  %v1001_v5 = vadd.f32 %v937_v58, %v711_v61  ;;  %v977_v61 = vld [vmem:[%s2254_s17 + $0x1f8] sm:$0xff]  ;;  %v944_v1 = vld [vmem:[%s2254_s17 + $0xf0] sm:$0xff] }
 0x11b   : > { %v1033_v7 = vadd.f32 %v969_v60, %v871_v62  ;;  %v1000_v8 = vadd.f32 %v936_v0, %v706_v3  ;;  %v1793_v10 = vpop.f32.mrb[24].mxu0  ;;  %v976_v3 = vld [vmem:[%s2254_s17 + $0x1f0] sm:$0xff] }
 0x11c   : > { %v1032_v9 = vadd.f32 %v968_v2, %v866_v4  ;;  %v1841_v12 = vpop.f32.mrb[24].mxu1  ;;  %1065 = vst.msk [vmem:[%s2271_s15 + $0xb8] sm:$0xff] %vm336_vm0, %v1001_v5  ;;  %v721_v14 = vadd.f32 %v1793_v10, %v2259_v6  ;;  %v715_v16 = vpop.f32.mrb[25].mxu0 }
 0x11d   : > { %1097 = vst.msk [vmem:[%s2271_s15 + $0x1b8] sm:$0xff] %vm336_vm0, %v1033_v7  ;;  %v881_v15 = vadd.f32 %v1841_v12, %v2259_v6  ;;  %v875_v18 = vpop.f32.mrb[25].mxu1  ;;  %1064 = vst.msk [vmem:[%s2271_s15 + $0xb0] sm:$0xff] %vm336_vm0, %v1000_v8  ;;  %v716_v20 = vadd.f32 %v2259_v6, %v715_v16 }
 0x11e   : > { %1096 = vst.msk [vmem:[%s2271_s15 + $0x1b0] sm:$0xff] %vm336_vm0, %v1032_v9  ;;  %v876_v21 = vadd.f32 %v2259_v6, %v875_v18  ;;  %v1003_v22 = vadd.f32 %v939_v11, %v721_v14 }
 0x11f   : > { %v1035_v23 = vadd.f32 %v971_v13, %v881_v15  ;;  %v1002_v24 = vadd.f32 %v938_v17, %v716_v20  ;;  %v1796_v26 = vpop.f32.mrb[26].mxu0 }
 0x120   : > { %v1034_v25 = vadd.f32 %v970_v19, %v876_v21  ;;  %v1844_v28 = vpop.f32.mrb[26].mxu1  ;;  %1067 = vst.msk [vmem:[%s2271_s15 + $0xc8] sm:$0xff] %vm336_vm0, %v1003_v22  ;;  %v731_v30 = vadd.f32 %v1796_v26, %v2259_v6  ;;  %v725_v32 = vpop.f32.mrb[27].mxu0 }
 0x121   : > { %1099 = vst.msk [vmem:[%s2271_s15 + $0x1c8] sm:$0xff] %vm336_vm0, %v1035_v23  ;;  %v891_v31 = vadd.f32 %v1844_v28, %v2259_v6  ;;  %v885_v34 = vpop.f32.mrb[27].mxu1  ;;  %1066 = vst.msk [vmem:[%s2271_s15 + $0xc0] sm:$0xff] %vm336_vm0, %v1002_v24  ;;  %v726_v36 = vadd.f32 %v2259_v6, %v725_v32 }
 0x122   : > { %1098 = vst.msk [vmem:[%s2271_s15 + $0x1c0] sm:$0xff] %vm336_vm0, %v1034_v25  ;;  %v886_v37 = vadd.f32 %v2259_v6, %v885_v34  ;;  %v1005_v38 = vadd.f32 %v941_v27, %v731_v30 }
 0x123   : > { %v1037_v39 = vadd.f32 %v973_v29, %v891_v31  ;;  %v1004_v40 = vadd.f32 %v940_v33, %v726_v36  ;;  %v1799_v42 = vpop.f32.mrb[28].mxu0 }
 0x124   : > { %v1036_v41 = vadd.f32 %v972_v35, %v886_v37  ;;  %v1847_v44 = vpop.f32.mrb[28].mxu1  ;;  %1069 = vst.msk [vmem:[%s2271_s15 + $0xd8] sm:$0xff] %vm336_vm0, %v1005_v38  ;;  %v741_v46 = vadd.f32 %v1799_v42, %v2259_v6  ;;  %v735_v48 = vpop.f32.mrb[29].mxu0 }
 0x125   : > { %1101 = vst.msk [vmem:[%s2271_s15 + $0x1d8] sm:$0xff] %vm336_vm0, %v1037_v39  ;;  %v901_v47 = vadd.f32 %v1847_v44, %v2259_v6  ;;  %v895_v50 = vpop.f32.mrb[29].mxu1  ;;  %1068 = vst.msk [vmem:[%s2271_s15 + $0xd0] sm:$0xff] %vm336_vm0, %v1004_v40  ;;  %v736_v52 = vadd.f32 %v2259_v6, %v735_v48 }
 0x126   : > { %1100 = vst.msk [vmem:[%s2271_s15 + $0x1d0] sm:$0xff] %vm336_vm0, %v1036_v41  ;;  %v896_v53 = vadd.f32 %v2259_v6, %v895_v50  ;;  %v1007_v54 = vadd.f32 %v943_v43, %v741_v46 }
 0x127   : > { %v1039_v55 = vadd.f32 %v975_v45, %v901_v47  ;;  %v1006_v56 = vadd.f32 %v942_v49, %v736_v52  ;;  %v1802_v58 = vpop.f32.mrb[30].mxu0 }
 0x128   : > { %v1038_v57 = vadd.f32 %v974_v51, %v896_v53  ;;  %v1850_v60 = vpop.f32.mrb[30].mxu1  ;;  %1071 = vst.msk [vmem:[%s2271_s15 + $0xe8] sm:$0xff] %vm336_vm0, %v1007_v54  ;;  %v751_v62 = vadd.f32 %v1802_v58, %v2259_v6  ;;  %v745_v0 = vpop.f32.mrb[31].mxu0  ;;  %1112 = sbr.rel (!%p2089_p4) target bundleno = 375 (0x177), region = 40 }
 0x129   : > { %1103 = vst.msk [vmem:[%s2271_s15 + $0x1e8] sm:$0xff] %vm336_vm0, %v1039_v55  ;;  %v911_v63 = vadd.f32 %v1850_v60, %v2259_v6  ;;  %v905_v2 = vpop.f32.mrb[31].mxu1  ;;  %1070 = vst.msk [vmem:[%s2271_s15 + $0xe0] sm:$0xff] %vm336_vm0, %v1006_v56  ;;  %v746_v4 = vadd.f32 %v2259_v6, %v745_v0 }
 0x12a   : > { %1102 = vst.msk [vmem:[%s2271_s15 + $0x1e0] sm:$0xff] %vm336_vm0, %v1038_v57  ;;  %v906_v5 = vadd.f32 %v2259_v6, %v905_v2  ;;  %v1009_v7 = vadd.f32 %v945_v59, %v751_v62 }
 0x12b   : > { %v1041_v8 = vadd.f32 %v977_v61, %v911_v63  ;;  %v1008_v9 = vadd.f32 %v944_v1, %v746_v4 }
 0x12c   : > { %v1040_v10 = vadd.f32 %v976_v3, %v906_v5  ;;  %1073 = vst.msk [vmem:[%s2271_s15 + $0xf8] sm:$0xff] %vm336_vm0, %v1009_v7 }
 0x12d   : > { %1105 = vst.msk [vmem:[%s2271_s15 + $0x1f8] sm:$0xff] %vm336_vm0, %v1041_v8  ;;  %1072 = vst.msk [vmem:[%s2271_s15 + $0xf0] sm:$0xff] %vm336_vm0, %v1008_v9 }
 0x12e   : > { %1104 = vst.msk [vmem:[%s2271_s15 + $0x1f0] sm:$0xff] %vm336_vm0, %v1040_v10 }
 0x12f   : > { %s2740_s25 = smov (!%p1115_p8, %s1114_s25), 64 }
 0x130   : > { %s1661_s5 = sshll.u32 %s2740_s25, 7 }
 0x131   : > { %p1664_p9 = scmp.eq.s32.totalorder %s1661_s5, 0 }
 0x132   : > { %s2532_s6 = sshrl.u32 (!%p1664_p9), %s2740_s25, 6 }
 0x133   : > { %1123 = sbr.rel (%p1664_p9) target bundleno = 375 (0x177), region = 44  ;;  %p1665_p10 = scmp.le.s32.totalorder (!%p1664_p9), %s2532_s6, 0 }
 0x13a   : > { %1535 = sbr.rel (%p1665_p10) target bundleno = 354 (0x162), region = 123  ;;  %s2731_s18 = smov (!%p1665_p10), %s2526_s29 }
 0x13b   : > { %s2732_s23 = smov (!%p1665_p10), %s2271_s15  ;;  %s2541_s30 = smov (!%p1665_p10), 0  }
 0x13c   : > { %s2543_s7 = smov (!%p1665_p10), 0  }
 0x141 LB: >> { %v1311_v6 = vld [vmem:[%s2013_s23] sm:$0xff]  ;;  %v1313_v11 = vld [vmem:[%s2013_s23 + $0x8] sm:$0xff]  ;;  %v1315_v12 = vld [vmem:[%s2013_s23 + $0x10] sm:$0xff]  ;;  %s1439_s8 = sadd.s32 1, %s2017_s30  ;;  %s1305_s7 = sadd.s32 1, %s2021_s7   ;;  %s2021_s7 = sphi %s2543_s7, %s1305_s7   ;;  %s2017_s30 = sphi %s2541_s30, %s2735_s30   ;;  %s2013_s23 = sphi %s2732_s23, %s2734_s23   ;;  %s2009_s18 = sphi %s2731_s18, %s2733_s18  }
 0x142   : >> { %1312 = vst [vmem:[%s2009_s18] sm:$0xff] %v1311_v6  ;;  %1314 = vst [vmem:[%s2009_s18 + $0x8] sm:$0xff] %v1313_v11  ;;  %v1317_v13 = vld [vmem:[%s2013_s23 + $0x18] sm:$0xff]  ;;  %v1319_v14 = vld [vmem:[%s2013_s23 + $0x20] sm:$0xff]  ;;  %p1440_p11 = scmp.ge.s32.totalorder %s1439_s8, %s2532_s6  ;;  %p1304_p12 = scmp.ge.s32.totalorder %s1305_s7, %s2532_s6 }
 0x143   : >> { %1316 = vst [vmem:[%s2009_s18 + $0x10] sm:$0xff] %v1315_v12  ;;  %v1321_v15 = vld [vmem:[%s2013_s23 + $0x28] sm:$0xff]  ;;  %1318 = vst [vmem:[%s2009_s18 + $0x18] sm:$0xff] %v1317_v13  ;;  %v1323_v16 = vld [vmem:[%s2013_s23 + $0x30] sm:$0xff] }
 0x144   : >> { %1320 = vst [vmem:[%s2009_s18 + $0x20] sm:$0xff] %v1319_v14  ;;  %1322 = vst [vmem:[%s2009_s18 + $0x28] sm:$0xff] %v1321_v15  ;;  %v1325_v17 = vld [vmem:[%s2013_s23 + $0x38] sm:$0xff]  ;;  %v1327_v18 = vld [vmem:[%s2013_s23 + $0x40] sm:$0xff]  ;;  %s2742_s8 = smov (%p1440_p11, %s1439_s8), 0 }
 0x145   : >> { %1324 = vst [vmem:[%s2009_s18 + $0x30] sm:$0xff] %v1323_v16  ;;  %1326 = vst [vmem:[%s2009_s18 + $0x38] sm:$0xff] %v1325_v17  ;;  %v1329_v19 = vld [vmem:[%s2013_s23 + $0x48] sm:$0xff]  ;;  %v1331_v20 = vld [vmem:[%s2013_s23 + $0x50] sm:$0xff]  ;;  %s1666_s9 = sshll.u32 %s2742_s8, 9  ;;  %s2735_s30 = smov %s2742_s8 }
 0x146   : >> { %1328 = vst [vmem:[%s2009_s18 + $0x40] sm:$0xff] %v1327_v18  ;;  %v1333_v21 = vld [vmem:[%s2013_s23 + $0x58] sm:$0xff]  ;;  %1330 = vst [vmem:[%s2009_s18 + $0x48] sm:$0xff] %v1329_v19  ;;  %v1335_v22 = vld [vmem:[%s2013_s23 + $0x60] sm:$0xff]  ;;  %s2599_s10 = scalar_lea.vmem %s2271_s15, %s1666_s9 [#allocation2]   ;;  %s2602_s11 = scalar_lea.vmem %s2526_s29, %s1666_s9  }
 0x147   : >> { %1332 = vst [vmem:[%s2009_s18 + $0x50] sm:$0xff] %v1331_v20  ;;  %1334 = vst [vmem:[%s2009_s18 + $0x58] sm:$0xff] %v1333_v21  ;;  %v1337_v23 = vld [vmem:[%s2013_s23 + $0x68] sm:$0xff]  ;;  %v1339_v24 = vld [vmem:[%s2013_s23 + $0x70] sm:$0xff] }
 0x148   : >> { %1336 = vst [vmem:[%s2009_s18 + $0x60] sm:$0xff] %v1335_v22  ;;  %1338 = vst [vmem:[%s2009_s18 + $0x68] sm:$0xff] %v1337_v23  ;;  %v1341_v25 = vld [vmem:[%s2013_s23 + $0x78] sm:$0xff]  ;;  %v1343_v26 = vld [vmem:[%s2013_s23 + $0x80] sm:$0xff] }
 0x149   : >> { %1340 = vst [vmem:[%s2009_s18 + $0x70] sm:$0xff] %v1339_v24  ;;  %v1345_v27 = vld [vmem:[%s2013_s23 + $0x88] sm:$0xff]  ;;  %1342 = vst [vmem:[%s2009_s18 + $0x78] sm:$0xff] %v1341_v25  ;;  %v1347_v28 = vld [vmem:[%s2013_s23 + $0x90] sm:$0xff] }
 0x14a   : >> { %1344 = vst [vmem:[%s2009_s18 + $0x80] sm:$0xff] %v1343_v26  ;;  %1346 = vst [vmem:[%s2009_s18 + $0x88] sm:$0xff] %v1345_v27  ;;  %v1349_v29 = vld [vmem:[%s2013_s23 + $0x98] sm:$0xff]  ;;  %v1351_v30 = vld [vmem:[%s2013_s23 + $0xa0] sm:$0xff] }
 0x14b   : >> { %1348 = vst [vmem:[%s2009_s18 + $0x90] sm:$0xff] %v1347_v28  ;;  %1350 = vst [vmem:[%s2009_s18 + $0x98] sm:$0xff] %v1349_v29  ;;  %v1353_v31 = vld [vmem:[%s2013_s23 + $0xa8] sm:$0xff]  ;;  %v1355_v32 = vld [vmem:[%s2013_s23 + $0xb0] sm:$0xff] }
 0x14c   : >> { %1352 = vst [vmem:[%s2009_s18 + $0xa0] sm:$0xff] %v1351_v30  ;;  %v1357_v33 = vld [vmem:[%s2013_s23 + $0xb8] sm:$0xff]  ;;  %1354 = vst [vmem:[%s2009_s18 + $0xa8] sm:$0xff] %v1353_v31  ;;  %v1359_v34 = vld [vmem:[%s2013_s23 + $0xc0] sm:$0xff] }
 0x14d   : >> { %1356 = vst [vmem:[%s2009_s18 + $0xb0] sm:$0xff] %v1355_v32  ;;  %1358 = vst [vmem:[%s2009_s18 + $0xb8] sm:$0xff] %v1357_v33  ;;  %v1361_v35 = vld [vmem:[%s2013_s23 + $0xc8] sm:$0xff]  ;;  %v1363_v36 = vld [vmem:[%s2013_s23 + $0xd0] sm:$0xff] }
 0x14e   : >> { %1360 = vst [vmem:[%s2009_s18 + $0xc0] sm:$0xff] %v1359_v34  ;;  %1362 = vst [vmem:[%s2009_s18 + $0xc8] sm:$0xff] %v1361_v35  ;;  %v1365_v37 = vld [vmem:[%s2013_s23 + $0xd8] sm:$0xff]  ;;  %v1367_v38 = vld [vmem:[%s2013_s23 + $0xe0] sm:$0xff] }
 0x14f   : >> { %1364 = vst [vmem:[%s2009_s18 + $0xd0] sm:$0xff] %v1363_v36  ;;  %v1369_v39 = vld [vmem:[%s2013_s23 + $0xe8] sm:$0xff]  ;;  %1366 = vst [vmem:[%s2009_s18 + $0xd8] sm:$0xff] %v1365_v37  ;;  %v1371_v40 = vld [vmem:[%s2013_s23 + $0xf0] sm:$0xff] }
 0x150   : >> { %1368 = vst [vmem:[%s2009_s18 + $0xe0] sm:$0xff] %v1367_v38  ;;  %1370 = vst [vmem:[%s2009_s18 + $0xe8] sm:$0xff] %v1369_v39  ;;  %v1373_v41 = vld [vmem:[%s2013_s23 + $0xf8] sm:$0xff]  ;;  %v1375_v42 = vld [vmem:[%s2013_s23 + $0x100] sm:$0xff] }
 0x151   : >> { %1372 = vst [vmem:[%s2009_s18 + $0xf0] sm:$0xff] %v1371_v40  ;;  %1374 = vst [vmem:[%s2009_s18 + $0xf8] sm:$0xff] %v1373_v41  ;;  %v1377_v43 = vld [vmem:[%s2013_s23 + $0x108] sm:$0xff]  ;;  %v1379_v44 = vld [vmem:[%s2013_s23 + $0x110] sm:$0xff] }
 0x152   : >> { %1376 = vst [vmem:[%s2009_s18 + $0x100] sm:$0xff] %v1375_v42  ;;  %v1381_v45 = vld [vmem:[%s2013_s23 + $0x118] sm:$0xff]  ;;  %1378 = vst [vmem:[%s2009_s18 + $0x108] sm:$0xff] %v1377_v43  ;;  %v1383_v46 = vld [vmem:[%s2013_s23 + $0x120] sm:$0xff] }
 0x153   : >> { %1380 = vst [vmem:[%s2009_s18 + $0x110] sm:$0xff] %v1379_v44  ;;  %1382 = vst [vmem:[%s2009_s18 + $0x118] sm:$0xff] %v1381_v45  ;;  %v1385_v47 = vld [vmem:[%s2013_s23 + $0x128] sm:$0xff]  ;;  %v1387_v48 = vld [vmem:[%s2013_s23 + $0x130] sm:$0xff] }
 0x154   : >> { %1384 = vst [vmem:[%s2009_s18 + $0x120] sm:$0xff] %v1383_v46  ;;  %1386 = vst [vmem:[%s2009_s18 + $0x128] sm:$0xff] %v1385_v47  ;;  %v1389_v49 = vld [vmem:[%s2013_s23 + $0x138] sm:$0xff]  ;;  %v1391_v50 = vld [vmem:[%s2013_s23 + $0x140] sm:$0xff] }
 0x155   : >> { %1388 = vst [vmem:[%s2009_s18 + $0x130] sm:$0xff] %v1387_v48  ;;  %v1393_v51 = vld [vmem:[%s2013_s23 + $0x148] sm:$0xff]  ;;  %1390 = vst [vmem:[%s2009_s18 + $0x138] sm:$0xff] %v1389_v49  ;;  %v1395_v52 = vld [vmem:[%s2013_s23 + $0x150] sm:$0xff] }
 0x156   : >> { %1392 = vst [vmem:[%s2009_s18 + $0x140] sm:$0xff] %v1391_v50  ;;  %1394 = vst [vmem:[%s2009_s18 + $0x148] sm:$0xff] %v1393_v51  ;;  %v1397_v53 = vld [vmem:[%s2013_s23 + $0x158] sm:$0xff]  ;;  %v1399_v54 = vld [vmem:[%s2013_s23 + $0x160] sm:$0xff] }
 0x157   : >> { %1396 = vst [vmem:[%s2009_s18 + $0x150] sm:$0xff] %v1395_v52  ;;  %1398 = vst [vmem:[%s2009_s18 + $0x158] sm:$0xff] %v1397_v53  ;;  %v1401_v55 = vld [vmem:[%s2013_s23 + $0x168] sm:$0xff]  ;;  %v1403_v56 = vld [vmem:[%s2013_s23 + $0x170] sm:$0xff] }
 0x158   : >> { %1400 = vst [vmem:[%s2009_s18 + $0x160] sm:$0xff] %v1399_v54  ;;  %v1405_v57 = vld [vmem:[%s2013_s23 + $0x178] sm:$0xff]  ;;  %1402 = vst [vmem:[%s2009_s18 + $0x168] sm:$0xff] %v1401_v55  ;;  %v1407_v58 = vld [vmem:[%s2013_s23 + $0x180] sm:$0xff] }
 0x159   : >> { %1404 = vst [vmem:[%s2009_s18 + $0x170] sm:$0xff] %v1403_v56  ;;  %1406 = vst [vmem:[%s2009_s18 + $0x178] sm:$0xff] %v1405_v57  ;;  %v1409_v59 = vld [vmem:[%s2013_s23 + $0x188] sm:$0xff]  ;;  %v1411_v60 = vld [vmem:[%s2013_s23 + $0x190] sm:$0xff] }
 0x15a   : >> { %1408 = vst [vmem:[%s2009_s18 + $0x180] sm:$0xff] %v1407_v58  ;;  %1410 = vst [vmem:[%s2009_s18 + $0x188] sm:$0xff] %v1409_v59  ;;  %v1413_v61 = vld [vmem:[%s2013_s23 + $0x198] sm:$0xff]  ;;  %v1415_v62 = vld [vmem:[%s2013_s23 + $0x1a0] sm:$0xff] }
 0x15b   : >> { %1412 = vst [vmem:[%s2009_s18 + $0x190] sm:$0xff] %v1411_v60  ;;  %v1417_v63 = vld [vmem:[%s2013_s23 + $0x1a8] sm:$0xff]  ;;  %1414 = vst [vmem:[%s2009_s18 + $0x198] sm:$0xff] %v1413_v61  ;;  %v1419_v0 = vld [vmem:[%s2013_s23 + $0x1b0] sm:$0xff]  ;;  %1307 = sbr.rel (!%p1304_p12) target bundleno = 321 (0x141), region = 129 }
 0x15c   : >> { %1416 = vst [vmem:[%s2009_s18 + $0x1a0] sm:$0xff] %v1415_v62  ;;  %1418 = vst [vmem:[%s2009_s18 + $0x1a8] sm:$0xff] %v1417_v63  ;;  %v1421_v1 = vld [vmem:[%s2013_s23 + $0x1b8] sm:$0xff]  ;;  %v1423_v2 = vld [vmem:[%s2013_s23 + $0x1c0] sm:$0xff] }
 0x15d   : >> { %1420 = vst [vmem:[%s2009_s18 + $0x1b0] sm:$0xff] %v1419_v0  ;;  %1422 = vst [vmem:[%s2009_s18 + $0x1b8] sm:$0xff] %v1421_v1  ;;  %v1425_v3 = vld [vmem:[%s2013_s23 + $0x1c8] sm:$0xff]  ;;  %v1427_v4 = vld [vmem:[%s2013_s23 + $0x1d0] sm:$0xff] }
 0x15e   : >> { %1424 = vst [vmem:[%s2009_s18 + $0x1c0] sm:$0xff] %v1423_v2  ;;  %v1429_v5 = vld [vmem:[%s2013_s23 + $0x1d8] sm:$0xff]  ;;  %1426 = vst [vmem:[%s2009_s18 + $0x1c8] sm:$0xff] %v1425_v3  ;;  %v1431_v7 = vld [vmem:[%s2013_s23 + $0x1e0] sm:$0xff] }
 0x15f   : >> { %1428 = vst [vmem:[%s2009_s18 + $0x1d0] sm:$0xff] %v1427_v4  ;;  %1430 = vst [vmem:[%s2009_s18 + $0x1d8] sm:$0xff] %v1429_v5  ;;  %v1433_v8 = vld [vmem:[%s2013_s23 + $0x1e8] sm:$0xff]  ;;  %v1435_v9 = vld [vmem:[%s2013_s23 + $0x1f0] sm:$0xff] }
 0x160   : >> { %1432 = vst [vmem:[%s2009_s18 + $0x1e0] sm:$0xff] %v1431_v7  ;;  %1434 = vst [vmem:[%s2009_s18 + $0x1e8] sm:$0xff] %v1433_v8  ;;  %v1437_v10 = vld [vmem:[%s2013_s23 + $0x1f8] sm:$0xff]  ;;  %s2734_s23 = smov %s2599_s10 }
 0x161   : >> { %1436 = vst [vmem:[%s2009_s18 + $0x1f0] sm:$0xff] %v1435_v9  ;;  %1438 = vst [vmem:[%s2009_s18 + $0x1f8] sm:$0xff] %v1437_v10  ;;  %s2733_s18 = smov %s2602_s11 }
 0x162 PF: > { %s2707_s12 = sand.u32 63, %s2740_s25   ;;  %s1677_s13 = sshll.u32 %s2532_s6, 9 }
 0x163   : > { %s1450_s14 = scalar_lea.vmem %s2271_s15, %s1677_s13 [#allocation2]   ;;  %s1452_s17 = scalar_lea.vmem %s2526_s29, %s1677_s13  }
 0x164   : > { %p1671_p13 = scmp.le.s32.totalorder %s2707_s12, 0 }
 0x165   : > { %s2023_s20 = smov (!%p1671_p13), %s1452_s17   ;;  %s2027_s21 = smov (!%p1671_p13), %s1450_s14  }
 0x166   : > { %1549 = sbr.rel (%p1671_p13) target bundleno = 375 (0x177), region = 134  ;;  %s2031_s24 = smov (!%p1671_p13), 0  }
 0x167   : > { %s2035_s26 = smov (!%p1671_p13), 0  }
 0x16d LB: >> { %v1462_v6 = vld [vmem:[%s2029_s21] sm:$0xff]  ;;  %s1464_s25 = sadd.s32 1, %s2033_s24  ;;  %s1456_s26 = sadd.s32 1, %s2037_s26   ;;  %s2037_s26 = sphi %s2035_s26, %s1456_s26   ;;  %s2033_s24 = sphi %s2031_s24, %s2032_s24   ;;  %s2029_s21 = sphi %s2027_s21, %s1469_s21   ;;  %s2025_s20 = sphi %s2023_s20, %s1470_s20  }
 0x16e   : >> { %1463 = vst [vmem:[%s2025_s20] sm:$0xff] %v1462_v6  ;;  %p1465_p0 = scmp.ge.s32.totalorder %s1464_s25, %s2707_s12  ;;  %p1455_p1 = scmp.ge.s32.totalorder %s1456_s26, %s2707_s12 }
 0x170   : >> { %s2744_s25 = smov (%p1465_p0, %s1464_s25), 0  ;;  %1458 = sbr.rel (!%p1455_p1) target bundleno = 365 (0x16d), region = 140 }
 0x171   : >> { %s1672_s15 = sshll.u32 %s2744_s25, 3  ;;  %s2032_s24 = smov %s2744_s25  }
 0x172   : >> { %s1469_s21 = scalar_lea.vmem %s1450_s14, %s1672_s15 [#allocation2]   ;;  %s1470_s20 = scalar_lea.vmem %s1452_s17, %s1672_s15  }
 0x177 PF: > { %p11_p2 = scmp.ge.s32.totalorder %s2079_s19, 4   ;;  %s2736_s15 = smov %s2001_s16 }
 0x178   : > { %s2737_s16 = smov %s2087_s22  ;;  %s2738_s17 = smov %s2079_s19 }
 0x179   :  { %13 = sbr.rel (!%p11_p2) target bundleno = 2 (0x2), region = 151 }

// kernel: ifno2d_forward.22
= control target key start
LH: loop header
LB: loop body
LE: loop exit
PB: predicated region body
PF: predicated region fallthrough
CT: control target
= control target key end

     0   :  { %vm95_vm0 = vcmask 261120   ;;  %s2986_s1 = inlined_call_operand.vmem [shape: f32[32,128], index: 1, kind: input, shape index: {}]   ;;  %s2987_s0 = inlined_call_operand.vmem [shape: f32[512,32], index: 0, kind: input, shape index: {}]   ;;  %s2988_s3 = inlined_call_operand.vmem [shape: f32[128,128], index: 3, kind: input, shape index: {}]   ;;  %s2989_s2 = inlined_call_operand.vmem [shape: f32[1,128], index: 2, kind: input, shape index: {}]   ;;  %s2990_s4 = inlined_call_operand.vmem [shape: f32[1,128], index: 4, kind: input, shape index: {}]   ;;  %s2991_s5 = inlined_call_operand.vmem [shape: f32[512,128], index: 5, kind: output, shape index: {}]  }
   0x1   :  { %v84_v0 = vld [vmem:[%s2986_s1] sm:$0xff]  ;;  %v85_v1 = vld [vmem:[%s2986_s1 + $0x8] sm:$0xff]  ;;  %v86_v2 = vld [vmem:[%s2986_s1 + $0x10] sm:$0xff] }
   0x2   :  { %v1916_v3 = vpack.c.bf16 %v85_v1, %v84_v0  ;;  %v87_v4 = vld [vmem:[%s2986_s1 + $0x18] sm:$0xff]  ;;  %v20_v5 = vld [vmem:[%s2987_s0] sm:$0xff]  ;;  %v21_v7 = vld [vmem:[%s2987_s0 + $0x8] sm:$0xff] }
   0x3   :  { %v1920_v6 = vpack.c.bf16 %v87_v4, %v86_v2  ;;  %1692 = vmatprep.mubr.msk.f32.mxu0 %vm95_vm0, %v20_v5  ;;  %v22_v8 = vld [vmem:[%s2987_s0 + $0x10] sm:$0xff]  ;;  %v23_v9 = vld [vmem:[%s2987_s0 + $0x18] sm:$0xff]  ;;  %v24_v10 = vld [vmem:[%s2987_s0 + $0x20] sm:$0xff] }
   0x4   :  { %1917 = vmatprep.subr.bf16.mxu0 %v1916_v3  ;;  %v25_v11 = vld [vmem:[%s2987_s0 + $0x28] sm:$0xff]  ;;  %v26_v12 = vld [vmem:[%s2987_s0 + $0x30] sm:$0xff]  ;;  %v27_v13 = vld [vmem:[%s2987_s0 + $0x38] sm:$0xff] }
   0x5   :  { %1919 = vmatpush3.bf16.msra.mxu0 %v1916_v3  ;;  %v28_v14 = vld [vmem:[%s2987_s0 + $0x40] sm:$0xff]  ;;  %v995_v16 = vld [vmem:[%s2988_s3 + $0x8] sm:$0xff]  ;;  %v996_v17 = vld [vmem:[%s2988_s3 + $0x10] sm:$0xff] }
   0x6   :  { %1921 = vmatprep.subr.bf16.mxu0 %v1920_v6  ;;  %v994_v15 = vld [vmem:[%s2988_s3] sm:$0xff]  ;;  %v997_v18 = vld [vmem:[%s2988_s3 + $0x18] sm:$0xff]  ;;  %v29_v19 = vld [vmem:[%s2987_s0 + $0x48] sm:$0xff] }
   0x7   :  { %v1924_v20 = vpack.c.bf16 %v995_v16, %v994_v15  ;;  %v30_v21 = vld [vmem:[%s2987_s0 + $0x50] sm:$0xff]  ;;  %v1928_v22 = vpack.c.bf16 %v997_v18, %v996_v17  ;;  %v998_v23 = vld [vmem:[%s2988_s3 + $0x20] sm:$0xff]  ;;  %v999_v24 = vld [vmem:[%s2988_s3 + $0x28] sm:$0xff] }
   0x8   :  { %v31_v25 = vld [vmem:[%s2987_s0 + $0x58] sm:$0xff]  ;;  %v32_v26 = vld [vmem:[%s2987_s0 + $0x60] sm:$0xff]  ;;  %v1932_v27 = vpack.c.bf16 %v999_v24, %v998_v23  ;;  %v33_v28 = vld [vmem:[%s2987_s0 + $0x68] sm:$0xff] }
   0x9   :  { %1923 = vmatpush3.bf16.msra.mxu0 %v1920_v6  ;;  %1956 = vmatprep.subr.bf16.mxu1 %v1924_v20  ;;  %v34_v29 = vld [vmem:[%s2987_s0 + $0x70] sm:$0xff]  ;;  %v35_v30 = vld [vmem:[%s2987_s0 + $0x78] sm:$0xff]  ;;  %v36_v31 = vld [vmem:[%s2987_s0 + $0x80] sm:$0xff] }
   0xa   :  { %1925 = vmatprep.subr.bf16.mxu0 %v1924_v20  ;;  %1964 = vmatpush3.bf16.msra.mxu1 %v1924_v20  ;;  %v37_v32 = vld [vmem:[%s2987_s0 + $0x88] sm:$0xff]  ;;  %v38_v33 = vld [vmem:[%s2987_s0 + $0x90] sm:$0xff]  ;;  %v39_v34 = vld [vmem:[%s2987_s0 + $0x98] sm:$0xff] }
   0xb   :  { %1957 = vmatprep.subr.bf16.mxu1 %v1928_v22  ;;  %v40_v35 = vld [vmem:[%s2987_s0 + $0xa0] sm:$0xff]  ;;  %v41_v36 = vld [vmem:[%s2987_s0 + $0xa8] sm:$0xff]  ;;  %v42_v37 = vld [vmem:[%s2987_s0 + $0xb0] sm:$0xff] }
   0xc   :  { %1693 = vmatmul.mubr.msk.f32.vlgmr.msra.gmra.mrb[0].mxu0 %vm95_vm0, %v21_v7  ;;  %v43_v38 = vld [vmem:[%s2987_s0 + $0xb8] sm:$0xff]  ;;  %v44_v39 = vld [vmem:[%s2987_s0 + $0xc0] sm:$0xff]  ;;  %v45_v40 = vld [vmem:[%s2987_s0 + $0xc8] sm:$0xff] }
   0xd   :  { %1695 = vmatprep.mubr.msk.f32.mxu0 %vm95_vm0, %v22_v8  ;;  %1927 = vmatpush3.bf16.msra.mxu0 %v1924_v20  ;;  %v46_v41 = vld [vmem:[%s2987_s0 + $0xd0] sm:$0xff]  ;;  %v47_v42 = vld [vmem:[%s2987_s0 + $0xd8] sm:$0xff]  ;;  %v48_v43 = vld [vmem:[%s2987_s0 + $0xe0] sm:$0xff] }
   0xe   :  { %1929 = vmatprep.subr.bf16.mxu0 %v1928_v22  ;;  %1965 = vmatpush3.bf16.msra.mxu1 %v1928_v22  ;;  %v49_v44 = vld [vmem:[%s2987_s0 + $0xe8] sm:$0xff]  ;;  %v50_v45 = vld [vmem:[%s2987_s0 + $0xf0] sm:$0xff]  ;;  %v51_v46 = vld [vmem:[%s2987_s0 + $0xf8] sm:$0xff] }
   0xf   :  { %1958 = vmatprep.subr.bf16.mxu1 %v1932_v27  ;;  %v52_v47 = vld [vmem:[%s2987_s0 + $0x100] sm:$0xff]  ;;  %v53_v48 = vld [vmem:[%s2987_s0 + $0x108] sm:$0xff]  ;;  %v54_v49 = vld [vmem:[%s2987_s0 + $0x110] sm:$0xff] }
  0x10   :  { %1696 = vmatmul.mubr.msk.f32.gmra.mrb[2].mxu0 %vm95_vm0, %v23_v9  ;;  %v55_v50 = vld [vmem:[%s2987_s0 + $0x118] sm:$0xff]  ;;  %v56_v51 = vld [vmem:[%s2987_s0 + $0x120] sm:$0xff]  ;;  %v57_v52 = vld [vmem:[%s2987_s0 + $0x128] sm:$0xff] }
  0x11   :  { %1698 = vmatprep.mubr.msk.f32.mxu0 %vm95_vm0, %v24_v10  ;;  %1931 = vmatpush3.bf16.msra.mxu0 %v1928_v22  ;;  %v58_v53 = vld [vmem:[%s2987_s0 + $0x130] sm:$0xff]  ;;  %v59_v54 = vld [vmem:[%s2987_s0 + $0x138] sm:$0xff]  ;;  %v60_v55 = vld [vmem:[%s2987_s0 + $0x140] sm:$0xff] }
  0x12   :  { %1933 = vmatprep.subr.bf16.mxu0 %v1932_v27  ;;  %1966 = vmatpush3.bf16.msra.mxu1 %v1932_v27  ;;  %v61_v56 = vld [vmem:[%s2987_s0 + $0x148] sm:$0xff]  ;;  %v62_v57 = vld [vmem:[%s2987_s0 + $0x150] sm:$0xff]  ;;  %v63_v58 = vld [vmem:[%s2987_s0 + $0x158] sm:$0xff] }
  0x13   :  { %v64_v59 = vld [vmem:[%s2987_s0 + $0x160] sm:$0xff]  ;;  %v1000_v60 = vld [vmem:[%s2988_s3 + $0x30] sm:$0xff]  ;;  %v1001_v61 = vld [vmem:[%s2988_s3 + $0x38] sm:$0xff] }
  0x14   :  { %1699 = vmatmul.mubr.msk.f32.gmra.mrb[4].mxu0 %vm95_vm0, %v25_v11  ;;  %v1936_v62 = vpack.c.bf16 %v1001_v61, %v1000_v60  ;;  %v65_v63 = vld [vmem:[%s2987_s0 + $0x168] sm:$0xff]  ;;  %v66_v0 = vld [vmem:[%s2987_s0 + $0x170] sm:$0xff]  ;;  %v1002_v1 = vld [vmem:[%s2988_s3 + $0x40] sm:$0xff] }
  0x15   :  { %1701 = vmatprep.mubr.msk.f32.mxu0 %vm95_vm0, %v26_v12  ;;  %1935 = vmatpush3.bf16.msra.mxu0 %v1932_v27  ;;  %v1003_v2 = vld [vmem:[%s2988_s3 + $0x48] sm:$0xff]  ;;  %v67_v4 = vld [vmem:[%s2987_s0 + $0x178] sm:$0xff]  ;;  %v68_v5 = vld [vmem:[%s2987_s0 + $0x180] sm:$0xff] }
  0x16   :  { %1937 = vmatprep.subr.bf16.mxu0 %v1936_v62  ;;  %1959 = vmatprep.subr.bf16.mxu1 %v1936_v62  ;;  %v1940_v3 = vpack.c.bf16 %v1003_v2, %v1002_v1  ;;  %v1004_v6 = vld [vmem:[%s2988_s3 + $0x50] sm:$0xff]  ;;  %v1005_v7 = vld [vmem:[%s2988_s3 + $0x58] sm:$0xff]  ;;  %v69_v9 = vld [vmem:[%s2987_s0 + $0x188] sm:$0xff] }
  0x17   :  { %1967 = vmatpush3.bf16.msra.mxu1 %v1936_v62  ;;  %v1944_v8 = vpack.c.bf16 %v1005_v7, %v1004_v6  ;;  %v70_v10 = vld [vmem:[%s2987_s0 + $0x190] sm:$0xff]  ;;  %v1006_v11 = vld [vmem:[%s2988_s3 + $0x60] sm:$0xff]  ;;  %v1007_v12 = vld [vmem:[%s2988_s3 + $0x68] sm:$0xff] }
  0x18   :  { %1702 = vmatmul.mubr.msk.f32.gmra.mrb[6].mxu0 %vm95_vm0, %v27_v13  ;;  %1960 = vmatprep.subr.bf16.mxu1 %v1940_v3  ;;  %v1948_v13 = vpack.c.bf16 %v1007_v12, %v1006_v11  ;;  %v72_v15 = vld [vmem:[%s2987_s0 + $0x1a0] sm:$0xff]  ;;  %v1008_v16 = vld [vmem:[%s2988_s3 + $0x70] sm:$0xff]  ;;  %v1009_v17 = vld [vmem:[%s2988_s3 + $0x78] sm:$0xff] }
  0x19   :  { %1704 = vmatprep.mubr.msk.f32.mxu0 %vm95_vm0, %v28_v14  ;;  %1939 = vmatpush3.bf16.msra.mxu0 %v1936_v62  ;;  %v71_v14 = vld [vmem:[%s2987_s0 + $0x198] sm:$0xff]  ;;  %v1952_v18 = vpack.c.bf16 %v1009_v17, %v1008_v16  ;;  %v74_v20 = vld [vmem:[%s2987_s0 + $0x1b0] sm:$0xff]  ;;  %v76_v22 = vld [vmem:[%s2987_s0 + $0x1c0] sm:$0xff] }
  0x1a   :  { %1941 = vmatprep.subr.bf16.mxu0 %v1940_v3  ;;  %v77_v23 = vld [vmem:[%s2987_s0 + $0x1c8] sm:$0xff]  ;;  %v78_v24 = vld [vmem:[%s2987_s0 + $0x1d0] sm:$0xff] }
  0x1b   :  { %1968 = vmatpush3.bf16.msra.mxu1 %v1940_v3  ;;  %v81_v27 = vld [vmem:[%s2987_s0 + $0x1e8] sm:$0xff] }
  0x1c   :  { %1705 = vmatmul.mubr.msk.f32.gmra.mrb[8].mxu0 %vm95_vm0, %v29_v19  ;;  %1961 = vmatprep.subr.bf16.mxu1 %v1944_v8  ;;  %v73_v19 = vld [vmem:[%s2987_s0 + $0x1a8] sm:$0xff] }
  0x1d   :  { %1707 = vmatprep.mubr.msk.f32.mxu0 %vm95_vm0, %v30_v21  ;;  %1943 = vmatpush3.bf16.msra.mxu0 %v1940_v3  ;;  %v75_v21 = vld [vmem:[%s2987_s0 + $0x1b8] sm:$0xff] }
  0x1e   :  { %1945 = vmatprep.subr.bf16.mxu0 %v1944_v8 }
  0x1f   :  { %1969 = vmatpush3.bf16.msra.mxu1 %v1944_v8 }
  0x20   :  { %1708 = vmatmul.mubr.msk.f32.gmra.mrb[10].mxu0 %vm95_vm0, %v31_v25  ;;  %1962 = vmatprep.subr.bf16.mxu1 %v1948_v13  ;;  %v79_v25 = vld [vmem:[%s2987_s0 + $0x1d8] sm:$0xff] }
  0x21   :  { %1710 = vmatprep.mubr.msk.f32.mxu0 %vm95_vm0, %v32_v26  ;;  %1947 = vmatpush3.bf16.msra.mxu0 %v1944_v8  ;;  %v80_v26 = vld [vmem:[%s2987_s0 + $0x1e0] sm:$0xff] }
  0x22   :  { %1949 = vmatprep.subr.bf16.mxu0 %v1948_v13 }
  0x23   :  { %1970 = vmatpush3.bf16.msra.mxu1 %v1948_v13 }
  0x24   :  { %1711 = vmatmul.mubr.msk.f32.gmra.mrb[12].mxu0 %vm95_vm0, %v33_v28  ;;  %1963 = vmatprep.subr.bf16.mxu1 %v1952_v18  ;;  %v82_v28 = vld [vmem:[%s2987_s0 + $0x1f0] sm:$0xff] }
  0x25   :  { %1713 = vmatprep.mubr.msk.f32.mxu0 %vm95_vm0, %v34_v29  ;;  %1951 = vmatpush3.bf16.msra.mxu0 %v1948_v13  ;;  %v83_v29 = vld [vmem:[%s2987_s0 + $0x1f8] sm:$0xff] }
  0x26   :  { %1953 = vmatprep.subr.bf16.mxu0 %v1952_v18 }
  0x27   :  { %1971 = vmatpush3.bf16.msra.mxu1 %v1952_v18 }
  0x28   :  { %1714 = vmatmul.mubr.msk.f32.gmra.mrb[14].mxu0 %vm95_vm0, %v35_v30  ;;  %v2450_v30 = vld [vmem:[%s2989_s2] ss:$0 sm:$0xff] }
  0x29   :  { %1716 = vmatprep.mubr.msk.f32.mxu0 %vm95_vm0, %v36_v31  ;;  %1955 = vmatpush3.bf16.msra.mxu0 %v1952_v18 }
  0x2c   :  { %1717 = vmatmul.mubr.msk.f32.gmra.mrb[16].mxu0 %vm95_vm0, %v37_v32 }
  0x2d   :  { %1719 = vmatprep.mubr.msk.f32.mxu0 %vm95_vm0, %v38_v33 }
  0x30   :  { %1720 = vmatmul.mubr.msk.f32.gmra.mrb[18].mxu0 %vm95_vm0, %v39_v34 }
  0x31   :  { %1722 = vmatprep.mubr.msk.f32.mxu0 %vm95_vm0, %v40_v35 }
  0x34   :  { %1723 = vmatmul.mubr.msk.f32.gmra.mrb[20].mxu0 %vm95_vm0, %v41_v36 }
  0x35   :  { %1725 = vmatprep.mubr.msk.f32.mxu0 %vm95_vm0, %v42_v37 }
  0x38   :  { %1726 = vmatmul.mubr.msk.f32.gmra.mrb[22].mxu0 %vm95_vm0, %v43_v38 }
  0x39   :  { %1728 = vmatprep.mubr.msk.f32.mxu0 %vm95_vm0, %v44_v39 }
  0x3c   :  { %1729 = vmatmul.mubr.msk.f32.gmra.mrb[24].mxu0 %vm95_vm0, %v45_v40 }
  0x3d   :  { %1731 = vmatprep.mubr.msk.f32.mxu0 %vm95_vm0, %v46_v41 }
  0x40   :  { %1732 = vmatmul.mubr.msk.f32.gmra.mrb[26].mxu0 %vm95_vm0, %v47_v42 }
  0x41   :  { %1734 = vmatprep.mubr.msk.f32.mxu0 %vm95_vm0, %v48_v43 }
  0x44   :  { %1735 = vmatmul.mubr.msk.f32.gmra.mrb[28].mxu0 %vm95_vm0, %v49_v44 }
  0x45   :  { %1737 = vmatprep.mubr.msk.f32.mxu0 %vm95_vm0, %v50_v45 }
  0x48   :  { %1738 = vmatmul.mubr.msk.f32.gmra.mrb[30].mxu0 %vm95_vm0, %v51_v46 }
  0x49   :  { %1740 = vmatprep.mubr.msk.f32.mxu0 %vm95_vm0, %v52_v47 }
  0x4c   :  { %1741 = vmatmul.mubr.msk.f32.gmra.mrb[32].mxu0 %vm95_vm0, %v53_v48 }
  0x4d   :  { %1743 = vmatprep.mubr.msk.f32.mxu0 %vm95_vm0, %v54_v49 }
  0x50   :  { %1744 = vmatmul.mubr.msk.f32.gmra.mrb[34].mxu0 %vm95_vm0, %v55_v50 }
  0x51   :  { %1746 = vmatprep.mubr.msk.f32.mxu0 %vm95_vm0, %v56_v51 }
  0x54   :  { %1747 = vmatmul.mubr.msk.f32.gmra.mrb[36].mxu0 %vm95_vm0, %v57_v52 }
  0x55   :  { %1749 = vmatprep.mubr.msk.f32.mxu0 %vm95_vm0, %v58_v53 }
  0x58   :  { %1750 = vmatmul.mubr.msk.f32.gmra.mrb[38].mxu0 %vm95_vm0, %v59_v54 }
  0x59   :  { %1752 = vmatprep.mubr.msk.f32.mxu0 %vm95_vm0, %v60_v55 }
  0x5c   :  { %1753 = vmatmul.mubr.msk.f32.gmra.mrb[40].mxu0 %vm95_vm0, %v61_v56 }
  0x5d   :  { %1755 = vmatprep.mubr.msk.f32.mxu0 %vm95_vm0, %v62_v57 }
  0x60   :  { %1756 = vmatmul.mubr.msk.f32.gmra.mrb[42].mxu0 %vm95_vm0, %v63_v58 }
  0x61   :  { %1758 = vmatprep.mubr.msk.f32.mxu0 %vm95_vm0, %v64_v59 }
  0x64   :  { %1759 = vmatmul.mubr.msk.f32.gmra.mrb[44].mxu0 %vm95_vm0, %v65_v63 }
  0x65   :  { %1761 = vmatprep.mubr.msk.f32.mxu0 %vm95_vm0, %v66_v0 }
  0x68   :  { %1762 = vmatmul.mubr.msk.f32.gmra.mrb[46].mxu0 %vm95_vm0, %v67_v4 }
  0x69   :  { %1764 = vmatprep.mubr.msk.f32.mxu0 %vm95_vm0, %v68_v5 }
  0x6c   :  { %1765 = vmatmul.mubr.msk.f32.gmra.mrb[48].mxu0 %vm95_vm0, %v69_v9 }
  0x6d   :  { %1767 = vmatprep.mubr.msk.f32.mxu0 %vm95_vm0, %v70_v10 }
  0x70   :  { %1768 = vmatmul.mubr.msk.f32.gmra.mrb[50].mxu0 %vm95_vm0, %v71_v14 }
  0x71   :  { %1770 = vmatprep.mubr.msk.f32.mxu0 %vm95_vm0, %v72_v15 }
  0x74   :  { %1771 = vmatmul.mubr.msk.f32.gmra.mrb[52].mxu0 %vm95_vm0, %v73_v19 }
  0x75   :  { %1773 = vmatprep.mubr.msk.f32.mxu0 %vm95_vm0, %v74_v20 }
  0x78   :  { %1774 = vmatmul.mubr.msk.f32.gmra.mrb[54].mxu0 %vm95_vm0, %v75_v21 }
  0x79   :  { %1776 = vmatprep.mubr.msk.f32.mxu0 %vm95_vm0, %v76_v22 }
  0x7c   :  { %1777 = vmatmul.mubr.msk.f32.gmra.mrb[56].mxu0 %vm95_vm0, %v77_v23 }
  0x7d   :  { %1779 = vmatprep.mubr.msk.f32.mxu0 %vm95_vm0, %v78_v24 }
  0x80   :  { %1780 = vmatmul.mubr.msk.f32.gmra.mrb[58].mxu0 %vm95_vm0, %v79_v25 }
  0x81   :  { %1782 = vmatprep.mubr.msk.f32.mxu0 %vm95_vm0, %v80_v26 }
  0x84   :  { %1783 = vmatmul.mubr.msk.f32.gmra.mrb[60].mxu0 %vm95_vm0, %v81_v27 }
  0x85   :  { %1785 = vmatprep.mubr.msk.f32.mxu0 %vm95_vm0, %v82_v28 }
  0x88   :  { %1786 = vmatmul.mubr.msk.f32.gmra.mrb[62].mxu0 %vm95_vm0, %v83_v29 }
  0xdf   :  { %v1694_v31 = vpop.f32.mrb[0].mxu0 }
  0xe0   :  { %v360_v32 = vadd.f32 %v1694_v31, %v2450_v30  ;;  %v354_v33 = vpop.f32.mrb[1].mxu0 }
  0xe1   :  { %v355_v34 = vadd.f32 %v2450_v30, %v354_v33 }
  0xe2   :  { %v739_v35 = vmul.f32 0.70710677, %v360_v32  ;;  %v674_v63 = vmul.f32 0.5, %v360_v32 }
  0xe3   :  { %v738_v36 = vmul.f32 0.70710677, %v355_v34  ;;  %v1697_v37 = vpop.f32.mrb[2].mxu0  ;;  %v673_v59 = vmul.f32 0.5, %v355_v34 }
  0xe4   :  { %1972 = verf.f32 %v739_v35  ;;  %v370_v38 = vadd.f32 %v1697_v37, %v2450_v30  ;;  %v364_v39 = vpop.f32.mrb[3].mxu0 }
  0xe5   :  { %1974 = verf.f32 %v738_v36  ;;  %v365_v40 = vadd.f32 %v2450_v30, %v364_v39 }
  0xe6   :  { %v741_v41 = vmul.f32 0.70710677, %v370_v38  ;;  %v676_v13 = vmul.f32 0.5, %v370_v38 }
  0xe7   :  { %v740_v42 = vmul.f32 0.70710677, %v365_v40  ;;  %v1700_v43 = vpop.f32.mrb[4].mxu0  ;;  %v675_v9 = vmul.f32 0.5, %v365_v40 }
  0xe8   :  { %1976 = verf.f32 %v741_v41  ;;  %v380_v44 = vadd.f32 %v1700_v43, %v2450_v30  ;;  %v374_v45 = vpop.f32.mrb[5].mxu0 }
  0xe9   :  { %1978 = verf.f32 %v740_v42  ;;  %v375_v46 = vadd.f32 %v2450_v30, %v374_v45 }
  0xea   :  { %v743_v47 = vmul.f32 0.70710677, %v380_v44  ;;  %v678_v27 = vmul.f32 0.5, %v380_v44 }
  0xeb   :  { %v742_v48 = vmul.f32 0.70710677, %v375_v46  ;;  %v1703_v49 = vpop.f32.mrb[6].mxu0  ;;  %v677_v23 = vmul.f32 0.5, %v375_v46 }
  0xec   :  { %1980 = verf.f32 %v743_v47  ;;  %v2459_v50 = vadd.f32 %v1703_v49, %v2450_v30  ;;  %v384_v51 = vpop.f32.mrb[7].mxu0 }
  0xed   :  { %1982 = verf.f32 %v742_v48  ;;  %v385_v52 = vadd.f32 %v2450_v30, %v384_v51 }
  0xee   :  { %v1973_v53 = vpop.eup %1972  ;;  %v745_v54 = vmul.f32 0.70710677, %v2459_v50  ;;  %v680_v42 = vmul.f32 0.5, %v2459_v50 }
  0xef   :  { %v1975_v55 = vpop.eup %1974  ;;  %v867_v56 = vadd.f32 1.0, %v1973_v53  ;;  %v744_v57 = vmul.f32 0.70710677, %v385_v52  ;;  %v1706_v58 = vpop.f32.mrb[8].mxu0  ;;  %v679_v40 = vmul.f32 0.5, %v385_v52 }
  0xf0   :  { %v866_v60 = vadd.f32 1.0, %v1975_v55  ;;  %1984 = verf.f32 %v745_v54  ;;  %v2464_v61 = vadd.f32 %v1706_v58, %v2450_v30  ;;  %v394_v62 = vpop.f32.mrb[9].mxu0 }
  0xf1   :  { %1986 = verf.f32 %v744_v57  ;;  %v2467_v0 = vadd.f32 %v2450_v30, %v394_v62  ;;  %v931_v5 = vmul.f32 %v867_v56, %v674_v63 }
  0xf2   :  { %v1977_v1 = vpop.eup %1976  ;;  %v747_v2 = vmul.f32 0.70710677, %v2464_v61  ;;  %v930_v3 = vmul.f32 %v866_v60, %v673_v59  ;;  %v682_v56 = vmul.f32 0.5, %v2464_v61 }
  0xf3   :  { %v1979_v4 = vpop.eup %1978  ;;  %v869_v6 = vadd.f32 1.0, %v1977_v1  ;;  %v746_v7 = vmul.f32 0.70710677, %v2467_v0  ;;  %v1709_v8 = vpop.f32.mrb[10].mxu0  ;;  %v681_v52 = vmul.f32 0.5, %v2467_v0 }
  0xf4   :  { %v868_v10 = vadd.f32 1.0, %v1979_v4  ;;  %1988 = verf.f32 %v747_v2  ;;  %v2472_v11 = vadd.f32 %v1709_v8, %v2450_v30  ;;  %v404_v12 = vpop.f32.mrb[11].mxu0  ;;  %1820 = vmatprep.mubr.f32.mxu0 %v930_v3 }
  0xf5   :  { %1990 = verf.f32 %v746_v7  ;;  %v2475_v14 = vadd.f32 %v2450_v30, %v404_v12  ;;  %1821 = vmatmul.mubr.f32.vlgmr.msra.gmra.mrb[64].mxu0 %v931_v5  ;;  %v933_v22 = vmul.f32 %v869_v6, %v676_v13 }
  0xf6   :  { %v1981_v15 = vpop.eup %1980  ;;  %v749_v16 = vmul.f32 0.70710677, %v2472_v11  ;;  %v932_v17 = vmul.f32 %v868_v10, %v675_v9  ;;  %v684_v6 = vmul.f32 0.5, %v2472_v11 }
  0xf7   :  { %v1983_v18 = vpop.eup %1982  ;;  %v871_v19 = vadd.f32 1.0, %v1981_v15  ;;  %v748_v20 = vmul.f32 0.70710677, %v2475_v14  ;;  %v1712_v21 = vpop.f32.mrb[12].mxu0  ;;  %v683_v3 = vmul.f32 0.5, %v2475_v14 }
  0xf8   :  { %v870_v24 = vadd.f32 1.0, %v1983_v18  ;;  %1992 = verf.f32 %v749_v16  ;;  %v2480_v25 = vadd.f32 %v1712_v21, %v2450_v30  ;;  %v414_v26 = vpop.f32.mrb[13].mxu0  ;;  %1823 = vmatprep.mubr.f32.mxu0 %v932_v17 }
  0xf9   :  { %1994 = verf.f32 %v748_v20  ;;  %v2483_v28 = vadd.f32 %v2450_v30, %v414_v26  ;;  %1824 = vmatmul.mubr.f32.gmra.mrb[66].mxu0 %v933_v22  ;;  %v935_v37 = vmul.f32 %v871_v19, %v678_v27 }
  0xfa   :  { %v1985_v29 = vpop.eup %1984  ;;  %v751_v31 = vmul.f32 0.70710677, %v2480_v25  ;;  %v934_v32 = vmul.f32 %v870_v24, %v677_v23  ;;  %v686_v20 = vmul.f32 0.5, %v2480_v25 }
  0xfb   :  { %v1987_v33 = vpop.eup %1986  ;;  %v873_v34 = vadd.f32 1.0, %v1985_v29  ;;  %v750_v35 = vmul.f32 0.70710677, %v2483_v28  ;;  %v1715_v36 = vpop.f32.mrb[14].mxu0  ;;  %v685_v17 = vmul.f32 0.5, %v2483_v28 }
  0xfc   :  { %1996 = verf.f32 %v751_v31  ;;  %v2488_v38 = vadd.f32 %v1715_v36, %v2450_v30  ;;  %v424_v39 = vpop.f32.mrb[15].mxu0  ;;  %1826 = vmatprep.mubr.f32.mxu0 %v934_v32  ;;  %v872_v41 = vadd.f32 1.0, %v1987_v33 }
  0xfd   :  { %1998 = verf.f32 %v750_v35  ;;  %v2492_v43 = vadd.f32 %v2450_v30, %v424_v39  ;;  %1827 = vmatmul.mubr.f32.gmra.mrb[68].mxu0 %v935_v37  ;;  %v937_v53 = vmul.f32 %v873_v34, %v680_v42 }
  0xfe   :  { %v1989_v44 = vpop.eup %1988  ;;  %v753_v45 = vmul.f32 0.70710677, %v2488_v38  ;;  %v936_v46 = vmul.f32 %v872_v41, %v679_v40  ;;  %v688_v35 = vmul.f32 0.5, %v2488_v38 }
  0xff   :  { %v1991_v47 = vpop.eup %1990  ;;  %v875_v48 = vadd.f32 1.0, %v1989_v44  ;;  %v752_v49 = vmul.f32 0.70710677, %v2492_v43  ;;  %v1718_v51 = vpop.f32.mrb[16].mxu0  ;;  %v687_v32 = vmul.f32 0.5, %v2492_v43 }
 0x100   :  { %v874_v54 = vadd.f32 1.0, %v1991_v47  ;;  %2000 = verf.f32 %v753_v45  ;;  %v2498_v50 = vadd.f32 %v1718_v51, %v2450_v30  ;;  %v434_v55 = vpop.f32.mrb[17].mxu0  ;;  %1829 = vmatprep.mubr.f32.mxu1 %v936_v46 }
 0x101   :  { %2002 = verf.f32 %v752_v49  ;;  %v2502_v57 = vadd.f32 %v2450_v30, %v434_v55  ;;  %1830 = vmatmul.mubr.f32.vlgmr.msra.gmra.mrb[0].mxu1 %v937_v53  ;;  %v939_v2 = vmul.f32 %v875_v48, %v682_v56 }
 0x102   :  { %v1993_v58 = vpop.eup %1992  ;;  %v755_v59 = vmul.f32 0.70710677, %v2498_v50  ;;  %v938_v60 = vmul.f32 %v874_v54, %v681_v52  ;;  %v690_v49 = vmul.f32 0.5, %v2498_v50 }
 0x103   :  { %v1995_v62 = vpop.eup %1994  ;;  %v877_v63 = vadd.f32 1.0, %v1993_v58  ;;  %v754_v0 = vmul.f32 0.70710677, %v2502_v57  ;;  %v1721_v1 = vpop.f32.mrb[18].mxu0  ;;  %v689_v46 = vmul.f32 0.5, %v2502_v57 }
 0x104   :  { %v876_v4 = vadd.f32 1.0, %v1995_v62  ;;  %2004 = verf.f32 %v755_v59  ;;  %v2508_v61 = vadd.f32 %v1721_v1, %v2450_v30  ;;  %v444_v5 = vpop.f32.mrb[19].mxu0  ;;  %1832 = vmatprep.mubr.f32.mxu1 %v938_v60 }
 0x105   :  { %2006 = verf.f32 %v754_v0  ;;  %v2512_v7 = vadd.f32 %v2450_v30, %v444_v5  ;;  %1833 = vmatmul.mubr.f32.gmra.mrb[2].mxu1 %v939_v2  ;;  %v941_v16 = vmul.f32 %v877_v63, %v684_v6 }
 0x106   :  { %v1997_v8 = vpop.eup %1996  ;;  %v757_v9 = vmul.f32 0.70710677, %v2508_v61  ;;  %v940_v10 = vmul.f32 %v876_v4, %v683_v3  ;;  %v692_v0 = vmul.f32 0.5, %v2508_v61 }
 0x107   :  { %v1999_v12 = vpop.eup %1998  ;;  %v879_v13 = vadd.f32 1.0, %v1997_v8  ;;  %v756_v14 = vmul.f32 0.70710677, %v2512_v7  ;;  %v1724_v15 = vpop.f32.mrb[20].mxu0  ;;  %v691_v60 = vmul.f32 0.5, %v2512_v7 }
 0x108   :  { %v878_v18 = vadd.f32 1.0, %v1999_v12  ;;  %2008 = verf.f32 %v757_v9  ;;  %v2518_v11 = vadd.f32 %v1724_v15, %v2450_v30  ;;  %v454_v19 = vpop.f32.mrb[21].mxu0  ;;  %1835 = vmatprep.mubr.f32.mxu1 %v940_v10 }
 0x109   :  { %2010 = verf.f32 %v756_v14  ;;  %v2522_v21 = vadd.f32 %v2450_v30, %v454_v19  ;;  %1836 = vmatmul.mubr.f32.gmra.mrb[4].mxu1 %v941_v16  ;;  %v943_v31 = vmul.f32 %v879_v13, %v686_v20 }
 0x10a   :  { %v2001_v22 = vpop.eup %2000  ;;  %v759_v23 = vmul.f32 0.70710677, %v2518_v11  ;;  %v942_v24 = vmul.f32 %v878_v18, %v685_v17  ;;  %v694_v14 = vmul.f32 0.5, %v2518_v11 }
 0x10b   :  { %v2003_v26 = vpop.eup %2002  ;;  %v881_v27 = vadd.f32 1.0, %v2001_v22  ;;  %v758_v28 = vmul.f32 0.70710677, %v2522_v21  ;;  %v1727_v29 = vpop.f32.mrb[22].mxu0  ;;  %v693_v10 = vmul.f32 0.5, %v2522_v21 }
 0x10c   :  { %v880_v33 = vadd.f32 1.0, %v2003_v26  ;;  %2012 = verf.f32 %v759_v23  ;;  %v2528_v25 = vadd.f32 %v1727_v29, %v2450_v30  ;;  %v464_v34 = vpop.f32.mrb[23].mxu0  ;;  %1838 = vmatprep.mubr.f32.mxu1 %v942_v24 }
 0x10d   :  { %2014 = verf.f32 %v758_v28  ;;  %v2532_v36 = vadd.f32 %v2450_v30, %v464_v34  ;;  %1839 = vmatmul.mubr.f32.gmra.mrb[6].mxu1 %v943_v31  ;;  %v945_v45 = vmul.f32 %v881_v27, %v688_v35 }
 0x10e   :  { %v2005_v37 = vpop.eup %2004  ;;  %v761_v39 = vmul.f32 0.70710677, %v2528_v25  ;;  %v944_v40 = vmul.f32 %v880_v33, %v687_v32  ;;  %v696_v28 = vmul.f32 0.5, %v2528_v25 }
 0x10f   :  { %v2007_v41 = vpop.eup %2006  ;;  %v883_v42 = vadd.f32 1.0, %v2005_v37  ;;  %v760_v43 = vmul.f32 0.70710677, %v2532_v36  ;;  %v1730_v44 = vpop.f32.mrb[24].mxu0  ;;  %v695_v24 = vmul.f32 0.5, %v2532_v36 }
 0x110   :  { %v882_v47 = vadd.f32 1.0, %v2007_v41  ;;  %2016 = verf.f32 %v761_v39  ;;  %v2538_v38 = vadd.f32 %v1730_v44, %v2450_v30  ;;  %v474_v48 = vpop.f32.mrb[25].mxu0  ;;  %1841 = vmatprep.mubr.f32.mxu1 %v944_v40 }
 0x111   :  { %2018 = verf.f32 %v760_v43  ;;  %v2542_v51 = vadd.f32 %v2450_v30, %v474_v48  ;;  %1842 = vmatmul.mubr.f32.gmra.mrb[8].mxu1 %v945_v45  ;;  %v947_v59 = vmul.f32 %v883_v42, %v690_v49 }
 0x112   :  { %v2009_v53 = vpop.eup %2008  ;;  %v763_v52 = vmul.f32 0.70710677, %v2538_v38  ;;  %v946_v54 = vmul.f32 %v882_v47, %v689_v46  ;;  %v698_v43 = vmul.f32 0.5, %v2538_v38 }
 0x113   :  { %v2011_v55 = vpop.eup %2010  ;;  %v885_v56 = vadd.f32 1.0, %v2009_v53  ;;  %v762_v57 = vmul.f32 0.70710677, %v2542_v51  ;;  %v1733_v58 = vpop.f32.mrb[26].mxu0  ;;  %v697_v40 = vmul.f32 0.5, %v2542_v51 }
 0x114   :  { %v884_v62 = vadd.f32 1.0, %v2011_v55  ;;  %2020 = verf.f32 %v763_v52  ;;  %v2548_v50 = vadd.f32 %v1733_v58, %v2450_v30  ;;  %v484_v63 = vpop.f32.mrb[27].mxu0  ;;  %1844 = vmatprep.mubr.f32.mxu1 %v946_v54 }
 0x115   :  { %2022 = verf.f32 %v762_v57  ;;  %v2552_v1 = vadd.f32 %v2450_v30, %v484_v63  ;;  %1845 = vmatmul.mubr.f32.gmra.mrb[10].mxu1 %v947_v59  ;;  %v949_v9 = vmul.f32 %v885_v56, %v692_v0 }
 0x116   :  { %v2013_v2 = vpop.eup %2012  ;;  %v765_v3 = vmul.f32 0.70710677, %v2548_v50  ;;  %v948_v4 = vmul.f32 %v884_v62, %v691_v60  ;;  %v700_v57 = vmul.f32 0.5, %v2548_v50 }
 0x117   :  { %v2015_v5 = vpop.eup %2014  ;;  %v887_v6 = vadd.f32 1.0, %v2013_v2  ;;  %v764_v7 = vmul.f32 0.70710677, %v2552_v1  ;;  %v1736_v8 = vpop.f32.mrb[28].mxu0  ;;  %v699_v54 = vmul.f32 0.5, %v2552_v1 }
 0x118   :  { %v886_v12 = vadd.f32 1.0, %v2015_v5  ;;  %2024 = verf.f32 %v765_v3  ;;  %v2558_v61 = vadd.f32 %v1736_v8, %v2450_v30  ;;  %v494_v13 = vpop.f32.mrb[29].mxu0  ;;  %1847 = vmatprep.mubr.f32.mxu1 %v948_v4 }
 0x119   :  { %2026 = verf.f32 %v764_v7  ;;  %v2562_v15 = vadd.f32 %v2450_v30, %v494_v13  ;;  %1848 = vmatmul.mubr.f32.gmra.mrb[12].mxu1 %v949_v9  ;;  %v951_v23 = vmul.f32 %v887_v6, %v694_v14 }
 0x11a   :  { %v2017_v16 = vpop.eup %2016  ;;  %v767_v17 = vmul.f32 0.70710677, %v2558_v61  ;;  %v950_v18 = vmul.f32 %v886_v12, %v693_v10  ;;  %v702_v7 = vmul.f32 0.5, %v2558_v61 }
 0x11b   :  { %v2019_v19 = vpop.eup %2018  ;;  %v889_v20 = vadd.f32 1.0, %v2017_v16  ;;  %v766_v21 = vmul.f32 0.70710677, %v2562_v15  ;;  %v1739_v22 = vpop.f32.mrb[30].mxu0  ;;  %v701_v4 = vmul.f32 0.5, %v2562_v15 }
 0x11c   :  { %v888_v26 = vadd.f32 1.0, %v2019_v19  ;;  %2028 = verf.f32 %v767_v17  ;;  %v2568_v11 = vadd.f32 %v1739_v22, %v2450_v30  ;;  %v504_v27 = vpop.f32.mrb[31].mxu0  ;;  %1850 = vmatprep.mubr.f32.mxu1 %v950_v18 }
 0x11d   :  { %2030 = verf.f32 %v766_v21  ;;  %v2572_v29 = vadd.f32 %v2450_v30, %v504_v27  ;;  %1851 = vmatmul.mubr.f32.gmra.mrb[14].mxu1 %v951_v23  ;;  %v953_v39 = vmul.f32 %v889_v20, %v696_v28 }
 0x11e   :  { %v2021_v31 = vpop.eup %2020  ;;  %v769_v32 = vmul.f32 0.70710677, %v2568_v11  ;;  %v952_v33 = vmul.f32 %v888_v26, %v695_v24  ;;  %v704_v21 = vmul.f32 0.5, %v2568_v11 }
 0x11f   :  { %v2023_v34 = vpop.eup %2022  ;;  %v891_v35 = vadd.f32 1.0, %v2021_v31  ;;  %v768_v36 = vmul.f32 0.70710677, %v2572_v29  ;;  %v1742_v37 = vpop.f32.mrb[32].mxu0  ;;  %v703_v18 = vmul.f32 0.5, %v2572_v29 }
 0x120   :  { %v890_v41 = vadd.f32 1.0, %v2023_v34  ;;  %2032 = verf.f32 %v769_v32  ;;  %v2578_v25 = vadd.f32 %v1742_v37, %v2450_v30  ;;  %v514_v42 = vpop.f32.mrb[33].mxu0  ;;  %1853 = vmatprep.mubr.f32.mxu1 %v952_v33 }
 0x121   :  { %2034 = verf.f32 %v768_v36  ;;  %v2582_v44 = vadd.f32 %v2450_v30, %v514_v42  ;;  %1854 = vmatmul.mubr.f32.gmra.mrb[16].mxu1 %v953_v39  ;;  %v955_v52 = vmul.f32 %v891_v35, %v698_v43 }
 0x122   :  { %v2025_v45 = vpop.eup %2024  ;;  %v771_v46 = vmul.f32 0.70710677, %v2578_v25  ;;  %v954_v47 = vmul.f32 %v890_v41, %v697_v40  ;;  %v706_v36 = vmul.f32 0.5, %v2578_v25 }
 0x123   :  { %v2027_v48 = vpop.eup %2026  ;;  %v893_v49 = vadd.f32 1.0, %v2025_v45  ;;  %v770_v51 = vmul.f32 0.70710677, %v2582_v44  ;;  %v1745_v53 = vpop.f32.mrb[34].mxu0  ;;  %v705_v33 = vmul.f32 0.5, %v2582_v44 }
 0x124   :  { %v892_v55 = vadd.f32 1.0, %v2027_v48  ;;  %2036 = verf.f32 %v771_v46  ;;  %v2588_v38 = vadd.f32 %v1745_v53, %v2450_v30  ;;  %v524_v56 = vpop.f32.mrb[35].mxu0  ;;  %1856 = vmatprep.mubr.f32.mxu1 %v954_v47 }
 0x125   :  { %2038 = verf.f32 %v770_v51  ;;  %v2592_v58 = vadd.f32 %v2450_v30, %v524_v56  ;;  %1857 = vmatmul.mubr.f32.gmra.mrb[18].mxu1 %v955_v52  ;;  %v957_v3 = vmul.f32 %v893_v49, %v700_v57 }
 0x126   :  { %v2029_v59 = vpop.eup %2028  ;;  %v773_v60 = vmul.f32 0.70710677, %v2588_v38  ;;  %v956_v62 = vmul.f32 %v892_v55, %v699_v54  ;;  %v708_v51 = vmul.f32 0.5, %v2588_v38 }
 0x127   :  { %v2031_v63 = vpop.eup %2030  ;;  %v895_v0 = vadd.f32 1.0, %v2029_v59  ;;  %v772_v1 = vmul.f32 0.70710677, %v2592_v58  ;;  %v1748_v2 = vpop.f32.mrb[36].mxu0  ;;  %v707_v47 = vmul.f32 0.5, %v2592_v58 }
 0x128   :  { %v894_v5 = vadd.f32 1.0, %v2031_v63  ;;  %2040 = verf.f32 %v773_v60  ;;  %v2598_v50 = vadd.f32 %v1748_v2, %v2450_v30  ;;  %v534_v6 = vpop.f32.mrb[37].mxu0  ;;  %1859 = vmatprep.mubr.f32.mxu1 %v956_v62 }
 0x129   :  { %2042 = verf.f32 %v772_v1  ;;  %v2602_v8 = vadd.f32 %v2450_v30, %v534_v6  ;;  %1860 = vmatmul.mubr.f32.gmra.mrb[20].mxu1 %v957_v3  ;;  %v959_v17 = vmul.f32 %v895_v0, %v702_v7 }
 0x12a   :  { %v2033_v9 = vpop.eup %2032  ;;  %v775_v10 = vmul.f32 0.70710677, %v2598_v50  ;;  %v958_v12 = vmul.f32 %v894_v5, %v701_v4  ;;  %v710_v1 = vmul.f32 0.5, %v2598_v50 }
 0x12b   :  { %v2035_v13 = vpop.eup %2034  ;;  %v897_v14 = vadd.f32 1.0, %v2033_v9  ;;  %v774_v15 = vmul.f32 0.70710677, %v2602_v8  ;;  %v1751_v16 = vpop.f32.mrb[38].mxu0  ;;  %v709_v62 = vmul.f32 0.5, %v2602_v8 }
 0x12c   :  { %v896_v19 = vadd.f32 1.0, %v2035_v13  ;;  %2044 = verf.f32 %v775_v10  ;;  %v2608_v61 = vadd.f32 %v1751_v16, %v2450_v30  ;;  %v544_v20 = vpop.f32.mrb[39].mxu0  ;;  %1862 = vmatprep.mubr.f32.mxu1 %v958_v12 }
 0x12d   :  { %2046 = verf.f32 %v774_v15  ;;  %v2612_v22 = vadd.f32 %v2450_v30, %v544_v20  ;;  %1863 = vmatmul.mubr.f32.gmra.mrb[22].mxu1 %v959_v17  ;;  %v961_v32 = vmul.f32 %v897_v14, %v704_v21 }
 0x12e   :  { %v2037_v23 = vpop.eup %2036  ;;  %v777_v24 = vmul.f32 0.70710677, %v2608_v61  ;;  %v960_v26 = vmul.f32 %v896_v19, %v703_v18  ;;  %v712_v15 = vmul.f32 0.5, %v2608_v61 }
 0x12f   :  { %v2039_v27 = vpop.eup %2038  ;;  %v899_v28 = vadd.f32 1.0, %v2037_v23  ;;  %v776_v29 = vmul.f32 0.70710677, %v2612_v22  ;;  %v1754_v31 = vpop.f32.mrb[40].mxu0  ;;  %v711_v12 = vmul.f32 0.5, %v2612_v22 }
 0x130   :  { %v898_v34 = vadd.f32 1.0, %v2039_v27  ;;  %2048 = verf.f32 %v777_v24  ;;  %v2618_v11 = vadd.f32 %v1754_v31, %v2450_v30  ;;  %v554_v35 = vpop.f32.mrb[41].mxu0  ;;  %1865 = vmatprep.mubr.f32.mxu1 %v960_v26 }
 0x131   :  { %2050 = verf.f32 %v776_v29  ;;  %v2622_v37 = vadd.f32 %v2450_v30, %v554_v35  ;;  %1866 = vmatmul.mubr.f32.gmra.mrb[24].mxu1 %v961_v32  ;;  %v963_v46 = vmul.f32 %v899_v28, %v706_v36 }
 0x132   :  { %v2041_v39 = vpop.eup %2040  ;;  %v779_v40 = vmul.f32 0.70710677, %v2618_v11  ;;  %v962_v41 = vmul.f32 %v898_v34, %v705_v33  ;;  %v714_v29 = vmul.f32 0.5, %v2618_v11 }
 0x133   :  { %v2043_v42 = vpop.eup %2042  ;;  %v901_v43 = vadd.f32 1.0, %v2041_v39  ;;  %v778_v44 = vmul.f32 0.70710677, %v2622_v37  ;;  %v1757_v45 = vpop.f32.mrb[42].mxu0  ;;  %v713_v26 = vmul.f32 0.5, %v2622_v37 }
 0x134   :  { %v900_v48 = vadd.f32 1.0, %v2043_v42  ;;  %2052 = verf.f32 %v779_v40  ;;  %v2628_v25 = vadd.f32 %v1757_v45, %v2450_v30  ;;  %v564_v49 = vpop.f32.mrb[43].mxu0  ;;  %1868 = vmatprep.mubr.f32.mxu1 %v962_v41 }
 0x135   :  { %2054 = verf.f32 %v778_v44  ;;  %v2632_v53 = vadd.f32 %v2450_v30, %v564_v49  ;;  %1869 = vmatmul.mubr.f32.gmra.mrb[26].mxu1 %v963_v46  ;;  %v965_v60 = vmul.f32 %v901_v43, %v708_v51 }
 0x136   :  { %v2045_v52 = vpop.eup %2044  ;;  %v781_v54 = vmul.f32 0.70710677, %v2628_v25  ;;  %v964_v55 = vmul.f32 %v900_v48, %v707_v47  ;;  %v716_v44 = vmul.f32 0.5, %v2628_v25 }
 0x137   :  { %v2047_v56 = vpop.eup %2046  ;;  %v903_v57 = vadd.f32 1.0, %v2045_v52  ;;  %v780_v58 = vmul.f32 0.70710677, %v2632_v53  ;;  %v1760_v59 = vpop.f32.mrb[44].mxu0  ;;  %v715_v41 = vmul.f32 0.5, %v2632_v53 }
 0x138   :  { %v902_v63 = vadd.f32 1.0, %v2047_v56  ;;  %2056 = verf.f32 %v781_v54  ;;  %v2638_v38 = vadd.f32 %v1760_v59, %v2450_v30  ;;  %v574_v0 = vpop.f32.mrb[45].mxu0  ;;  %1871 = vmatprep.mubr.f32.mxu1 %v964_v55 }
 0x139   :  { %2058 = verf.f32 %v780_v58  ;;  %v2642_v2 = vadd.f32 %v2450_v30, %v574_v0  ;;  %1872 = vmatmul.mubr.f32.gmra.mrb[28].mxu1 %v965_v60  ;;  %v967_v10 = vmul.f32 %v903_v57, %v710_v1 }
 0x13a   :  { %v2049_v3 = vpop.eup %2048  ;;  %v783_v4 = vmul.f32 0.70710677, %v2638_v38  ;;  %v966_v5 = vmul.f32 %v902_v63, %v709_v62  ;;  %v718_v58 = vmul.f32 0.5, %v2638_v38 }
 0x13b   :  { %v2051_v6 = vpop.eup %2050  ;;  %v905_v7 = vadd.f32 1.0, %v2049_v3  ;;  %v782_v8 = vmul.f32 0.70710677, %v2642_v2  ;;  %v1763_v9 = vpop.f32.mrb[46].mxu0  ;;  %v717_v55 = vmul.f32 0.5, %v2642_v2 }
 0x13c   :  { %v904_v13 = vadd.f32 1.0, %v2051_v6  ;;  %2060 = verf.f32 %v783_v4  ;;  %v2648_v50 = vadd.f32 %v1763_v9, %v2450_v30  ;;  %v584_v14 = vpop.f32.mrb[47].mxu0  ;;  %1874 = vmatprep.mubr.f32.mxu1 %v966_v5 }
 0x13d   :  { %2062 = verf.f32 %v782_v8  ;;  %v2652_v16 = vadd.f32 %v2450_v30, %v584_v14  ;;  %1875 = vmatmul.mubr.f32.gmra.mrb[30].mxu1 %v967_v10  ;;  %v969_v24 = vmul.f32 %v905_v7, %v712_v15 }
 0x13e   :  { %v2053_v17 = vpop.eup %2052  ;;  %v785_v18 = vmul.f32 0.70710677, %v2648_v50  ;;  %v968_v19 = vmul.f32 %v904_v13, %v711_v12  ;;  %v720_v8 = vmul.f32 0.5, %v2648_v50 }
 0x13f   :  { %v2055_v20 = vpop.eup %2054  ;;  %v907_v21 = vadd.f32 1.0, %v2053_v17  ;;  %v784_v22 = vmul.f32 0.70710677, %v2652_v16  ;;  %v1766_v23 = vpop.f32.mrb[48].mxu0  ;;  %v719_v5 = vmul.f32 0.5, %v2652_v16 }
 0x140   :  { %v906_v27 = vadd.f32 1.0, %v2055_v20  ;;  %2064 = verf.f32 %v785_v18  ;;  %v2658_v61 = vadd.f32 %v1766_v23, %v2450_v30  ;;  %v594_v28 = vpop.f32.mrb[49].mxu0  ;;  %1877 = vmatprep.mubr.f32.mxu1 %v968_v19 }
 0x141   :  { %2066 = verf.f32 %v784_v22  ;;  %v2662_v31 = vadd.f32 %v2450_v30, %v594_v28  ;;  %1878 = vmatmul.mubr.f32.gmra.mrb[32].mxu1 %v969_v24  ;;  %v971_v40 = vmul.f32 %v907_v21, %v714_v29 }
 0x142   :  { %v2057_v32 = vpop.eup %2056  ;;  %v787_v33 = vmul.f32 0.70710677, %v2658_v61  ;;  %v970_v34 = vmul.f32 %v906_v27, %v713_v26  ;;  %v722_v22 = vmul.f32 0.5, %v2658_v61 }
 0x143   :  { %v2059_v35 = vpop.eup %2058  ;;  %v909_v36 = vadd.f32 1.0, %v2057_v32  ;;  %v786_v37 = vmul.f32 0.70710677, %v2662_v31  ;;  %v1769_v39 = vpop.f32.mrb[50].mxu0  ;;  %v721_v19 = vmul.f32 0.5, %v2662_v31 }
 0x144   :  { %v908_v42 = vadd.f32 1.0, %v2059_v35  ;;  %2068 = verf.f32 %v787_v33  ;;  %v2668_v11 = vadd.f32 %v1769_v39, %v2450_v30  ;;  %v604_v43 = vpop.f32.mrb[51].mxu0  ;;  %1880 = vmatprep.mubr.f32.mxu1 %v970_v34 }
 0x145   :  { %2070 = verf.f32 %v786_v37  ;;  %v2672_v45 = vadd.f32 %v2450_v30, %v604_v43  ;;  %1881 = vmatmul.mubr.f32.gmra.mrb[34].mxu1 %v971_v40  ;;  %v973_v54 = vmul.f32 %v909_v36, %v716_v44 }
 0x146   :  { %v2061_v46 = vpop.eup %2060  ;;  %v789_v47 = vmul.f32 0.70710677, %v2668_v11  ;;  %v972_v48 = vmul.f32 %v908_v42, %v715_v41  ;;  %v724_v37 = vmul.f32 0.5, %v2668_v11 }
 0x147   :  { %v2063_v49 = vpop.eup %2062  ;;  %v911_v51 = vadd.f32 1.0, %v2061_v46  ;;  %v788_v53 = vmul.f32 0.70710677, %v2672_v45  ;;  %v1772_v52 = vpop.f32.mrb[52].mxu0  ;;  %v723_v34 = vmul.f32 0.5, %v2672_v45 }
 0x148   :  { %v910_v56 = vadd.f32 1.0, %v2063_v49  ;;  %2072 = verf.f32 %v789_v47  ;;  %v2678_v25 = vadd.f32 %v1772_v52, %v2450_v30  ;;  %v614_v57 = vpop.f32.mrb[53].mxu0  ;;  %1883 = vmatprep.mubr.f32.mxu1 %v972_v48 }
 0x149   :  { %2074 = verf.f32 %v788_v53  ;;  %v2682_v59 = vadd.f32 %v2450_v30, %v614_v57  ;;  %1884 = vmatmul.mubr.f32.gmra.mrb[36].mxu1 %v973_v54  ;;  %v975_v4 = vmul.f32 %v911_v51, %v718_v58 }
 0x14a   :  { %v2065_v60 = vpop.eup %2064  ;;  %v791_v62 = vmul.f32 0.70710677, %v2678_v25  ;;  %v974_v63 = vmul.f32 %v910_v56, %v717_v55  ;;  %v726_v53 = vmul.f32 0.5, %v2678_v25  ;;  %v2100_v25 = vld [vmem:[%s2989_s2] ss:$0 sm:$0xff] }
 0x14b   :  { %v2067_v0 = vpop.eup %2066  ;;  %v913_v1 = vadd.f32 1.0, %v2065_v60  ;;  %v790_v2 = vmul.f32 0.70710677, %v2682_v59  ;;  %v1775_v3 = vpop.f32.mrb[54].mxu0  ;;  %v725_v48 = vmul.f32 0.5, %v2682_v59 }
 0x14c   :  { %v912_v6 = vadd.f32 1.0, %v2067_v0  ;;  %2076 = verf.f32 %v791_v62  ;;  %v2688_v38 = vadd.f32 %v1775_v3, %v2450_v30  ;;  %v624_v7 = vpop.f32.mrb[55].mxu0  ;;  %1886 = vmatprep.mubr.f32.mxu1 %v974_v63 }
 0x14d   :  { %2078 = verf.f32 %v790_v2  ;;  %v2692_v9 = vadd.f32 %v2450_v30, %v624_v7  ;;  %1887 = vmatmul.mubr.f32.gmra.mrb[38].mxu1 %v975_v4  ;;  %v977_v18 = vmul.f32 %v913_v1, %v720_v8 }
 0x14e   :  { %v2069_v10 = vpop.eup %2068  ;;  %v793_v12 = vmul.f32 0.70710677, %v2688_v38  ;;  %v976_v13 = vmul.f32 %v912_v6, %v719_v5 }
 0x14f   :  { %v2071_v14 = vpop.eup %2070  ;;  %v915_v15 = vadd.f32 1.0, %v2069_v10  ;;  %v792_v16 = vmul.f32 0.70710677, %v2692_v9  ;;  %v1778_v17 = vpop.f32.mrb[56].mxu0  ;;  %v727_v63 = vmul.f32 0.5, %v2692_v9 }
 0x150   :  { %v914_v20 = vadd.f32 1.0, %v2071_v14  ;;  %2080 = verf.f32 %v793_v12  ;;  %v2698_v50 = vadd.f32 %v1778_v17, %v2450_v30  ;;  %v634_v21 = vpop.f32.mrb[57].mxu0  ;;  %1889 = vmatprep.mubr.f32.mxu1 %v976_v13 }
 0x151   :  { %2082 = verf.f32 %v792_v16  ;;  %v2702_v23 = vadd.f32 %v2450_v30, %v634_v21  ;;  %1890 = vmatmul.mubr.f32.gmra.mrb[40].mxu1 %v977_v18  ;;  %v979_v33 = vmul.f32 %v915_v15, %v722_v22 }
 0x152   :  { %v2073_v24 = vpop.eup %2072  ;;  %v795_v26 = vmul.f32 0.70710677, %v2698_v50  ;;  %v978_v27 = vmul.f32 %v914_v20, %v721_v19  ;;  %v730_v14 = vmul.f32 0.5, %v2698_v50 }
 0x153   :  { %v2075_v28 = vpop.eup %2074  ;;  %v917_v29 = vadd.f32 1.0, %v2073_v24  ;;  %v794_v31 = vmul.f32 0.70710677, %v2702_v23  ;;  %v1781_v32 = vpop.f32.mrb[58].mxu0  ;;  %v729_v12 = vmul.f32 0.5, %v2702_v23 }
 0x154   :  { %v916_v35 = vadd.f32 1.0, %v2075_v28  ;;  %2084 = verf.f32 %v795_v26  ;;  %v2708_v61 = vadd.f32 %v1781_v32, %v2450_v30  ;;  %v644_v36 = vpop.f32.mrb[59].mxu0  ;;  %1892 = vmatprep.mubr.f32.mxu1 %v978_v27 }
 0x155   :  { %2086 = verf.f32 %v794_v31  ;;  %v645_v39 = vadd.f32 %v2450_v30, %v644_v36  ;;  %1893 = vmatmul.mubr.f32.gmra.mrb[42].mxu1 %v979_v33  ;;  %v981_v47 = vmul.f32 %v917_v29, %v724_v37 }
 0x156   :  { %v2077_v40 = vpop.eup %2076  ;;  %v797_v41 = vmul.f32 0.70710677, %v2708_v61  ;;  %v980_v42 = vmul.f32 %v916_v35, %v723_v34  ;;  %v732_v21 = vmul.f32 0.5, %v2708_v61 }
 0x157   :  { %v2079_v43 = vpop.eup %2078  ;;  %v919_v44 = vadd.f32 1.0, %v2077_v40  ;;  %v796_v45 = vmul.f32 0.70710677, %v645_v39  ;;  %v1784_v46 = vpop.f32.mrb[60].mxu0  ;;  %v731_v19 = vmul.f32 0.5, %v645_v39 }
 0x158   :  { %v918_v49 = vadd.f32 1.0, %v2079_v43  ;;  %2088 = verf.f32 %v797_v41  ;;  %v660_v51 = vadd.f32 %v1784_v46, %v2450_v30  ;;  %v654_v11 = vpop.f32.mrb[61].mxu0  ;;  %1895 = vmatprep.mubr.f32.mxu1 %v980_v42  ;;  %v2728_v41 = vld [vmem:[%s2990_s4] ss:$0 sm:$0xff] }
 0x159   :  { %2090 = verf.f32 %v796_v45  ;;  %v655_v52 = vadd.f32 %v2450_v30, %v654_v11  ;;  %1896 = vmatmul.mubr.f32.gmra.mrb[44].mxu1 %v981_v47  ;;  %v983_v59 = vmul.f32 %v919_v44, %v726_v53  ;;  %v728_v30 = vmul.f32 0.5, %v2688_v38 }
 0x15a   :  { %v2081_v54 = vpop.eup %2080  ;;  %v799_v55 = vmul.f32 0.70710677, %v660_v51  ;;  %v982_v56 = vmul.f32 %v918_v49, %v725_v48  ;;  %v734_v29 = vmul.f32 0.5, %v660_v51 }
 0x15b   :  { %v2083_v57 = vpop.eup %2082  ;;  %v921_v58 = vadd.f32 1.0, %v2081_v54  ;;  %v798_v60 = vmul.f32 0.70710677, %v655_v52  ;;  %v1787_v62 = vpop.f32.mrb[62].mxu0  ;;  %v733_v28 = vmul.f32 0.5, %v655_v52 }
 0x15c   :  { %v920_v0 = vadd.f32 1.0, %v2083_v57  ;;  %2092 = verf.f32 %v799_v55  ;;  %v670_v1 = vadd.f32 %v2100_v25, %v1787_v62  ;;  %v664_v2 = vpop.f32.mrb[63].mxu0  ;;  %1898 = vmatprep.mubr.f32.mxu1 %v982_v56 }
 0x15d   :  { %2094 = verf.f32 %v798_v60  ;;  %v665_v3 = vadd.f32 %v2100_v25, %v664_v2  ;;  %1899 = vmatmul.mubr.f32.gmra.mrb[46].mxu1 %v983_v59  ;;  %v985_v10 = vmul.f32 %v921_v58, %v728_v30 }
 0x15e   :  { %v2085_v4 = vpop.eup %2084  ;;  %v801_v5 = vmul.f32 0.70710677, %v670_v1  ;;  %v984_v6 = vmul.f32 %v920_v0, %v727_v63  ;;  %v736_v61 = vmul.f32 0.5, %v670_v1 }
 0x15f   :  { %v2087_v7 = vpop.eup %2086  ;;  %v923_v8 = vadd.f32 1.0, %v2085_v4  ;;  %v800_v9 = vmul.f32 0.70710677, %v665_v3  ;;  %v735_v36 = vmul.f32 0.5, %v665_v3 }
 0x160   :  { %v922_v13 = vadd.f32 1.0, %v2087_v7  ;;  %2096 = verf.f32 %v801_v5  ;;  %1901 = vmatprep.mubr.f32.mxu1 %v984_v6 }
 0x161   :  { %2098 = verf.f32 %v800_v9  ;;  %1902 = vmatmul.mubr.f32.gmra.mrb[48].mxu1 %v985_v10  ;;  %v987_v18 = vmul.f32 %v923_v8, %v730_v14 }
 0x162   :  { %v2089_v38 = vpop.eup %2088  ;;  %v986_v15 = vmul.f32 %v922_v13, %v729_v12 }
 0x163   :  { %v2091_v16 = vpop.eup %2090  ;;  %v925_v17 = vadd.f32 1.0, %v2089_v38 }
 0x164   :  { %v924_v20 = vadd.f32 1.0, %v2091_v16  ;;  %1904 = vmatprep.mubr.f32.mxu1 %v986_v15 }
 0x165   :  { %1905 = vmatmul.mubr.f32.gmra.mrb[50].mxu1 %v987_v18  ;;  %v989_v27 = vmul.f32 %v925_v17, %v732_v21 }
 0x166   :  { %v2093_v22 = vpop.eup %2092  ;;  %v988_v23 = vmul.f32 %v924_v20, %v731_v19 }
 0x167   :  { %v2095_v24 = vpop.eup %2094  ;;  %v927_v26 = vadd.f32 1.0, %v2093_v22 }
 0x168   :  { %v926_v50 = vadd.f32 1.0, %v2095_v24  ;;  %1907 = vmatprep.mubr.f32.mxu1 %v988_v23 }
 0x169   :  { %1908 = vmatmul.mubr.f32.gmra.mrb[52].mxu1 %v989_v27  ;;  %v991_v35 = vmul.f32 %v927_v26, %v734_v29 }
 0x16a   :  { %v2097_v31 = vpop.eup %2096  ;;  %v990_v32 = vmul.f32 %v926_v50, %v733_v28 }
 0x16b   :  { %v2099_v33 = vpop.eup %2098  ;;  %v929_v34 = vadd.f32 1.0, %v2097_v31 }
 0x16c   :  { %v928_v37 = vadd.f32 1.0, %v2099_v33  ;;  %1910 = vmatprep.mubr.f32.mxu1 %v990_v32 }
 0x16d   :  { %1911 = vmatmul.mubr.f32.gmra.mrb[54].mxu1 %v991_v35  ;;  %v993_v40 = vmul.f32 %v929_v34, %v736_v61 }
 0x16e   :  { %v992_v39 = vmul.f32 %v928_v37, %v735_v36 }
 0x170   :  { %1913 = vmatprep.mubr.f32.mxu1 %v992_v39 }
 0x171   :  { %1914 = vmatmul.mubr.f32.gmra.mrb[56].mxu1 %v993_v40 }
 0x1c8   :  { %v1822_v42 = vpop.f32.mrb[64].mxu0 }
 0x1c9   :  { %v1089_v43 = vadd.f32 %v1822_v42, %v2728_v41  ;;  %v1083_v44 = vpop.f32.mrb[65].mxu0 }
 0x1ca   :  { %v1084_v45 = vadd.f32 %v2728_v41, %v1083_v44 }
 0x1cb   :  { %1403 = vst [vmem:[%s2991_s5 + $0x8] sm:$0xff] %v1089_v43 }
 0x1cc   :  { %1402 = vst [vmem:[%s2991_s5] sm:$0xff] %v1084_v45  ;;  %v1825_v46 = vpop.f32.mrb[66].mxu0 }
 0x1cd   :  { %v1099_v47 = vadd.f32 %v1825_v46, %v2728_v41  ;;  %v1093_v48 = vpop.f32.mrb[67].mxu0 }
 0x1ce   :  { %v1094_v49 = vadd.f32 %v2728_v41, %v1093_v48 }
 0x1cf   :  { %1405 = vst [vmem:[%s2991_s5 + $0x18] sm:$0xff] %v1099_v47 }
 0x1d0   :  { %1404 = vst [vmem:[%s2991_s5 + $0x10] sm:$0xff] %v1094_v49  ;;  %v1828_v51 = vpop.f32.mrb[68].mxu0 }
 0x1d1   :  { %v1109_v11 = vadd.f32 %v1828_v51, %v2728_v41  ;;  %v1103_v53 = vpop.f32.mrb[69].mxu0 }
 0x1d2   :  { %v1104_v52 = vadd.f32 %v2728_v41, %v1103_v53 }
 0x1d3   :  { %1407 = vst [vmem:[%s2991_s5 + $0x28] sm:$0xff] %v1109_v11 }
 0x1d4   :  { %1406 = vst [vmem:[%s2991_s5 + $0x20] sm:$0xff] %v1104_v52  ;;  %v1831_v54 = vpop.f32.mrb[0].mxu1 }
 0x1d5   :  { %v1119_v55 = vadd.f32 %v1831_v54, %v2728_v41  ;;  %v1113_v56 = vpop.f32.mrb[1].mxu1 }
 0x1d6   :  { %v1114_v57 = vadd.f32 %v2728_v41, %v1113_v56 }
 0x1d7   :  { %1409 = vst [vmem:[%s2991_s5 + $0x38] sm:$0xff] %v1119_v55 }
 0x1d8   :  { %1408 = vst [vmem:[%s2991_s5 + $0x30] sm:$0xff] %v1114_v57  ;;  %v1834_v58 = vpop.f32.mrb[2].mxu1 }
 0x1d9   :  { %v1129_v60 = vadd.f32 %v1834_v58, %v2728_v41  ;;  %v1123_v62 = vpop.f32.mrb[3].mxu1 }
 0x1da   :  { %v1124_v59 = vadd.f32 %v2728_v41, %v1123_v62 }
 0x1db   :  { %1411 = vst [vmem:[%s2991_s5 + $0x48] sm:$0xff] %v1129_v60 }
 0x1dc   :  { %1410 = vst [vmem:[%s2991_s5 + $0x40] sm:$0xff] %v1124_v59  ;;  %v1837_v63 = vpop.f32.mrb[4].mxu1 }
 0x1dd   :  { %v1139_v0 = vadd.f32 %v1837_v63, %v2728_v41  ;;  %v1133_v25 = vpop.f32.mrb[5].mxu1 }
 0x1de   :  { %v1134_v1 = vadd.f32 %v2728_v41, %v1133_v25 }
 0x1df   :  { %1413 = vst [vmem:[%s2991_s5 + $0x58] sm:$0xff] %v1139_v0 }
 0x1e0   :  { %1412 = vst [vmem:[%s2991_s5 + $0x50] sm:$0xff] %v1134_v1  ;;  %v1840_v2 = vpop.f32.mrb[6].mxu1 }
 0x1e1   :  { %v1149_v30 = vadd.f32 %v1840_v2, %v2728_v41  ;;  %v1143_v3 = vpop.f32.mrb[7].mxu1 }
 0x1e2   :  { %v1144_v4 = vadd.f32 %v2728_v41, %v1143_v3 }
 0x1e3   :  { %1415 = vst [vmem:[%s2991_s5 + $0x68] sm:$0xff] %v1149_v30 }
 0x1e4   :  { %1414 = vst [vmem:[%s2991_s5 + $0x60] sm:$0xff] %v1144_v4  ;;  %v1843_v5 = vpop.f32.mrb[8].mxu1 }
 0x1e5   :  { %v1159_v6 = vadd.f32 %v1843_v5, %v2728_v41  ;;  %v1153_v7 = vpop.f32.mrb[9].mxu1 }
 0x1e6   :  { %v1154_v8 = vadd.f32 %v2728_v41, %v1153_v7 }
 0x1e7   :  { %1417 = vst [vmem:[%s2991_s5 + $0x78] sm:$0xff] %v1159_v6 }
 0x1e8   :  { %1416 = vst [vmem:[%s2991_s5 + $0x70] sm:$0xff] %v1154_v8  ;;  %v1846_v9 = vpop.f32.mrb[10].mxu1 }
 0x1e9   :  { %v1169_v10 = vadd.f32 %v1846_v9, %v2728_v41  ;;  %v1163_v12 = vpop.f32.mrb[11].mxu1 }
 0x1ea   :  { %v1164_v13 = vadd.f32 %v2728_v41, %v1163_v12 }
 0x1eb   :  { %1419 = vst [vmem:[%s2991_s5 + $0x88] sm:$0xff] %v1169_v10 }
 0x1ec   :  { %1418 = vst [vmem:[%s2991_s5 + $0x80] sm:$0xff] %v1164_v13  ;;  %v1849_v14 = vpop.f32.mrb[12].mxu1 }
 0x1ed   :  { %v1179_v38 = vadd.f32 %v1849_v14, %v2728_v41  ;;  %v1173_v15 = vpop.f32.mrb[13].mxu1 }
 0x1ee   :  { %v1174_v16 = vadd.f32 %v2728_v41, %v1173_v15 }
 0x1ef   :  { %1421 = vst [vmem:[%s2991_s5 + $0x98] sm:$0xff] %v1179_v38 }
 0x1f0   :  { %1420 = vst [vmem:[%s2991_s5 + $0x90] sm:$0xff] %v1174_v16  ;;  %v1852_v17 = vpop.f32.mrb[14].mxu1 }
 0x1f1   :  { %v1189_v18 = vadd.f32 %v1852_v17, %v2728_v41  ;;  %v1183_v19 = vpop.f32.mrb[15].mxu1 }
 0x1f2   :  { %v1184_v20 = vadd.f32 %v2728_v41, %v1183_v19 }
 0x1f3   :  { %1423 = vst [vmem:[%s2991_s5 + $0xa8] sm:$0xff] %v1189_v18 }
 0x1f4   :  { %1422 = vst [vmem:[%s2991_s5 + $0xa0] sm:$0xff] %v1184_v20  ;;  %v1855_v21 = vpop.f32.mrb[16].mxu1 }
 0x1f5   :  { %v1199_v22 = vadd.f32 %v1855_v21, %v2728_v41  ;;  %v1193_v23 = vpop.f32.mrb[17].mxu1 }
 0x1f6   :  { %v1194_v24 = vadd.f32 %v2728_v41, %v1193_v23 }
 0x1f7   :  { %1425 = vst [vmem:[%s2991_s5 + $0xb8] sm:$0xff] %v1199_v22 }
 0x1f8   :  { %1424 = vst [vmem:[%s2991_s5 + $0xb0] sm:$0xff] %v1194_v24  ;;  %v1858_v26 = vpop.f32.mrb[18].mxu1 }
 0x1f9   :  { %v1209_v27 = vadd.f32 %v1858_v26, %v2728_v41  ;;  %v1203_v28 = vpop.f32.mrb[19].mxu1 }
 0x1fa   :  { %v1204_v50 = vadd.f32 %v2728_v41, %v1203_v28 }
 0x1fb   :  { %1427 = vst [vmem:[%s2991_s5 + $0xc8] sm:$0xff] %v1209_v27 }
 0x1fc   :  { %1426 = vst [vmem:[%s2991_s5 + $0xc0] sm:$0xff] %v1204_v50  ;;  %v1861_v29 = vpop.f32.mrb[20].mxu1 }
 0x1fd   :  { %v1219_v31 = vadd.f32 %v1861_v29, %v2728_v41  ;;  %v1213_v32 = vpop.f32.mrb[21].mxu1 }
 0x1fe   :  { %v1214_v33 = vadd.f32 %v2728_v41, %v1213_v32 }
 0x1ff   :  { %1429 = vst [vmem:[%s2991_s5 + $0xd8] sm:$0xff] %v1219_v31 }
 0x200   :  { %1428 = vst [vmem:[%s2991_s5 + $0xd0] sm:$0xff] %v1214_v33  ;;  %v1864_v34 = vpop.f32.mrb[22].mxu1 }
 0x201   :  { %v1229_v35 = vadd.f32 %v1864_v34, %v2728_v41  ;;  %v1223_v36 = vpop.f32.mrb[23].mxu1 }
 0x202   :  { %v1224_v37 = vadd.f32 %v2728_v41, %v1223_v36 }
 0x203   :  { %1431 = vst [vmem:[%s2991_s5 + $0xe8] sm:$0xff] %v1229_v35 }
 0x204   :  { %1430 = vst [vmem:[%s2991_s5 + $0xe0] sm:$0xff] %v1224_v37  ;;  %v1867_v61 = vpop.f32.mrb[24].mxu1 }
 0x205   :  { %v1239_v39 = vadd.f32 %v1867_v61, %v2728_v41  ;;  %v1233_v40 = vpop.f32.mrb[25].mxu1 }
 0x206   :  { %v1234_v42 = vadd.f32 %v2728_v41, %v1233_v40 }
 0x207   :  { %1433 = vst [vmem:[%s2991_s5 + $0xf8] sm:$0xff] %v1239_v39 }
 0x208   :  { %1432 = vst [vmem:[%s2991_s5 + $0xf0] sm:$0xff] %v1234_v42  ;;  %v1870_v43 = vpop.f32.mrb[26].mxu1 }
 0x209   :  { %v1249_v44 = vadd.f32 %v1870_v43, %v2728_v41  ;;  %v1243_v45 = vpop.f32.mrb[27].mxu1 }
 0x20a   :  { %v1244_v46 = vadd.f32 %v2728_v41, %v1243_v45 }
 0x20b   :  { %1435 = vst [vmem:[%s2991_s5 + $0x108] sm:$0xff] %v1249_v44 }
 0x20c   :  { %1434 = vst [vmem:[%s2991_s5 + $0x100] sm:$0xff] %v1244_v46  ;;  %v1873_v47 = vpop.f32.mrb[28].mxu1 }
 0x20d   :  { %v1259_v48 = vadd.f32 %v1873_v47, %v2728_v41  ;;  %v1253_v49 = vpop.f32.mrb[29].mxu1 }
 0x20e   :  { %v1254_v51 = vadd.f32 %v2728_v41, %v1253_v49 }
 0x20f   :  { %1437 = vst [vmem:[%s2991_s5 + $0x118] sm:$0xff] %v1259_v48 }
 0x210   :  { %1436 = vst [vmem:[%s2991_s5 + $0x110] sm:$0xff] %v1254_v51  ;;  %v1876_v11 = vpop.f32.mrb[30].mxu1 }
 0x211   :  { %v1269_v53 = vadd.f32 %v1876_v11, %v2728_v41  ;;  %v1263_v52 = vpop.f32.mrb[31].mxu1 }
 0x212   :  { %v1264_v54 = vadd.f32 %v2728_v41, %v1263_v52 }
 0x213   :  { %1439 = vst [vmem:[%s2991_s5 + $0x128] sm:$0xff] %v1269_v53 }
 0x214   :  { %1438 = vst [vmem:[%s2991_s5 + $0x120] sm:$0xff] %v1264_v54  ;;  %v1879_v55 = vpop.f32.mrb[32].mxu1 }
 0x215   :  { %v1279_v56 = vadd.f32 %v1879_v55, %v2728_v41  ;;  %v1273_v57 = vpop.f32.mrb[33].mxu1 }
 0x216   :  { %v1274_v58 = vadd.f32 %v2728_v41, %v1273_v57 }
 0x217   :  { %1441 = vst [vmem:[%s2991_s5 + $0x138] sm:$0xff] %v1279_v56 }
 0x218   :  { %1440 = vst [vmem:[%s2991_s5 + $0x130] sm:$0xff] %v1274_v58  ;;  %v1882_v60 = vpop.f32.mrb[34].mxu1 }
 0x219   :  { %v1289_v62 = vadd.f32 %v1882_v60, %v2728_v41  ;;  %v1283_v59 = vpop.f32.mrb[35].mxu1 }
 0x21a   :  { %v1284_v63 = vadd.f32 %v2728_v41, %v1283_v59 }
 0x21b   :  { %1443 = vst [vmem:[%s2991_s5 + $0x148] sm:$0xff] %v1289_v62 }
 0x21c   :  { %1442 = vst [vmem:[%s2991_s5 + $0x140] sm:$0xff] %v1284_v63  ;;  %v1885_v0 = vpop.f32.mrb[36].mxu1 }
 0x21d   :  { %v1299_v25 = vadd.f32 %v1885_v0, %v2728_v41  ;;  %v1293_v1 = vpop.f32.mrb[37].mxu1 }
 0x21e   :  { %v1294_v2 = vadd.f32 %v2728_v41, %v1293_v1 }
 0x21f   :  { %1445 = vst [vmem:[%s2991_s5 + $0x158] sm:$0xff] %v1299_v25 }
 0x220   :  { %1444 = vst [vmem:[%s2991_s5 + $0x150] sm:$0xff] %v1294_v2  ;;  %v1888_v30 = vpop.f32.mrb[38].mxu1 }
 0x221   :  { %v1309_v3 = vadd.f32 %v1888_v30, %v2728_v41  ;;  %v1303_v4 = vpop.f32.mrb[39].mxu1 }
 0x222   :  { %v1304_v5 = vadd.f32 %v2728_v41, %v1303_v4 }
 0x223   :  { %1447 = vst [vmem:[%s2991_s5 + $0x168] sm:$0xff] %v1309_v3 }
 0x224   :  { %1446 = vst [vmem:[%s2991_s5 + $0x160] sm:$0xff] %v1304_v5  ;;  %v1891_v6 = vpop.f32.mrb[40].mxu1 }
 0x225   :  { %v1319_v7 = vadd.f32 %v1891_v6, %v2728_v41  ;;  %v1313_v8 = vpop.f32.mrb[41].mxu1 }
 0x226   :  { %v1314_v9 = vadd.f32 %v2728_v41, %v1313_v8 }
 0x227   :  { %1449 = vst [vmem:[%s2991_s5 + $0x178] sm:$0xff] %v1319_v7 }
 0x228   :  { %1448 = vst [vmem:[%s2991_s5 + $0x170] sm:$0xff] %v1314_v9  ;;  %v1894_v10 = vpop.f32.mrb[42].mxu1 }
 0x229   :  { %v1329_v12 = vadd.f32 %v1894_v10, %v2728_v41  ;;  %v1323_v13 = vpop.f32.mrb[43].mxu1 }
 0x22a   :  { %v1324_v14 = vadd.f32 %v2728_v41, %v1323_v13 }
 0x22b   :  { %1451 = vst [vmem:[%s2991_s5 + $0x188] sm:$0xff] %v1329_v12 }
 0x22c   :  { %1450 = vst [vmem:[%s2991_s5 + $0x180] sm:$0xff] %v1324_v14  ;;  %v1897_v38 = vpop.f32.mrb[44].mxu1 }
 0x22d   :  { %v1339_v15 = vadd.f32 %v1897_v38, %v2728_v41  ;;  %v1333_v16 = vpop.f32.mrb[45].mxu1 }
 0x22e   :  { %v1334_v17 = vadd.f32 %v2728_v41, %v1333_v16 }
 0x22f   :  { %1453 = vst [vmem:[%s2991_s5 + $0x198] sm:$0xff] %v1339_v15 }
 0x230   :  { %1452 = vst [vmem:[%s2991_s5 + $0x190] sm:$0xff] %v1334_v17  ;;  %v1900_v18 = vpop.f32.mrb[46].mxu1 }
 0x231   :  { %v1349_v19 = vadd.f32 %v1900_v18, %v2728_v41  ;;  %v1343_v20 = vpop.f32.mrb[47].mxu1 }
 0x232   :  { %v1344_v21 = vadd.f32 %v2728_v41, %v1343_v20 }
 0x233   :  { %1455 = vst [vmem:[%s2991_s5 + $0x1a8] sm:$0xff] %v1349_v19 }
 0x234   :  { %1454 = vst [vmem:[%s2991_s5 + $0x1a0] sm:$0xff] %v1344_v21  ;;  %v1903_v22 = vpop.f32.mrb[48].mxu1 }
 0x235   :  { %v1359_v23 = vadd.f32 %v1903_v22, %v2728_v41  ;;  %v1353_v24 = vpop.f32.mrb[49].mxu1 }
 0x236   :  { %v1354_v26 = vadd.f32 %v2728_v41, %v1353_v24 }
 0x237   :  { %1457 = vst [vmem:[%s2991_s5 + $0x1b8] sm:$0xff] %v1359_v23 }
 0x238   :  { %1456 = vst [vmem:[%s2991_s5 + $0x1b0] sm:$0xff] %v1354_v26  ;;  %v1906_v27 = vpop.f32.mrb[50].mxu1 }
 0x239   :  { %v1369_v28 = vadd.f32 %v1906_v27, %v2728_v41  ;;  %v1363_v50 = vpop.f32.mrb[51].mxu1 }
 0x23a   :  { %v1364_v29 = vadd.f32 %v2728_v41, %v1363_v50 }
 0x23b   :  { %1459 = vst [vmem:[%s2991_s5 + $0x1c8] sm:$0xff] %v1369_v28 }
 0x23c   :  { %1458 = vst [vmem:[%s2991_s5 + $0x1c0] sm:$0xff] %v1364_v29  ;;  %v1909_v31 = vpop.f32.mrb[52].mxu1 }
 0x23d   :  { %v1379_v32 = vadd.f32 %v1909_v31, %v2728_v41  ;;  %v1373_v33 = vpop.f32.mrb[53].mxu1 }
 0x23e   :  { %v1374_v34 = vadd.f32 %v2728_v41, %v1373_v33 }
 0x23f   :  { %1461 = vst [vmem:[%s2991_s5 + $0x1d8] sm:$0xff] %v1379_v32 }
 0x240   :  { %1460 = vst [vmem:[%s2991_s5 + $0x1d0] sm:$0xff] %v1374_v34  ;;  %v1912_v35 = vpop.f32.mrb[54].mxu1 }
 0x241   :  { %v1389_v36 = vadd.f32 %v1912_v35, %v2728_v41  ;;  %v1383_v37 = vpop.f32.mrb[55].mxu1 }
 0x242   :  { %v1384_v61 = vadd.f32 %v2728_v41, %v1383_v37 }
 0x243   :  { %1463 = vst [vmem:[%s2991_s5 + $0x1e8] sm:$0xff] %v1389_v36 }
 0x244   :  { %1462 = vst [vmem:[%s2991_s5 + $0x1e0] sm:$0xff] %v1384_v61  ;;  %v1915_v39 = vpop.f32.mrb[56].mxu1 }
 0x245   :  { %v1399_v40 = vadd.f32 %v1915_v39, %v2728_v41  ;;  %v1393_v42 = vpop.f32.mrb[57].mxu1 }
 0x246   :  { %v1394_v43 = vadd.f32 %v2728_v41, %v1393_v42 }
 0x247   :  { %1465 = vst [vmem:[%s2991_s5 + $0x1f8] sm:$0xff] %v1399_v40 }
 0x248   :  { %1464 = vst [vmem:[%s2991_s5 + $0x1f0] sm:$0xff] %v1394_v43 }

// kernel: ifno2d_forward.24
= control target key start
LH: loop header
LB: loop body
LE: loop exit
PB: predicated region body
PF: predicated region fallthrough
CT: control target
= control target key end

     0   :  { %vm37_vm0 = vcmask 1042432   ;;  %vm30_vm1 = vcmask 23552   ;;  %vm135_vm2 = vcmask 64512   ;;  %s322_s1 = inlined_call_operand.vmem [shape: f32[3,8], index: 1, kind: input, shape index: {}]   ;;  %s323_s0 = inlined_call_operand.vmem [shape: f32[16,3], index: 0, kind: input, shape index: {}]   ;;  %s324_s3 = inlined_call_operand.vmem [shape: f32[8,8], index: 3, kind: input, shape index: {}]   ;;  %s325_s2 = inlined_call_operand.vmem [shape: f32[1,8], index: 2, kind: input, shape index: {}]   ;;  %s326_s4 = inlined_call_operand.vmem [shape: f32[1,8], index: 4, kind: input, shape index: {}]   ;;  %s327_s5 = inlined_call_operand.vmem [shape: f32[16,8], index: 5, kind: output, shape index: {}]  }
   0x1   :  { %v22_v0 = vld [vmem:[%s322_s1] sm:$0x7]  ;;  %v21_v2 = vld [vmem:[%s323_s0 + $0x8] sm:$0xff] }
   0x2   :  { %v20_v1 = vld [vmem:[%s323_s0] sm:$0xff]  ;;  %246 = vmatprep.subr.msk.mxu0 %vm37_vm0, %v22_v0 }
   0x3   :  { %248 = vmatprep.mubr.msk.f32.mxu0 %vm30_vm1, %v20_v1  ;;  %247 = vmatpush3.msk.msra.mxu0 %vm37_vm0, %v22_v0  ;;  %v127_v3 = vld [vmem:[%s324_s3] sm:$0xff] }
   0x4   :  { %249 = vmatmul.mubr.msk.f32.vlgmr.msra.gmra.mrb[0].mxu0 %vm30_vm1, %v21_v2  ;;  %251 = vmatprep.subr.mxu1 %v127_v3  ;;  %v233_v4 = vld [vmem:[%s325_s2] ss:$0 sm:$0xff] }
   0x5   :  { %252 = vmatpush3.msra.mxu1 %v127_v3  ;;  %v237_v19 = vld [vmem:[%s326_s4] ss:$0 sm:$0xff] }
  0xd7   :  { %v250_v5 = vpop.f32.mrb[0].mxu0 }
  0xd8   :  { %v113_v6 = vadd.f32 %v250_v5, %v233_v4  ;;  %v107_v7 = vpop.f32.mrb[1].mxu0 }
  0xd9   :  { %v108_v8 = vadd.f32 %v233_v4, %v107_v7 }
  0xda   :  { %v120_v9 = vmul.f32 0.70710677, %v113_v6  ;;  %v117_v16 = vmul.f32 0.5, %v113_v6 }
  0xdb   :  { %v119_v10 = vmul.f32 0.70710677, %v108_v8  ;;  %v116_v14 = vmul.f32 0.5, %v108_v8 }
  0xdc   :  { %256 = verf.f32 %v120_v9 }
  0xdd   :  { %258 = verf.f32 %v119_v10 }
  0xe6   :  { %v257_v11 = vpop.eup %256 }
  0xe7   :  { %v259_v12 = vpop.eup %258  ;;  %v124_v13 = vadd.f32 1.0, %v257_v11 }
  0xe8   :  { %v123_v15 = vadd.f32 1.0, %v259_v12 }
  0xe9   :  { %v126_v18 = vmul.f32 %v124_v13, %v117_v16 }
  0xea   :  { %v125_v17 = vmul.f32 %v123_v15, %v116_v14 }
  0xec   :  { %253 = vmatprep.mubr.msk.f32.mxu1 %vm135_vm2, %v125_v17 }
  0xed   :  { %254 = vmatmul.mubr.msk.f32.vlgmr.msra.gmra.mrb[0].mxu1 %vm135_vm2, %v126_v18 }
 0x1c0   :  { %v255_v20 = vpop.f32.mrb[0].mxu1 }
 0x1c1   :  { %v214_v21 = vadd.f32 %v255_v20, %v237_v19  ;;  %v208_v22 = vpop.f32.mrb[1].mxu1 }
 0x1c2   :  { %v209_v23 = vadd.f32 %v237_v19, %v208_v22 }
 0x1c3   :  { %v220_v24 = vmul.f32 0.70710677, %v214_v21  ;;  %v218_v28 = vmul.f32 0.5, %v214_v21 }
 0x1c4   :  { %v219_v25 = vmul.f32 0.70710677, %v209_v23  ;;  %v217_v30 = vmul.f32 0.5, %v209_v23 }
 0x1c5   :  { %260 = verf.f32 %v220_v24 }
 0x1c6   :  { %262 = verf.f32 %v219_v25 }
 0x1cf   :  { %v261_v26 = vpop.eup %260 }
 0x1d0   :  { %v263_v27 = vpop.eup %262  ;;  %v224_v29 = vadd.f32 1.0, %v261_v26 }
 0x1d1   :  { %v223_v31 = vadd.f32 1.0, %v263_v27 }
 0x1d2   :  { %v226_v32 = vmul.f32 %v224_v29, %v218_v28 }
 0x1d3   :  { %v225_v33 = vmul.f32 %v223_v31, %v217_v30 }
 0x1d4   :  { %228 = vst.msk [vmem:[%s327_s5 + $0x8] sm:$0xff] %vm135_vm2, %v226_v32 }
 0x1d5   :  { %227 = vst.msk [vmem:[%s327_s5] sm:$0xff] %vm135_vm2, %v225_v33 }

// kernel: ifno2d_forward.23
= control target key start
LH: loop header
LB: loop body
LE: loop exit
PB: predicated region body
PF: predicated region fallthrough
CT: control target
= control target key end

     0   :  { %vm157_vm0 = vcmask 64512   ;;  %s401_s0 = inlined_call_operand.vmem [shape: f32[2,256], index: 0, kind: input, shape index: {}]   ;;  %s402_s1 = inlined_call_operand.vmem [shape: f32[256,8], index: 1, kind: input, shape index: {}]   ;;  %s403_s2 = inlined_call_operand.vmem [shape: f32[1,8], index: 2, kind: input, shape index: {}]   ;;  %s404_s3 = inlined_call_operand.vmem [shape: f32[2,8], index: 3, kind: output, shape index: {}]  }
   0x1   :  { %v34_v0 = vld [vmem:[%s402_s1 + $0x80] sm:$0xff]  ;;  %v35_v1 = vld [vmem:[%s402_s1 + $0x88] sm:$0xff]  ;;  %v36_v5 = vld [vmem:[%s402_s1 + $0x90] sm:$0xff] }
   0x2   :  { %v18_v2 = vld [vmem:[%s402_s1] sm:$0xff]  ;;  %v234_v3 = vpack.c.bf16 %v35_v1, %v34_v0  ;;  %v19_v4 = vld [vmem:[%s402_s1 + $0x8] sm:$0xff]  ;;  %v37_v6 = vld [vmem:[%s402_s1 + $0x98] sm:$0xff] }
   0x3   :  { %v236_v7 = vpack.c.bf16 %v19_v4, %v18_v2  ;;  %v238_v8 = vpack.c.bf16 %v37_v6, %v36_v5  ;;  %v20_v9 = vld [vmem:[%s402_s1 + $0x10] sm:$0xff]  ;;  %v21_v10 = vld [vmem:[%s402_s1 + $0x18] sm:$0xff]  ;;  %v38_v11 = vld [vmem:[%s402_s1 + $0xa0] sm:$0xff] }
   0x4   :  { %235 = vmatprep.subr.bf16.mxu0 %v234_v3  ;;  %v39_v12 = vld [vmem:[%s402_s1 + $0xa8] sm:$0xff]  ;;  %v240_v13 = vpack.c.bf16 %v21_v10, %v20_v9  ;;  %v22_v15 = vld [vmem:[%s402_s1 + $0x20] sm:$0xff]  ;;  %v40_v17 = vld [vmem:[%s402_s1 + $0xb0] sm:$0xff] }
   0x5   :  { %237 = vmatpush3.bf16.msra.mxu0 %v236_v7  ;;  %v242_v14 = vpack.c.bf16 %v39_v12, %v38_v11  ;;  %v23_v16 = vld [vmem:[%s402_s1 + $0x28] sm:$0xff]  ;;  %v41_v18 = vld [vmem:[%s402_s1 + $0xb8] sm:$0xff]  ;;  %v24_v21 = vld [vmem:[%s402_s1 + $0x30] sm:$0xff] }
   0x6   :  { %239 = vmatprep.subr.bf16.mxu0 %v238_v8  ;;  %v244_v19 = vpack.c.bf16 %v23_v16, %v22_v15  ;;  %v246_v20 = vpack.c.bf16 %v41_v18, %v40_v17  ;;  %v25_v22 = vld [vmem:[%s402_s1 + $0x38] sm:$0xff]  ;;  %v42_v23 = vld [vmem:[%s402_s1 + $0xc0] sm:$0xff]  ;;  %v43_v24 = vld [vmem:[%s402_s1 + $0xc8] sm:$0xff] }
   0x7   :  { %v248_v25 = vpack.c.bf16 %v25_v22, %v24_v21  ;;  %v271_v26 = vld.sshfl [vmem:[%s401_s0] sm:$0xff pattern:$0x76325410]  ;;  %v272_v27 = vld.sshfl [vmem:[%s401_s0 + $0x8] sm:$0xff pattern:$0x76325410]  ;;  %v250_v28 = vpack.c.bf16 %v43_v24, %v42_v23 }
   0x8   :  { %v26_v29 = vld [vmem:[%s402_s1 + $0x40] sm:$0xff]  ;;  %v27_v30 = vld [vmem:[%s402_s1 + $0x48] sm:$0xff]  ;;  %v44_v31 = vld [vmem:[%s402_s1 + $0xd0] sm:$0xff]  ;;  %v78_v34 = vcombine.high %v271_v26, %v272_v27  ;;  %v77_v51 = vcombine.low %v271_v26, %v272_v27 }
   0x9   :  { %241 = vmatpush3.bf16.msra.mxu0 %v240_v13  ;;  %v45_v32 = vld [vmem:[%s402_s1 + $0xd8] sm:$0xff]  ;;  %v252_v33 = vpack.c.bf16 %v27_v30, %v26_v29  ;;  %v28_v36 = vld [vmem:[%s402_s1 + $0x50] sm:$0xff]  ;;  %v46_v38 = vld [vmem:[%s402_s1 + $0xe0] sm:$0xff] }
   0xa   :  { %243 = vmatprep.subr.bf16.mxu0 %v242_v14  ;;  %v254_v35 = vpack.c.bf16 %v45_v32, %v44_v31  ;;  %v29_v37 = vld [vmem:[%s402_s1 + $0x58] sm:$0xff]  ;;  %v47_v39 = vld [vmem:[%s402_s1 + $0xe8] sm:$0xff]  ;;  %145 = vmatprep.mubr.f32.mxu0 %v78_v34  ;;  %v30_v42 = vld [vmem:[%s402_s1 + $0x60] sm:$0xff] }
   0xb   :  { %v256_v40 = vpack.c.bf16 %v29_v37, %v28_v36  ;;  %v258_v41 = vpack.c.bf16 %v47_v39, %v46_v38  ;;  %v31_v43 = vld [vmem:[%s402_s1 + $0x68] sm:$0xff]  ;;  %v48_v44 = vld [vmem:[%s402_s1 + $0xf0] sm:$0xff]  ;;  %v49_v45 = vld [vmem:[%s402_s1 + $0xf8] sm:$0xff] }
   0xc   :  { %v260_v46 = vpack.c.bf16 %v31_v43, %v30_v42  ;;  %v262_v47 = vpack.c.bf16 %v49_v45, %v48_v44  ;;  %v32_v48 = vld [vmem:[%s402_s1 + $0x70] sm:$0xff]  ;;  %v33_v49 = vld [vmem:[%s402_s1 + $0x78] sm:$0xff]  ;;  %v198_v53 = vld [vmem:[%s403_s2] ss:$0 sm:$0xff] }
   0xd   :  { %245 = vmatpush3.bf16.msra.mxu0 %v244_v19  ;;  %v264_v50 = vpack.c.bf16 %v33_v49, %v32_v48 }
   0xe   :  { %247 = vmatprep.subr.bf16.mxu0 %v246_v20 }
  0x11   :  { %249 = vmatpush3.bf16.msra.mxu0 %v248_v25 }
  0x12   :  { %251 = vmatprep.subr.bf16.mxu0 %v250_v28 }
  0x15   :  { %253 = vmatpush3.bf16.msra.mxu0 %v252_v33 }
  0x16   :  { %255 = vmatprep.subr.bf16.mxu0 %v254_v35 }
  0x19   :  { %257 = vmatpush3.bf16.msra.mxu0 %v256_v40 }
  0x1a   :  { %259 = vmatprep.subr.bf16.mxu0 %v258_v41 }
  0x1d   :  { %261 = vmatpush3.bf16.msra.mxu0 %v260_v46 }
  0x1e   :  { %263 = vmatprep.subr.bf16.mxu0 %v262_v47 }
  0x21   :  { %265 = vmatpush3.bf16.msra.mxu0 %v264_v50 }
  0x24   :  { %146 = vmatmul.mubr.f32.vlgmr.msra.gmra.mrb[0].mxu0 %v77_v51 }
  0xf7   :  { %v231_v52 = vpop.f32.mrb[0].mxu0 }
  0xf8   :  { %v232_v54 = vpop.f32.mrb[1].mxu0 }
  0xf9   :  { %v233_v55 = vadd.f32 %v232_v54, %v231_v52 }
  0xfb   :  { %v148_v56 = vadd.f32 %v233_v55, %v198_v53 }
  0xfd   :  { %v153_v57 = vmul.f32 0.70710677, %v148_v56  ;;  %v151_v59 = vmul.f32 0.5, %v148_v56 }
  0xff   :  { %269 = verf.f32 %v153_v57 }
 0x109   :  { %v270_v58 = vpop.eup %269 }
 0x10a   :  { %v155_v60 = vadd.f32 1.0, %v270_v58 }
 0x10c   :  { %v156_v61 = vmul.f32 %v155_v60, %v151_v59 }
 0x10e   :  { %158 = vst.msk [vmem:[#allocation2] sm:$0xff] %vm157_vm0, %v156_v61 }
 0x115   :  { %v176_v62 = vld [vmem:[#allocation2] sm:$0x3] }
 0x116   :  { %177 = vst [vmem:[%s404_s3] sm:$0x3] %v176_v62 }

// kernel: ifno2d_forward.25
= control target key start
LH: loop header
LB: loop body
LE: loop exit
PB: predicated region body
PF: predicated region fallthrough
CT: control target
= control target key end

     0   :  { %7 = vsyncpa [#allocation3], 0  ;;  %s553_s0 = inlined_call_operand.vmem [shape: f32[2,1,8], index: 0, kind: input, shape index: {}]   ;;  %s554_s1 = inlined_call_operand.vmem [shape: f32[2,8,8], index: 1, kind: input, shape index: {}]   ;;  %s555_s2 = inlined_call_operand.hbm [shape: f32[2,1,8], index: 2, kind: output, shape index: {}]  }
   0x1   :  { %9 = vsyncpa [#allocation3 + $0x1], 0  ;;  %s450_s9 = smov 0   ;;  %s452_s10 = smov 0  }
   0x2   :  { %s454_s11 = smov 0   ;;  %s456_s12 = smov 0  }
   0x3 LB: > { %s471_s13 = sadd.s32 4294967295, %s430_s12   ;;  %s310_s14 = sadd.s32 4294967294, %s430_s12   ;;  %s430_s12 = sphi %s456_s12, %s561_s12   ;;  %s426_s11 = sphi %s454_s11, %s560_s11   ;;  %s422_s10 = sphi %s452_s10, %s559_s10   ;;  %s418_s9 = sphi %s450_s9, %s558_s9  }
   0x4   : > { %s475_s15 = sadd.s32 1, %s430_s12   ;;  %s74_s16 = sadd.s32 1, %s426_s11 }
   0x5   : > { %s71_s17 = ssub.s32 %s430_s12, %s475_s15  ;;  %p84_p0 = scmp.ne.s32.totalorder %s426_s11, %s422_s10 }
   0x6   : > { %p72_p1 = scmp.eq.s32.totalorder %s71_s17, 0  ;;  %p85_p2 = scmp.eq.s32.totalorder %s471_s13, 1 }
   0x7   : > { %p90_p3 = scmp.ne.s32.totalorder %s422_s10, %s418_s9  ;;  %p91_p4 = scmp.eq.s32.totalorder %s310_s14, 1 }
   0x8   : > { %s486_s18 = scalar_select %p72_p1, %s426_s11, %s74_s16  }
   0x9   : > { %p488_p5 = por %p85_p2, %p84_p0  ;;  %p492_p6 = por %p91_p4, %p90_p3 }
   0xa   : > { %p313_p7 = scmp.ge.s32.totalorder %s430_s12, 1  ;;  %p122_p8 = scmp.lt.s32.totalorder %s430_s12, 3 }
   0xc   : > { %p123_p9 = pnand %p313_p7, %p122_p8 }
   0xd   : > { %p145_p10 = scmp.lt.s32.totalorder (!%p123_p9), %s471_s13, 1  ;;  %v432_v0 = vmov (!%p123_p9), 0.0   ;;  %vm433_vm0 = vmmov (!%p123_p9), 0   ;;  %vm154_vm1 = vcmask (!%p123_p9), 64512   ;;  %s143_s29 = sand.u32 (!%p123_p9), 1, %s422_s10   ;;  %vm231_vm2 = vcmask (!%p123_p9), 57344  }
   0xe   : > { %126 = sbr.rel (%p123_p9) target bundleno = 255 (0xff), region = 28  ;;  %322 = vmatprep.subr.mxu0 (!%p123_p9), %v432_v0  ;;  %324 = vmatprep.mubr.msk.f32.mxu0 (!%p123_p9), %vm433_vm0, %v432_v0  ;;  %s317_s30 = sshll.u32 (!%p123_p9), %s471_s13, 4 }
   0xf   : > { %s144_s3 = scalar_lea.vmem (!%p123_p9), [#allocation2], %s143_s29  ;;  %s511_s7 = scalar_lea.hbm (!%p123_p9), %s555_s2, %s317_s30 }
  0x10   : > { %s246_s4 = sshll.u32 (!%p123_p9), %s144_s3, 4  ;;  %s234_s8 = scalar_lea.sflag (!%p123_p9), [#allocation3], %s143_s29  ;;  %s513_s4 = int_to_ptr.vmem [resolvable:$true] %s246_s4 }
  0x11   : > { %s368_s14 = scalar_lea.vmem (!%p123_p9), %s513_s4, 16 }
  0x12   : > { %p369_p11 = scmp.ne.s32.totalorder (!%p123_p9), %s513_s4, %s368_s14 }
  0x14   : > { %p370_p12 = pnand (!%p123_p9), %p369_p11, %p488_p5 }
  0x15   : > { %s146_s21 = scalar_select %p145_p10, %s471_s13, 1 }
  0x16   : > { %p371_p13 = pneg %p370_p12  ;;  %s434_s13 = smov [#allocation2]  }
  0x17   : > { %s314_s22 = sshll.u32 %s146_s21, 3  ;;  %s147_s25 = scalar_lea.vmem %s553_s0, %s146_s21 }
  0x18   : > { %s151_s28 = scalar_lea.vmem %s554_s1, %s314_s22  ;;  %v152_v2 = vld [vmem:[%s147_s25] sm:$0x1]  ;;  %s372_s16 = sshll.u32 %s434_s13, 4  ;;  %s373_s16 = int_to_ptr.vmem [resolvable:$false] %s372_s16 }
  0x19   : > { %v153_v1 = vld [vmem:[%s151_s28] sm:$0xff]  ;;  %s374_s17 = scalar_lea.vmem %s373_s16, 32  ;;  %p375_p0 = scmp.lt.s32.totalorder %s513_s4, %s373_s16 }
  0x1a   : > { %323 = vmatpush3.xpose.msk.msra.mxu0 %vm154_vm1, %v153_v1  ;;  %p376_p1 = scmp.lt.s32.totalorder %s374_s17, %s368_s14 }
  0x1c   : > { %p377_p2 = por %p376_p1, %p375_p0 }
  0x1d   : > { %325 = vmatmul.mubr.msk.f32.vlgmr.msra.gmra.mrb[0].mxu0 %vm154_vm1, %v152_v2 }
  0x1e   : > { %p378_p3 = pnand %p377_p2, %p371_p13 }
  0xf0   : > { %v227_v3 = vpop.f32.mrb[0].mxu0 }
  0xf1   : > { %232 = vst.msk [vmem:[%s144_s3] sm:$0x1] %vm231_vm2, %v227_v3  ;;  %v326_v4 = vpop.f32.mrb[1].mxu0 }
  0xf2   : > { %381 = shalt.err (!%p378_p3)
}
  0xf3   : > { %s382_s21 = scalar_lea.hbm %s511_s7, 16  ;;  %s386_s24 = scalar_lea.hbm %s555_s2, 32 }
  0xf4   : > { %p383_p4 = scmp.ne.s32.totalorder %s511_s7, %s382_s21  ;;  %p387_p9 = scmp.lt.u32.totalorder %s511_s7, %s555_s2 }
  0xf5   : > { %p388_p10 = scmp.lt.u32.totalorder %s386_s24, %s382_s21  ;;  %p390_p12 = scmp.lt.u32.totalorder %s382_s21, %s511_s7 }
  0xf6   : > { %p384_p7 = pnand %p383_p4, %p488_p5 }
  0xf7   : > { %p389_p11 = por %p388_p10, %p387_p9 }
  0xf8   : > { %p385_p8 = pneg %p384_p7 }
  0xf9   : > { %p391_p13 = por %p390_p12, %p389_p11 }
  0xfb   : > { %p392_p0 = pnand %p391_p13, %p385_p8 }
  0xfd   : > { %395 = shalt.err (!%p392_p0)
}
  0xfe   : > { %327 = dma.vmem_to_hbm [thread:$0]  (%p488_p5), %s513_s4, 16, %s511_s7, %s234_s8  }
  0xff PF: > { %p333_p1 = scmp.ge.s32.totalorder %s430_s12, 2  ;;  %s258_s27 = sand.u32 1, %s418_s9  }
 0x100   : > { %s259_s28 = scalar_lea.sflag [#allocation3], %s258_s27 }
 0x101   : > { %p330_p2 = pnand %p333_p1, %p492_p6 }
 0x103   : > { %413 = dma.done.wait (!%p330_p2), %s259_s28, 16  }
 0x104   : > { %415 = vsyncadd (!%p330_p2), %s259_s28, 4294967280  ;;  %p12_p3 = scmp.ge.s32.totalorder %s475_s15, 4   ;;  %s558_s9 = smov %s422_s10 }
 0x105   : > { %s559_s10 = smov %s426_s11  ;;  %s560_s11 = smov %s486_s18 }
 0x106   : > { %s561_s12 = smov %s475_s15  ;;  %14 = sbr.rel (!%p12_p3) target bundleno = 3 (0x3), region = 66 }
 0x10d   :  { %263 = vsyncpa [#allocation3], 1 }
 0x10e   :  { %265 = vsyncpa [#allocation3 + $0x1], 1 }

</bundles_post_ra>
